<compile_context>
chip_gen: v7x
topology: tpu7x:2x2x1
jax: 0.10.0
libtpu: 0.0.40
codegen_flags: <defaults>
</compile_context>

<pallas_src>
import functools

import numpy as np
import jax
import jax.numpy as jnp
from jax import lax
from jax.experimental import pallas as pl
from jax.experimental.pallas import tpu as pltpu


_VMEM = pl.BlockSpec(memory_space=pltpu.MemorySpace.VMEM)


def _round_up(x, m):
    return -(-x // m) * m


@functools.lru_cache(maxsize=None)
def _geometry(H, W):
    """Static geometry of the conv/pool chain for an (H, W) input."""
    assert H % 2 == 0 and W % 2 == 0, "even spatial dims required"
    h2, w2 = H // 2, W // 2
    oh, ow = (H - 3) // 2 + 1, (W - 3) // 2 + 1          # conv1 output
    ph, pw = (oh - 3) // 3 + 1, (ow - 3) // 3 + 1        # pool1 output
    assert ph % 2 == 0 and pw % 2 == 0, \
        "pool1 output must be even for the conv2 parity split"
    ph2, pw2 = ph // 2, pw // 2
    oh2, ow2 = (ph - 3) // 2 + 1, (pw - 3) // 2 + 1      # conv2 output
    # TODO(synk): general fused tail for maxpool2 outputs larger than 1x1.
    assert (oh2 - 3) // 3 + 1 == 1 and (ow2 - 3) // 3 + 1 == 1, \
        "fused tail assumes a 1x1 maxpool2 output"

    seg1 = h2 * w2                                   # per-image conv1 lane segment
    l1 = (oh - 1) * w2 + ow                          # valid pitched conv1 length
    assert l1 + w2 + 1 == seg1
    k1 = _round_up(3 * (ph - 1) * w2 + 3 * (pw - 1) + 1, 8)   # pool-sel K
    assert k1 + 2 * w2 + 2 <= seg1

    area2 = ph2 * pw2                                # per-parity pool1 slab size
    pod = _round_up(4 * area2, 128)                  # per-image pool1 lane segment
    l2 = (oh2 - 1) * pw2 + ow2                       # valid pitched conv2 length
    seg2 = max(32, _round_up(l2, 32))                # per-image conv2 lane segment
    assert 3 * area2 + pw2 + 1 + seg2 <= pod
    assert seg2 >= l2 and seg2 > 2 + 2 * pw2
    return dict(h2=h2, w2=w2, ph=ph, pw=pw, pw2=pw2, seg1=seg1, k1=k1,
                area2=area2, pod=pod, seg2=seg2)


@functools.lru_cache(maxsize=None)
def _pool1_selection_np(H, W):
    """Exact 0/1 matrix: stride-3 pool1 downsample + parity re-layout for conv2."""
    g = _geometry(H, W)
    sel = np.zeros((g["k1"], g["pod"]), np.float32)
    for r in range(g["ph"]):
        for c in range(g["pw"]):
            src = 3 * r * g["w2"] + 3 * c                       # pitched max position
            dst = (((r % 2) * 2 + (c % 2)) * g["area2"]
                   + (r // 2) * g["pw2"] + (c // 2))            # parity-pitched dest
            sel[src, dst] = 1.0
    return sel


@functools.lru_cache(maxsize=None)
def _pool2_selection_np(n_batch, seg2, pitch2):
    """Exact 0/1 matrix extracting each image's pooled feature column."""
    k2 = n_batch * seg2 - 2 - 2 * pitch2
    sel = np.zeros((k2, n_batch), np.float32)
    for n in range(n_batch):
        sel[n * seg2, n] = 1.0
    return sel


# ---------------------------------------------------------------------------
# The fully fused forward kernel.
# ---------------------------------------------------------------------------
def _eeg2dconvnet_kernel(xp_ref, w1_ref, b1_ref, sel1_ref, w2_ref, b2_ref,
                         sel2_ref, fw1_ref, fb1_ref, fw2_ref, fb2_ref, o_ref,
                         im1_ref, acc1_ref, mw1_ref, pool1_ref, im2_ref,
                         *, n_batch, c_pad, pitch1, seg1, k1, pitch2, area2,
                         pod, seg2):
    # xp_ref  : (N, 4, c_pad, seg1+pad) bf16  parity slabs: xp[n,p,c,i*w2+j]
    #           = x[n, c, 2i + p//2, 2j + p%2] (zero padded channels / lanes)
    # w1_ref  : (32, 9*c_pad) bf16   conv1 weight, taps fused along K
    # sel1_ref: (k1, pod)     bf16   pool1 downsample + relayout (one-hot)
    # w2_ref  : (64, 9*32)    bf16   conv2 weight, taps fused along K
    # sel2_ref: (k2, N)       f32    per-image feature-column extraction
    # fw1_ref : (256, 64)     f32    fc1 weight with adaptive-pool fold
    # fw2_ref : (ncls, 256)   f32    fc2 weight (PyTorch layout, used as-is)
    # o_ref   : (ncls, N)     f32    class probabilities, transposed

    # ---- conv1: in-kernel im2col (K fused over the 9 taps) + one GEMM -------
    for t in range(9):
        kh, kw = t // 3, t % 3
        p = (kh % 2) * 2 + (kw % 2)
        off = (kh // 2) * pitch1 + (kw // 2)
        for n in range(n_batch):
            im1_ref[t * c_pad:(t + 1) * c_pad, n * seg1:(n + 1) * seg1] = \
                xp_ref[n, p, :, off:off + seg1]
    acc1_ref[...] = (
        jnp.dot(w1_ref[...], im1_ref[...], preferred_element_type=jnp.float32)
        + b1_ref[...])

    # ---- maxpool1 (3x3, stride 3), separable: width max then height max -----
    L1 = n_batch * seg1
    mw1_ref[:, :L1 - 2] = jnp.maximum(
        jnp.maximum(acc1_ref[:, 0:L1 - 2], acc1_ref[:, 1:L1 - 1]),
        acc1_ref[:, 2:L1])
    # per image: height max, then stride-3 downsample + parity re-layout for
    # conv2 as one exact one-hot selection GEMM (output padded to `pod` lanes).
    for n in range(n_batch):
        b = n * seg1
        mh = jnp.maximum(
            jnp.maximum(mw1_ref[:, b:b + k1],
                        mw1_ref[:, b + pitch1:b + pitch1 + k1]),
            mw1_ref[:, b + 2 * pitch1:b + 2 * pitch1 + k1])
        pooled = jnp.dot(mh.astype(jnp.bfloat16), sel1_ref[...],
                         preferred_element_type=jnp.float32)
        pool1_ref[:, n * pod:(n + 1) * pod] = pooled.astype(jnp.bfloat16)

    # ---- conv2: in-kernel im2col + one GEMM ---------------------------------
    c1 = pool1_ref.shape[0]
    for t in range(9):
        kh, kw = t // 3, t % 3
        p = (kh % 2) * 2 + (kw % 2)
        off = (kh // 2) * pitch2 + (kw // 2)
        for n in range(n_batch):
            src = n * pod + p * area2 + off
            im2_ref[t * c1:(t + 1) * c1, n * seg2:(n + 1) * seg2] = \
                pool1_ref[:, src:src + seg2]
    acc2 = (jnp.dot(w2_ref[...], im2_ref[...], preferred_element_type=jnp.float32)
            + b2_ref[...])

    # ---- maxpool2 (3x3, stride 3) -> one value per channel per image --------
    L2 = n_batch * seg2
    mw2 = jnp.maximum(jnp.maximum(acc2[:, 0:L2 - 2], acc2[:, 1:L2 - 1]),
                      acc2[:, 2:L2])
    k2 = L2 - 2 - 2 * pitch2
    mh2 = jnp.maximum(jnp.maximum(mw2[:, 0:k2], mw2[:, pitch2:pitch2 + k2]),
                      mw2[:, 2 * pitch2:2 * pitch2 + k2])
    # extract column n*seg2 per image (exact one-hot GEMM) -> (c2, N)
    fm_t = jnp.dot(mh2, sel2_ref[...], preferred_element_type=jnp.float32)

    # ---- dropout = identity (inference); adaptive avg-pool folded into fc1 --
    # (transposed orientation: no in-kernel transposes needed)
    h = jnp.dot(fw1_ref[...], fm_t, preferred_element_type=jnp.float32) + fb1_ref[...]
    h = jnp.maximum(h, 0.0)                                           # relu
    logits = (jnp.dot(fw2_ref[...], h, preferred_element_type=jnp.float32)
              + fb2_ref[...])                                         # (ncls, N)
    mx = jnp.max(logits, axis=0, keepdims=True)                       # softmax(dim=1)
    e = jnp.exp(logits - mx)
    o_ref[...] = (e / jnp.sum(e, axis=0, keepdims=True)).astype(o_ref.dtype)


# ---------------------------------------------------------------------------
# Parameters (PyTorch layouts) + one-time conversion to kernel-ready layouts.
# ---------------------------------------------------------------------------
def _uniform(key, shape, fan_in):
    bound = 1.0 / np.sqrt(fan_in)
    return jax.random.uniform(key, shape, jnp.float32, -bound, bound)


def init_params(key, in_ch=22, num_classes=2):
    ks = jax.random.split(key, 8)
    return {
        "conv1_w": _uniform(ks[0], (32, in_ch, 3, 3), in_ch * 9),
        "conv1_b": _uniform(ks[1], (32,), in_ch * 9),
        "conv2_w": _uniform(ks[2], (64, 32, 3, 3), 32 * 9),
        "conv2_b": _uniform(ks[3], (64,), 32 * 9),
        "fc1_w": _uniform(ks[4], (256, 1024), 1024),
        "fc1_b": _uniform(ks[5], (256,), 1024),
        "fc2_w": _uniform(ks[6], (2 if num_classes is None else num_classes, 256), 256),
        "fc2_b": _uniform(ks[7], (2 if num_classes is None else num_classes,), 256),
    }


def prepare_params(p, input_hw=(64, 64)):
    """One-time conversion: fused-tap conv weights (bf16), folded fc1 weight,
    prepared biases and the pool1 selection matrix (real array arguments)."""
    H, W = input_hw
    _ = _geometry(H, W)                      # validate geometry once
    cout1, cin1 = p["conv1_w"].shape[:2]
    cout2, cin2 = p["conv2_w"].shape[:2]
    c_pad = _round_up(cin1, 32)

    # conv weights: (O, I, 3, 3) -> (O, kh, kw, I) -> (O, 9, I) -> (O, 9*I_pad)
    w1 = jnp.transpose(p["conv1_w"], (0, 2, 3, 1)).reshape(cout1, 9, cin1)
    w1 = jnp.pad(w1, ((0, 0), (0, 0), (0, c_pad - cin1))).reshape(cout1, 9 * c_pad)
    w2 = jnp.transpose(p["conv2_w"], (0, 2, 3, 1)).reshape(cout2, 9 * cin2)

    # AdaptiveAvgPool2d((4,4)) on a 1x1 map broadcasts; flatten + fc1 therefore
    # uses each channel 16 times -> fold the 16 fc1 columns per channel (exact).
    fc1_w = p["fc1_w"]
    assert fc1_w.shape[1] == cout2 * 16, "fc1 expects 64*4*4 flattened features"
    fc1_folded = fc1_w.reshape(fc1_w.shape[0], cout2, 16).sum(axis=2)   # (256, c2)

    return {
        "conv1_w": w1.astype(jnp.bfloat16),                       # (32, 9*c_pad)
        "conv1_b": p["conv1_b"].reshape(-1, 1).astype(jnp.float32),
        "sel1": jnp.asarray(_pool1_selection_np(H, W), jnp.bfloat16),
        "conv2_w": w2.astype(jnp.bfloat16),                       # (64, 288)
        "conv2_b": p["conv2_b"].reshape(-1, 1).astype(jnp.float32),
        "fc1_w": fc1_folded.astype(jnp.float32),                  # (256, c2)
        "fc1_b": p["fc1_b"].reshape(-1, 1).astype(jnp.float32),
        "fc2_w": p["fc2_w"].astype(jnp.float32),                  # (ncls, 256)
        "fc2_b": p["fc2_b"].reshape(-1, 1).astype(jnp.float32),
    }


# ---------------------------------------------------------------------------
# Forward pass (mirrors EEG2DConvNet.forward, inference mode)
# ---------------------------------------------------------------------------
def eeg2dconvnet_forward(kp, x):
    N, C, H, W = x.shape
    g = _geometry(H, W)
    cout1 = kp["conv1_w"].shape[0]
    c_pad = kp["conv1_w"].shape[1] // 9
    cout2 = kp["conv2_w"].shape[0]
    ncls = kp["fc2_w"].shape[0]
    assert C <= c_pad
    assert kp["sel1"].shape == (g["k1"], g["pod"]), \
        "prepare_params(input_hw=...) does not match the input spatial size"

    h2, w2 = g["h2"], g["w2"]
    seg1, k1, pod, seg2 = g["seg1"], g["k1"], g["pod"], g["seg2"]
    pw2, area2 = g["pw2"], g["area2"]
    lane_pad = _round_up(w2 + 1, 128)

    # Space-to-depth parity split (stride-2 conv taps become static slices),
    # channel pad to an MXU/sublane friendly c_pad, lane pad for shifted taps.
    # TODO(synk): fold this transpose into the kernel (allow_input_fusion or
    # in-kernel strided DMA) to remove one extra HBM round trip.
    xp = x.astype(jnp.bfloat16).reshape(N, C, h2, 2, w2, 2)
    xp = xp.transpose(0, 3, 5, 1, 2, 4).reshape(N, 4, C, h2 * w2)
    xp = jnp.pad(xp, ((0, 0), (0, 0), (0, c_pad - C), (0, lane_pad)))

    sel2 = jnp.asarray(_pool2_selection_np(N, seg2, pw2), jnp.float32)

    kernel = functools.partial(
        _eeg2dconvnet_kernel, n_batch=N, c_pad=c_pad, pitch1=w2, seg1=seg1,
        k1=k1, pitch2=pw2, area2=area2, pod=pod, seg2=seg2)

    # VMEM budget (N=2): im2col 1.2 MB + acc/mw 0.5 MB + inputs/weights ~1 MB.
    out_t = pl.pallas_call(
        kernel,
        out_shape=jax.ShapeDtypeStruct((ncls, N), jnp.float32),
        in_specs=[_VMEM] * 11,
        out_specs=_VMEM,
        scratch_shapes=[
            pltpu.VMEM((9 * c_pad, N * seg1), jnp.bfloat16),   # conv1 im2col
            pltpu.VMEM((cout1, N * seg1), jnp.float32),        # conv1 accumulator
            pltpu.VMEM((cout1, N * seg1), jnp.float32),        # width-max intermediate
            pltpu.VMEM((cout1, N * pod), jnp.bfloat16),        # pool1 (parity layout)
            pltpu.VMEM((9 * cout1, N * seg2), jnp.bfloat16),   # conv2 im2col
        ],
    )(xp, kp["conv1_w"], kp["conv1_b"], kp["sel1"],
      kp["conv2_w"], kp["conv2_b"], sel2,
      kp["fc1_w"], kp["fc1_b"], kp["fc2_w"], kp["fc2_b"])
    return out_t.T                                              # (N, ncls)


# ---------------------------------------------------------------------------
# Pure-JAX reference of the PyTorch forward (for a tolerance check in main).
# ---------------------------------------------------------------------------
def _reference_forward(p, x):
    dn = ("NCHW", "OIHW", "NCHW")
    y = lax.conv_general_dilated(x, p["conv1_w"], (2, 2), "VALID",
                                 dimension_numbers=dn)
    y = y + p["conv1_b"][None, :, None, None]
    y = lax.reduce_window(y, -jnp.inf, lax.max, (1, 1, 3, 3), (1, 1, 3, 3), "VALID")
    y = lax.conv_general_dilated(y, p["conv2_w"], (2, 2), "VALID",
                                 dimension_numbers=dn)
    y = y + p["conv2_b"][None, :, None, None]
    y = lax.reduce_window(y, -jnp.inf, lax.max, (1, 1, 3, 3), (1, 1, 3, 3), "VALID")
    y = jnp.broadcast_to(y, (y.shape[0], y.shape[1], 4, 4))     # adaptive (4,4) on 1x1
    y = y.reshape(y.shape[0], -1)
    y = y @ p["fc1_w"].T + p["fc1_b"]
    y = jnp.maximum(y, 0.0)
    y = y @ p["fc2_w"].T + p["fc2_b"]
    return jax.nn.softmax(y, axis=1)


if __name__ == "__main__":
    key = jax.random.PRNGKey(0)
    pkey, xkey = jax.random.split(key)
    params = init_params(pkey, in_ch=22, num_classes=2)

    # 64x64 input -> conv1 31x31 -> pool1 10x10 -> conv2 4x4 -> pool2 1x1
    # -> adaptive (4,4) broadcast -> 1024 features (matches fc1 in_features).
    x = jax.random.normal(xkey, (2, 22, 64, 64), dtype=jnp.float32)

    kparams = prepare_params(params, input_hw=(64, 64))
    fwd = jax.jit(eeg2dconvnet_forward)
    out = jax.block_until_ready(fwd(kparams, x))

    out_np = np.asarray(out)
    assert out_np.shape == (2, 2)
    assert np.all(np.isfinite(out_np))
    assert np.allclose(out_np.sum(axis=1), 1.0, atol=1e-5)       # softmax rows sum to 1

    # Cross-check vs. a pure-JAX reference of the PyTorch forward (loose
    # tolerance: conv operands and pool1 activations are bf16 in the kernel).
    with jax.default_matmul_precision("highest"):
        ref = np.asarray(_reference_forward(params, x))
    assert np.allclose(out_np, ref, atol=3e-2), float(np.abs(out_np - ref).max())

    print("KERNEL_OK")
</pallas_src>

<mosaic_0001>
module attributes {stable_mosaic.version = 11 : i64} {
  func.func @_eeg2dconvnet_kernel(%arg0: memref<2x4x32x1152xbf16, #tpu.memory_space<vmem>>, %arg1: memref<32x288xbf16, #tpu.memory_space<vmem>>, %arg2: memref<32x1xf32, #tpu.memory_space<vmem>>, %arg3: memref<896x128xbf16, #tpu.memory_space<vmem>>, %arg4: memref<64x288xbf16, #tpu.memory_space<vmem>>, %arg5: memref<64x1xf32, #tpu.memory_space<vmem>>, %arg6: memref<52x2xf32, #tpu.memory_space<vmem>>, %arg7: memref<256x64xf32, #tpu.memory_space<vmem>>, %arg8: memref<256x1xf32, #tpu.memory_space<vmem>>, %arg9: memref<2x256xf32, #tpu.memory_space<vmem>>, %arg10: memref<2x1xf32, #tpu.memory_space<vmem>>, %arg11: memref<2x2xf32, #tpu.memory_space<vmem>>, %arg12: memref<288x2048xbf16, #tpu.memory_space<vmem>>, %arg13: memref<32x2048xf32, #tpu.memory_space<vmem>>, %arg14: memref<32x2048xf32, #tpu.memory_space<vmem>>, %arg15: memref<32x256xbf16, #tpu.memory_space<vmem>>, %arg16: memref<288x64xbf16, #tpu.memory_space<vmem>>) attributes {dimension_semantics = [], scalar_prefetch = 0 : i64, scratch_operands = 5 : i64, tpu.core_type = #tpu.core_type<tc>} {
    %c0 = arith.constant 0 : index
    %c0_0 = arith.constant 0 : index
    %c0_1 = arith.constant 0 : index
    %c0_2 = arith.constant 0 : index
    %0 = vector.load %arg0[%c0, %c0_0, %c0_1, %c0_2] : memref<2x4x32x1152xbf16, #tpu.memory_space<vmem>>, vector<1x1x32x1024xbf16>
    %1 = vector.shape_cast %0 : vector<1x1x32x1024xbf16> to vector<32x1024xbf16>
    %c0_3 = arith.constant 0 : index
    %c0_4 = arith.constant 0 : index
    %2 = vector.load %arg12[%c0_3, %c0_4] : memref<288x2048xbf16, #tpu.memory_space<vmem>>, vector<32x1024xbf16>
    tpu.vector_store %arg12[%c0_3, %c0_4], %1 {strides = array<i32>} : memref<288x2048xbf16, #tpu.memory_space<vmem>>, vector<32x1024xbf16>,
    %c1 = arith.constant 1 : index
    %c0_5 = arith.constant 0 : index
    %c0_6 = arith.constant 0 : index
    %c0_7 = arith.constant 0 : index
    %3 = vector.load %arg0[%c1, %c0_5, %c0_6, %c0_7] : memref<2x4x32x1152xbf16, #tpu.memory_space<vmem>>, vector<1x1x32x1024xbf16>
    %4 = vector.shape_cast %3 : vector<1x1x32x1024xbf16> to vector<32x1024xbf16>
    %c0_8 = arith.constant 0 : index
    %c1024 = arith.constant 1024 : index
    %5 = vector.load %arg12[%c0_8, %c1024] : memref<288x2048xbf16, #tpu.memory_space<vmem>>, vector<32x1024xbf16>
    tpu.vector_store %arg12[%c0_8, %c1024], %4 {strides = array<i32>} : memref<288x2048xbf16, #tpu.memory_space<vmem>>, vector<32x1024xbf16>,
    %c0_9 = arith.constant 0 : index
    %c1_10 = arith.constant 1 : index
    %c0_11 = arith.constant 0 : index
    %c0_12 = arith.constant 0 : index
    %6 = vector.load %arg0[%c0_9, %c1_10, %c0_11, %c0_12] : memref<2x4x32x1152xbf16, #tpu.memory_space<vmem>>, vector<1x1x32x1024xbf16>
    %7 = vector.shape_cast %6 : vector<1x1x32x1024xbf16> to vector<32x1024xbf16>
    %c32 = arith.constant 32 : index
    %c0_13 = arith.constant 0 : index
    %8 = vector.load %arg12[%c32, %c0_13] : memref<288x2048xbf16, #tpu.memory_space<vmem>>, vector<32x1024xbf16>
    tpu.vector_store %arg12[%c32, %c0_13], %7 {strides = array<i32>} : memref<288x2048xbf16, #tpu.memory_space<vmem>>, vector<32x1024xbf16>,
    %c1_14 = arith.constant 1 : index
    %c1_15 = arith.constant 1 : index
    %c0_16 = arith.constant 0 : index
    %c0_17 = arith.constant 0 : index
    %9 = vector.load %arg0[%c1_14, %c1_15, %c0_16, %c0_17] : memref<2x4x32x1152xbf16, #tpu.memory_space<vmem>>, vector<1x1x32x1024xbf16>
    %10 = vector.shape_cast %9 : vector<1x1x32x1024xbf16> to vector<32x1024xbf16>
    %c32_18 = arith.constant 32 : index
    %c1024_19 = arith.constant 1024 : index
    %11 = vector.load %arg12[%c32_18, %c1024_19] : memref<288x2048xbf16, #tpu.memory_space<vmem>>, vector<32x1024xbf16>
    tpu.vector_store %arg12[%c32_18, %c1024_19], %10 {strides = array<i32>} : memref<288x2048xbf16, #tpu.memory_space<vmem>>, vector<32x1024xbf16>,
    %c0_20 = arith.constant 0 : index
    %c0_21 = arith.constant 0 : index
    %c0_22 = arith.constant 0 : index
    %c1_23 = arith.constant 1 : index
    %12 = vector.load %arg0[%c0_20, %c0_21, %c0_22, %c1_23] : memref<2x4x32x1152xbf16, #tpu.memory_space<vmem>>, vector<1x1x32x1024xbf16>
    %13 = vector.shape_cast %12 : vector<1x1x32x1024xbf16> to vector<32x1024xbf16>
    %c64 = arith.constant 64 : index
    %c0_24 = arith.constant 0 : index
    %14 = vector.load %arg12[%c64, %c0_24] : memref<288x2048xbf16, #tpu.memory_space<vmem>>, vector<32x1024xbf16>
    tpu.vector_store %arg12[%c64, %c0_24], %13 {strides = array<i32>} : memref<288x2048xbf16, #tpu.memory_space<vmem>>, vector<32x1024xbf16>,
    %c1_25 = arith.constant 1 : index
    %c0_26 = arith.constant 0 : index
    %c0_27 = arith.constant 0 : index
    %c1_28 = arith.constant 1 : index
    %15 = vector.load %arg0[%c1_25, %c0_26, %c0_27, %c1_28] : memref<2x4x32x1152xbf16, #tpu.memory_space<vmem>>, vector<1x1x32x1024xbf16>
    %16 = vector.shape_cast %15 : vector<1x1x32x1024xbf16> to vector<32x1024xbf16>
    %c64_29 = arith.constant 64 : index
    %c1024_30 = arith.constant 1024 : index
    %17 = vector.load %arg12[%c64_29, %c1024_30] : memref<288x2048xbf16, #tpu.memory_space<vmem>>, vector<32x1024xbf16>
    tpu.vector_store %arg12[%c64_29, %c1024_30], %16 {strides = array<i32>} : memref<288x2048xbf16, #tpu.memory_space<vmem>>, vector<32x1024xbf16>,
    %c0_31 = arith.constant 0 : index
    %c2 = arith.constant 2 : index
    %c0_32 = arith.constant 0 : index
    %c0_33 = arith.constant 0 : index
    %18 = vector.load %arg0[%c0_31, %c2, %c0_32, %c0_33] : memref<2x4x32x1152xbf16, #tpu.memory_space<vmem>>, vector<1x1x32x1024xbf16>
    %19 = vector.shape_cast %18 : vector<1x1x32x1024xbf16> to vector<32x1024xbf16>
    %c96 = arith.constant 96 : index
    %c0_34 = arith.constant 0 : index
    %20 = vector.load %arg12[%c96, %c0_34] : memref<288x2048xbf16, #tpu.memory_space<vmem>>, vector<32x1024xbf16>
    tpu.vector_store %arg12[%c96, %c0_34], %19 {strides = array<i32>} : memref<288x2048xbf16, #tpu.memory_space<vmem>>, vector<32x1024xbf16>,
    %c1_35 = arith.constant 1 : index
    %c2_36 = arith.constant 2 : index
    %c0_37 = arith.constant 0 : index
    %c0_38 = arith.constant 0 : index
    %21 = vector.load %arg0[%c1_35, %c2_36, %c0_37, %c0_38] : memref<2x4x32x1152xbf16, #tpu.memory_space<vmem>>, vector<1x1x32x1024xbf16>
    %22 = vector.shape_cast %21 : vector<1x1x32x1024xbf16> to vector<32x1024xbf16>
    %c96_39 = arith.constant 96 : index
    %c1024_40 = arith.constant 1024 : index
    %23 = vector.load %arg12[%c96_39, %c1024_40] : memref<288x2048xbf16, #tpu.memory_space<vmem>>, vector<32x1024xbf16>
    tpu.vector_store %arg12[%c96_39, %c1024_40], %22 {strides = array<i32>} : memref<288x2048xbf16, #tpu.memory_space<vmem>>, vector<32x1024xbf16>,
    %c0_41 = arith.constant 0 : index
    %c3 = arith.constant 3 : index
    %c0_42 = arith.constant 0 : index
    %c0_43 = arith.constant 0 : index
    %24 = vector.load %arg0[%c0_41, %c3, %c0_42, %c0_43] : memref<2x4x32x1152xbf16, #tpu.memory_space<vmem>>, vector<1x1x32x1024xbf16>
    %25 = vector.shape_cast %24 : vector<1x1x32x1024xbf16> to vector<32x1024xbf16>
    %c128 = arith.constant 128 : index
    %c0_44 = arith.constant 0 : index
    %26 = vector.load %arg12[%c128, %c0_44] : memref<288x2048xbf16, #tpu.memory_space<vmem>>, vector<32x1024xbf16>
    tpu.vector_store %arg12[%c128, %c0_44], %25 {strides = array<i32>} : memref<288x2048xbf16, #tpu.memory_space<vmem>>, vector<32x1024xbf16>,
    %c1_45 = arith.constant 1 : index
    %c3_46 = arith.constant 3 : index
    %c0_47 = arith.constant 0 : index
    %c0_48 = arith.constant 0 : index
    %27 = vector.load %arg0[%c1_45, %c3_46, %c0_47, %c0_48] : memref<2x4x32x1152xbf16, #tpu.memory_space<vmem>>, vector<1x1x32x1024xbf16>
    %28 = vector.shape_cast %27 : vector<1x1x32x1024xbf16> to vector<32x1024xbf16>
    %c128_49 = arith.constant 128 : index
    %c1024_50 = arith.constant 1024 : index
    %29 = vector.load %arg12[%c128_49, %c1024_50] : memref<288x2048xbf16, #tpu.memory_space<vmem>>, vector<32x1024xbf16>
    tpu.vector_store %arg12[%c128_49, %c1024_50], %28 {strides = array<i32>} : memref<288x2048xbf16, #tpu.memory_space<vmem>>, vector<32x1024xbf16>,
    %c0_51 = arith.constant 0 : index
    %c2_52 = arith.constant 2 : index
    %c0_53 = arith.constant 0 : index
    %c1_54 = arith.constant 1 : index
    %30 = vector.load %arg0[%c0_51, %c2_52, %c0_53, %c1_54] : memref<2x4x32x1152xbf16, #tpu.memory_space<vmem>>, vector<1x1x32x1024xbf16>
    %31 = vector.shape_cast %30 : vector<1x1x32x1024xbf16> to vector<32x1024xbf16>
    %c160 = arith.constant 160 : index
    %c0_55 = arith.constant 0 : index
    %32 = vector.load %arg12[%c160, %c0_55] : memref<288x2048xbf16, #tpu.memory_space<vmem>>, vector<32x1024xbf16>
    tpu.vector_store %arg12[%c160, %c0_55], %31 {strides = array<i32>} : memref<288x2048xbf16, #tpu.memory_space<vmem>>, vector<32x1024xbf16>,
    %c1_56 = arith.constant 1 : index
    %c2_57 = arith.constant 2 : index
    %c0_58 = arith.constant 0 : index
    %c1_59 = arith.constant 1 : index
    %33 = vector.load %arg0[%c1_56, %c2_57, %c0_58, %c1_59] : memref<2x4x32x1152xbf16, #tpu.memory_space<vmem>>, vector<1x1x32x1024xbf16>
    %34 = vector.shape_cast %33 : vector<1x1x32x1024xbf16> to vector<32x1024xbf16>
    %c160_60 = arith.constant 160 : index
    %c1024_61 = arith.constant 1024 : index
    %35 = vector.load %arg12[%c160_60, %c1024_61] : memref<288x2048xbf16, #tpu.memory_space<vmem>>, vector<32x1024xbf16>
    tpu.vector_store %arg12[%c160_60, %c1024_61], %34 {strides = array<i32>} : memref<288x2048xbf16, #tpu.memory_space<vmem>>, vector<32x1024xbf16>,
    %c0_62 = arith.constant 0 : index
    %c0_63 = arith.constant 0 : index
    %c0_64 = arith.constant 0 : index
    %c32_65 = arith.constant 32 : index
    %36 = vector.load %arg0[%c0_62, %c0_63, %c0_64, %c32_65] : memref<2x4x32x1152xbf16, #tpu.memory_space<vmem>>, vector<1x1x32x1024xbf16>
    %37 = vector.shape_cast %36 : vector<1x1x32x1024xbf16> to vector<32x1024xbf16>
    %c192 = arith.constant 192 : index
    %c0_66 = arith.constant 0 : index
    %38 = vector.load %arg12[%c192, %c0_66] : memref<288x2048xbf16, #tpu.memory_space<vmem>>, vector<32x1024xbf16>
    tpu.vector_store %arg12[%c192, %c0_66], %37 {strides = array<i32>} : memref<288x2048xbf16, #tpu.memory_space<vmem>>, vector<32x1024xbf16>,
    %c1_67 = arith.constant 1 : index
    %c0_68 = arith.constant 0 : index
    %c0_69 = arith.constant 0 : index
    %c32_70 = arith.constant 32 : index
    %39 = vector.load %arg0[%c1_67, %c0_68, %c0_69, %c32_70] : memref<2x4x32x1152xbf16, #tpu.memory_space<vmem>>, vector<1x1x32x1024xbf16>
    %40 = vector.shape_cast %39 : vector<1x1x32x1024xbf16> to vector<32x1024xbf16>
    %c192_71 = arith.constant 192 : index
    %c1024_72 = arith.constant 1024 : index
    %41 = vector.load %arg12[%c192_71, %c1024_72] : memref<288x2048xbf16, #tpu.memory_space<vmem>>, vector<32x1024xbf16>
    tpu.vector_store %arg12[%c192_71, %c1024_72], %40 {strides = array<i32>} : memref<288x2048xbf16, #tpu.memory_space<vmem>>, vector<32x1024xbf16>,
    %c0_73 = arith.constant 0 : index
    %c1_74 = arith.constant 1 : index
    %c0_75 = arith.constant 0 : index
    %c32_76 = arith.constant 32 : index
    %42 = vector.load %arg0[%c0_73, %c1_74, %c0_75, %c32_76] : memref<2x4x32x1152xbf16, #tpu.memory_space<vmem>>, vector<1x1x32x1024xbf16>
    %43 = vector.shape_cast %42 : vector<1x1x32x1024xbf16> to vector<32x1024xbf16>
    %c224 = arith.constant 224 : index
    %c0_77 = arith.constant 0 : index
    %44 = vector.load %arg12[%c224, %c0_77] : memref<288x2048xbf16, #tpu.memory_space<vmem>>, vector<32x1024xbf16>
    tpu.vector_store %arg12[%c224, %c0_77], %43 {strides = array<i32>} : memref<288x2048xbf16, #tpu.memory_space<vmem>>, vector<32x1024xbf16>,
    %c1_78 = arith.constant 1 : index
    %c1_79 = arith.constant 1 : index
    %c0_80 = arith.constant 0 : index
    %c32_81 = arith.constant 32 : index
    %45 = vector.load %arg0[%c1_78, %c1_79, %c0_80, %c32_81] : memref<2x4x32x1152xbf16, #tpu.memory_space<vmem>>, vector<1x1x32x1024xbf16>
    %46 = vector.shape_cast %45 : vector<1x1x32x1024xbf16> to vector<32x1024xbf16>
    %c224_82 = arith.constant 224 : index
    %c1024_83 = arith.constant 1024 : index
    %47 = vector.load %arg12[%c224_82, %c1024_83] : memref<288x2048xbf16, #tpu.memory_space<vmem>>, vector<32x1024xbf16>
    tpu.vector_store %arg12[%c224_82, %c1024_83], %46 {strides = array<i32>} : memref<288x2048xbf16, #tpu.memory_space<vmem>>, vector<32x1024xbf16>,
    %c0_84 = arith.constant 0 : index
    %c0_85 = arith.constant 0 : index
    %c0_86 = arith.constant 0 : index
    %c33 = arith.constant 33 : index
    %48 = vector.load %arg0[%c0_84, %c0_85, %c0_86, %c33] : memref<2x4x32x1152xbf16, #tpu.memory_space<vmem>>, vector<1x1x32x1024xbf16>
    %49 = vector.shape_cast %48 : vector<1x1x32x1024xbf16> to vector<32x1024xbf16>
    %c256 = arith.constant 256 : index
    %c0_87 = arith.constant 0 : index
    %50 = vector.load %arg12[%c256, %c0_87] : memref<288x2048xbf16, #tpu.memory_space<vmem>>, vector<32x1024xbf16>
    tpu.vector_store %arg12[%c256, %c0_87], %49 {strides = array<i32>} : memref<288x2048xbf16, #tpu.memory_space<vmem>>, vector<32x1024xbf16>,
    %c1_88 = arith.constant 1 : index
    %c0_89 = arith.constant 0 : index
    %c0_90 = arith.constant 0 : index
    %c33_91 = arith.constant 33 : index
    %51 = vector.load %arg0[%c1_88, %c0_89, %c0_90, %c33_91] : memref<2x4x32x1152xbf16, #tpu.memory_space<vmem>>, vector<1x1x32x1024xbf16>
    %52 = vector.shape_cast %51 : vector<1x1x32x1024xbf16> to vector<32x1024xbf16>
    %c256_92 = arith.constant 256 : index
    %c1024_93 = arith.constant 1024 : index
    %53 = vector.load %arg12[%c256_92, %c1024_93] : memref<288x2048xbf16, #tpu.memory_space<vmem>>, vector<32x1024xbf16>
    tpu.vector_store %arg12[%c256_92, %c1024_93], %52 {strides = array<i32>} : memref<288x2048xbf16, #tpu.memory_space<vmem>>, vector<32x1024xbf16>,
    %c0_94 = arith.constant 0 : index
    %c0_95 = arith.constant 0 : index
    %54 = vector.load %arg1[%c0_94, %c0_95] : memref<32x288xbf16, #tpu.memory_space<vmem>>, vector<32x288xbf16>
    %c0_96 = arith.constant 0 : index
    %c0_97 = arith.constant 0 : index
    %55 = vector.load %arg12[%c0_96, %c0_97] : memref<288x2048xbf16, #tpu.memory_space<vmem>>, vector<288x2048xbf16>
    %cst = arith.constant dense<0.000000e+00> : vector<32x2048xf32>
    %56 = tpu.matmul %54, %55, %cst {dimension_numbers = #tpu.dot_dimension_numbers<[1], [0], [0], [1], [0, 0, 1, 1], [], []>} : vector<32x288xbf16>, vector<288x2048xbf16>, vector<32x2048xf32> -> vector<32x2048xf32>
    %c0_98 = arith.constant 0 : index
    %c0_99 = arith.constant 0 : index
    %57 = vector.load %arg2[%c0_98, %c0_99] : memref<32x1xf32, #tpu.memory_space<vmem>>, vector<32x1xf32>
    %58 = vector.broadcast %57 : vector<32x1xf32> to vector<32x2048xf32>
    %59 = arith.addf %56, %58 : vector<32x2048xf32>
    %c0_100 = arith.constant 0 : index
    %c0_101 = arith.constant 0 : index
    %60 = vector.load %arg13[%c0_100, %c0_101] : memref<32x2048xf32, #tpu.memory_space<vmem>>, vector<32x2048xf32>
    tpu.vector_store %arg13[%c0_100, %c0_101], %59 {strides = array<i32>} : memref<32x2048xf32, #tpu.memory_space<vmem>>, vector<32x2048xf32>,
    %c0_102 = arith.constant 0 : index
    %c0_103 = arith.constant 0 : index
    %61 = vector.load %arg13[%c0_102, %c0_103] : memref<32x2048xf32, #tpu.memory_space<vmem>>, vector<32x2046xf32>
    %c0_104 = arith.constant 0 : index
    %c1_105 = arith.constant 1 : index
    %62 = vector.load %arg13[%c0_104, %c1_105] : memref<32x2048xf32, #tpu.memory_space<vmem>>, vector<32x2046xf32>
    %63 = arith.maximumf %61, %62 : vector<32x2046xf32>
    %c0_106 = arith.constant 0 : index
    %c2_107 = arith.constant 2 : index
    %64 = vector.load %arg13[%c0_106, %c2_107] : memref<32x2048xf32, #tpu.memory_space<vmem>>, vector<32x2046xf32>
    %65 = arith.maximumf %63, %64 : vector<32x2046xf32>
    %c0_108 = arith.constant 0 : index
    %c0_109 = arith.constant 0 : index
    %66 = vector.load %arg14[%c0_108, %c0_109] : memref<32x2048xf32, #tpu.memory_space<vmem>>, vector<32x2046xf32>
    tpu.vector_store %arg14[%c0_108, %c0_109], %65 {strides = array<i32>} : memref<32x2048xf32, #tpu.memory_space<vmem>>, vector<32x2046xf32>,
    %c0_110 = arith.constant 0 : index
    %c0_111 = arith.constant 0 : index
    %67 = vector.load %arg14[%c0_110, %c0_111] : memref<32x2048xf32, #tpu.memory_space<vmem>>, vector<32x896xf32>
    %c0_112 = arith.constant 0 : index
    %c32_113 = arith.constant 32 : index
    %68 = vector.load %arg14[%c0_112, %c32_113] : memref<32x2048xf32, #tpu.memory_space<vmem>>, vector<32x896xf32>
    %69 = arith.maximumf %67, %68 : vector<32x896xf32>
    %c0_114 = arith.constant 0 : index
    %c64_115 = arith.constant 64 : index
    %70 = vector.load %arg14[%c0_114, %c64_115] : memref<32x2048xf32, #tpu.memory_space<vmem>>, vector<32x896xf32>
    %71 = arith.maximumf %69, %70 : vector<32x896xf32>
    %72 = arith.truncf %71 : vector<32x896xf32> to vector<32x896xbf16>
    %c0_116 = arith.constant 0 : index
    %c0_117 = arith.constant 0 : index
    %73 = vector.load %arg3[%c0_116, %c0_117] : memref<896x128xbf16, #tpu.memory_space<vmem>>, vector<896x128xbf16>
    %cst_118 = arith.constant dense<0.000000e+00> : vector<32x128xf32>
    %74 = tpu.matmul %72, %73, %cst_118 {dimension_numbers = #tpu.dot_dimension_numbers<[1], [0], [0], [1], [0, 0, 1, 1], [], []>} : vector<32x896xbf16>, vector<896x128xbf16>, vector<32x128xf32> -> vector<32x128xf32>
    %75 = arith.truncf %74 : vector<32x128xf32> to vector<32x128xbf16>
    %c0_119 = arith.constant 0 : index
    %c0_120 = arith.constant 0 : index
    %76 = vector.load %arg15[%c0_119, %c0_120] : memref<32x256xbf16, #tpu.memory_space<vmem>>, vector<32x128xbf16>
    tpu.vector_store %arg15[%c0_119, %c0_120], %75 {strides = array<i32>} : memref<32x256xbf16, #tpu.memory_space<vmem>>, vector<32x128xbf16>,
    %c0_121 = arith.constant 0 : index
    %c1024_122 = arith.constant 1024 : index
    %77 = vector.load %arg14[%c0_121, %c1024_122] : memref<32x2048xf32, #tpu.memory_space<vmem>>, vector<32x896xf32>
    %c0_123 = arith.constant 0 : index
    %c1056 = arith.constant 1056 : index
    %78 = vector.load %arg14[%c0_123, %c1056] : memref<32x2048xf32, #tpu.memory_space<vmem>>, vector<32x896xf32>
    %79 = arith.maximumf %77, %78 : vector<32x896xf32>
    %c0_124 = arith.constant 0 : index
    %c1088 = arith.constant 1088 : index
    %80 = vector.load %arg14[%c0_124, %c1088] : memref<32x2048xf32, #tpu.memory_space<vmem>>, vector<32x896xf32>
    %81 = arith.maximumf %79, %80 : vector<32x896xf32>
    %82 = arith.truncf %81 : vector<32x896xf32> to vector<32x896xbf16>
    %c0_125 = arith.constant 0 : index
    %c0_126 = arith.constant 0 : index
    %83 = vector.load %arg3[%c0_125, %c0_126] : memref<896x128xbf16, #tpu.memory_space<vmem>>, vector<896x128xbf16>
    %cst_127 = arith.constant dense<0.000000e+00> : vector<32x128xf32>
    %84 = tpu.matmul %82, %83, %cst_127 {dimension_numbers = #tpu.dot_dimension_numbers<[1], [0], [0], [1], [0, 0, 1, 1], [], []>} : vector<32x896xbf16>, vector<896x128xbf16>, vector<32x128xf32> -> vector<32x128xf32>
    %85 = arith.truncf %84 : vector<32x128xf32> to vector<32x128xbf16>
    %c0_128 = arith.constant 0 : index
    %c128_129 = arith.constant 128 : index
    %86 = vector.load %arg15[%c0_128, %c128_129] : memref<32x256xbf16, #tpu.memory_space<vmem>>, vector<32x128xbf16>
    tpu.vector_store %arg15[%c0_128, %c128_129], %85 {strides = array<i32>} : memref<32x256xbf16, #tpu.memory_space<vmem>>, vector<32x128xbf16>,
    %c0_130 = arith.constant 0 : index
    %c0_131 = arith.constant 0 : index
    %87 = vector.load %arg15[%c0_130, %c0_131] : memref<32x256xbf16, #tpu.memory_space<vmem>>, vector<32x32xbf16>
    %c0_132 = arith.constant 0 : index
    %c0_133 = arith.constant 0 : index
    %88 = vector.load %arg16[%c0_132, %c0_133] : memref<288x64xbf16, #tpu.memory_space<vmem>>, vector<32x32xbf16>
    tpu.vector_store %arg16[%c0_132, %c0_133], %87 {strides = array<i32>} : memref<288x64xbf16, #tpu.memory_space<vmem>>, vector<32x32xbf16>,
    %c0_134 = arith.constant 0 : index
    %c128_135 = arith.constant 128 : index
    %89 = vector.load %arg15[%c0_134, %c128_135] : memref<32x256xbf16, #tpu.memory_space<vmem>>, vector<32x32xbf16>
    %c0_136 = arith.constant 0 : index
    %c32_137 = arith.constant 32 : index
    %90 = vector.load %arg16[%c0_136, %c32_137] : memref<288x64xbf16, #tpu.memory_space<vmem>>, vector<32x32xbf16>
    tpu.vector_store %arg16[%c0_136, %c32_137], %89 {strides = array<i32>} : memref<288x64xbf16, #tpu.memory_space<vmem>>, vector<32x32xbf16>,
    %c0_138 = arith.constant 0 : index
    %c25 = arith.constant 25 : index
    %91 = vector.load %arg15[%c0_138, %c25] : memref<32x256xbf16, #tpu.memory_space<vmem>>, vector<32x32xbf16>
    %c32_139 = arith.constant 32 : index
    %c0_140 = arith.constant 0 : index
    %92 = vector.load %arg16[%c32_139, %c0_140] : memref<288x64xbf16, #tpu.memory_space<vmem>>, vector<32x32xbf16>
    tpu.vector_store %arg16[%c32_139, %c0_140], %91 {strides = array<i32>} : memref<288x64xbf16, #tpu.memory_space<vmem>>, vector<32x32xbf16>,
    %c0_141 = arith.constant 0 : index
    %c153 = arith.constant 153 : index
    %93 = vector.load %arg15[%c0_141, %c153] : memref<32x256xbf16, #tpu.memory_space<vmem>>, vector<32x32xbf16>
    %c32_142 = arith.constant 32 : index
    %c32_143 = arith.constant 32 : index
    %94 = vector.load %arg16[%c32_142, %c32_143] : memref<288x64xbf16, #tpu.memory_space<vmem>>, vector<32x32xbf16>
    tpu.vector_store %arg16[%c32_142, %c32_143], %93 {strides = array<i32>} : memref<288x64xbf16, #tpu.memory_space<vmem>>, vector<32x32xbf16>,
    %c0_144 = arith.constant 0 : index
    %c1_145 = arith.constant 1 : index
    %95 = vector.load %arg15[%c0_144, %c1_145] : memref<32x256xbf16, #tpu.memory_space<vmem>>, vector<32x32xbf16>
    %c64_146 = arith.constant 64 : index
    %c0_147 = arith.constant 0 : index
    %96 = vector.load %arg16[%c64_146, %c0_147] : memref<288x64xbf16, #tpu.memory_space<vmem>>, vector<32x32xbf16>
    tpu.vector_store %arg16[%c64_146, %c0_147], %95 {strides = array<i32>} : memref<288x64xbf16, #tpu.memory_space<vmem>>, vector<32x32xbf16>,
    %c0_148 = arith.constant 0 : index
    %c129 = arith.constant 129 : index
    %97 = vector.load %arg15[%c0_148, %c129] : memref<32x256xbf16, #tpu.memory_space<vmem>>, vector<32x32xbf16>
    %c64_149 = arith.constant 64 : index
    %c32_150 = arith.constant 32 : index
    %98 = vector.load %arg16[%c64_149, %c32_150] : memref<288x64xbf16, #tpu.memory_space<vmem>>, vector<32x32xbf16>
    tpu.vector_store %arg16[%c64_149, %c32_150], %97 {strides = array<i32>} : memref<288x64xbf16, #tpu.memory_space<vmem>>, vector<32x32xbf16>,
    %c0_151 = arith.constant 0 : index
    %c50 = arith.constant 50 : index
    %99 = vector.load %arg15[%c0_151, %c50] : memref<32x256xbf16, #tpu.memory_space<vmem>>, vector<32x32xbf16>
    %c96_152 = arith.constant 96 : index
    %c0_153 = arith.constant 0 : index
    %100 = vector.load %arg16[%c96_152, %c0_153] : memref<288x64xbf16, #tpu.memory_space<vmem>>, vector<32x32xbf16>
    tpu.vector_store %arg16[%c96_152, %c0_153], %99 {strides = array<i32>} : memref<288x64xbf16, #tpu.memory_space<vmem>>, vector<32x32xbf16>,
    %c0_154 = arith.constant 0 : index
    %c178 = arith.constant 178 : index
    %101 = vector.load %arg15[%c0_154, %c178] : memref<32x256xbf16, #tpu.memory_space<vmem>>, vector<32x32xbf16>
    %c96_155 = arith.constant 96 : index
    %c32_156 = arith.constant 32 : index
    %102 = vector.load %arg16[%c96_155, %c32_156] : memref<288x64xbf16, #tpu.memory_space<vmem>>, vector<32x32xbf16>
    tpu.vector_store %arg16[%c96_155, %c32_156], %101 {strides = array<i32>} : memref<288x64xbf16, #tpu.memory_space<vmem>>, vector<32x32xbf16>,
    %c0_157 = arith.constant 0 : index
    %c75 = arith.constant 75 : index
    %103 = vector.load %arg15[%c0_157, %c75] : memref<32x256xbf16, #tpu.memory_space<vmem>>, vector<32x32xbf16>
    %c128_158 = arith.constant 128 : index
    %c0_159 = arith.constant 0 : index
    %104 = vector.load %arg16[%c128_158, %c0_159] : memref<288x64xbf16, #tpu.memory_space<vmem>>, vector<32x32xbf16>
    tpu.vector_store %arg16[%c128_158, %c0_159], %103 {strides = array<i32>} : memref<288x64xbf16, #tpu.memory_space<vmem>>, vector<32x32xbf16>,
    %c0_160 = arith.constant 0 : index
    %c203 = arith.constant 203 : index
    %105 = vector.load %arg15[%c0_160, %c203] : memref<32x256xbf16, #tpu.memory_space<vmem>>, vector<32x32xbf16>
    %c128_161 = arith.constant 128 : index
    %c32_162 = arith.constant 32 : index
    %106 = vector.load %arg16[%c128_161, %c32_162] : memref<288x64xbf16, #tpu.memory_space<vmem>>, vector<32x32xbf16>
    tpu.vector_store %arg16[%c128_161, %c32_162], %105 {strides = array<i32>} : memref<288x64xbf16, #tpu.memory_space<vmem>>, vector<32x32xbf16>,
    %c0_163 = arith.constant 0 : index
    %c51 = arith.constant 51 : index
    %107 = vector.load %arg15[%c0_163, %c51] : memref<32x256xbf16, #tpu.memory_space<vmem>>, vector<32x32xbf16>
    %c160_164 = arith.constant 160 : index
    %c0_165 = arith.constant 0 : index
    %108 = vector.load %arg16[%c160_164, %c0_165] : memref<288x64xbf16, #tpu.memory_space<vmem>>, vector<32x32xbf16>
    tpu.vector_store %arg16[%c160_164, %c0_165], %107 {strides = array<i32>} : memref<288x64xbf16, #tpu.memory_space<vmem>>, vector<32x32xbf16>,
    %c0_166 = arith.constant 0 : index
    %c179 = arith.constant 179 : index
    %109 = vector.load %arg15[%c0_166, %c179] : memref<32x256xbf16, #tpu.memory_space<vmem>>, vector<32x32xbf16>
    %c160_167 = arith.constant 160 : index
    %c32_168 = arith.constant 32 : index
    %110 = vector.load %arg16[%c160_167, %c32_168] : memref<288x64xbf16, #tpu.memory_space<vmem>>, vector<32x32xbf16>
    tpu.vector_store %arg16[%c160_167, %c32_168], %109 {strides = array<i32>} : memref<288x64xbf16, #tpu.memory_space<vmem>>, vector<32x32xbf16>,
    %c0_169 = arith.constant 0 : index
    %c5 = arith.constant 5 : index
    %111 = vector.load %arg15[%c0_169, %c5] : memref<32x256xbf16, #tpu.memory_space<vmem>>, vector<32x32xbf16>
    %c192_170 = arith.constant 192 : index
    %c0_171 = arith.constant 0 : index
    %112 = vector.load %arg16[%c192_170, %c0_171] : memref<288x64xbf16, #tpu.memory_space<vmem>>, vector<32x32xbf16>
    tpu.vector_store %arg16[%c192_170, %c0_171], %111 {strides = array<i32>} : memref<288x64xbf16, #tpu.memory_space<vmem>>, vector<32x32xbf16>,
    %c0_172 = arith.constant 0 : index
    %c133 = arith.constant 133 : index
    %113 = vector.load %arg15[%c0_172, %c133] : memref<32x256xbf16, #tpu.memory_space<vmem>>, vector<32x32xbf16>
    %c192_173 = arith.constant 192 : index
    %c32_174 = arith.constant 32 : index
    %114 = vector.load %arg16[%c192_173, %c32_174] : memref<288x64xbf16, #tpu.memory_space<vmem>>, vector<32x32xbf16>
    tpu.vector_store %arg16[%c192_173, %c32_174], %113 {strides = array<i32>} : memref<288x64xbf16, #tpu.memory_space<vmem>>, vector<32x32xbf16>,
    %c0_175 = arith.constant 0 : index
    %c30 = arith.constant 30 : index
    %115 = vector.load %arg15[%c0_175, %c30] : memref<32x256xbf16, #tpu.memory_space<vmem>>, vector<32x32xbf16>
    %c224_176 = arith.constant 224 : index
    %c0_177 = arith.constant 0 : index
    %116 = vector.load %arg16[%c224_176, %c0_177] : memref<288x64xbf16, #tpu.memory_space<vmem>>, vector<32x32xbf16>
    tpu.vector_store %arg16[%c224_176, %c0_177], %115 {strides = array<i32>} : memref<288x64xbf16, #tpu.memory_space<vmem>>, vector<32x32xbf16>,
    %c0_178 = arith.constant 0 : index
    %c158 = arith.constant 158 : index
    %117 = vector.load %arg15[%c0_178, %c158] : memref<32x256xbf16, #tpu.memory_space<vmem>>, vector<32x32xbf16>
    %c224_179 = arith.constant 224 : index
    %c32_180 = arith.constant 32 : index
    %118 = vector.load %arg16[%c224_179, %c32_180] : memref<288x64xbf16, #tpu.memory_space<vmem>>, vector<32x32xbf16>
    tpu.vector_store %arg16[%c224_179, %c32_180], %117 {strides = array<i32>} : memref<288x64xbf16, #tpu.memory_space<vmem>>, vector<32x32xbf16>,
    %c0_181 = arith.constant 0 : index
    %c6 = arith.constant 6 : index
    %119 = vector.load %arg15[%c0_181, %c6] : memref<32x256xbf16, #tpu.memory_space<vmem>>, vector<32x32xbf16>
    %c256_182 = arith.constant 256 : index
    %c0_183 = arith.constant 0 : index
    %120 = vector.load %arg16[%c256_182, %c0_183] : memref<288x64xbf16, #tpu.memory_space<vmem>>, vector<32x32xbf16>
    tpu.vector_store %arg16[%c256_182, %c0_183], %119 {strides = array<i32>} : memref<288x64xbf16, #tpu.memory_space<vmem>>, vector<32x32xbf16>,
    %c0_184 = arith.constant 0 : index
    %c134 = arith.constant 134 : index
    %121 = vector.load %arg15[%c0_184, %c134] : memref<32x256xbf16, #tpu.memory_space<vmem>>, vector<32x32xbf16>
    %c256_185 = arith.constant 256 : index
    %c32_186 = arith.constant 32 : index
    %122 = vector.load %arg16[%c256_185, %c32_186] : memref<288x64xbf16, #tpu.memory_space<vmem>>, vector<32x32xbf16>
    tpu.vector_store %arg16[%c256_185, %c32_186], %121 {strides = array<i32>} : memref<288x64xbf16, #tpu.memory_space<vmem>>, vector<32x32xbf16>,
    %c0_187 = arith.constant 0 : index
    %c0_188 = arith.constant 0 : index
    %123 = vector.load %arg4[%c0_187, %c0_188] : memref<64x288xbf16, #tpu.memory_space<vmem>>, vector<64x288xbf16>
    %c0_189 = arith.constant 0 : index
    %c0_190 = arith.constant 0 : index
    %124 = vector.load %arg16[%c0_189, %c0_190] : memref<288x64xbf16, #tpu.memory_space<vmem>>, vector<288x64xbf16>
    %cst_191 = arith.constant dense<0.000000e+00> : vector<64x64xf32>
    %125 = tpu.matmul %123, %124, %cst_191 {dimension_numbers = #tpu.dot_dimension_numbers<[1], [0], [0], [1], [0, 0, 1, 1], [], []>} : vector<64x288xbf16>, vector<288x64xbf16>, vector<64x64xf32> -> vector<64x64xf32>
    %c0_192 = arith.constant 0 : index
    %c0_193 = arith.constant 0 : index
    %126 = vector.load %arg5[%c0_192, %c0_193] : memref<64x1xf32, #tpu.memory_space<vmem>>, vector<64x1xf32>
    %127 = vector.broadcast %126 : vector<64x1xf32> to vector<64x64xf32>
    %128 = arith.addf %125, %127 : vector<64x64xf32>
    %129 = vector.extract_strided_slice %128 {offsets = [0, 0], sizes = [64, 62], strides = [1, 1]} : vector<64x64xf32> to vector<64x62xf32>
    %130 = vector.extract_strided_slice %128 {offsets = [0, 1], sizes = [64, 62], strides = [1, 1]} : vector<64x64xf32> to vector<64x62xf32>
    %131 = arith.maximumf %129, %130 : vector<64x62xf32>
    %132 = vector.extract_strided_slice %128 {offsets = [0, 2], sizes = [64, 62], strides = [1, 1]} : vector<64x64xf32> to vector<64x62xf32>
    %133 = arith.maximumf %131, %132 : vector<64x62xf32>
    %134 = vector.extract_strided_slice %133 {offsets = [0, 0], sizes = [64, 52], strides = [1, 1]} : vector<64x62xf32> to vector<64x52xf32>
    %135 = vector.extract_strided_slice %133 {offsets = [0, 5], sizes = [64, 52], strides = [1, 1]} : vector<64x62xf32> to vector<64x52xf32>
    %136 = arith.maximumf %134, %135 : vector<64x52xf32>
    %137 = vector.extract_strided_slice %133 {offsets = [0, 10], sizes = [64, 52], strides = [1, 1]} : vector<64x62xf32> to vector<64x52xf32>
    %138 = arith.maximumf %136, %137 : vector<64x52xf32>
    %c0_194 = arith.constant 0 : index
    %c0_195 = arith.constant 0 : index
    %139 = vector.load %arg6[%c0_194, %c0_195] : memref<52x2xf32, #tpu.memory_space<vmem>>, vector<52x2xf32>
    %cst_196 = arith.constant dense<0.000000e+00> : vector<64x2xf32>
    %140 = tpu.matmul %138, %139, %cst_196 {dimension_numbers = #tpu.dot_dimension_numbers<[1], [0], [0], [1], [0, 0, 1, 1], [], []>} : vector<64x52xf32>, vector<52x2xf32>, vector<64x2xf32> -> vector<64x2xf32>
    %c0_197 = arith.constant 0 : index
    %c0_198 = arith.constant 0 : index
    %141 = vector.load %arg7[%c0_197, %c0_198] : memref<256x64xf32, #tpu.memory_space<vmem>>, vector<256x64xf32>
    %cst_199 = arith.constant dense<0.000000e+00> : vector<256x2xf32>
    %142 = tpu.matmul %141, %140, %cst_199 {dimension_numbers = #tpu.dot_dimension_numbers<[1], [0], [0], [1], [0, 0, 1, 1], [], []>} : vector<256x64xf32>, vector<64x2xf32>, vector<256x2xf32> -> vector<256x2xf32>
    %c0_200 = arith.constant 0 : index
    %c0_201 = arith.constant 0 : index
    %143 = vector.load %arg8[%c0_200, %c0_201] : memref<256x1xf32, #tpu.memory_space<vmem>>, vector<256x1xf32>
    %144 = vector.broadcast %143 : vector<256x1xf32> to vector<256x2xf32>
    %145 = arith.addf %142, %144 : vector<256x2xf32>
    %cst_202 = arith.constant 0.000000e+00 : f32
    %146 = vector.broadcast %cst_202 : f32 to vector<256x2xf32>
    %147 = arith.maximumf %145, %146 : vector<256x2xf32>
    %c0_203 = arith.constant 0 : index
    %c0_204 = arith.constant 0 : index
    %148 = vector.load %arg9[%c0_203, %c0_204] : memref<2x256xf32, #tpu.memory_space<vmem>>, vector<2x256xf32>
    %cst_205 = arith.constant dense<0.000000e+00> : vector<2x2xf32>
    %149 = tpu.matmul %148, %147, %cst_205 {dimension_numbers = #tpu.dot_dimension_numbers<[1], [0], [0], [1], [0, 0, 1, 1], [], []>} : vector<2x256xf32>, vector<256x2xf32>, vector<2x2xf32> -> vector<2x2xf32>
    %c0_206 = arith.constant 0 : index
    %c0_207 = arith.constant 0 : index
    %150 = vector.load %arg10[%c0_206, %c0_207] : memref<2x1xf32, #tpu.memory_space<vmem>>, vector<2x1xf32>
    %151 = vector.broadcast %150 : vector<2x1xf32> to vector<2x2xf32>
    %152 = arith.addf %149, %151 : vector<2x2xf32>
    %cst_208 = arith.constant dense<0xFF800000> : vector<2xf32>
    %153 = vector.multi_reduction <maximumf>, %152, %cst_208 [0] : vector<2x2xf32> to vector<2xf32>
    %154 = vector.shape_cast %153 : vector<2xf32> to vector<1x2xf32>
    %155 = vector.broadcast %154 : vector<1x2xf32> to vector<2x2xf32>
    %156 = arith.subf %152, %155 : vector<2x2xf32>
    %157 = math.exp %156 : vector<2x2xf32>
    %cst_209 = arith.constant dense<0.000000e+00> : vector<2xf32>
    %158 = vector.multi_reduction <add>, %157, %cst_209 [0] : vector<2x2xf32> to vector<2xf32>
    %159 = vector.shape_cast %158 : vector<2xf32> to vector<1x2xf32>
    %160 = vector.broadcast %159 : vector<1x2xf32> to vector<2x2xf32>
    %161 = arith.divf %157, %160 : vector<2x2xf32>
    %c0_210 = arith.constant 0 : index
    %c0_211 = arith.constant 0 : index
    %162 = vector.load %arg11[%c0_210, %c0_211] : memref<2x2xf32, #tpu.memory_space<vmem>>, vector<2x2xf32>
    tpu.vector_store %arg11[%c0_210, %c0_211], %161 {strides = array<i32>} : memref<2x2xf32, #tpu.memory_space<vmem>>, vector<2x2xf32>,
    return
  }
}

</mosaic_0001>

<bundles_post_ra>
// kernel: eeg2dconvnet_forward.1
= control target key start
LH: loop header
LB: loop body
LE: loop exit
PB: predicated region body
PF: predicated region fallthrough
CT: control target
= control target key end

     0   :  { %s10533_s21 = smov 127   ;;  %s10534_s24 = smov 96   ;;  %v10536_v25 = vmov 0   ;;  %vm620_vm0 = vcmask 1039360   ;;  %vm1785_vm1 = vcmask 785408   ;;  %vm2498_vm2 = vcmask 777216   ;;  %s14853_s0 = inlined_call_operand.vmem [shape: bf16[2,4,32,1152], index: 0, kind: input, shape index: {}]   ;;  %s14854_s1 = inlined_call_operand.vmem [shape: bf16[32,288], index: 1, kind: input, shape index: {}]   ;;  %s14855_s2 = inlined_call_operand.vmem [shape: f32[32,1], index: 2, kind: input, shape index: {}]   ;;  %s14856_s3 = inlined_call_operand.vmem [shape: bf16[896,128], index: 3, kind: input, shape index: {}]   ;;  %s14857_s4 = inlined_call_operand.vmem [shape: bf16[64,288], index: 4, kind: input, shape index: {}]   ;;  %s14858_s5 = inlined_call_operand.vmem [shape: f32[64,1], index: 5, kind: input, shape index: {}]   ;;  %s14859_s6 = inlined_call_operand.vmem [shape: f32[52,2], index: 6, kind: input, shape index: {}]   ;;  %s14860_s8 = inlined_call_operand.vmem [shape: f32[256,1], index: 8, kind: input, shape index: {}]   ;;  %s14861_s10 = inlined_call_operand.vmem [shape: f32[2,1], index: 10, kind: input, shape index: {}]   ;;  %s14862_s7 = inlined_call_operand.vmem [shape: f32[256,64], index: 7, kind: input, shape index: {}]   ;;  %s14863_s9 = inlined_call_operand.vmem [shape: f32[2,256], index: 9, kind: input, shape index: {}]   ;;  %s14864_s11 = inlined_call_operand.vmem [shape: f32[2,2], index: 11, kind: output, shape index: {}]  }
   0x1   :  { %v10619_v0 = vld [vmem:[%s14853_s0 + $0x4] ss:$36 sps:$4 sm:$0xff]   ;;  %v10639_v3 = vld [vmem:[%s14853_s0 + $0x4c] ss:$36 sps:$4 sm:$0xff]   ;;  %v10133_v7 = vld [vmem:[%s14853_s0 + $0x94] ss:$36 sps:$4 sm:$0xff]   ;;  %9792 = vset.pattern.permute.xlu1 %v10536_v25  ;;  %9791 = vset.pattern.permute.xlu0 %v10536_v25 }
   0x2   :  { %v10624_v1 = vld [vmem:[%s14853_s0] ss:$36 sps:$4 sm:$0xff]   ;;  %586 = vrot.lane.b32.xlu0 %v10619_v0, %s10533_s21  ;;  %v10631_v2 = vld [vmem:[%s14853_s0 + $0x8] ss:$36 sps:$4 sm:$0xff]   ;;  %3082 = vmatprep.subr.bf16.mxu0 %v10619_v0  ;;  %v10653_v5 = vld [vmem:[%s14853_s0 + $0x50] ss:$36 sps:$4 sm:$0xff]  }
   0x3   :  { %584 = vrot.lane.b32.xlu1 %v10624_v1, %s10533_s21  ;;  %3083 = vmatpush1.bf16.msra.mxu0 %v10624_v1  ;;  %v10645_v4 = vld [vmem:[%s14853_s0 + $0x48] ss:$36 sps:$4 sm:$0xff]   ;;  %v10137_v9 = vld [vmem:[%s14853_s0 + $0x90] ss:$36 sps:$4 sm:$0xff]   ;;  %v10138_v10 = vld [vmem:[%s14853_s0 + $0xdc] ss:$36 sps:$4 sm:$0xff]  }
   0x4   :  { %3084 = vmatprep.subr.bf16.mxu0 %v10639_v3  ;;  %v10661_v6 = vld [vmem:[%s14853_s0 + $0x124] ss:$36 sps:$4 sm:$0xff]   ;;  %v10691_v12 = vld [vmem:[%s14853_s0 + $0xc] ss:$36 sps:$4 sm:$0xff]   ;;  %v10142_v14 = vld [vmem:[%s14853_s0 + $0xd8] ss:$36 sps:$4 sm:$0xff]  }
   0x5   :  { %v10673_v8 = vld [vmem:[%s14853_s0 + $0x128] ss:$36 sps:$4 sm:$0xff]   ;;  %v10684_v11 = vld [vmem:[%s14853_s0 + $0x120] ss:$36 sps:$4 sm:$0xff]   ;;  %v10706_v15 = vld [vmem:[%s14853_s0 + $0x54] ss:$36 sps:$4 sm:$0xff]   ;;  %3188 = vmatprep.subr.bf16.mxu1 %v10691_v12 }
   0x6   :  { %588 = vrot.lane.b32.xlu0 %v10631_v2, %s10533_s21  ;;  %v10698_v13 = vld [vmem:[%s14853_s0 + $0x16c] ss:$36 sps:$4 sm:$0xff]   ;;  %3189 = vmatpush1.bf16.msra.mxu1 %v10631_v2  ;;  %v10155_v18 = vld [vmem:[%s14853_s0 + $0x9c] ss:$36 sps:$4 sm:$0xff]   ;;  %v10161_v20 = vld [vmem:[%s14853_s0 + $0xe4] ss:$36 sps:$4 sm:$0xff]  }
   0x7   :  { %604 = vrot.lane.b32.xlu1 %v10639_v3, %s10533_s21  ;;  %3085 = vmatpush1.bf16.msra.mxu0 %v10645_v4  ;;  %v10715_v16 = vld [vmem:[%s14853_s0 + $0x170] ss:$36 sps:$4 sm:$0xff]   ;;  %v10723_v17 = vld [vmem:[%s14853_s0 + $0x168] ss:$36 sps:$4 sm:$0xff]   ;;  %v10135_v19 = vld [vmem:[%s14853_s0 + $0x98] ss:$36 sps:$4 sm:$0xff]  }
   0x8   :  { %3086 = vmatprep.subr.bf16.mxu0 %v10133_v7  ;;  %3190 = vmatprep.subr.bf16.mxu1 %v10706_v15  ;;  %v10140_v21 = vld [vmem:[%s14853_s0 + $0xe0] ss:$36 sps:$4 sm:$0xff]   ;;  %v10769_v23 = vld [vmem:[%s14853_s0 + $0x10] ss:$36 sps:$4 sm:$0xff]   ;;  %s10535_s12 = smov 95   ;;  %vm3075_vm3 = vcmask 261120  }
   0x9   :  { %v10760_v22 = vld [vmem:[%s14854_s1 + $0x4] ss:$12 sps:$4 sm:$0xff]   ;;  %v10785_v24 = vld [vmem:[%s14853_s0 + $0x58] ss:$36 sps:$4 sm:$0xff]   ;;  %v10862_v33 = vld [vmem:[%s14853_s0 + $0xe8] ss:$36 sps:$4 sm:$0xff]  }
   0xa   :  { %606 = vrot.lane.b32.xlu0 %v10653_v5, %s10533_s21  ;;  %3191 = vmatpush1.bf16.msra.mxu1 %v10653_v5  ;;  %v10806_v26 = vld [vmem:[%s14853_s0 + $0x12c] ss:$36 sps:$4 sm:$0xff]   ;;  %v10818_v28 = vld [vmem:[%s14853_s0 + $0x174] ss:$36 sps:$4 sm:$0xff]   ;;  %v10836_v30 = vld [vmem:[%s14853_s0 + $0xa0] ss:$36 sps:$4 sm:$0xff]  }
   0xb   :  { %602 = vrot.lane.b32.xlu1 %v10645_v4, %s10533_s21  ;;  %3087 = vmatpush1.bf16.msra.mxu0 %v10137_v9  ;;  %v10150_v27 = vld [vmem:[%s14853_s0 + $0x130] ss:$36 sps:$4 sm:$0xff]   ;;  %v10153_v29 = vld [vmem:[%s14853_s0 + $0x178] ss:$36 sps:$4 sm:$0xff]   ;;  %v10875_v35 = vld [vmem:[%s14853_s0 + $0x60] ss:$36 sps:$4 sm:$0xff]  }
   0xc   :  { %3088 = vmatprep.subr.bf16.mxu0 %v10138_v10  ;;  %3192 = vmatprep.subr.bf16.mxu1 %v10155_v18  ;;  %v10845_v31 = vld [vmem:[%s14853_s0 + $0x14] ss:$36 sps:$4 sm:$0xff]   ;;  %v10868_v34 = vld [vmem:[%s14853_s0 + $0x5c] ss:$36 sps:$4 sm:$0xff]   ;;  %v10902_v40 = vld [vmem:[%s14853_s0 + $0x64] ss:$36 sps:$4 sm:$0xff]  }
   0xd   :  { %3114 = vmatprep.mubr.bf16.mxu0 %v10760_v22  ;;  %3220 = vmatprep.mubr.bf16.mxu1 %v10760_v22  ;;  %v10853_v32 = vld [vmem:[%s14853_s0 + $0x18] ss:$36 sps:$4 sm:$0xff]   ;;  %v10168_v37 = vld [vmem:[%s14853_s0 + $0x20] ss:$36 sps:$4 sm:$0xff]   ;;  %v10173_v41 = vld [vmem:[%s14853_s0 + $0x68] ss:$36 sps:$4 sm:$0xff]  }
   0xe   :  { %1395 = vrot.lane.b32.xlu0 %v10661_v6, %s10533_s21  ;;  %3193 = vmatpush1.bf16.msra.mxu1 %v10135_v19  ;;  %v10882_v36 = vld [vmem:[%s14853_s0 + $0x1c] ss:$36 sps:$4 sm:$0xff]   ;;  %v10169_v38 = vld [vmem:[%s14853_s0 + $0x134] ss:$36 sps:$4 sm:$0xff]   ;;  %v10941_v56 = vld [vmem:[%s14853_s0 + $0xa4] ss:$36 sps:$4 sm:$0xff]  }
   0xf   :  { %1397 = vrot.lane.b32.xlu1 %v10673_v8, %s10533_s21  ;;  %3089 = vmatpush1.bf16.msra.mxu0 %v10142_v14  ;;  %v10170_v39 = vld [vmem:[%s14853_s0 + $0x138] ss:$36 sps:$4 sm:$0xff]   ;;  %v10175_v45 = vld [vmem:[%s14853_s0 + $0x180] ss:$36 sps:$4 sm:$0xff]   ;;  %v10949_v57 = vld [vmem:[%s14853_s0 + $0xa8] ss:$36 sps:$4 sm:$0xff]  }
  0x10   :  { %3194 = vmatprep.subr.bf16.mxu1 %v10161_v20  ;;  %v10174_v44 = vld [vmem:[%s14853_s0 + $0x17c] ss:$36 sps:$4 sm:$0xff]   ;;  %v10183_v59 = vld [vmem:[%s14853_s0 + $0x1b4] ss:$36 sps:$4 sm:$0xff]   ;;  %v10960_v61 = vld [vmem:[%s14853_s0 + $0xec] ss:$36 sps:$4 sm:$0xff]  }
  0x11   :  { %v10968_v62 = vld [vmem:[%s14853_s0 + $0xf0] ss:$36 sps:$4 sm:$0xff]   ;;  %vm4567_vm4 = vcmask 1031168   ;;  %s10538_s14 = smov 64   ;;  %vm5097_vm5 = vcmask 523264   ;;  %s10540_s30 = smov 53  }
  0x12   :  { %1393 = vrot.lane.b32.xlu0 %v10684_v11, %s10533_s21  ;;  %3195 = vmatpush1.bf16.msra.mxu1 %v10140_v21  ;;  %v10185_v63 = vld [vmem:[%s14853_s0 + $0x1b0] ss:$36 sps:$4 sm:$0xff]   ;;  %s10541_s13 = smov 123   ;;  %s10542_s15 = smov 103   ;;  %vm6908_vm6 = vcmask 523520   ;;  %vm7563_vm7 = vcmask 1043456  }
  0x13   :  { %1413 = vrot.lane.b32.xlu1 %v10698_v13, %s10533_s21  ;;  %s10545_s16 = smov 7   ;;  %s10546_s17 = smov 109   ;;  %vm7538_vm8 = vcmask 424960   ;;  %vm8337_vm9 = vcmask 9216  }
  0x14   :  { %s10547_s18 = smov 27   ;;  %s10548_s19 = smov 31  }
  0x15   :  { %s10549_s20 = smov 98   ;;  %s10550_s22 = smov 78  }
  0x16   :  { %1415 = vrot.lane.b32.xlu0 %v10715_v16, %s10533_s21  ;;  %s10551_s23 = smov 2   ;;  %s10552_s25 = smov 110  }
  0x17   :  { %1411 = vrot.lane.b32.xlu1 %v10723_v17, %s10533_s21  ;;  %s10553_s27 = smov 122   ;;  %s10554_s28 = smov 26  }
  0x1a   :  { %1751 = vrot.lane.b32.xlu0 %v10619_v0, %s10534_s24 }
  0x1b   :  { %1753 = vrot.lane.b32.xlu1 %v10631_v2, %s10534_s24 }
  0x1e   :  { %1749 = vrot.lane.b32.xlu0 %v10624_v1, %s10534_s24 }
  0x1f   :  { %1769 = vrot.lane.b32.xlu1 %v10639_v3, %s10534_s24 }
  0x22   :  { %1771 = vrot.lane.b32.xlu0 %v10653_v5, %s10534_s24 }
  0x23   :  { %1767 = vrot.lane.b32.xlu1 %v10645_v4, %s10534_s24 }
  0x26   :  { %2108 = vrot.lane.b32.xlu0 %v10133_v7, %s10534_s24 }
  0x27   :  { %2110 = vrot.lane.b32.xlu1 %v10135_v19, %s10534_s24 }
  0x2a   :  { %2106 = vrot.lane.b32.xlu0 %v10137_v9, %s10534_s24  ;;  %v10191_v9 = vld [vmem:[%s14853_s0 + $0x184] ss:$36 sps:$4 sm:$0xff]  }
  0x2b   :  { %2126 = vrot.lane.b32.xlu1 %v10138_v10, %s10534_s24 }
  0x2e   :  { %2128 = vrot.lane.b32.xlu0 %v10140_v21, %s10534_s24 }
  0x2f   :  { %2124 = vrot.lane.b32.xlu1 %v10142_v14, %s10534_s24 }
  0x32   :  { %590 = vrot.lane.b32.xlu0 %v10691_v12, %s10533_s21 }
  0x33   :  { %592 = vrot.lane.b32.xlu1 %v10769_v23, %s10533_s21 }
  0x36   :  { %2464 = vrot.lane.b32.xlu0 %v10619_v0, %s10535_s12 }
  0x37   :  { %2466 = vrot.lane.b32.xlu1 %v10631_v2, %s10535_s12 }
  0x3a   :  { %2462 = vrot.lane.b32.xlu0 %v10624_v1, %s10535_s12  ;;  %v10188_v1 = vld [vmem:[%s14853_s0 + $0x1fc] ss:$36 sps:$4 sm:$0xff]  }
  0x3b   :  { %608 = vrot.lane.b32.xlu1 %v10706_v15, %s10533_s21 }
  0x3e   :  { %610 = vrot.lane.b32.xlu0 %v10785_v24, %s10533_s21 }
  0x3f   :  { %2482 = vrot.lane.b32.xlu1 %v10639_v3, %s10535_s12  ;;  %v10186_v3 = vld [vmem:[%s14853_s0 + $0x13c] ss:$36 sps:$4 sm:$0xff]  }
  0x42   :  { %2484 = vrot.lane.b32.xlu0 %v10653_v5, %s10535_s12  ;;  %v10190_v5 = vld [vmem:[%s14853_s0 + $0x1f8] ss:$36 sps:$4 sm:$0xff]  }
  0x43   :  { %2480 = vrot.lane.b32.xlu1 %v10645_v4, %s10535_s12  ;;  %v10187_v4 = vld [vmem:[%s14853_s0 + $0x140] ss:$36 sps:$4 sm:$0xff]  }
  0x46   :  { %2468 = vrot.lane.b32.xlu0 %v10691_v12, %s10535_s12 }
  0x47   :  { %2470 = vrot.lane.b32.xlu1 %v10769_v23, %s10535_s12 }
  0x4a   :  { %2486 = vrot.lane.b32.xlu0 %v10706_v15, %s10535_s12 }
  0x4b   :  { %2488 = vrot.lane.b32.xlu1 %v10785_v24, %s10535_s12 }
  0x4e   :  { %1399 = vrot.lane.b32.xlu0 %v10806_v26, %s10533_s21 }
  0x4f   :  { %1401 = vrot.lane.b32.xlu1 %v10150_v27, %s10533_s21 }
  0x52   :  { %1417 = vrot.lane.b32.xlu0 %v10818_v28, %s10533_s21 }
  0x53   :  { %1419 = vrot.lane.b32.xlu1 %v10153_v29, %s10533_s21 }
  0x56   :  { %1755 = vrot.lane.b32.xlu0 %v10691_v12, %s10534_s24 }
  0x57   :  { %1757 = vrot.lane.b32.xlu1 %v10769_v23, %s10534_s24 }
  0x5a   :  { %1773 = vrot.lane.b32.xlu0 %v10706_v15, %s10534_s24 }
  0x5b   :  { %1775 = vrot.lane.b32.xlu1 %v10785_v24, %s10534_s24 }
  0x5e   :  { %2112 = vrot.lane.b32.xlu0 %v10155_v18, %s10534_s24 }
  0x5f   :  { %2114 = vrot.lane.b32.xlu1 %v10836_v30, %s10534_s24 }
  0x62   :  { %594 = vrot.lane.b32.xlu0 %v10845_v31, %s10533_s21 }
  0x63   :  { %596 = vrot.lane.b32.xlu1 %v10853_v32, %s10533_s21 }
  0x66   :  { %2130 = vrot.lane.b32.xlu0 %v10161_v20, %s10534_s24 }
  0x67   :  { %2132 = vrot.lane.b32.xlu1 %v10862_v33, %s10534_s24 }
  0x6a   :  { %612 = vrot.lane.b32.xlu0 %v10868_v34, %s10533_s21 }
  0x6b   :  { %614 = vrot.lane.b32.xlu1 %v10875_v35, %s10533_s21 }
  0x6e   :  { %598 = vrot.lane.b32.xlu0 %v10882_v36, %s10533_s21 }
  0x6f   :  { %600 = vrot.lane.b32.xlu1 %v10168_v37, %s10533_s21 }
  0x72   :  { %1403 = vrot.lane.b32.xlu0 %v10169_v38, %s10533_s21 }
  0x73   :  { %1405 = vrot.lane.b32.xlu1 %v10170_v39, %s10533_s21  ;;  %v10194_v39 = vld [vmem:[%s14853_s0 + $0x68] ss:$36 sps:$4 sm:$0xff]  }
  0x74   :  { %v587_v42 = vpop.permute.xlu0 %586 }
  0x75   :  { %v585_v43 = vpop.permute.xlu1 %584 }
  0x76   :  { %616 = vrot.lane.b32.xlu0 %v10902_v40, %s10533_s21  ;;  %v621_v49 = vsel %vm620_vm0, %v585_v43, %v587_v42 }
  0x77   :  { %618 = vrot.lane.b32.xlu1 %v10173_v41, %s10533_s21 }
  0x78   :  { %v10917_v46 = vpop.permute.xlu0 %588 }
  0x79   :  { %v605_v47 = vpop.permute.xlu1 %604  ;;  %v622_v48 = vsel %vm620_vm0, %v587_v42, %v10917_v46 }
  0x7a   :  { %1421 = vrot.lane.b32.xlu0 %v10174_v44, %s10533_s21  ;;  %3090 = vmatprep.subr.bf16.mxu0 %v622_v48 }
  0x7b   :  { %1423 = vrot.lane.b32.xlu1 %v10175_v45, %s10533_s21  ;;  %3091 = vmatpush1.bf16.msra.mxu0 %v621_v49  ;;  %v11045_v49 = vld [vmem:[%s14853_s0 + $0xac] ss:$36 sps:$4 sm:$0xff]  }
  0x7c   :  { %v10924_v50 = vpop.permute.xlu0 %606 }
  0x7d   :  { %v603_v51 = vpop.permute.xlu1 %602  ;;  %v630_v52 = vsel %vm620_vm0, %v605_v47, %v10924_v50 }
  0x7e   :  { %1759 = vrot.lane.b32.xlu0 %v10845_v31, %s10534_s24  ;;  %3092 = vmatprep.subr.bf16.mxu0 %v630_v52  ;;  %v629_v53 = vsel %vm620_vm0, %v603_v51, %v605_v47  ;;  %v10196_v52 = vld [vmem:[%s14853_s0 + $0xb0] ss:$36 sps:$4 sm:$0xff]  }
  0x7f   :  { %1761 = vrot.lane.b32.xlu1 %v10853_v32, %s10534_s24  ;;  %3093 = vmatpush1.bf16.msra.mxu0 %v629_v53 }
  0x80   :  { %v1396_v54 = vpop.permute.xlu0 %1395  ;;  %3094 = vmatprep.subr.bf16.mxu0 %v10661_v6 }
  0x81   :  { %v10934_v55 = vpop.permute.xlu1 %1397 }
  0x82   :  { %1777 = vrot.lane.b32.xlu0 %v10868_v34, %s10534_s24  ;;  %v1430_v10 = vsel %vm620_vm0, %v1396_v54, %v10934_v55 }
  0x83   :  { %1779 = vrot.lane.b32.xlu1 %v10875_v35, %s10534_s24  ;;  %3095 = vmatpush1.bf16.msra.mxu0 %v10684_v11  ;;  %v10192_v11 = vld [vmem:[%s14853_s0 + $0x188] ss:$36 sps:$4 sm:$0xff]  }
  0x84   :  { %v1394_v58 = vpop.permute.xlu0 %1393  ;;  %3096 = vmatprep.subr.bf16.mxu0 %v10698_v13 }
  0x85   :  { %v1414_v60 = vpop.permute.xlu1 %1413  ;;  %v1429_v14 = vsel %vm620_vm0, %v1394_v58, %v1396_v54 }
  0x86   :  { %2116 = vrot.lane.b32.xlu0 %v10941_v56, %s10534_s24 }
  0x87   :  { %2118 = vrot.lane.b32.xlu1 %v10949_v57, %s10534_s24  ;;  %3097 = vmatpush1.bf16.msra.mxu0 %v10723_v17  ;;  %v10193_v17 = vld [vmem:[%s14853_s0 + $0x20] ss:$36 sps:$4 sm:$0xff]  }
  0x88   :  { %v10973_v0 = vpop.permute.xlu0 %1415  ;;  %3098 = vmatprep.subr.bf16.mxu0 %v10183_v59 }
  0x89   :  { %v1412_v2 = vpop.permute.xlu1 %1411  ;;  %v1438_v15 = vsel %vm620_vm0, %v1414_v60, %v10973_v0 }
  0x8a   :  { %2134 = vrot.lane.b32.xlu0 %v10960_v61, %s10534_s24  ;;  %v1437_v20 = vsel %vm620_vm0, %v1412_v2, %v1414_v60  ;;  %v11065_v60 = vld [vmem:[%s14853_s0 + $0xf4] ss:$36 sps:$4 sm:$0xff]  }
  0x8b   :  { %2136 = vrot.lane.b32.xlu1 %v10968_v62, %s10534_s24  ;;  %3099 = vmatpush1.bf16.msra.mxu0 %v10185_v63 }
  0x8c   :  { %v1752_v6 = vpop.permute.xlu0 %1751  ;;  %3100 = vmatprep.subr.bf16.mxu0 %v10188_v1  ;;  %v11075_v1 = vld [vmem:[%s14854_s1] ss:$12 sps:$4 sm:$0xff]  }
  0x8d   :  { %v10991_v7 = vpop.permute.xlu1 %1753 }
  0x8e   :  { %1407 = vrot.lane.b32.xlu0 %v10186_v3, %s10533_s21  ;;  %v1787_v21 = vsel %vm1785_vm1, %v1752_v6, %v10991_v7  ;;  %v11080_v3 = vld [vmem:[%s14854_s1 + $0x1c] ss:$12 sps:$4 sm:$0xff]  }
  0x8f   :  { %1409 = vrot.lane.b32.xlu1 %v10187_v4, %s10533_s21  ;;  %3101 = vmatpush1.bf16.msra.mxu0 %v10190_v5 }
  0x90   :  { %v1750_v12 = vpop.permute.xlu0 %1749  ;;  %3102 = vmatprep.subr.bf16.mxu0 %v1430_v10 }
  0x91   :  { %v1770_v13 = vpop.permute.xlu1 %1769  ;;  %v1786_v37 = vsel %vm1785_vm1, %v1750_v12, %v1752_v6  ;;  %v10202_v6 = vld [vmem:[%s14853_s0 + $0x20] ss:$36 sps:$4 sm:$0xff]  }
  0x92   :  { %1425 = vrot.lane.b32.xlu0 %v10191_v9, %s10533_s21  ;;  %v11097_v12 = vld [vmem:[%s14853_s0 + $0x244] ss:$36 sps:$4 sm:$0xff]  }
  0x93   :  { %1427 = vrot.lane.b32.xlu1 %v10192_v11, %s10533_s21  ;;  %3103 = vmatpush1.bf16.msra.mxu0 %v1429_v14  ;;  %v11108_v14 = vld [vmem:[%s14854_s1 + $0x18] ss:$12 sps:$4 sm:$0xff]  }
  0x94   :  { %v11011_v18 = vpop.permute.xlu0 %1771  ;;  %3104 = vmatprep.subr.bf16.mxu0 %v1438_v15 }
  0x95   :  { %v1768_v19 = vpop.permute.xlu1 %1767  ;;  %v1795_v38 = vsel %vm1785_vm1, %v1770_v13, %v11011_v18 }
  0x96   :  { %1763 = vrot.lane.b32.xlu0 %v10882_v36, %s10534_s24  ;;  %v1794_v43 = vsel %vm1785_vm1, %v1768_v19, %v1770_v13  ;;  %v11103_v13 = vld [vmem:[%s14853_s0 + $0x248] ss:$36 sps:$4 sm:$0xff]  }
  0x97   :  { %1765 = vrot.lane.b32.xlu1 %v10193_v17, %s10534_s24  ;;  %3105 = vmatpush1.bf16.msra.mxu0 %v1437_v20  ;;  %v11119_v20 = vld [vmem:[%s14853_s0 + $0x240] ss:$36 sps:$4 sm:$0xff]  }
  0x98   :  { %v2109_v27 = vpop.permute.xlu0 %2108  ;;  %3106 = vmatprep.subr.bf16.mxu0 %v1787_v21 }
  0x99   :  { %v11019_v29 = vpop.permute.xlu1 %2110 }
  0x9a   :  { %2472 = vrot.lane.b32.xlu0 %v10845_v31, %s10535_s12  ;;  %v2143_v44 = vsel %vm1785_vm1, %v2109_v27, %v11019_v29 }
  0x9b   :  { %2474 = vrot.lane.b32.xlu1 %v10853_v32, %s10535_s12  ;;  %3107 = vmatpush1.bf16.msra.mxu0 %v1786_v37 }
  0x9c   :  { %v2107_v41 = vpop.permute.xlu0 %2106  ;;  %3108 = vmatprep.subr.bf16.mxu0 %v1795_v38 }
  0x9d   :  { %v2127_v42 = vpop.permute.xlu1 %2126  ;;  %v2142_v48 = vsel %vm1785_vm1, %v2107_v41, %v2109_v27  ;;  %v10211_v41 = vld [vmem:[%s14853_s0 + $0x68] ss:$36 sps:$4 sm:$0xff]  }
  0x9e   :  { %1781 = vrot.lane.b32.xlu0 %v10902_v40, %s10534_s24 }
  0x9f   :  { %1783 = vrot.lane.b32.xlu1 %v10194_v39, %s10534_s24  ;;  %3109 = vmatpush1.bf16.msra.mxu0 %v1794_v43 }
  0xa0   :  { %v11037_v45 = vpop.permute.xlu0 %2128  ;;  %3110 = vmatprep.subr.bf16.mxu0 %v2143_v44  ;;  %v10219_v44 = vld [vmem:[%s14853_s0 + $0x1bc] ss:$36 sps:$4 sm:$0xff]  }
  0xa1   :  { %v2125_v47 = vpop.permute.xlu1 %2124  ;;  %v2151_v51 = vsel %vm1785_vm1, %v2127_v42, %v11037_v45 }
  0xa2   :  { %2490 = vrot.lane.b32.xlu0 %v10868_v34, %s10535_s12  ;;  %v2150_v63 = vsel %vm1785_vm1, %v2125_v47, %v2127_v42 }
  0xa3   :  { %2492 = vrot.lane.b32.xlu1 %v10875_v35, %s10535_s12  ;;  %3111 = vmatpush1.bf16.msra.mxu0 %v2142_v48 }
  0xa4   :  { %v591_v53 = vpop.permute.xlu0 %590  ;;  %3112 = vmatprep.subr.bf16.mxu0 %v2151_v51 }
  0xa5   :  { %v11054_v54 = vpop.permute.xlu1 %592  ;;  %v623_v58 = vsel %vm620_vm0, %v10917_v46, %v591_v53  ;;  %v10200_v46 = vld [vmem:[%s14853_s0 + $0xf8] ss:$36 sps:$4 sm:$0xff]  }
  0xa6   :  { %2120 = vrot.lane.b32.xlu0 %v11045_v49, %s10534_s24  ;;  %v624_v59 = vsel %vm620_vm0, %v591_v53, %v11054_v54  ;;  %v11179_v53 = vld [vmem:[%s14853_s0 + $0x250] sm:$0xff] }
  0xa7   :  { %2122 = vrot.lane.b32.xlu1 %v10196_v52, %s10534_s24  ;;  %3196 = vmatprep.subr.bf16.mxu1 %v624_v59  ;;  %v10221_v52 = vld [vmem:[%s14853_s0 + $0x1b8] ss:$36 sps:$4 sm:$0xff]  }
  0xa8   :  { %3113 = vmatpush1.bf16.msra.mxu0 %v2150_v63  ;;  %3197 = vmatpush1.bf16.msra.mxu1 %v623_v58  ;;  %v2465_v2 = vpop.permute.xlu0 %2464  ;;  %v11184_v58 = vld [vmem:[%s14853_s0 + $0x274] sm:$0xff] }
  0xa9   :  { %v2467_v4 = vpop.permute.xlu1 %2466 }
  0xaa   :  { %2138 = vrot.lane.b32.xlu0 %v11065_v60, %s10534_s24  ;;  %v2500_v5 = vsel %vm2498_vm2, %v2465_v2, %v2467_v4 }
  0xab   :  { %2140 = vrot.lane.b32.xlu1 %v10200_v46, %s10534_s24  ;;  %3115 = vmatmul.mubr.bf16.vlgmr.msra.gmra.mrb[0].mxu0 %v11075_v1 }
  0xac   :  { %3135 = vmatprep.subr.bf16.mxu0 %v2500_v5  ;;  %v2463_v9 = vpop.permute.xlu0 %2462  ;;  %3124 = vmatprep.mubr.bf16.mxu0 %v11080_v3  ;;  %v11211_v5 = vld [vmem:[%s14854_s1 + $0x20] ss:$12 sps:$4 sm:$0xff]  }
  0xad   :  { %v2499_v10 = vsel %vm2498_vm2, %v2463_v9, %v2465_v2  ;;  %v609_v11 = vpop.permute.xlu1 %608  ;;  %v11200_v2 = vld [vmem:[%s14853_s0 + $0x24c] ss:$36 sps:$4 sm:$0xff]   ;;  %v10228_v9 = vld [vmem:[%s14853_s0 + $0x200] ss:$36 sps:$4 sm:$0xff]  }
  0xae   :  { %2476 = vrot.lane.b32.xlu0 %v10882_v36, %s10535_s12  ;;  %3136 = vmatpush1.bf16.msra.mxu0 %v2499_v10  ;;  %v631_v21 = vsel %vm620_vm0, %v10924_v50, %v609_v11  ;;  %v11140_v50 = vld [vmem:[%s14853_s0 + $0x28c] ss:$36 sps:$4 sm:$0xff]  }
  0xaf   :  { %2478 = vrot.lane.b32.xlu1 %v10202_v6, %s10535_s12 }
  0xb0   :  { %v11110_v15 = vpop.permute.xlu0 %610 }
  0xb1   :  { %v2483_v17 = vpop.permute.xlu1 %2482  ;;  %v632_v19 = vsel %vm620_vm0, %v609_v11, %v11110_v15  ;;  %v11223_v11 = vld [vmem:[%s14853_s0 + $0x364] ss:$36 sps:$4 sm:$0xff]  }
  0xb2   :  { %765 = vrot.lane.b32.xlu0 %v11097_v12, %s10533_s21  ;;  %3198 = vmatprep.subr.bf16.mxu1 %v632_v19 }
  0xb3   :  { %767 = vrot.lane.b32.xlu1 %v11103_v13, %s10533_s21  ;;  %3125 = vmatmul.mubr.bf16.gmra.mrb[4].mxu0 %v11108_v14 }
  0xb4   :  { %3199 = vmatpush1.bf16.msra.mxu1 %v631_v21  ;;  %v2485_v27 = vpop.permute.xlu0 %2484  ;;  %3167 = vmatprep.mubr.bf16.mxu0 %v10536_v25 }
  0xb5   :  { %v2481_v37 = vpop.permute.xlu1 %2480  ;;  %v2508_v38 = vsel %vm2498_vm2, %v2483_v17, %v2485_v27  ;;  %3200 = vmatprep.subr.bf16.mxu1 %v10806_v26  ;;  %v11145_v26 = vld [vmem:[%s14854_s1 + $0x8] ss:$12 sps:$4 sm:$0xff]  }
  0xb6   :  { %v2507_v39 = vsel %vm2498_vm2, %v2481_v37, %v2483_v17  ;;  %763 = vrot.lane.b32.xlu0 %v11119_v20, %s10533_s21  ;;  %3137 = vmatprep.subr.bf16.mxu0 %v2508_v38  ;;  %v10231_v17 = vld [vmem:[%s14853_s0 + $0x368] ss:$36 sps:$4 sm:$0xff]   ;;  %v11248_v37 = vld [vmem:[%s14853_s0 + $0x294] ss:$36 sps:$4 sm:$0xff]  }
  0xb7   :  { %2494 = vrot.lane.b32.xlu1 %v10902_v40, %s10535_s12  ;;  %3138 = vmatpush1.bf16.msra.mxu0 %v2507_v39 }
  0xb8   :  { %3201 = vmatpush1.bf16.msra.mxu1 %v10673_v8  ;;  %v2469_v42 = vpop.permute.xlu0 %2468  ;;  %v11161_v8 = vld [vmem:[%s14853_s0 + $0x290] ss:$36 sps:$4 sm:$0xff]  }
  0xb9   :  { %v11148_v43 = vpop.permute.xlu1 %2470  ;;  %3202 = vmatprep.subr.bf16.mxu1 %v10818_v28  ;;  %v2501_v48 = vsel %vm2498_vm2, %v2467_v4, %v2469_v42  ;;  %v11170_v28 = vld [vmem:[%s14853_s0 + $0x288] ss:$36 sps:$4 sm:$0xff]   ;;  %v11206_v4 = vcombine.low %v11179_v53, %v11184_v58 }
  0xba   :  { %2496 = vrot.lane.b32.xlu0 %v10211_v41, %s10535_s12  ;;  %v2502_v47 = vsel %vm2498_vm2, %v2469_v42, %v11148_v43 }
  0xbb   :  { %783 = vrot.lane.b32.xlu1 %v11140_v50, %s10533_s21  ;;  %8928 = vmatmul.mubr.msk.bf16.vlgmr.msra.gmra.mrb[0].mxu0 %vm3075_vm3, %v11145_v26 }
  0xbc   :  { %3241 = vmatprep.subr.bf16.mxu0 %v2502_v47  ;;  %3203 = vmatpush1.bf16.msra.mxu1 %v10715_v16  ;;  %v2487_v51 = vpop.permute.xlu0 %2486  ;;  %v10226_v16 = vld [vmem:[%s14853_s0 + $0x204] ss:$36 sps:$4 sm:$0xff]   ;;  %v11273_v47 = vld [vmem:[%s14853_s0 + $0x3ac] ss:$36 sps:$4 sm:$0xff]  }
  0xbd   :  { %3242 = vmatpush1.bf16.msra.mxu0 %v2501_v48  ;;  %v11186_v59 = vpop.permute.xlu1 %2488  ;;  %3204 = vmatprep.subr.bf16.mxu1 %v10219_v44  ;;  %v2509_v46 = vsel %vm2498_vm2, %v2485_v27, %v2487_v51  ;;  %v11262_v44 = vld [vmem:[%s14853_s0 + $0x298] ss:$36 sps:$4 sm:$0xff]  }
  0xbe   :  { %785 = vrot.lane.b32.xlu0 %v11161_v8, %s10533_s21  ;;  %v2510_v63 = vsel %vm2498_vm2, %v2487_v51, %v11186_v59  ;;  %3177 = vmatprep.mubr.bf16.mxu0 %v10536_v25 }
  0xbf   :  { %781 = vrot.lane.b32.xlu1 %v11170_v28, %s10533_s21  ;;  %3243 = vmatprep.subr.bf16.mxu0 %v2510_v63 }
  0xc0   :  { %3205 = vmatpush1.bf16.msra.mxu1 %v10221_v52  ;;  %v1400_v6 = vpop.permute.xlu0 %1399 }
  0xc1   :  { %3244 = vmatpush1.bf16.msra.mxu0 %v2509_v46  ;;  %v11216_v10 = vpop.permute.xlu1 %1401  ;;  %3206 = vmatprep.subr.bf16.mxu1 %v10226_v16  ;;  %v1431_v38 = vsel %vm620_vm0, %v10934_v55, %v1400_v6  ;;  %v11294_v16 = vld [vmem:[%s14853_s0 + $0x3a8] ss:$36 sps:$4 sm:$0xff]  }
  0xc2   :  { %769 = vrot.lane.b32.xlu0 %v11200_v2, %s10533_s21  ;;  %3294 = vmatprep.subr.bf16.mxu0 %v10845_v31  ;;  %v1432_v21 = vsel %vm620_vm0, %v1400_v6, %v11216_v10  ;;  %v11243_v31 = vld [vmem:[%s14853_s0 + $0x360] ss:$36 sps:$4 sm:$0xff]  }
  0xc3   :  { %771 = vrot.lane.b32.xlu1 %v11206_v4, %s10533_s21  ;;  %8929 = vmatmul.mubr.msk.bf16.gmra.mrb[4].mxu0 %vm3075_vm3, %v11211_v5 }
  0xc4   :  { %3207 = vmatpush1.bf16.msra.mxu1 %v10228_v9  ;;  %v1418_v19 = vpop.permute.xlu0 %1417  ;;  %3273 = vmatprep.mubr.bf16.mxu0 %v10536_v25 }
  0xc5   :  { %v11236_v27 = vpop.permute.xlu1 %1419  ;;  %3208 = vmatprep.subr.bf16.mxu1 %v1432_v21  ;;  %v1439_v55 = vsel %vm620_vm0, %v10973_v0, %v1418_v19  ;;  %v10238_v0 = vld [vmem:[%s14853_s0 + $0x3b0] ss:$36 sps:$4 sm:$0xff]  }
  0xc6   :  { %1573 = vrot.lane.b32.xlu0 %v11223_v11, %s10533_s21  ;;  %v1440_v41 = vsel %vm620_vm0, %v1418_v19, %v11236_v27  ;;  %v10247_v21 = vld [vmem:[%s14853_s0 + $0x134] ss:$36 sps:$4 sm:$0xff]  }
  0xc7   :  { %1575 = vrot.lane.b32.xlu1 %v10231_v17, %s10533_s21 }
  0xc8   :  { %3209 = vmatpush1.bf16.msra.mxu1 %v1431_v38  ;;  %v1756_v39 = vpop.permute.xlu0 %1755  ;;  %v11352_v38 = vld [vmem:[%s14853_s0 + $0x2d4] ss:$36 sps:$4 sm:$0xff]  }
  0xc9   :  { %v11255_v42 = vpop.permute.xlu1 %1757  ;;  %3210 = vmatprep.subr.bf16.mxu1 %v1440_v41 }
  0xca   :  { %1571 = vrot.lane.b32.xlu0 %v11243_v31, %s10533_s21  ;;  %v1789_v51 = vsel %vm1785_vm1, %v1756_v39, %v11255_v42 }
  0xcb   :  { %787 = vrot.lane.b32.xlu1 %v11248_v37, %s10533_s21  ;;  %8930 = vmatmul.mubr.msk.bf16.vlgmr.msra.gmra.mrb[8].mxu0 %vm3075_vm3, %v11145_v26 }
  0xcc   :  { %3295 = vmatpush1.bf16.msra.mxu0 %v10769_v23  ;;  %3211 = vmatpush1.bf16.msra.mxu1 %v1439_v55  ;;  %v1774_v48 = vpop.permute.xlu0 %1773  ;;  %v1788_v23 = vsel %vm1785_vm1, %v10991_v7, %v1756_v39  ;;  %v10245_v39 = vld [vmem:[%s14853_s0 + $0x130] ss:$36 sps:$4 sm:$0xff]   ;;  %v10253_v55 = vld [vmem:[%s14853_s0 + $0x17c] ss:$36 sps:$4 sm:$0xff]  }
  0xcd   :  { %v11278_v52 = vpop.permute.xlu1 %1775  ;;  %3212 = vmatprep.subr.bf16.mxu1 %v1789_v51  ;;  %3296 = vmatprep.subr.bf16.mxu0 %v10868_v34  ;;  %v1796_v7 = vsel %vm1785_vm1, %v11011_v18, %v1774_v48 }
  0xce   :  { %789 = vrot.lane.b32.xlu0 %v11262_v44, %s10533_s21  ;;  %3283 = vmatprep.mubr.bf16.mxu0 %v10536_v25  ;;  %v1797_v63 = vsel %vm1785_vm1, %v1774_v48, %v11278_v52  ;;  %v11375_v48 = vld [vmem:[%s14853_s0 + $0x2d0] ss:$36 sps:$4 sm:$0xff]  }
  0xcf   :  { %1591 = vrot.lane.b32.xlu1 %v11273_v47, %s10533_s21 }
  0xd0   :  { %3297 = vmatpush1.bf16.msra.mxu0 %v10785_v24  ;;  %3213 = vmatpush1.bf16.msra.mxu1 %v1788_v23  ;;  %v2113_v34 = vpop.permute.xlu0 %2112  ;;  %v10259_v23 = vld [vmem:[%s14853_s0 + $0x1c4] ss:$36 sps:$4 sm:$0xff]  }
  0xd1   :  { %v11299_v46 = vpop.permute.xlu1 %2114  ;;  %3214 = vmatprep.subr.bf16.mxu1 %v1797_v63  ;;  %3298 = vmatprep.subr.bf16.mxu0 %v10941_v56 }
  0xd2   :  { %1593 = vrot.lane.b32.xlu0 %v10238_v0, %s10533_s21  ;;  %v2145_v6 = vsel %vm1785_vm1, %v2113_v34, %v11299_v46 }
  0xd3   :  { %1589 = vrot.lane.b32.xlu1 %v11294_v16, %s10533_s21  ;;  %8931 = vmatmul.mubr.msk.bf16.gmra.mrb[12].mxu0 %vm3075_vm3, %v11211_v5 }
  0xd4   :  { %3299 = vmatpush1.bf16.msra.mxu0 %v10836_v30  ;;  %3215 = vmatpush1.bf16.msra.mxu1 %v1796_v7  ;;  %v595_v24 = vpop.permute.xlu0 %594  ;;  %v2144_v30 = vsel %vm1785_vm1, %v11019_v29, %v2113_v34  ;;  %v11400_v34 = vld [vmem:[%s14853_s0 + $0x320] ss:$36 sps:$4 sm:$0xff]  }
  0xd5   :  { %v11312_v9 = vpop.permute.xlu1 %596  ;;  %3216 = vmatprep.subr.bf16.mxu1 %v2145_v6  ;;  %3300 = vmatprep.subr.bf16.mxu0 %v10960_v61  ;;  %v10257_v7 = vld [vmem:[%s14853_s0 + $0x1c0] ss:$36 sps:$4 sm:$0xff]   ;;  %v10260_v6 = vld [vmem:[%s14853_s0 + $0x36c] ss:$36 sps:$4 sm:$0xff]  }
  0xd6   :  { %1930 = vrot.lane.b32.xlu0 %v11097_v12, %s10534_s24  ;;  %v626_v56 = vsel %vm620_vm0, %v595_v24, %v11312_v9  ;;  %3326 = vmatprep.mubr.bf16.mxu0 %v10760_v22 }
  0xd7   :  { %1932 = vrot.lane.b32.xlu1 %v11103_v13, %s10534_s24 }
  0xd8   :  { %3301 = vmatpush1.bf16.msra.mxu0 %v10862_v33  ;;  %3217 = vmatpush1.bf16.msra.mxu1 %v2144_v30  ;;  %v2131_v18 = vpop.permute.xlu0 %2130  ;;  %v625_v33 = vsel %vm620_vm0, %v11054_v54, %v595_v24  ;;  %v10265_v24 = vld [vmem:[%s14853_s0 + $0x20c] ss:$36 sps:$4 sm:$0xff]  }
  0xd9   :  { %3302 = vmatprep.subr.bf16.mxu0 %v626_v56  ;;  %v11325_v61 = vpop.permute.xlu1 %2132  ;;  %v2152_v17 = vsel %vm1785_vm1, %v11037_v45, %v2131_v18  ;;  %v11431_v56 = vld [vmem:[%s14854_s1 + $0x4] ss:$12 sps:$4 sm:$0xff]   ;;  %v10263_v30 = vld [vmem:[%s14853_s0 + $0x208] ss:$36 sps:$4 sm:$0xff]  }
  0xda   :  { %1928 = vrot.lane.b32.xlu0 %v11119_v20, %s10534_s24  ;;  %v2153_v22 = vsel %vm1785_vm1, %v2131_v18, %v11325_v61 }
  0xdb   :  { %1948 = vrot.lane.b32.xlu1 %v11140_v50, %s10534_s24  ;;  %3218 = vmatprep.subr.bf16.mxu1 %v2153_v22  ;;  %v10266_v22 = vld [vmem:[%s14853_s0 + $0x3b4] ss:$36 sps:$4 sm:$0xff]  }
  0xdc   :  { %3303 = vmatpush1.bf16.msra.mxu0 %v625_v33  ;;  %3219 = vmatpush1.bf16.msra.mxu1 %v2152_v17  ;;  %v613_v29 = vpop.permute.xlu0 %612  ;;  %v10267_v33 = vld [vmem:[%s14853_s0 + $0x3b8] ss:$36 sps:$4 sm:$0xff]  }
  0xdd   :  { %v11337_v19 = vpop.permute.xlu1 %614  ;;  %3400 = vmatprep.subr.bf16.mxu1 %v10882_v36  ;;  %v633_v45 = vsel %vm620_vm0, %v11110_v15, %v613_v29  ;;  %v11359_v36 = vld [vmem:[%s14853_s0 + $0x2d8] ss:$36 sps:$4 sm:$0xff]  }
  0xde   :  { %1950 = vrot.lane.b32.xlu0 %v11161_v8, %s10534_s24  ;;  %v634_v54 = vsel %vm620_vm0, %v613_v29, %v11337_v19 }
  0xdf   :  { %1946 = vrot.lane.b32.xlu1 %v11170_v28, %s10534_s24  ;;  %3304 = vmatprep.subr.bf16.mxu0 %v634_v54 }
  0xe0   :  { %3221 = vmatmul.mubr.bf16.vlgmr.msra.gmra.mrb[0].mxu1 %v11075_v1  ;;  %3305 = vmatpush1.bf16.msra.mxu0 %v633_v45  ;;  %v599_v15 = vpop.permute.xlu0 %598 }
  0xe1   :  { %3401 = vmatpush1.bf16.msra.mxu1 %v10853_v32  ;;  %v601_v41 = vpop.permute.xlu1 %600  ;;  %3306 = vmatprep.subr.bf16.mxu0 %v10247_v21  ;;  %v11382_v32 = vld [vmem:[%s14853_s0 + $0x31c] ss:$36 sps:$4 sm:$0xff]  }
  0xe2   :  { %2286 = vrot.lane.b32.xlu0 %v11352_v38, %s10534_s24  ;;  %3402 = vmatprep.subr.bf16.mxu1 %v10902_v40  ;;  %v10251_v40 = vld [vmem:[%s14853_s0 + $0x178] ss:$36 sps:$4 sm:$0xff]   ;;  %v628_v17 = vsel %vm620_vm0, %v599_v15, %v601_v41 }
  0xe3   :  { %2288 = vrot.lane.b32.xlu1 %v11359_v36, %s10534_s24  ;;  %3230 = vmatprep.mubr.bf16.mxu1 %v11080_v3 }
  0xe4   :  { %3307 = vmatpush1.bf16.msra.mxu0 %v10245_v39  ;;  %v1404_v51 = vpop.permute.xlu0 %1403  ;;  %v10271_v39 = vld [vmem:[%s14853_s0 + $0x13c] ss:$36 sps:$4 sm:$0xff]  }
  0xe5   :  { %3403 = vmatpush1.bf16.msra.mxu1 %v10875_v35  ;;  %v11389_v0 = vpop.permute.xlu1 %1405  ;;  %3308 = vmatprep.subr.bf16.mxu0 %v10253_v55  ;;  %v11407_v35 = vld [vmem:[%s14853_s0 + $0x318] ss:$36 sps:$4 sm:$0xff]  }
  0xe6   :  { %2284 = vrot.lane.b32.xlu0 %v11375_v48, %s10534_s24  ;;  %3404 = vmatprep.subr.bf16.mxu1 %v11045_v49  ;;  %v1434_v45 = vsel %vm620_vm0, %v1404_v51, %v11389_v0 }
  0xe7   :  { %2304 = vrot.lane.b32.xlu1 %v11382_v32, %s10534_s24 }
  0xe8   :  { %3309 = vmatpush1.bf16.msra.mxu0 %v10251_v40  ;;  %v617_v63 = vpop.permute.xlu0 %616  ;;  %3231 = vmatmul.mubr.bf16.gmra.mrb[4].mxu1 %v11108_v14 }
  0xe9   :  { %3405 = vmatpush1.bf16.msra.mxu1 %v10949_v57  ;;  %v619_v49 = vpop.permute.xlu1 %618  ;;  %3310 = vmatprep.subr.bf16.mxu0 %v10259_v23  ;;  %v10261_v57 = vld [vmem:[%s14853_s0 + $0x370] ss:$36 sps:$4 sm:$0xff]   ;;  %v10269_v23 = vld [vmem:[%s14853_s0 + $0x138] ss:$36 sps:$4 sm:$0xff]  }
  0xea   :  { %2306 = vrot.lane.b32.xlu0 %v11400_v34, %s10534_s24  ;;  %3406 = vmatprep.subr.bf16.mxu1 %v11065_v60  ;;  %v636_v54 = vsel %vm620_vm0, %v617_v63, %v619_v49  ;;  %v10272_v49 = vld [vmem:[%s14853_s0 + $0x180] ss:$36 sps:$4 sm:$0xff]  }
  0xeb   :  { %2302 = vrot.lane.b32.xlu1 %v11407_v35, %s10534_s24  ;;  %3432 = vmatprep.mubr.bf16.mxu1 %v11431_v56 }
  0xec   :  { %3311 = vmatpush1.bf16.msra.mxu0 %v10257_v7  ;;  %v1422_v60 = vpop.permute.xlu0 %1421 }
  0xed   :  { %3407 = vmatpush1.bf16.msra.mxu1 %v10968_v62  ;;  %v11438_v18 = vpop.permute.xlu1 %1423  ;;  %3312 = vmatprep.subr.bf16.mxu0 %v10265_v24  ;;  %v627_v62 = vsel %vm620_vm0, %v11312_v9, %v599_v15  ;;  %v1433_v9 = vsel %vm620_vm0, %v11216_v10, %v1404_v51  ;;  %v635_v15 = vsel %vm620_vm0, %v11337_v19, %v617_v63  ;;  %v10274_v10 = vld [vmem:[%s14853_s0 + $0x184] ss:$36 sps:$4 sm:$0xff]  }
  0xee   :  { %3408 = vmatprep.subr.bf16.mxu1 %v628_v17  ;;  %1577 = vrot.lane.b32.xlu0 %v10260_v6, %s10533_s21  ;;  %v1442_v55 = vsel %vm620_vm0, %v1422_v60, %v11438_v18  ;;  %v1441_v19 = vsel %vm620_vm0, %v11236_v27, %v1422_v60  ;;  %v10277_v27 = vld [vmem:[%s14853_s0 + $0x1cc] ss:$36 sps:$4 sm:$0xff]  }
  0xef   :  { %1579 = vrot.lane.b32.xlu1 %v10261_v57, %s10533_s21 }
  0xf0   :  { %3313 = vmatpush1.bf16.msra.mxu0 %v10263_v30  ;;  %v1760_v29 = vpop.permute.xlu0 %1759  ;;  %v10275_v30 = vld [vmem:[%s14853_s0 + $0x1c8] ss:$36 sps:$4 sm:$0xff]  }
  0xf1   :  { %3409 = vmatpush1.bf16.msra.mxu1 %v627_v62  ;;  %v11453_v21 = vpop.permute.xlu1 %1761  ;;  %3314 = vmatprep.subr.bf16.mxu0 %v1434_v45  ;;  %v1790_v24 = vsel %vm1785_vm1, %v11255_v42, %v1760_v29  ;;  %v10278_v62 = vld [vmem:[%s14853_s0 + $0x210] ss:$36 sps:$4 sm:$0xff]  }
  0xf2   :  { %3410 = vmatprep.subr.bf16.mxu1 %v636_v54  ;;  %1595 = vrot.lane.b32.xlu0 %v10266_v22, %s10533_s21  ;;  %v1791_v63 = vsel %vm1785_vm1, %v1760_v29, %v11453_v21 }
  0xf3   :  { %1597 = vrot.lane.b32.xlu1 %v10267_v33, %s10533_s21 }
  0xf4   :  { %3315 = vmatpush1.bf16.msra.mxu0 %v1433_v9  ;;  %v1778_v41 = vpop.permute.xlu0 %1777  ;;  %v11532_v9 = vld [vmem:[%s14853_s0 + $0x2dc] ss:$36 sps:$4 sm:$0xff]  }
  0xf5   :  { %3411 = vmatpush1.bf16.msra.mxu1 %v635_v15  ;;  %v11467_v40 = vpop.permute.xlu1 %1779  ;;  %3316 = vmatprep.subr.bf16.mxu0 %v1442_v55  ;;  %v1798_v42 = vsel %vm1785_vm1, %v11278_v52, %v1778_v41  ;;  %v11541_v15 = vld [vmem:[%s14853_s0 + $0x2e0] ss:$36 sps:$4 sm:$0xff]  }
  0xf6   :  { %1934 = vrot.lane.b32.xlu0 %v11200_v2, %s10534_s24  ;;  %3412 = vmatprep.subr.bf16.mxu1 %v10271_v39  ;;  %v1799_v57 = vsel %vm1785_vm1, %v1778_v41, %v11467_v40 }
  0xf7   :  { %1936 = vrot.lane.b32.xlu1 %v11206_v4, %s10534_s24 }
  0xf8   :  { %3317 = vmatpush1.bf16.msra.mxu0 %v1441_v19  ;;  %v2117_v51 = vpop.permute.xlu0 %2116 }
  0xf9   :  { %3413 = vmatpush1.bf16.msra.mxu1 %v10269_v23  ;;  %v11483_v7 = vpop.permute.xlu1 %2118  ;;  %3318 = vmatprep.subr.bf16.mxu0 %v1791_v63  ;;  %v2146_v52 = vsel %vm1785_vm1, %v11299_v46, %v2117_v51 }
  0xfa   :  { %2643 = vrot.lane.b32.xlu0 %v11097_v12, %s10535_s12  ;;  %3414 = vmatprep.subr.bf16.mxu1 %v10274_v10  ;;  %v2147_v22 = vsel %vm1785_vm1, %v2117_v51, %v11483_v7 }
  0xfb   :  { %2645 = vrot.lane.b32.xlu1 %v11103_v13, %s10535_s12  ;;  %v10280_v13 = vld [vmem:[%s14853_s0 + $0x214] ss:$36 sps:$4 sm:$0xff]  }
  0xfc   :  { %3319 = vmatpush1.bf16.msra.mxu0 %v1790_v24  ;;  %v2135_v6 = vpop.permute.xlu0 %2134 }
  0xfd   :  { %3415 = vmatpush1.bf16.msra.mxu1 %v10272_v49  ;;  %v11499_v60 = vpop.permute.xlu1 %2136  ;;  %3320 = vmatprep.subr.bf16.mxu0 %v1799_v57  ;;  %v2154_v46 = vsel %vm1785_vm1, %v11325_v61, %v2135_v6  ;;  %v11551_v61 = vld [vmem:[%s14853_s0 + $0x324] ss:$36 sps:$4 sm:$0xff]  }
  0xfe   :  { %2641 = vrot.lane.b32.xlu0 %v11119_v20, %s10535_s12  ;;  %3416 = vmatprep.subr.bf16.mxu1 %v10277_v27  ;;  %v2155_v45 = vsel %vm1785_vm1, %v2135_v6, %v11499_v60 }
  0xff   :  { %1952 = vrot.lane.b32.xlu1 %v11248_v37, %s10534_s24 }
 0x100   :  { %3321 = vmatpush1.bf16.msra.mxu0 %v1798_v42  ;;  %v1408_v17 = vpop.permute.xlu0 %1407 }
 0x101   :  { %3417 = vmatpush1.bf16.msra.mxu1 %v10275_v30  ;;  %v1410_v33 = vpop.permute.xlu1 %1409  ;;  %3322 = vmatprep.subr.bf16.mxu0 %v2147_v22 }
 0x102   :  { %1954 = vrot.lane.b32.xlu0 %v11262_v44, %s10534_s24  ;;  %3418 = vmatprep.subr.bf16.mxu1 %v10280_v13  ;;  %v1436_v39 = vsel %vm620_vm0, %v1408_v17, %v1410_v33  ;;  %v11636_v33 = vld [vmem:[%s14853_s0 + $0x25c] ss:$36 sps:$4 sm:$0xff]  }
 0x103   :  { %2661 = vrot.lane.b32.xlu1 %v11140_v50, %s10535_s12 }
 0x104   :  { %3323 = vmatpush1.bf16.msra.mxu0 %v2146_v52  ;;  %v1426_v29 = vpop.permute.xlu0 %1425 }
 0x105   :  { %3419 = vmatpush1.bf16.msra.mxu1 %v10278_v62  ;;  %v1428_v54 = vpop.permute.xlu1 %1427  ;;  %3324 = vmatprep.subr.bf16.mxu0 %v2155_v45  ;;  %v1443_v10 = vsel %vm620_vm0, %v11438_v18, %v1426_v29 }
 0x106   :  { %3420 = vmatprep.subr.bf16.mxu1 %v1436_v39  ;;  %2663 = vrot.lane.b32.xlu0 %v11161_v8, %s10535_s12  ;;  %v1435_v8 = vsel %vm620_vm0, %v11389_v0, %v1408_v17  ;;  %v1444_v23 = vsel %vm620_vm0, %v1426_v29, %v1428_v54  ;;  %v11559_v0 = vld [vmem:[%s14853_s0 + $0x328] ss:$36 sps:$4 sm:$0xff]   ;;  %v11614_v17 = vld [vmem:[%s14853_s0 + $0x29c] ss:$36 sps:$4 sm:$0xff]   ;;  %v10294_v29 = vld [vmem:[%s14853_s0 + $0x374] ss:$36 sps:$4 sm:$0xff]  }
 0x107   :  { %2659 = vrot.lane.b32.xlu1 %v11170_v28, %s10535_s12  ;;  %v11670_v54 = vld [vmem:[%s14853_s0 + $0x2a4] ss:$36 sps:$4 sm:$0xff]  }
 0x108   :  { %3325 = vmatpush1.bf16.msra.mxu0 %v2154_v46  ;;  %v1764_v41 = vpop.permute.xlu0 %1763 }
 0x109   :  { %3421 = vmatpush1.bf16.msra.mxu1 %v1435_v8  ;;  %v1766_v55 = vpop.permute.xlu1 %1765  ;;  %v1792_v18 = vsel %vm1785_vm1, %v11453_v21, %v1764_v41  ;;  %v11592_v21 = vld [vmem:[%s14853_s0 + $0x258] ss:$36 sps:$4 sm:$0xff]  }
 0x10a   :  { %3422 = vmatprep.subr.bf16.mxu1 %v1444_v23  ;;  %2290 = vrot.lane.b32.xlu0 %v11532_v9, %s10534_s24  ;;  %v1793_v63 = vsel %vm1785_vm1, %v1764_v41, %v1766_v55  ;;  %v10304_v41 = vld [vmem:[%s14853_s0 + $0x24c] ss:$36 sps:$4 sm:$0xff]  }
 0x10b   :  { %2292 = vrot.lane.b32.xlu1 %v11541_v15, %s10534_s24  ;;  %3327 = vmatmul.mubr.bf16.vlgmr.msra.gmra.mrb[16].mxu0 %v11075_v1 }
 0x10c   :  { %v2473_v19 = vpop.permute.xlu0 %2472  ;;  %3336 = vmatprep.mubr.bf16.mxu0 %v11080_v3 }
 0x10d   :  { %3423 = vmatpush1.bf16.msra.mxu1 %v1443_v10  ;;  %v11564_v51 = vpop.permute.xlu1 %2474  ;;  %v2503_v49 = vsel %vm2498_vm2, %v11148_v43, %v2473_v19  ;;  %v11579_v43 = vcombine.high %v11179_v53, %v11184_v58 }
 0x10e   :  { %3424 = vmatprep.subr.bf16.mxu1 %v1793_v63  ;;  %2308 = vrot.lane.b32.xlu0 %v11551_v61, %s10534_s24  ;;  %v2504_v27 = vsel %vm2498_vm2, %v2473_v19, %v11564_v51  ;;  %v10302_v63 = vld [vmem:[%s14853_s0 + $0x248] ss:$36 sps:$4 sm:$0xff]  }
 0x10f   :  { %2310 = vrot.lane.b32.xlu1 %v11559_v0, %s10534_s24  ;;  %3347 = vmatprep.subr.bf16.mxu0 %v2504_v27  ;;  %v10307_v27 = vld [vmem:[%s14853_s0 + $0x294] ss:$36 sps:$4 sm:$0xff]  }
 0x110   :  { %3348 = vmatpush1.bf16.msra.mxu0 %v2503_v49  ;;  %v1782_v24 = vpop.permute.xlu0 %1781 }
 0x111   :  { %3425 = vmatpush1.bf16.msra.mxu1 %v1792_v18  ;;  %v1784_v6 = vpop.permute.xlu1 %1783  ;;  %v1800_v30 = vsel %vm1785_vm1, %v11467_v40, %v1782_v24 }
 0x112   :  { %2647 = vrot.lane.b32.xlu0 %v11200_v2, %s10535_s12  ;;  %v1801_v57 = vsel %vm1785_vm1, %v1782_v24, %v1784_v6  ;;  %v10305_v6 = vld [vmem:[%s14853_s0 + $0x290] ss:$36 sps:$4 sm:$0xff]  }
 0x113   :  { %2649 = vrot.lane.b32.xlu1 %v11206_v4, %s10535_s12  ;;  %3337 = vmatmul.mubr.bf16.gmra.mrb[20].mxu0 %v11108_v14 }
 0x114   :  { %3426 = vmatprep.subr.bf16.mxu1 %v1801_v57  ;;  %v2491_v53 = vpop.permute.xlu0 %2490  ;;  %3379 = vmatprep.mubr.bf16.mxu0 %v10536_v25 }
 0x115   :  { %3427 = vmatpush1.bf16.msra.mxu1 %v1800_v30  ;;  %v11595_v58 = vpop.permute.xlu1 %2492  ;;  %v2511_v2 = vsel %vm2498_vm2, %v11186_v59, %v2491_v53  ;;  %v10316_v30 = vld [vmem:[%s14853_s0 + $0x3f4] ss:$36 sps:$4 sm:$0xff]  }
 0x116   :  { %773 = vrot.lane.b32.xlu0 %v11579_v43, %s10533_s21  ;;  %v2512_v4 = vsel %vm2498_vm2, %v2491_v53, %v11595_v58 }
 0x117   :  { %775 = vrot.lane.b32.xlu1 %v11592_v21, %s10533_s21  ;;  %3349 = vmatprep.subr.bf16.mxu0 %v2512_v4  ;;  %v10319_v4 = vld [vmem:[%s14853_s0 + $0x438] ss:$36 sps:$4 sm:$0xff]  }
 0x118   :  { %3350 = vmatpush1.bf16.msra.mxu0 %v2511_v2  ;;  %v2121_v40 = vpop.permute.xlu0 %2120  ;;  %v10321_v2 = vld [vmem:[%s14853_s0 + $0x43c] ss:$36 sps:$4 sm:$0xff]  }
 0x119   :  { %v2123_v13 = vpop.permute.xlu1 %2122  ;;  %3506 = vmatprep.subr.bf16.mxu0 %v11097_v12  ;;  %v2148_v42 = vsel %vm1785_vm1, %v11483_v7, %v2121_v40  ;;  %v11623_v12 = vld [vmem:[%s14853_s0 + $0x2a0] ss:$36 sps:$4 sm:$0xff]  }
 0x11a   :  { %2665 = vrot.lane.b32.xlu0 %v11248_v37, %s10535_s12  ;;  %v2149_v59 = vsel %vm1785_vm1, %v2121_v40, %v2123_v13 }
 0x11b   :  { %2667 = vrot.lane.b32.xlu1 %v11262_v44, %s10535_s12  ;;  %8932 = vmatmul.mubr.msk.bf16.vlgmr.msra.gmra.mrb[16].mxu0 %vm3075_vm3, %v11145_v26 }
 0x11c   :  { %3428 = vmatprep.subr.bf16.mxu1 %v2149_v59  ;;  %3507 = vmatpush1.bf16.msra.mxu0 %v11119_v20  ;;  %v2139_v37 = vpop.permute.xlu0 %2138  ;;  %v10293_v20 = vld [vmem:[%s14853_s0 + $0x260] ss:$36 sps:$4 sm:$0xff]  }
 0x11d   :  { %3429 = vmatpush1.bf16.msra.mxu1 %v2148_v42  ;;  %v2141_v7 = vpop.permute.xlu1 %2140  ;;  %3508 = vmatprep.subr.bf16.mxu0 %v11140_v50  ;;  %v2156_v22 = vsel %vm1785_vm1, %v11499_v60, %v2139_v37  ;;  %v11802_v59 = vld [vmem:[%s14853_s0 + $0x3c4] ss:$36 sps:$4 sm:$0xff]  }
 0x11e   :  { %791 = vrot.lane.b32.xlu0 %v11614_v17, %s10533_s21  ;;  %v2157_v44 = vsel %vm1785_vm1, %v2139_v37, %v2141_v7  ;;  %3389 = vmatprep.mubr.bf16.mxu0 %v10536_v25 }
 0x11f   :  { %793 = vrot.lane.b32.xlu1 %v11623_v12, %s10533_s21  ;;  %3430 = vmatprep.subr.bf16.mxu1 %v2157_v44 }
 0x120   :  { %3509 = vmatpush1.bf16.msra.mxu0 %v11170_v28  ;;  %v2477_v50 = vpop.permute.xlu0 %2476  ;;  %v11659_v28 = vld [vmem:[%s14853_s0 + $0x378] ss:$36 sps:$4 sm:$0xff]  }
 0x121   :  { %3431 = vmatpush1.bf16.msra.mxu1 %v2156_v22  ;;  %v2479_v60 = vpop.permute.xlu1 %2478  ;;  %3510 = vmatprep.subr.bf16.mxu0 %v11352_v38  ;;  %v2505_v52 = vsel %vm2498_vm2, %v11564_v51, %v2477_v50 }
 0x122   :  { %777 = vrot.lane.b32.xlu0 %v11636_v33, %s10533_s21  ;;  %v2506_v62 = vsel %vm2498_vm2, %v2477_v50, %v2479_v60  ;;  %v10329_v50 = vld [vmem:[%s14853_s0 + $0x36c] ss:$36 sps:$4 sm:$0xff]  }
 0x123   :  { %779 = vrot.lane.b32.xlu1 %v10293_v20, %s10533_s21  ;;  %8933 = vmatmul.mubr.msk.bf16.gmra.mrb[20].mxu0 %vm3075_vm3, %v11211_v5 }
 0x124   :  { %3433 = vmatmul.mubr.bf16.vlgmr.msra.gmra.mrb[8].mxu1 %v11075_v1  ;;  %3453 = vmatprep.subr.bf16.mxu1 %v2506_v62  ;;  %v766_v38 = vpop.permute.xlu0 %765  ;;  %v10298_v1 = vld [vmem:[%s14853_s0 + $0x2a8] ss:$36 sps:$4 sm:$0xff]   ;;  %v10324_v62 = vld [vmem:[%s14853_s0 + $0x260] ss:$36 sps:$4 sm:$0xff]  }
 0x125   :  { %3454 = vmatpush1.bf16.msra.mxu1 %v2505_v52  ;;  %3511 = vmatpush1.bf16.msra.mxu0 %v11375_v48  ;;  %v11663_v45 = vpop.permute.xlu1 %767 }
 0x126   :  { %1581 = vrot.lane.b32.xlu0 %v10294_v29, %s10533_s21  ;;  %3512 = vmatprep.subr.bf16.mxu0 %v11382_v32  ;;  %v800_v39 = vsel %vm620_vm0, %v766_v38, %v11663_v45 }
 0x127   :  { %1583 = vrot.lane.b32.xlu1 %v11659_v28, %s10533_s21  ;;  %3442 = vmatprep.mubr.bf16.mxu1 %v11080_v3  ;;  %v10299_v3 = vld [vmem:[%s14853_s0 + $0x3bc] ss:$36 sps:$4 sm:$0xff]  }
 0x128   :  { %v764_v48 = vpop.permute.xlu0 %763  ;;  %3538 = vmatprep.mubr.bf16.mxu0 %v11431_v56 }
 0x129   :  { %3513 = vmatpush1.bf16.msra.mxu0 %v11407_v35  ;;  %v2495_v32 = vpop.permute.xlu1 %2494  ;;  %v799_v46 = vsel %vm620_vm0, %v764_v48, %v766_v38  ;;  %v11692_v35 = vld [vmem:[%s14853_s0 + $0x3c0] ss:$36 sps:$4 sm:$0xff]   ;;  %v10332_v48 = vld [vmem:[%s14853_s0 + $0x3b4] ss:$36 sps:$4 sm:$0xff]  }
 0x12a   :  { %3514 = vmatprep.subr.bf16.mxu0 %v800_v39  ;;  %795 = vrot.lane.b32.xlu0 %v11670_v54, %s10533_s21  ;;  %v2513_v10 = vsel %vm2498_vm2, %v11595_v58, %v2495_v32  ;;  %v10314_v58 = vld [vmem:[%s14853_s0 + $0x3f0] ss:$36 sps:$4 sm:$0xff]  }
 0x12b   :  { %797 = vrot.lane.b32.xlu1 %v10298_v1, %s10533_s21 }
 0x12c   :  { %3443 = vmatmul.mubr.bf16.gmra.mrb[12].mxu1 %v11108_v14  ;;  %v2497_v8 = vpop.permute.xlu0 %2496 }
 0x12d   :  { %3515 = vmatpush1.bf16.msra.mxu0 %v799_v46  ;;  %v784_v55 = vpop.permute.xlu1 %783  ;;  %v2514_v23 = vsel %vm2498_vm2, %v2495_v32, %v2497_v8  ;;  %3485 = vmatprep.mubr.bf16.mxu1 %v10536_v25  ;;  %v10330_v8 = vld [vmem:[%s14853_s0 + $0x3b0] ss:$36 sps:$4 sm:$0xff]  }
 0x12e   :  { %1599 = vrot.lane.b32.xlu0 %v10299_v3, %s10533_s21  ;;  %3455 = vmatprep.subr.bf16.mxu1 %v2514_v23  ;;  %v10337_v23 = vld [vmem:[%s14853_s0 + $0x3fc] ss:$36 sps:$4 sm:$0xff]  }
 0x12f   :  { %1601 = vrot.lane.b32.xlu1 %v11692_v35, %s10533_s21  ;;  %3456 = vmatpush1.bf16.msra.mxu1 %v2513_v10 }
 0x130   :  { %v11705_v14 = vpop.permute.xlu0 %785  ;;  %3612 = vmatprep.subr.bf16.mxu1 %v10304_v41  ;;  %v10326_v41 = vld [vmem:[%s14853_s0 + $0x2a8] ss:$36 sps:$4 sm:$0xff]  }
 0x131   :  { %v782_v19 = vpop.permute.xlu1 %781  ;;  %v808_v51 = vsel %vm620_vm0, %v784_v55, %v11705_v14 }
 0x132   :  { %v807_v49 = vsel %vm620_vm0, %v782_v19, %v784_v55  ;;  %1938 = vrot.lane.b32.xlu0 %v11579_v43, %s10534_s24  ;;  %3516 = vmatprep.subr.bf16.mxu0 %v808_v51  ;;  %v10342_v51 = vld [vmem:[%s14853_s0 + $0x444] ss:$36 sps:$4 sm:$0xff]  }
 0x133   :  { %1940 = vrot.lane.b32.xlu1 %v11592_v21, %s10534_s24  ;;  %3517 = vmatpush1.bf16.msra.mxu0 %v807_v49 }
 0x134   :  { %8934 = vmatmul.mubr.msk.bf16.vlgmr.msra.gmra.mrb[8].mxu1 %vm3075_vm3, %v11145_v26  ;;  %v770_v18 = vpop.permute.xlu0 %769  ;;  %3518 = vmatprep.subr.bf16.mxu0 %v11223_v11  ;;  %v11734_v26 = vld [vmem:[%s14853_s0 + $0x2e4] ss:$36 sps:$4 sm:$0xff]  }
 0x135   :  { %3613 = vmatpush1.bf16.msra.mxu1 %v10302_v63  ;;  %v11723_v24 = vpop.permute.xlu1 %771  ;;  %3495 = vmatprep.mubr.bf16.mxu1 %v10536_v25  ;;  %v11742_v11 = vld [vmem:[%s14853_s0 + $0x2e8] ss:$36 sps:$4 sm:$0xff]   ;;  %v801_v37 = vsel %vm620_vm0, %v11663_v45, %v770_v18 }
 0x136   :  { %1956 = vrot.lane.b32.xlu0 %v11614_v17, %s10534_s24  ;;  %3614 = vmatprep.subr.bf16.mxu1 %v10307_v27  ;;  %v802_v13 = vsel %vm620_vm0, %v770_v18, %v11723_v24  ;;  %v10327_v45 = vld [vmem:[%s14853_s0 + $0x368] ss:$36 sps:$4 sm:$0xff]   ;;  %v10340_v27 = vld [vmem:[%s14853_s0 + $0x440] ss:$36 sps:$4 sm:$0xff]  }
 0x137   :  { %1958 = vrot.lane.b32.xlu1 %v11623_v12, %s10534_s24  ;;  %3519 = vmatpush1.bf16.msra.mxu0 %v11243_v31  ;;  %v11756_v31 = vld [vmem:[%s14853_s0 + $0x32c] ss:$36 sps:$4 sm:$0xff]  }
 0x138   :  { %v1574_v57 = vpop.permute.xlu0 %1573  ;;  %3520 = vmatprep.subr.bf16.mxu0 %v11273_v47  ;;  %v11764_v47 = vld [vmem:[%s14853_s0 + $0x330] ss:$36 sps:$4 sm:$0xff]  }
 0x139   :  { %3615 = vmatpush1.bf16.msra.mxu1 %v10305_v6  ;;  %v11748_v53 = vpop.permute.xlu1 %1575  ;;  %v11884_v6 = vld [vmem:[%s14853_s0 + $0x2ec] ss:$36 sps:$4 sm:$0xff]  }
 0x13a   :  { %2294 = vrot.lane.b32.xlu0 %v11734_v26, %s10534_s24  ;;  %3616 = vmatprep.subr.bf16.mxu1 %v11532_v9  ;;  %v1608_v42 = vsel %vm620_vm0, %v1574_v57, %v11748_v53 }
 0x13b   :  { %2296 = vrot.lane.b32.xlu1 %v11742_v11, %s10534_s24  ;;  %3521 = vmatpush1.bf16.msra.mxu0 %v11294_v16 }
 0x13c   :  { %8935 = vmatmul.mubr.msk.bf16.gmra.mrb[12].mxu1 %vm3075_vm3, %v11211_v5  ;;  %v1572_v9 = vpop.permute.xlu0 %1571  ;;  %3522 = vmatprep.subr.bf16.mxu0 %v10316_v30  ;;  %v11782_v5 = vld [vmem:[%s14853_s0 + $0x37c] ss:$36 sps:$4 sm:$0xff]  }
 0x13d   :  { %3617 = vmatpush1.bf16.msra.mxu1 %v11359_v36  ;;  %v788_v16 = vpop.permute.xlu1 %787  ;;  %3644 = vmatprep.mubr.bf16.mxu1 %v11431_v56  ;;  %v10318_v36 = vld [vmem:[%s14853_s0 + $0x380] ss:$36 sps:$4 sm:$0xff]   ;;  %v1607_v20 = vsel %vm620_vm0, %v1572_v9, %v1574_v57  ;;  %v10334_v57 = vld [vmem:[%s14853_s0 + $0x2f0] ss:$36 sps:$4 sm:$0xff]  }
 0x13e   :  { %2312 = vrot.lane.b32.xlu0 %v11756_v31, %s10534_s24  ;;  %3618 = vmatprep.subr.bf16.mxu1 %v11551_v61  ;;  %v809_v52 = vsel %vm620_vm0, %v11705_v14, %v788_v16  ;;  %v11897_v9 = vld [vmem:[%s14853_s0 + $0x334] ss:$36 sps:$4 sm:$0xff]  }
 0x13f   :  { %2314 = vrot.lane.b32.xlu1 %v11764_v47, %s10534_s24  ;;  %3523 = vmatpush1.bf16.msra.mxu0 %v10314_v58 }
 0x140   :  { %v11792_v40 = vpop.permute.xlu0 %789  ;;  %3524 = vmatprep.subr.bf16.mxu0 %v10321_v2  ;;  %v10339_v2 = vld [vmem:[%s14853_s0 + $0x338] ss:$36 sps:$4 sm:$0xff]  }
 0x141   :  { %3619 = vmatpush1.bf16.msra.mxu1 %v11400_v34  ;;  %v1592_v61 = vpop.permute.xlu1 %1591  ;;  %v10323_v34 = vld [vmem:[%s14853_s0 + $0x3c8] ss:$36 sps:$4 sm:$0xff]   ;;  %v810_v22 = vsel %vm620_vm0, %v788_v16, %v11792_v40 }
 0x142   :  { %3620 = vmatprep.subr.bf16.mxu1 %v802_v13  ;;  %1585 = vrot.lane.b32.xlu0 %v11782_v5, %s10533_s21  ;;  %v10343_v13 = vld [vmem:[%s14853_s0 + $0x260] ss:$36 sps:$4 sm:$0xff]  }
 0x143   :  { %1587 = vrot.lane.b32.xlu1 %v10318_v36, %s10533_s21  ;;  %3525 = vmatpush1.bf16.msra.mxu0 %v10319_v4 }
 0x144   :  { %v11812_v7 = vpop.permute.xlu0 %1593  ;;  %3526 = vmatprep.subr.bf16.mxu0 %v1608_v42 }
 0x145   :  { %3621 = vmatpush1.bf16.msra.mxu1 %v801_v37  ;;  %v1590_v44 = vpop.permute.xlu1 %1589  ;;  %v1616_v60 = vsel %vm620_vm0, %v1592_v61, %v11812_v7 }
 0x146   :  { %3622 = vmatprep.subr.bf16.mxu1 %v810_v22  ;;  %1603 = vrot.lane.b32.xlu0 %v11802_v59, %s10533_s21  ;;  %v1615_v1 = vsel %vm620_vm0, %v1590_v44, %v1592_v61  ;;  %v11925_v22 = vld [vmem:[%s14854_s1] ss:$12 sps:$4 sm:$0xff]  }
 0x147   :  { %1605 = vrot.lane.b32.xlu1 %v10323_v34, %s10533_s21  ;;  %3527 = vmatpush1.bf16.msra.mxu0 %v1607_v20 }
 0x148   :  { %v1931_v29 = vpop.permute.xlu0 %1930  ;;  %3528 = vmatprep.subr.bf16.mxu0 %v1616_v60 }
 0x149   :  { %3623 = vmatpush1.bf16.msra.mxu1 %v809_v52  ;;  %v11830_v38 = vpop.permute.xlu1 %1932 }
 0x14a   :  { %1942 = vrot.lane.b32.xlu0 %v11636_v33, %s10534_s24  ;;  %3624 = vmatprep.subr.bf16.mxu1 %v10329_v50  ;;  %v1965_v32 = vsel %vm1785_vm1, %v1931_v29, %v11830_v38  ;;  %v11935_v50 = vld [vmem:[%s14854_s1 + $0x1c] ss:$12 sps:$4 sm:$0xff]  }
 0x14b   :  { %1944 = vrot.lane.b32.xlu1 %v10324_v62, %s10534_s24  ;;  %3529 = vmatpush1.bf16.msra.mxu0 %v1615_v1  ;;  %v3022_v1 = vld [vmem:[%s14855_s2 + $0x8] sm:$0xff] }
 0x14c   :  { %v1929_v39 = vpop.permute.xlu0 %1928  ;;  %3530 = vmatprep.subr.bf16.mxu0 %v1965_v32 }
 0x14d   :  { %v1964_v46 = vsel %vm1785_vm1, %v1929_v39, %v1931_v29  ;;  %v1949_v3 = vpop.permute.xlu1 %1948  ;;  %3625 = vmatpush1.bf16.msra.mxu1 %v10327_v45  ;;  %v3021_v29 = vld [vmem:[%s14855_s2] sm:$0xff] }
 0x14e   :  { %2651 = vrot.lane.b32.xlu0 %v11579_v43, %s10535_s12  ;;  %3626 = vmatprep.subr.bf16.mxu1 %v10332_v48  ;;  %v10335_v43 = vld [vmem:[%s14853_s0 + $0x3f8] ss:$36 sps:$4 sm:$0xff]  }
 0x14f   :  { %2653 = vrot.lane.b32.xlu1 %v11592_v21, %s10535_s12  ;;  %3531 = vmatpush1.bf16.msra.mxu0 %v1964_v46  ;;  %v11962_v39 = vld [vmem:[%s14854_s1 + $0x18] ss:$12 sps:$4 sm:$0xff]  }
 0x150   :  { %v11855_v55 = vpop.permute.xlu0 %1950  ;;  %v3024_v46 = vld [vmem:[%s14855_s2 + $0x18] sm:$0xff] }
 0x151   :  { %v1947_v10 = vpop.permute.xlu1 %1946  ;;  %v1973_v14 = vsel %vm1785_vm1, %v1949_v3, %v11855_v55  ;;  %3627 = vmatpush1.bf16.msra.mxu1 %v10330_v8 }
 0x152   :  { %v1972_v19 = vsel %vm1785_vm1, %v1947_v10, %v1949_v3  ;;  %1960 = vrot.lane.b32.xlu0 %v11670_v54, %s10534_s24  ;;  %3532 = vmatprep.subr.bf16.mxu0 %v1973_v14 }
 0x153   :  { %1962 = vrot.lane.b32.xlu1 %v10326_v41, %s10534_s24  ;;  %3533 = vmatpush1.bf16.msra.mxu0 %v1972_v19 }
 0x154   :  { %v2287_v63 = vpop.permute.xlu0 %2286  ;;  %3628 = vmatprep.subr.bf16.mxu1 %v10337_v23 }
 0x155   :  { %v11872_v49 = vpop.permute.xlu1 %2288  ;;  %3629 = vmatpush1.bf16.msra.mxu1 %v10335_v43 }
 0x156   :  { %2669 = vrot.lane.b32.xlu0 %v11614_v17, %s10535_s12  ;;  %v2321_v18 = vsel %vm1785_vm1, %v2287_v63, %v11872_v49  ;;  %3630 = vmatprep.subr.bf16.mxu1 %v10342_v51 }
 0x157   :  { %2671 = vrot.lane.b32.xlu1 %v11623_v12, %s10535_s12  ;;  %3534 = vmatprep.subr.bf16.mxu0 %v2321_v18  ;;  %v10347_v18 = vld [vmem:[%s14853_s0 + $0x254] ss:$36 sps:$4 sm:$0xff]  }
 0x158   :  { %v2285_v30 = vpop.permute.xlu0 %2284 }
 0x159   :  { %v2320_v17 = vsel %vm1785_vm1, %v2285_v30, %v2287_v63  ;;  %v2305_v58 = vpop.permute.xlu1 %2304  ;;  %3631 = vmatpush1.bf16.msra.mxu1 %v10340_v27 }
 0x15a   :  { %2298 = vrot.lane.b32.xlu0 %v11884_v6, %s10534_s24  ;;  %3535 = vmatpush1.bf16.msra.mxu0 %v2320_v17 }
 0x15b   :  { %2300 = vrot.lane.b32.xlu1 %v10334_v57, %s10534_s24 }
 0x15c   :  { %v11903_v16 = vpop.permute.xlu0 %2306 }
 0x15d   :  { %v2303_v36 = vpop.permute.xlu1 %2302  ;;  %v2329_v4 = vsel %vm1785_vm1, %v2305_v58, %v11903_v16 }
 0x15e   :  { %v2328_v61 = vsel %vm1785_vm1, %v2303_v36, %v2305_v58  ;;  %2316 = vrot.lane.b32.xlu0 %v11897_v9, %s10534_s24  ;;  %3536 = vmatprep.subr.bf16.mxu0 %v2329_v4  ;;  %v10345_v58 = vld [vmem:[%s14853_s0 + $0x250] ss:$36 sps:$4 sm:$0xff]  }
 0x15f   :  { %2318 = vrot.lane.b32.xlu1 %v10339_v2, %s10534_s24  ;;  %3537 = vmatpush1.bf16.msra.mxu0 %v2328_v61  ;;  %v11998_v61 = vld [vmem:[%s14854_s1 + $0x8] ss:$12 sps:$4 sm:$0xff]  }
 0x160   :  { %v1578_v42 = vpop.permute.xlu0 %1577 }
 0x161   :  { %v11914_v34 = vpop.permute.xlu1 %1579  ;;  %v1609_v37 = vsel %vm620_vm0, %v11748_v53, %v1578_v42  ;;  %v10344_v53 = vld [vmem:[%s14853_s0 + $0x2a8] ss:$36 sps:$4 sm:$0xff]  }
 0x162   :  { %2655 = vrot.lane.b32.xlu0 %v11636_v33, %s10535_s12  ;;  %v1610_v44 = vsel %vm620_vm0, %v1578_v42, %v11914_v34  ;;  %3539 = vmatmul.mubr.bf16.vlgmr.msra.gmra.mrb[24].mxu0 %v11925_v22  ;;  %v10348_v42 = vld [vmem:[%s14853_s0 + $0x298] ss:$36 sps:$4 sm:$0xff]  }
 0x163   :  { %2657 = vrot.lane.b32.xlu1 %v10343_v13, %s10535_s12  ;;  %3632 = vmatprep.subr.bf16.mxu1 %v1610_v44 }
 0x164   :  { %3633 = vmatpush1.bf16.msra.mxu1 %v1609_v37  ;;  %v1596_v20 = vpop.permute.xlu0 %1595  ;;  %3548 = vmatprep.mubr.bf16.mxu0 %v11935_v50 }
 0x165   :  { %v11938_v60 = vpop.permute.xlu1 %1597  ;;  %v1617_v62 = vsel %vm620_vm0, %v11812_v7, %v1596_v20 }
 0x166   :  { %2673 = vrot.lane.b32.xlu0 %v11670_v54, %s10535_s12  ;;  %v1618_v52 = vsel %vm620_vm0, %v1596_v20, %v11938_v60 }
 0x167   :  { %2675 = vrot.lane.b32.xlu1 %v10344_v53, %s10535_s12  ;;  %3634 = vmatprep.subr.bf16.mxu1 %v1618_v52 }
 0x168   :  { %3635 = vmatpush1.bf16.msra.mxu1 %v1617_v62  ;;  %v1935_v45 = vpop.permute.xlu0 %1934 }
 0x169   :  { %v11953_v7 = vpop.permute.xlu1 %1936  ;;  %v1966_v48 = vsel %vm1785_vm1, %v11830_v38, %v1935_v45  ;;  %v3023_v38 = vld [vmem:[%s14855_s2 + $0x10] sm:$0xff]  ;;  %s10544_s2 = smov 85  }
 0x16a   :  { %3027 = vperm.xlu0 %9791, %v3021_v29   ;;  %v1967_v32 = vsel %vm1785_vm1, %v1935_v45, %v11953_v7  ;;  %3549 = vmatmul.mubr.bf16.gmra.mrb[28].mxu0 %v11962_v39  ;;  %v12021_v29 = vld [vmem:[%s14854_s1 + $0x20] ss:$12 sps:$4 sm:$0xff]  }
 0x16b   :  { %3032 = vperm.xlu1 %9792, %v3022_v1   ;;  %3636 = vmatprep.subr.bf16.mxu1 %v1967_v32 }
 0x16c   :  { %3637 = vmatpush1.bf16.msra.mxu1 %v1966_v48  ;;  %v2644_v3 = vpop.permute.xlu0 %2643  ;;  %3591 = vmatprep.mubr.bf16.mxu0 %v10536_v25 }
 0x16d   :  { %v2646_v8 = vpop.permute.xlu1 %2645 }
 0x16e   :  { %3042 = vperm.xlu0 %9791, %v3024_v46   ;;  %v2678_v41 = vsel %vm2498_vm2, %v2644_v3, %v2646_v8 }
 0x16f   :  { %3037 = vperm.xlu1 %9792, %v3023_v38   ;;  %3559 = vmatprep.subr.bf16.mxu0 %v2678_v41 }
 0x170   :  { %v2642_v23 = vpop.permute.xlu0 %2641 }
 0x171   :  { %v2677_v10 = vsel %vm2498_vm2, %v2642_v23, %v2644_v3  ;;  %v1953_v14 = vpop.permute.xlu1 %1952 }
 0x172   :  { %3560 = vmatpush1.bf16.msra.mxu0 %v2677_v10  ;;  %v1974_v63 = vsel %vm1785_vm1, %v11855_v55, %v1953_v14  ;;  %v10350_v55 = vld [vmem:[%s14853_s0 + $0x29c] ss:$36 sps:$4 sm:$0xff]  }
 0x174   :  { %v11974_v43 = vpop.permute.xlu0 %1954 }
 0x175   :  { %v2662_v19 = vpop.permute.xlu1 %2661  ;;  %v1975_v51 = vsel %vm1785_vm1, %v1953_v14, %v11974_v43 }
 0x176   :  { %3638 = vmatprep.subr.bf16.mxu1 %v1975_v51 }
 0x177   :  { %3639 = vmatpush1.bf16.msra.mxu1 %v1974_v63 }
 0x178   :  { %v2664_v27 = vpop.permute.xlu0 %2663 }
 0x179   :  { %v2660_v57 = vpop.permute.xlu1 %2659  ;;  %v2686_v30 = vsel %vm2498_vm2, %v2662_v19, %v2664_v27 }
 0x17a   :  { %v2685_v17 = vsel %vm2498_vm2, %v2660_v57, %v2662_v19  ;;  %3561 = vmatprep.subr.bf16.mxu0 %v2686_v30  ;;  %v10354_v57 = vld [vmem:[%s14853_s0 + $0x3b8] ss:$36 sps:$4 sm:$0xff]  }
 0x17b   :  { %3562 = vmatpush1.bf16.msra.mxu0 %v2685_v17 }
 0x17c   :  { %v2291_v2 = vpop.permute.xlu0 %2290  ;;  %3718 = vmatprep.subr.bf16.mxu0 %v10347_v18 }
 0x17d   :  { %v11991_v36 = vpop.permute.xlu1 %2292  ;;  %v2322_v4 = vsel %vm1785_vm1, %v11872_v49, %v2291_v2 }
 0x17e   :  { %8936 = vmatmul.mubr.msk.bf16.vlgmr.msra.gmra.mrb[24].mxu0 %vm3075_vm3, %v11998_v61  ;;  %v2323_v13 = vsel %vm1785_vm1, %v2291_v2, %v11991_v36 }
 0x17f   :  { %3640 = vmatprep.subr.bf16.mxu1 %v2323_v13  ;;  %3719 = vmatpush1.bf16.msra.mxu0 %v10345_v58  ;;  %v10359_v58 = vld [vmem:[%s14853_s0 + $0x404] ss:$36 sps:$4 sm:$0xff]  }
 0x180   :  { %3641 = vmatpush1.bf16.msra.mxu1 %v2322_v4  ;;  %v2309_v37 = vpop.permute.xlu0 %2308  ;;  %3720 = vmatprep.subr.bf16.mxu0 %v10350_v55  ;;  %v10357_v55 = vld [vmem:[%s14853_s0 + $0x400] ss:$36 sps:$4 sm:$0xff]  }
 0x181   :  { %v12007_v49 = vpop.permute.xlu1 %2310  ;;  %v2330_v44 = vsel %vm1785_vm1, %v11903_v16, %v2309_v37  ;;  %3601 = vmatprep.mubr.bf16.mxu0 %v10536_v25 }
 0x182   :  { %v2331_v53 = vsel %vm1785_vm1, %v2309_v37, %v12007_v49 }
 0x183   :  { %3642 = vmatprep.subr.bf16.mxu1 %v2331_v53  ;;  %3721 = vmatpush1.bf16.msra.mxu0 %v10348_v42 }
 0x184   :  { %3643 = vmatpush1.bf16.msra.mxu1 %v2330_v44  ;;  %v2648_v20 = vpop.permute.xlu0 %2647  ;;  %3722 = vmatprep.subr.bf16.mxu0 %v11734_v26 }
 0x185   :  { %v12015_v62 = vpop.permute.xlu1 %2649  ;;  %v2679_v52 = vsel %vm2498_vm2, %v2646_v8, %v2648_v20 }
 0x186   :  { %8937 = vmatmul.mubr.msk.bf16.gmra.mrb[28].mxu0 %vm3075_vm3, %v12021_v29  ;;  %v2680_v16 = vsel %vm2498_vm2, %v2648_v20, %v12015_v62 }
 0x187   :  { %3645 = vmatmul.mubr.bf16.vlgmr.msra.gmra.mrb[16].mxu1 %v11925_v22  ;;  %3665 = vmatprep.subr.bf16.mxu1 %v2680_v16 }
 0x188   :  { %3666 = vmatpush1.bf16.msra.mxu1 %v2679_v52  ;;  %3723 = vmatpush1.bf16.msra.mxu0 %v11541_v15  ;;  %v774_v26 = vpop.permute.xlu0 %773 }
 0x189   :  { %v12029_v45 = vpop.permute.xlu1 %775  ;;  %3724 = vmatprep.subr.bf16.mxu0 %v11756_v31  ;;  %3654 = vmatprep.mubr.bf16.mxu1 %v11935_v50 }
 0x18a   :  { %3750 = vmatprep.mubr.bf16.mxu0 %v11431_v56  ;;  %v804_v48 = vsel %vm620_vm0, %v774_v26, %v12029_v45 }
 0x18c   :  { %3725 = vmatpush1.bf16.msra.mxu0 %v11559_v0  ;;  %v2666_v1 = vpop.permute.xlu0 %2665  ;;  %v803_v0 = vsel %vm620_vm0, %v11723_v24, %v774_v26  ;;  %v10353_v24 = vld [vmem:[%s14853_s0 + $0x374] ss:$36 sps:$4 sm:$0xff]  }
 0x18d   :  { %v12037_v32 = vpop.permute.xlu1 %2667  ;;  %3726 = vmatprep.subr.bf16.mxu0 %v804_v48  ;;  %v2687_v15 = vsel %vm2498_vm2, %v2664_v27, %v2666_v1 }
 0x18e   :  { %v2688_v46 = vsel %vm2498_vm2, %v2666_v1, %v12037_v32  ;;  %v12042_v3 = vpop.f32.mrb[0].mxu0 }
 0x18f   :  { %3655 = vmatmul.mubr.bf16.gmra.mrb[20].mxu1 %v11962_v39  ;;  %3667 = vmatprep.subr.bf16.mxu1 %v2688_v46  ;;  %v12047_v31 = vpop.f32.mrb[1].mxu0 }
 0x190   :  { %3668 = vmatpush1.bf16.msra.mxu1 %v2687_v15  ;;  %3727 = vmatpush1.bf16.msra.mxu0 %v803_v0  ;;  %v792_v38 = vpop.permute.xlu0 %791  ;;  %v12049_v8 = vpop.f32.mrb[2].mxu0 }
 0x191   :  { %v12051_v41 = vpop.permute.xlu1 %793  ;;  %v811_v23 = vsel %vm620_vm0, %v11792_v40, %v792_v38  ;;  %3697 = vmatprep.mubr.bf16.mxu1 %v10536_v25  ;;  %3824 = vmatprep.subr.bf16.mxu1 %v11636_v33  ;;  %v12060_v10 = vpop.f32.mrb[3].mxu0  ;;  %v10351_v40 = vld [vmem:[%s14853_s0 + $0x370] ss:$36 sps:$4 sm:$0xff]   ;;  %v10356_v33 = vld [vmem:[%s14853_s0 + $0x3bc] ss:$36 sps:$4 sm:$0xff]  }
 0x192   :  { %v812_v14 = vsel %vm620_vm0, %v792_v38, %v12051_v41 }
 0x193   :  { %3728 = vmatprep.subr.bf16.mxu0 %v812_v14 }
 0x194   :  { %3729 = vmatpush1.bf16.msra.mxu0 %v811_v23  ;;  %v778_v19 = vpop.permute.xlu0 %777 }
 0x195   :  { %v780_v51 = vpop.permute.xlu1 %779  ;;  %3730 = vmatprep.subr.bf16.mxu0 %v10353_v24 }
 0x196   :  { %v12070_v63 = vpop.f32.mrb[4].mxu0 }
 0x197   :  { %8938 = vmatmul.mubr.msk.bf16.vlgmr.msra.gmra.mrb[16].mxu1 %vm3075_vm3, %v11998_v61  ;;  %v12074_v27 = vpop.f32.mrb[5].mxu0 }
 0x198   :  { %3825 = vmatpush1.bf16.msra.mxu1 %v11592_v21  ;;  %3731 = vmatpush1.bf16.msra.mxu0 %v10351_v40  ;;  %v1582_v18 = vpop.permute.xlu0 %1581  ;;  %v12080_v30 = vpop.f32.mrb[6].mxu0 }
 0x199   :  { %v12082_v17 = vpop.permute.xlu1 %1583  ;;  %3826 = vmatprep.subr.bf16.mxu1 %v11670_v54  ;;  %3732 = vmatprep.subr.bf16.mxu0 %v10356_v33  ;;  %v12088_v2 = vpop.f32.mrb[7].mxu0  ;;  %v10362_v54 = vld [vmem:[%s14853_s0 + $0x44c] ss:$36 sps:$4 sm:$0xff]  }
 0x19a   :  { %3707 = vmatprep.mubr.bf16.mxu1 %v10536_v25  ;;  %v1612_v52 = vsel %vm620_vm0, %v1582_v18, %v12082_v17 }
 0x19c   :  { %3827 = vmatpush1.bf16.msra.mxu1 %v11623_v12  ;;  %3733 = vmatpush1.bf16.msra.mxu0 %v10354_v57  ;;  %v796_v21 = vpop.permute.xlu0 %795 }
 0x19d   :  { %v798_v4 = vpop.permute.xlu1 %797  ;;  %3828 = vmatprep.subr.bf16.mxu1 %v11884_v6  ;;  %3734 = vmatprep.subr.bf16.mxu0 %v10359_v58  ;;  %v10360_v6 = vld [vmem:[%s14853_s0 + $0x448] ss:$36 sps:$4 sm:$0xff]  }
 0x19e   :  { %v12099_v13 = vpop.f32.mrb[8].mxu0  ;;  %v814_v1 = vsel %vm620_vm0, %v796_v21, %v798_v4 }
 0x19f   :  { %8939 = vmatmul.mubr.msk.bf16.gmra.mrb[20].mxu1 %vm3075_vm3, %v12021_v29  ;;  %v12103_v12 = vpop.f32.mrb[9].mxu0 }
 0x1a0   :  { %3829 = vmatpush1.bf16.msra.mxu1 %v11742_v11  ;;  %3735 = vmatpush1.bf16.msra.mxu0 %v10357_v55  ;;  %v1600_v42 = vpop.permute.xlu0 %1599  ;;  %v12109_v37 = vpop.f32.mrb[10].mxu0  ;;  %v806_v11 = vsel %vm620_vm0, %v778_v19, %v780_v51  ;;  %v10365_v51 = vld [vmem:[%s14853_s0 + $0x40c] ss:$36 sps:$4 sm:$0xff]  }
 0x1a1   :  { %v12111_v44 = vpop.permute.xlu1 %1601  ;;  %3830 = vmatprep.subr.bf16.mxu1 %v11897_v9  ;;  %3736 = vmatprep.subr.bf16.mxu0 %v10362_v54  ;;  %v12114_v53 = vpop.f32.mrb[11].mxu0  ;;  %v805_v9 = vsel %vm620_vm0, %v12029_v45, %v778_v19  ;;  %v1619_v38 = vsel %vm620_vm0, %v11938_v60, %v1600_v42  ;;  %v10366_v54 = vld [vmem:[%s14853_s0 + $0x450] ss:$36 sps:$4 sm:$0xff]  }
 0x1a2   :  { %3856 = vmatprep.mubr.bf16.mxu1 %v11431_v56  ;;  %v1611_v56 = vsel %vm620_vm0, %v11914_v34, %v1582_v18  ;;  %v1620_v15 = vsel %vm620_vm0, %v1600_v42, %v12111_v44  ;;  %v813_v34 = vsel %vm620_vm0, %v12051_v41, %v796_v21 }
 0x1a4   :  { %3831 = vmatpush1.bf16.msra.mxu1 %v11764_v47  ;;  %3737 = vmatpush1.bf16.msra.mxu0 %v10360_v6  ;;  %v1939_v20 = vpop.permute.xlu0 %1938 }
 0x1a5   :  { %3832 = vmatprep.subr.bf16.mxu1 %v806_v11  ;;  %v12121_v16 = vpop.permute.xlu1 %1940  ;;  %3738 = vmatprep.subr.bf16.mxu0 %v1612_v52  ;;  %v1968_v19 = vsel %vm1785_vm1, %v11953_v7, %v1939_v20 }
 0x1a6   :  { %v12123_v26 = vpop.f32.mrb[12].mxu0  ;;  %v1969_v24 = vsel %vm1785_vm1, %v1939_v20, %v12121_v16 }
 0x1a7   :  { %v12129_v47 = vpop.f32.mrb[13].mxu0 }
 0x1a8   :  { %3833 = vmatpush1.bf16.msra.mxu1 %v805_v9  ;;  %3739 = vmatpush1.bf16.msra.mxu0 %v1611_v56  ;;  %v1957_v48 = vpop.permute.xlu0 %1956  ;;  %v12134_v46 = vpop.f32.mrb[14].mxu0 }
 0x1a9   :  { %3834 = vmatprep.subr.bf16.mxu1 %v814_v1  ;;  %v12136_v0 = vpop.permute.xlu1 %1958  ;;  %3740 = vmatprep.subr.bf16.mxu0 %v1620_v15  ;;  %v12138_v45 = vpop.f32.mrb[15].mxu0 }
 0x1aa   :  { %v1977_v60 = vsel %vm1785_vm1, %v1957_v48, %v12136_v0 }
 0x1ac   :  { %3835 = vmatpush1.bf16.msra.mxu1 %v813_v34  ;;  %3741 = vmatpush1.bf16.msra.mxu0 %v1619_v38  ;;  %v2295_v23 = vpop.permute.xlu0 %2294 }
 0x1ad   :  { %v12146_v14 = vpop.permute.xlu1 %2296  ;;  %3742 = vmatprep.subr.bf16.mxu0 %v1969_v24  ;;  %3836 = vmatprep.subr.bf16.mxu1 %v11782_v5  ;;  %v1976_v5 = vsel %vm1785_vm1, %v11974_v43, %v1957_v48  ;;  %v10368_v43 = vld [vmem:[%s14853_s0 + $0x454] ss:$36 sps:$4 sm:$0xff]   ;;  %v2324_v21 = vsel %vm1785_vm1, %v11991_v36, %v2295_v23 }
 0x1ae   :  { %v2325_v33 = vsel %vm1785_vm1, %v2295_v23, %v12146_v14 }
 0x1b0   :  { %3837 = vmatpush1.bf16.msra.mxu1 %v11659_v28  ;;  %3743 = vmatpush1.bf16.msra.mxu0 %v1968_v19  ;;  %v2313_v41 = vpop.permute.xlu0 %2312 }
 0x1b1   :  { %v12154_v40 = vpop.permute.xlu1 %2314  ;;  %3744 = vmatprep.subr.bf16.mxu0 %v1977_v60  ;;  %3838 = vmatprep.subr.bf16.mxu1 %v11802_v59  ;;  %v10363_v59 = vld [vmem:[%s14853_s0 + $0x408] ss:$36 sps:$4 sm:$0xff]   ;;  %v2332_v6 = vsel %vm1785_vm1, %v12007_v49, %v2313_v41  ;;  %s10537_s0 = smov 126  }
 0x1b2   :  { %v2333_v4 = vsel %vm1785_vm1, %v2313_v41, %v12154_v40 }
 0x1b3   :  { %v12162_v7 = vpop.f32.mrb[0].mxu1 }
 0x1b4   :  { %3839 = vmatpush1.bf16.msra.mxu1 %v11692_v35  ;;  %3745 = vmatpush1.bf16.msra.mxu0 %v1976_v5  ;;  %v1586_v28 = vpop.permute.xlu0 %1585  ;;  %v12170_v18 = vpop.f32.mrb[1].mxu1 }
 0x1b5   :  { %v1588_v57 = vpop.permute.xlu1 %1587  ;;  %3746 = vmatprep.subr.bf16.mxu0 %v2325_v33  ;;  %3840 = vmatprep.subr.bf16.mxu1 %v10365_v51  ;;  %v12175_v58 = vpop.f32.mrb[2].mxu1  ;;  %v1613_v49 = vsel %vm620_vm0, %v12082_v17, %v1586_v28 }
 0x1b6   :  { %v12177_v35 = vpop.f32.mrb[3].mxu1  ;;  %v1614_v36 = vsel %vm620_vm0, %v1586_v28, %v1588_v57 }
 0x1b8   :  { %3841 = vmatpush1.bf16.msra.mxu1 %v10363_v59  ;;  %3747 = vmatpush1.bf16.msra.mxu0 %v2324_v21  ;;  %v1604_v55 = vpop.permute.xlu0 %1603 }
 0x1b9   :  { %v1606_v42 = vpop.permute.xlu1 %1605  ;;  %3748 = vmatprep.subr.bf16.mxu0 %v2333_v4  ;;  %3842 = vmatprep.subr.bf16.mxu1 %v10368_v43  ;;  %v1621_v24 = vsel %vm620_vm0, %v12111_v44, %v1604_v55 }
 0x1ba   :  { %v1622_v48 = vsel %vm620_vm0, %v1604_v55, %v1606_v42 }
 0x1bb   :  { %v12188_v11 = vpop.f32.mrb[4].mxu1 }
 0x1bc   :  { %3843 = vmatpush1.bf16.msra.mxu1 %v10366_v54  ;;  %3749 = vmatpush1.bf16.msra.mxu0 %v2332_v6  ;;  %v1943_v20 = vpop.permute.xlu0 %1942  ;;  %v12191_v52 = vpop.f32.mrb[5].mxu1 }
 0x1bd   :  { %3844 = vmatprep.subr.bf16.mxu1 %v1614_v36  ;;  %v1945_v9 = vpop.permute.xlu1 %1944  ;;  %v12193_v56 = vpop.f32.mrb[6].mxu1 }
 0x1be   :  { %v12195_v1 = vpop.f32.mrb[7].mxu1  ;;  %v1971_v17 = vsel %vm1785_vm1, %v1943_v20, %v1945_v9 }
 0x1bf   :  { %3751 = vmatmul.mubr.bf16.vlgmr.msra.gmra.mrb[32].mxu0 %v11925_v22 }
 0x1c0   :  { %3845 = vmatpush1.bf16.msra.mxu1 %v1613_v49  ;;  %v2652_v15 = vpop.permute.xlu0 %2651  ;;  %3760 = vmatprep.mubr.bf16.mxu0 %v11935_v50 }
 0x1c1   :  { %3846 = vmatprep.subr.bf16.mxu1 %v1622_v48  ;;  %v2654_v34 = vpop.permute.xlu1 %2653  ;;  %v2681_v38 = vsel %vm2498_vm2, %v12015_v62, %v2652_v15  ;;  %v1970_v62 = vsel %vm1785_vm1, %v12121_v16, %v1943_v20 }
 0x1c2   :  { %v2682_v23 = vsel %vm2498_vm2, %v2652_v15, %v2654_v34 }
 0x1c3   :  { %3771 = vmatprep.subr.bf16.mxu0 %v2682_v23 }
 0x1c4   :  { %3847 = vmatpush1.bf16.msra.mxu1 %v1621_v24  ;;  %3772 = vmatpush1.bf16.msra.mxu0 %v2681_v38  ;;  %v1961_v19 = vpop.permute.xlu0 %1960 }
 0x1c5   :  { %3848 = vmatprep.subr.bf16.mxu1 %v1971_v17  ;;  %v1963_v41 = vpop.permute.xlu1 %1962  ;;  %v1978_v33 = vsel %vm1785_vm1, %v12136_v0, %v1961_v19 }
 0x1c6   :  { %v1979_v60 = vsel %vm1785_vm1, %v1961_v19, %v1963_v41 }
 0x1c7   :  { %3761 = vmatmul.mubr.bf16.gmra.mrb[36].mxu0 %v11962_v39 }
 0x1c8   :  { %3849 = vmatpush1.bf16.msra.mxu1 %v1970_v62  ;;  %v2670_v51 = vpop.permute.xlu0 %2669  ;;  %3803 = vmatprep.mubr.bf16.mxu0 %v10536_v25 }
 0x1c9   :  { %3850 = vmatprep.subr.bf16.mxu1 %v1979_v60  ;;  %v2672_v44 = vpop.permute.xlu1 %2671  ;;  %v2689_v5 = vsel %vm2498_vm2, %v12037_v32, %v2670_v51 }
 0x1ca   :  { %v2690_v28 = vsel %vm2498_vm2, %v2670_v51, %v2672_v44 }
 0x1cb   :  { %3773 = vmatprep.subr.bf16.mxu0 %v2690_v28 }
 0x1cc   :  { %3851 = vmatpush1.bf16.msra.mxu1 %v1978_v33  ;;  %3774 = vmatpush1.bf16.msra.mxu0 %v2689_v5  ;;  %v2299_v59 = vpop.permute.xlu0 %2298 }
 0x1cd   :  { %v2301_v57 = vpop.permute.xlu1 %2300  ;;  %v2326_v16 = vsel %vm1785_vm1, %v12146_v14, %v2299_v59 }
 0x1ce   :  { %v2327_v43 = vsel %vm1785_vm1, %v2299_v59, %v2301_v57 }
 0x1cf   :  { %8940 = vmatmul.mubr.msk.bf16.vlgmr.msra.gmra.mrb[32].mxu0 %vm3075_vm3, %v11998_v61  ;;  %3852 = vmatprep.subr.bf16.mxu1 %v2327_v43 }
 0x1d0   :  { %3853 = vmatpush1.bf16.msra.mxu1 %v2326_v16  ;;  %v2317_v32 = vpop.permute.xlu0 %2316  ;;  %3813 = vmatprep.mubr.bf16.mxu0 %v10536_v25 }
 0x1d1   :  { %v2319_v21 = vpop.permute.xlu1 %2318  ;;  %v2334_v0 = vsel %vm1785_vm1, %v12154_v40, %v2317_v32 }
 0x1d2   :  { %v2335_v55 = vsel %vm1785_vm1, %v2317_v32, %v2319_v21 }
 0x1d3   :  { %3854 = vmatprep.subr.bf16.mxu1 %v2335_v55 }
 0x1d4   :  { %3855 = vmatpush1.bf16.msra.mxu1 %v2334_v0  ;;  %v2656_v4 = vpop.permute.xlu0 %2655 }
 0x1d5   :  { %v2658_v14 = vpop.permute.xlu1 %2657  ;;  %v2683_v42 = vsel %vm2498_vm2, %v2654_v34, %v2656_v4 }
 0x1d6   :  { %v2684_v54 = vsel %vm2498_vm2, %v2656_v4, %v2658_v14 }
 0x1d7   :  { %8941 = vmatmul.mubr.msk.bf16.gmra.mrb[36].mxu0 %vm3075_vm3, %v12021_v29  ;;  %3857 = vmatmul.mubr.bf16.vlgmr.msra.gmra.mrb[24].mxu1 %v11925_v22 }
 0x1d8   :  { %3877 = vmatprep.subr.bf16.mxu1 %v2684_v54  ;;  %v2674_v6 = vpop.permute.xlu0 %2673  ;;  %3866 = vmatprep.mubr.bf16.mxu1 %v11935_v50 }
 0x1d9   :  { %3878 = vmatpush1.bf16.msra.mxu1 %v2683_v42  ;;  %v2676_v40 = vpop.permute.xlu1 %2675  ;;  %v2691_v20 = vsel %vm2498_vm2, %v2672_v44, %v2674_v6 }
 0x1da   :  { %v2692_v36 = vsel %vm2498_vm2, %v2674_v6, %v2676_v40 }
 0x1db   :  { %3879 = vmatprep.subr.bf16.mxu1 %v2692_v36 }
 0x1dd   :  { %3880 = vmatpush1.bf16.msra.mxu1 %v2691_v20 }
 0x1df   :  { %3867 = vmatmul.mubr.bf16.gmra.mrb[28].mxu1 %v11962_v39 }
 0x1e0   :  { %3909 = vmatprep.mubr.bf16.mxu1 %v10536_v25 }
 0x1e7   :  { %8942 = vmatmul.mubr.msk.bf16.vlgmr.msra.gmra.mrb[24].mxu1 %vm3075_vm3, %v11998_v61 }
 0x1e8   :  { %3919 = vmatprep.mubr.bf16.mxu1 %v10536_v25 }
 0x1e9   :  { %v12240_v22 = vpop.permute.xlu0 %3027 }
 0x1ea   :  { %v12242_v50 = vpop.permute.xlu1 %3032  ;;  %v12246_v9 = vadd.f32 %v12042_v3, %v12240_v22  ;;  %v3223_v49 = vadd.f32 %v12162_v7, %v12240_v22  ;;  %v3225_v39 = vadd.f32 %v12170_v18, %v12240_v22 }
 0x1eb   :  { %v3229_v48 = vadd.f32 %v12177_v35, %v12242_v50  ;;  %v12256_v25 = vadd.f32 %v12049_v8, %v12242_v50  ;;  %v3227_v61 = vadd.f32 %v12175_v58, %v12242_v50 }
 0x1ec   :  { %4122 = vrot.lane.b32.xlu1 %v12246_v9, %s10533_s21  ;;  %v12263_v3 = vadd.f32 %v12099_v13, %v3223_v49  ;;  %v12266_v7 = vadd.f32 %v12103_v12, %v3225_v39 }
 0x1ed   :  { %v12269_v18 = vadd.f32 %v12114_v53, %v3229_v48  ;;  %4154 = vrot.lane.b32.xlu0 %v12256_v25, %s10533_s21  ;;  %v12273_v8 = vpop.permute.xlu0 %3042  ;;  %v12276_v35 = vadd.f32 %v12109_v37, %v3227_v61 }
 0x1ee   :  { %v12278_v58 = vpop.permute.xlu1 %3037  ;;  %v3239_v13 = vadd.f32 %v12195_v1, %v12273_v8  ;;  %v12282_v15 = vpop.f32.mrb[16].mxu0  ;;  %v3237_v12 = vadd.f32 %v12193_v56, %v12273_v8  ;;  %v12356_v19 = vadd.f32 %v12088_v2, %v12273_v8 }
 0x1ef   :  { %v12286_v53 = vpop.f32.mrb[17].mxu0  ;;  %8943 = vmatmul.mubr.msk.bf16.gmra.mrb[28].mxu1 %vm3075_vm3, %v12021_v29  ;;  %v3233_v34 = vadd.f32 %v12188_v11, %v12278_v58  ;;  %v3235_v56 = vadd.f32 %v12191_v52, %v12278_v58  ;;  %v12320_v52 = vadd.f32 %v12060_v10, %v12242_v50  ;;  %v12340_v10 = vadd.f32 %v12070_v63, %v12278_v58 }
 0x1f0   :  { %v12293_v37 = vadd.f32 %v12138_v45, %v3239_v13  ;;  %v12295_v38 = vpop.f32.mrb[18].mxu0  ;;  %4439 = vrot.lane.b32.xlu1 %v12246_v9, %s10537_s0  ;;  %v12302_v1 = vadd.f32 %v12134_v46, %v3237_v12  ;;  %v12313_v45 = vadd.f32 %v12047_v31, %v12240_v22  ;;  %v12352_v17 = vadd.f32 %v12074_v27, %v12278_v58 }
 0x1f1   :  { %v12304_v23 = vpop.f32.mrb[19].mxu0  ;;  %4471 = vrot.lane.b32.xlu0 %v12256_v25, %s10537_s0  ;;  %v12309_v29 = vadd.f32 %v12123_v26, %v3233_v34  ;;  %v12316_v11 = vadd.f32 %v12129_v47, %v3235_v56  ;;  %v12344_v47 = vadd.f32 %v12080_v30, %v12273_v8  ;;  %v12460_v32 = vadd.f32 %v12282_v15, %v12240_v22 }
 0x1f2   :  { %14907 = vst [vmem:[#allocation7_spill] sm:$0xff] %v12293_v37  ;;  %v12464_v21 = vadd.f32 %v12286_v53, %v12240_v22  ;;  %v12478_v55 = vadd.f32 %v12295_v38, %v12242_v50  ;;  %v12484_v14 = vadd.f32 %v12304_v23, %v12242_v50 }
 0x1f4   :  { %4124 = vrot.lane.b32.xlu1 %v12313_v45, %s10533_s21 }
 0x1f5   :  { %4156 = vrot.lane.b32.xlu0 %v12320_v52, %s10533_s21 }
 0x1f6   :  { %v12326_v46 = vpop.f32.mrb[20].mxu0 }
 0x1f7   :  { %v12328_v26 = vpop.f32.mrb[21].mxu0  ;;  %v12502_v40 = vadd.f32 %v12326_v46, %v12278_v58 }
 0x1f8   :  { %v12330_v24 = vpop.f32.mrb[22].mxu0  ;;  %4441 = vrot.lane.b32.xlu1 %v12313_v45, %s10537_s0  ;;  %v12508_v20 = vadd.f32 %v12328_v26, %v12278_v58 }
 0x1f9   :  { %v12334_v31 = vpop.f32.mrb[23].mxu0  ;;  %4473 = vrot.lane.b32.xlu0 %v12320_v52, %s10537_s0  ;;  %v12524_v13 = vadd.f32 %v12330_v24, %v12273_v8 }
 0x1fa   :  { %v12528_v12 = vadd.f32 %v12334_v31, %v12273_v8 }
 0x1fb   :  { %14914 = vst [vmem:[#allocation14_spill] sm:$0xff] %v12524_v13 }
 0x1fc   :  { %4186 = vrot.lane.b32.xlu1 %v12340_v10, %s10533_s21  ;;  %14915 = vst [vmem:[#allocation15_spill] sm:$0xff] %v12528_v12 }
 0x1fd   :  { %4218 = vrot.lane.b32.xlu0 %v12344_v47, %s10533_s21 }
 0x200   :  { %4188 = vrot.lane.b32.xlu1 %v12352_v17, %s10533_s21 }
 0x201   :  { %4220 = vrot.lane.b32.xlu0 %v12356_v19, %s10533_s21 }
 0x204   :  { %4505 = vrot.lane.b32.xlu1 %v12352_v17, %s10537_s0 }
 0x205   :  { %4537 = vrot.lane.b32.xlu0 %v12356_v19, %s10537_s0 }
 0x207   :  { %v3487_v63 = vpop.f32.mrb[8].mxu1 }
 0x208   :  { %v3489_v30 = vpop.f32.mrb[9].mxu1  ;;  %4128 = vrot.lane.b32.xlu1 %v12266_v7, %s10533_s21  ;;  %v12403_v44 = vadd.f32 %v3487_v63, %v12240_v22 }
 0x209   :  { %v3491_v27 = vpop.f32.mrb[10].mxu1  ;;  %4126 = vrot.lane.b32.xlu0 %v12263_v3, %s10533_s21  ;;  %v12406_v5 = vadd.f32 %v3489_v30, %v12240_v22 }
 0x20a   :  { %v3493_v2 = vpop.f32.mrb[11].mxu1  ;;  %v12417_v28 = vadd.f32 %v3491_v27, %v12242_v50 }
 0x20b   :  { %14908 = vst [vmem:[#allocation8_spill] sm:$0xff] %v12406_v5  ;;  %v12420_v33 = vadd.f32 %v3493_v2, %v12242_v50 }
 0x20c   :  { %4445 = vrot.lane.b32.xlu1 %v12266_v7, %s10537_s0 }
 0x20d   :  { %4443 = vrot.lane.b32.xlu0 %v12263_v3, %s10537_s0  ;;  %14909 = vst [vmem:[#allocation9_spill] sm:$0xff] %v12420_v33 }
 0x20f   :  { %v3497_v41 = vpop.f32.mrb[12].mxu1 }
 0x210   :  { %v3499_v60 = vpop.f32.mrb[13].mxu1  ;;  %4158 = vrot.lane.b32.xlu1 %v12276_v35, %s10533_s21  ;;  %v12431_v59 = vadd.f32 %v3497_v41, %v12278_v58 }
 0x211   :  { %v3501_v62 = vpop.f32.mrb[14].mxu1  ;;  %4160 = vrot.lane.b32.xlu0 %v12269_v18, %s10533_s21  ;;  %v12434_v57 = vadd.f32 %v3499_v60, %v12278_v58 }
 0x212   :  { %v3503_v51 = vpop.f32.mrb[15].mxu1  ;;  %v12448_v43 = vadd.f32 %v3501_v62, %v12273_v8 }
 0x213   :  { %14910 = vst [vmem:[#allocation10_spill] sm:$0xff] %v12434_v57  ;;  %v12445_v16 = vadd.f32 %v3503_v51, %v12273_v8 }
 0x214   :  { %4475 = vrot.lane.b32.xlu1 %v12276_v35, %s10537_s0 }
 0x215   :  { %4477 = vrot.lane.b32.xlu0 %v12269_v18, %s10537_s0  ;;  %14911 = vst [vmem:[#allocation11_spill] sm:$0xff] %v12445_v16 }
 0x218   :  { %4192 = vrot.lane.b32.xlu1 %v12316_v11, %s10533_s21 }
 0x219   :  { %4190 = vrot.lane.b32.xlu0 %v12309_v29, %s10533_s21 }
 0x21c   :  { %4509 = vrot.lane.b32.xlu1 %v12316_v11, %s10537_s0 }
 0x21d   :  { %4507 = vrot.lane.b32.xlu0 %v12309_v29, %s10537_s0 }
 0x220   :  { %4222 = vrot.lane.b32.xlu1 %v12302_v1, %s10533_s21 }
 0x221   :  { %4224 = vrot.lane.b32.xlu0 %v12293_v37, %s10533_s21 }
 0x224   :  { %4539 = vrot.lane.b32.xlu1 %v12302_v1, %s10537_s0 }
 0x225   :  { %4541 = vrot.lane.b32.xlu0 %v12293_v37, %s10537_s0 }
 0x228   :  { %4503 = vrot.lane.b32.xlu1 %v12340_v10, %s10537_s0 }
 0x229   :  { %4535 = vrot.lane.b32.xlu0 %v12344_v47, %s10537_s0 }
 0x22c   :  { %4134 = vrot.lane.b32.xlu1 %v12403_v44, %s10533_s21 }
 0x22d   :  { %4136 = vrot.lane.b32.xlu0 %v12406_v5, %s10533_s21 }
 0x230   :  { %4451 = vrot.lane.b32.xlu1 %v12403_v44, %s10537_s0 }
 0x231   :  { %4453 = vrot.lane.b32.xlu0 %v12406_v5, %s10537_s0 }
 0x234   :  { %4166 = vrot.lane.b32.xlu1 %v12417_v28, %s10533_s21 }
 0x235   :  { %4168 = vrot.lane.b32.xlu0 %v12420_v33, %s10533_s21 }
 0x238   :  { %4483 = vrot.lane.b32.xlu1 %v12417_v28, %s10537_s0 }
 0x239   :  { %4485 = vrot.lane.b32.xlu0 %v12420_v33, %s10537_s0 }
 0x23c   :  { %4198 = vrot.lane.b32.xlu1 %v12431_v59, %s10533_s21 }
 0x23d   :  { %4200 = vrot.lane.b32.xlu0 %v12434_v57, %s10533_s21 }
 0x240   :  { %4515 = vrot.lane.b32.xlu1 %v12431_v59, %s10537_s0 }
 0x241   :  { %4517 = vrot.lane.b32.xlu0 %v12434_v57, %s10537_s0 }
 0x244   :  { %4232 = vrot.lane.b32.xlu1 %v12445_v16, %s10533_s21 }
 0x245   :  { %4230 = vrot.lane.b32.xlu0 %v12448_v43, %s10533_s21 }
 0x248   :  { %4549 = vrot.lane.b32.xlu1 %v12445_v16, %s10537_s0 }
 0x249   :  { %4547 = vrot.lane.b32.xlu0 %v12448_v43, %s10537_s0 }
 0x24c   :  { %4130 = vrot.lane.b32.xlu1 %v12460_v32, %s10533_s21 }
 0x24d   :  { %4132 = vrot.lane.b32.xlu0 %v12464_v21, %s10533_s21 }
 0x250   :  { %4447 = vrot.lane.b32.xlu1 %v12460_v32, %s10537_s0 }
 0x251   :  { %4449 = vrot.lane.b32.xlu0 %v12464_v21, %s10537_s0  ;;  %v12474_v0 = vpop.f32.mrb[24].mxu0 }
 0x252   :  { %v12480_v4 = vpop.f32.mrb[25].mxu0 }
 0x253   :  { %v12486_v54 = vpop.f32.mrb[26].mxu0 }
 0x254   :  { %v12488_v42 = vpop.f32.mrb[27].mxu0  ;;  %4162 = vrot.lane.b32.xlu1 %v12478_v55, %s10533_s21 }
 0x255   :  { %4164 = vrot.lane.b32.xlu0 %v12484_v14, %s10533_s21 }
 0x258   :  { %4479 = vrot.lane.b32.xlu1 %v12478_v55, %s10537_s0 }
 0x259   :  { %4481 = vrot.lane.b32.xlu0 %v12484_v14, %s10537_s0  ;;  %v12498_v6 = vpop.f32.mrb[28].mxu0 }
 0x25a   :  { %14912 = vst [vmem:[#allocation12_spill] sm:$0xff] %v12498_v6  ;;  %v12504_v36 = vpop.f32.mrb[29].mxu0 }
 0x25b   :  { %14913 = vst [vmem:[#allocation13_spill] sm:$0xff] %v12504_v36  ;;  %v12510_v49 = vpop.f32.mrb[30].mxu0 }
 0x25c   :  { %v12512_v39 = vpop.f32.mrb[31].mxu0  ;;  %4194 = vrot.lane.b32.xlu1 %v12502_v40, %s10533_s21 }
 0x25d   :  { %4196 = vrot.lane.b32.xlu0 %v12508_v20, %s10533_s21 }
 0x25e   :  { %v4123_v48 = vpop.permute.xlu1 %4122 }
 0x25f   :  { %v4155_v61 = vpop.permute.xlu0 %4154 }
 0x260   :  { %4511 = vrot.lane.b32.xlu1 %v12502_v40, %s10537_s0 }
 0x261   :  { %4513 = vrot.lane.b32.xlu0 %v12508_v20, %s10537_s0 }
 0x262   :  { %v4440_v15 = vpop.permute.xlu1 %4439 }
 0x263   :  { %v4472_v53 = vpop.permute.xlu0 %4471 }
 0x264   :  { %4226 = vrot.lane.b32.xlu1 %v12524_v13, %s10533_s21 }
 0x265   :  { %4228 = vrot.lane.b32.xlu0 %v12528_v12, %s10533_s21 }
 0x266   :  { %v4125_v34 = vpop.permute.xlu1 %4124 }
 0x267   :  { %v4157_v38 = vpop.permute.xlu0 %4156  ;;  %v4251_v56 = vsel %vm620_vm0, %v4123_v48, %v4125_v34 }
 0x268   :  { %v4266_v23 = vsel %vm620_vm0, %v4155_v61, %v4157_v38  ;;  %4543 = vrot.lane.b32.xlu1 %v12524_v13, %s10537_s0  ;;  %v4375_v46 = vmax.f32 %v12246_v9, %v4251_v56 }
 0x269   :  { %4545 = vrot.lane.b32.xlu0 %v12528_v12, %s10537_s0  ;;  %v4391_v31 = vmax.f32 %v12256_v25, %v4266_v23 }
 0x26a   :  { %v3699_v26 = vpop.f32.mrb[16].mxu1  ;;  %v4442_v24 = vpop.permute.xlu1 %4441 }
 0x26b   :  { %v12542_v63 = vpop.f32.mrb[17].mxu1  ;;  %v4474_v30 = vpop.permute.xlu0 %4473  ;;  %v4568_v27 = vsel %vm4567_vm4, %v4440_v15, %v4442_v24 }
 0x26c   :  { %v4583_v2 = vsel %vm4567_vm4, %v4472_v53, %v4474_v30  ;;  %v4692_v41 = vmax.f32 %v4375_v46, %v4568_v27  ;;  %v12546_v60 = vpop.f32.mrb[18].mxu1  ;;  %v12557_v53 = vadd.f32 %v3699_v26, %v12240_v22 }
 0x26d   :  { %v4708_v62 = vmax.f32 %v4391_v31, %v4583_v2  ;;  %v3705_v51 = vpop.f32.mrb[19].mxu1 }
 0x26e   :  { %4756 = vst [vmem:[#allocation4] sm:$0xff] %v4692_v41  ;;  %v12548_v48 = vpop.permute.xlu1 %4186  ;;  %14916 = vst [vmem:[#allocation16_spill] sm:$0xff] %v12557_v53 }
 0x26f   :  { %4772 = vst [vmem:[#allocation4 + $0x80] sm:$0xff] %v4708_v62  ;;  %v12550_v9 = vpop.permute.xlu0 %4218  ;;  %v9798_v61 = vpack.i.bf16 %v4708_v62, %v4692_v41 }
 0x271   :  { %9799 = vrot.lane.b32.xlu0 %v9798_v61, %s10538_s14  ;;  %9794 = vrot.lane.b32.xlu1 %v9798_v61, %s10534_s24 }
 0x272   :  { %v3709_v25 = vpop.f32.mrb[20].mxu1  ;;  %v12554_v15 = vpop.permute.xlu1 %4188 }
 0x273   :  { %v12559_v56 = vpop.f32.mrb[21].mxu1  ;;  %v12561_v23 = vpop.permute.xlu0 %4220 }
 0x274   :  { %v12563_v46 = vpop.f32.mrb[22].mxu1 }
 0x275   :  { %v12565_v31 = vpop.f32.mrb[23].mxu1  ;;  %4142 = vrot.lane.b32.xlu0 %v12557_v53, %s10533_s21 }
 0x276   :  { %v12569_v27 = vpop.permute.xlu1 %4505 }
 0x277   :  { %v12571_v2 = vpop.permute.xlu0 %4537 }
 0x279   :  { %4459 = vrot.lane.b32.xlu0 %v12557_v53, %s10537_s0 }
 0x27a   :  { %v12575_v26 = vpop.permute.xlu1 %4128 }
 0x27b   :  { %v4127_v41 = vpop.permute.xlu0 %4126 }
 0x27c   :  { %v4252_v62 = vsel %vm620_vm0, %v4125_v34, %v4127_v41  ;;  %v4253_v61 = vsel %vm620_vm0, %v4127_v41, %v12575_v26 }
 0x27d   :  { %v4376_v5 = vmax.f32 %v12313_v45, %v4252_v62  ;;  %v4377_v16 = vmax.f32 %v12263_v3, %v4253_v61 }
 0x27e   :  { %v12580_v57 = vpop.permute.xlu1 %4445 }
 0x27f   :  { %v4444_v33 = vpop.permute.xlu0 %4443 }
 0x280   :  { %v4569_v36 = vsel %vm4567_vm4, %v4442_v24, %v4444_v33  ;;  %v4570_v53 = vsel %vm4567_vm4, %v4444_v33, %v12580_v57 }
 0x281   :  { %v4693_v6 = vmax.f32 %v4376_v5, %v4569_v36  ;;  %v4694_v13 = vmax.f32 %v4377_v16, %v4570_v53  ;;  %v12598_v5 = vadd.f32 %v3705_v51, %v12242_v50 }
 0x282   :  { %v4159_v12 = vpop.permute.xlu1 %4158 }
 0x283   :  { %4757 = vst [vmem:[#allocation4 + $0x8] sm:$0xff] %v4693_v6  ;;  %4758 = vst [vmem:[#allocation4 + $0x10] sm:$0xff] %v4694_v13  ;;  %v12587_v34 = vpop.permute.xlu0 %4160  ;;  %v4267_v41 = vsel %vm620_vm0, %v4157_v38, %v4159_v12  ;;  %v12590_v37 = vpack.i.bf16 %v4694_v13, %v4693_v6 }
 0x284   :  { %v4268_v3 = vsel %vm620_vm0, %v4159_v12, %v12587_v34  ;;  %v4392_v45 = vmax.f32 %v12320_v52, %v4267_v41  ;;  %14917 = vst [vmem:[#allocation17_spill] sm:$0xff] %v12598_v5 }
 0x285   :  { %9814 = vrot.lane.b32.xlu0 %v12590_v37, %s10538_s14  ;;  %v4393_v16 = vmax.f32 %v12276_v35, %v4268_v3 }
 0x286   :  { %v4476_v33 = vpop.permute.xlu1 %4475 }
 0x287   :  { %v12601_v36 = vpop.permute.xlu0 %4477  ;;  %v4584_v38 = vsel %vm4567_vm4, %v4474_v30, %v4476_v33 }
 0x288   :  { %v4585_v6 = vsel %vm4567_vm4, %v4476_v33, %v12601_v36  ;;  %v4709_v13 = vmax.f32 %v4392_v45, %v4584_v38 }
 0x289   :  { %v4710_v12 = vmax.f32 %v4393_v16, %v4585_v6  ;;  %4176 = vrot.lane.b32.xlu0 %v12598_v5, %s10533_s21  ;;  %v12629_v6 = vadd.f32 %v3709_v25, %v12278_v58 }
 0x28a   :  { %4773 = vst [vmem:[#allocation4 + $0x88] sm:$0xff] %v4709_v13  ;;  %v12608_v52 = vpop.permute.xlu1 %4192 }
 0x28b   :  { %4774 = vst [vmem:[#allocation4 + $0x90] sm:$0xff] %v4710_v12  ;;  %v4191_v24 = vpop.permute.xlu0 %4190  ;;  %v12620_v41 = vpack.i.bf16 %v4710_v12, %v4709_v13  ;;  %14918 = vst [vmem:[#allocation18_spill] sm:$0xff] %v12629_v6  ;;  %v10369_v13 = vld [vmem:[%s14856_s3 + $0x40] sm:$0xff]  }
 0x28c   :  { %v4282_v35 = vsel %vm620_vm0, %v12554_v15, %v4191_v24  ;;  %v4283_v51 = vsel %vm620_vm0, %v4191_v24, %v12608_v52  ;;  %v10370_v24 = vld [vmem:[%s14856_s3] sm:$0xff]   ;;  %9114 = vmatprep.subr.bf16.mxu0 %v10369_v13 }
 0x28d   :  { %4493 = vrot.lane.b32.xlu0 %v12598_v5, %s10537_s0  ;;  %v4408_v53 = vmax.f32 %v12352_v17, %v4282_v35  ;;  %v4409_v62 = vmax.f32 %v12309_v29, %v4283_v51  ;;  %9115 = vmatpush3.bf16.msra.mxu0 %v10370_v24  ;;  %v4281_v51 = vsel %vm620_vm0, %v12548_v48, %v12554_v15  ;;  %v10373_v24 = vld [vmem:[%s14856_s3 + $0x50] sm:$0xff]   ;;  %v10384_v5 = vld [vmem:[%s14856_s3 + $0x38] sm:$0xff]  }
 0x28e   :  { %v12616_v30 = vpop.permute.xlu1 %4509  ;;  %v4407_v15 = vmax.f32 %v12340_v10, %v4281_v51  ;;  %v10375_v51 = vld [vmem:[%s14856_s3 + $0x58] sm:$0xff]  }
 0x28f   :  { %v4508_v61 = vpop.permute.xlu0 %4507 }
 0x290   :  { %v4599_v3 = vsel %vm4567_vm4, %v12569_v27, %v4508_v61  ;;  %v4600_v45 = vsel %vm4567_vm4, %v4508_v61, %v12616_v30 }
 0x291   :  { %v4725_v33 = vmax.f32 %v4408_v53, %v4599_v3  ;;  %v4726_v16 = vmax.f32 %v4409_v62, %v4600_v45  ;;  %9819 = vrot.lane.b32.xlu0 %v12620_v41, %s10534_s24  ;;  %v10371_v3 = vld [vmem:[%s14856_s3 + $0x48] sm:$0xff]  }
 0x292   :  { %v4223_v38 = vpop.permute.xlu1 %4222  ;;  %9116 = vmatprep.subr.bf16.mxu0 %v10371_v3 }
 0x293   :  { %4789 = vst [vmem:[#allocation4 + $0x108] sm:$0xff] %v4725_v33  ;;  %4790 = vst [vmem:[#allocation4 + $0x110] sm:$0xff] %v4726_v16  ;;  %v12631_v29 = vpop.permute.xlu0 %4224  ;;  %v4297_v17 = vsel %vm620_vm0, %v12561_v23, %v4223_v38 }
 0x294   :  { %v4298_v12 = vsel %vm620_vm0, %v4223_v38, %v12631_v29  ;;  %v4424_v25 = vmax.f32 %v12356_v19, %v4297_v17  ;;  %v4296_v19 = vsel %vm620_vm0, %v12550_v9, %v12561_v23 }
 0x295   :  { %4206 = vrot.lane.b32.xlu0 %v12629_v6, %s10533_s21  ;;  %v4425_v53 = vmax.f32 %v12302_v1, %v4298_v12  ;;  %v10372_v1 = vld [vmem:[%s14856_s3 + $0x8] sm:$0xff]   ;;  %v4423_v9 = vmax.f32 %v12344_v47, %v4296_v19  ;;  %v12671_v12 = vpack.i.bf16 %v4726_v16, %v4725_v33  ;;  %v12687_v33 = vadd.f32 %v12565_v31, %v12273_v8 }
 0x296   :  { %v4540_v35 = vpop.permute.xlu1 %4539  ;;  %9117 = vmatpush3.bf16.msra.mxu0 %v10372_v1  ;;  %v12712_v19 = vadd.f32 %v12542_v63, %v12240_v22  ;;  %v10378_v63 = vld [vmem:[%s14856_s3 + $0x20] sm:$0xff]  }
 0x297   :  { %v12650_v62 = vpop.permute.xlu0 %4541  ;;  %v4614_v61 = vsel %vm4567_vm4, %v12571_v2, %v4540_v35  ;;  %9118 = vmatprep.subr.bf16.mxu0 %v10373_v24  ;;  %14919 = vst [vmem:[#allocation19_spill] sm:$0xff] %v12687_v33 }
 0x298   :  { %v4615_v45 = vsel %vm4567_vm4, %v4540_v35, %v12650_v62  ;;  %v4741_v38 = vmax.f32 %v4424_v25, %v4614_v61  ;;  %v10374_v35 = vld [vmem:[%s14856_s3 + $0x10] sm:$0xff]   ;;  %v10376_v61 = vld [vmem:[%s14856_s3 + $0x18] sm:$0xff]   ;;  %14921 = vst [vmem:[#allocation21_spill] sm:$0xff] %v12712_v19 }
 0x299   :  { %v4742_v48 = vmax.f32 %v4425_v53, %v4615_v45  ;;  %4523 = vrot.lane.b32.xlu0 %v12629_v6, %s10537_s0 }
 0x29a   :  { %4805 = vst [vmem:[#allocation4 + $0x188] sm:$0xff] %v4741_v38  ;;  %v4504_v17 = vpop.permute.xlu1 %4503  ;;  %9119 = vmatpush3.bf16.msra.mxu0 %v10374_v35  ;;  %v10379_v35 = vld [vmem:[%s14856_s3 + $0x68] sm:$0xff]  }
 0x29b   :  { %4806 = vst [vmem:[#allocation4 + $0x190] sm:$0xff] %v4742_v48  ;;  %v4536_v23 = vpop.permute.xlu0 %4535  ;;  %v4598_v13 = vsel %vm4567_vm4, %v4504_v17, %v12569_v27  ;;  %9120 = vmatprep.subr.bf16.mxu0 %v10375_v51  ;;  %v10377_v17 = vld [vmem:[%s14856_s3 + $0x60] sm:$0xff]   ;;  %v10380_v51 = vld [vmem:[%s14856_s3 + $0x28] sm:$0xff]  }
 0x29c   :  { %v4613_v25 = vsel %vm4567_vm4, %v4536_v23, %v12571_v2  ;;  %v4724_v10 = vmax.f32 %v4407_v15, %v4598_v13 }
 0x29d   :  { %v4740_v47 = vmax.f32 %v4423_v9, %v4613_v25  ;;  %9834 = vrot.lane.b32.xlu0 %v12671_v12, %s10538_s14 }
 0x29e   :  { %4788 = vst [vmem:[#allocation4 + $0x100] sm:$0xff] %v4724_v10  ;;  %v12683_v27 = vpop.permute.xlu1 %4134  ;;  %9121 = vmatpush3.bf16.msra.mxu0 %v10376_v61  ;;  %v12768_v61 = vadd.f32 %v12546_v60, %v12242_v50  ;;  %v10382_v60 = vld [vmem:[%s14856_s3 + $0x30] sm:$0xff]  }
 0x29f   :  { %4804 = vst [vmem:[#allocation4 + $0x180] sm:$0xff] %v4740_v47  ;;  %v12689_v2 = vpop.permute.xlu0 %4136  ;;  %v12691_v16 = vpack.i.bf16 %v4740_v47, %v4724_v10  ;;  %9122 = vmatprep.subr.bf16.mxu0 %v10377_v17  ;;  %v12743_v10 = vpack.i.bf16 %v4742_v48, %v4741_v38 }
 0x2a0   :  { %14920 = vst [vmem:[#allocation20_spill] sm:$0xff] %v12689_v2  ;;  %v4257_v53 = vsel %vm620_vm0, %v12683_v27, %v12689_v2 }
 0x2a1   :  { %4240 = vrot.lane.b32.xlu0 %v12687_v33, %s10533_s21  ;;  %9804 = vrot.lane.b32.xlu1 %v12691_v16, %s10534_s24  ;;  %v4381_v45 = vmax.f32 %v12403_v44, %v4257_v53  ;;  %v12764_v53 = vadd.f32 %v12486_v54, %v12242_v50 }
 0x2a2   :  { %v12706_v31 = vpop.f32.mrb[32].mxu0  ;;  %v12708_v3 = vpop.permute.xlu1 %4451  ;;  %9123 = vmatpush3.bf16.msra.mxu0 %v10378_v63  ;;  %v10381_v63 = vld [vmem:[%s14856_s3 + $0x70] sm:$0xff]  }
 0x2a3   :  { %v12715_v1 = vpop.f32.mrb[33].mxu0  ;;  %v12717_v15 = vpop.permute.xlu0 %4453  ;;  %9124 = vmatprep.subr.bf16.mxu0 %v10379_v35  ;;  %14923 = vst [vmem:[#allocation23_spill] sm:$0xff] %v12764_v53 }
 0x2a4   :  { %14922 = vst [vmem:[#allocation22_spill] sm:$0xff] %v12717_v15  ;;  %v4574_v9 = vsel %vm4567_vm4, %v12708_v3, %v12717_v15  ;;  %v12725_v23 = vpop.f32.mrb[34].mxu0 }
 0x2a5   :  { %v12730_v44 = vmax.f32 %v4381_v45, %v4574_v9  ;;  %v12732_v13 = vpop.f32.mrb[35].mxu0  ;;  %4557 = vrot.lane.b32.xlu0 %v12687_v33, %s10537_s0  ;;  %4144 = vrot.lane.b32.xlu1 %v12712_v19, %s10533_s21 }
 0x2a6   :  { %v12738_v24 = vpop.permute.xlu1 %4166  ;;  %9125 = vmatpush3.bf16.msra.mxu0 %v10380_v51 }
 0x2a7   :  { %4762 = vst [vmem:[#allocation4 + $0x30] sm:$0xff] %v12730_v44  ;;  %v12741_v25 = vpop.permute.xlu0 %4168  ;;  %9126 = vmatprep.subr.bf16.mxu0 %v10381_v63 }
 0x2a8   :  { %v4272_v47 = vsel %vm620_vm0, %v12738_v24, %v12741_v25 }
 0x2a9   :  { %9839 = vrot.lane.b32.xlu0 %v12743_v10, %s10534_s24  ;;  %4461 = vrot.lane.b32.xlu1 %v12712_v19, %s10537_s0  ;;  %v4397_v45 = vmax.f32 %v12417_v28, %v4272_v47 }
 0x2aa   :  { %v12758_v38 = vpop.f32.mrb[36].mxu0  ;;  %v12760_v48 = vpop.permute.xlu1 %4483  ;;  %9127 = vmatpush3.bf16.msra.mxu0 %v10382_v60  ;;  %v12816_v60 = vadd.f32 %v12488_v42, %v12242_v50 }
 0x2ab   :  { %v12771_v17 = vpop.f32.mrb[37].mxu0  ;;  %v12773_v9 = vpop.permute.xlu0 %4485 }
 0x2ac   :  { %14924 = vst [vmem:[#allocation24_spill] sm:$0xff] %v12773_v9  ;;  %v4589_v54 = vsel %vm4567_vm4, %v12760_v48, %v12773_v9  ;;  %v12781_v35 = vpop.f32.mrb[38].mxu0  ;;  %14926 = vst [vmem:[#allocation26_spill] sm:$0xff] %v12816_v60 }
 0x2ad   :  { %v12786_v28 = vmax.f32 %v4397_v45, %v4589_v54  ;;  %v12788_v47 = vpop.f32.mrb[39].mxu0  ;;  %4170 = vrot.lane.b32.xlu0 %v12764_v53, %s10533_s21  ;;  %4174 = vrot.lane.b32.xlu1 %v12768_v61, %s10533_s21  ;;  %v10383_v45 = vld [vmem:[%s14856_s3 + $0x78] sm:$0xff]  }
 0x2ae   :  { %v12794_v51 = vpop.permute.xlu1 %4198  ;;  %9128 = vmatprep.subr.bf16.mxu0 %v10383_v45 }
 0x2af   :  { %4778 = vst [vmem:[#allocation4 + $0xb0] sm:$0xff] %v12786_v28  ;;  %v12797_v33 = vpop.permute.xlu0 %4200  ;;  %9129 = vmatpush3.bf16.msra.mxu0 %v10384_v5 }
 0x2b0   :  { %14925 = vst [vmem:[#allocation25_spill] sm:$0xff] %v12797_v33  ;;  %v4287_v54 = vsel %vm620_vm0, %v12794_v51, %v12797_v33 }
 0x2b1   :  { %4487 = vrot.lane.b32.xlu0 %v12764_v53, %s10537_s0  ;;  %4491 = vrot.lane.b32.xlu1 %v12768_v61, %s10537_s0  ;;  %v4413_v19 = vmax.f32 %v12431_v59, %v4287_v54 }
 0x2b2   :  { %v12812_v63 = vpop.permute.xlu1 %4515 }
 0x2b3   :  { %v12819_v33 = vpop.permute.xlu0 %4517 }
 0x2b4   :  { %14927 = vst [vmem:[#allocation27_spill] sm:$0xff] %v12819_v33  ;;  %v4604_v15 = vsel %vm4567_vm4, %v12812_v63, %v12819_v33 }
 0x2b5   :  { %v4730_v2 = vmax.f32 %v4413_v19, %v4604_v15  ;;  %4172 = vrot.lane.b32.xlu0 %v12816_v60, %s10533_s21  ;;  %9809 = vrot.lane.b32.xlu1 %v12590_v37, %s10534_s24  ;;  %v12845_v37 = vadd.f32 %v12510_v49, %v12273_v8 }
 0x2b6   :  { %v12828_v45 = vpop.permute.xlu1 %4232 }
 0x2b7   :  { %14928 = vst [vmem:[#allocation28_spill] sm:$0xff] %v12828_v45  ;;  %4794 = vst [vmem:[#allocation4 + $0x130] sm:$0xff] %v4730_v2  ;;  %v12830_v42 = vpop.permute.xlu0 %4230  ;;  %v12849_v2 = vadd.f32 %v12559_v56, %v12278_v58 }
 0x2b8   :  { %v4302_v59 = vsel %vm620_vm0, %v12830_v42, %v12828_v45  ;;  %14930 = vst [vmem:[#allocation30_spill] sm:$0xff] %v12845_v37 }
 0x2b9   :  { %4489 = vrot.lane.b32.xlu0 %v12816_v60, %s10537_s0  ;;  %9824 = vrot.lane.b32.xlu1 %v12620_v41, %s10538_s14  ;;  %14931 = vst [vmem:[#allocation31_spill] sm:$0xff] %v12849_v2  ;;  %v4429_v15 = vmax.f32 %v12448_v43, %v4302_v59 }
 0x2ba   :  { %v12839_v5 = vpop.f32.mrb[24].mxu1  ;;  %v12841_v19 = vpop.permute.xlu1 %4549 }
 0x2bb   :  { %14929 = vst [vmem:[#allocation29_spill] sm:$0xff] %v12841_v19  ;;  %v12852_v54 = vpop.f32.mrb[25].mxu1  ;;  %v12854_v33 = vpop.permute.xlu0 %4547 }
 0x2bc   :  { %v4619_v41 = vsel %vm4567_vm4, %v12854_v33, %v12841_v19  ;;  %v12859_v6 = vpop.f32.mrb[26].mxu1 }
 0x2bd   :  { %v4746_v45 = vmax.f32 %v4429_v15, %v4619_v41  ;;  %v12861_v60 = vpop.f32.mrb[27].mxu1  ;;  %4234 = vrot.lane.b32.xlu0 %v12845_v37, %s10533_s21  ;;  %4208 = vrot.lane.b32.xlu1 %v12849_v2, %s10533_s21  ;;  %v12878_v15 = vadd.f32 %v12512_v39, %v12273_v8 }
 0x2be   :  { %v4131_v43 = vpop.permute.xlu1 %4130 }
 0x2bf   :  { %4810 = vst [vmem:[#allocation4 + $0x1b0] sm:$0xff] %v4746_v45  ;;  %v4133_v49 = vpop.permute.xlu0 %4132  ;;  %v4254_v56 = vsel %vm620_vm0, %v12575_v26, %v4131_v43 }
 0x2c0   :  { %v4256_v59 = vsel %vm620_vm0, %v4133_v49, %v12683_v27  ;;  %v4255_v19 = vsel %vm620_vm0, %v4131_v43, %v4133_v49  ;;  %v4378_v45 = vmax.f32 %v12266_v7, %v4254_v56  ;;  %v12885_v27 = vadd.f32 %v12563_v46, %v12273_v8 }
 0x2c1   :  { %4551 = vrot.lane.b32.xlu0 %v12845_v37, %s10537_s0  ;;  %4525 = vrot.lane.b32.xlu1 %v12849_v2, %s10537_s0  ;;  %v4380_v43 = vmax.f32 %v12464_v21, %v4256_v59  ;;  %v4379_v49 = vmax.f32 %v12460_v32, %v4255_v19 }
 0x2c2   :  { %v12881_v41 = vpop.f32.mrb[28].mxu1  ;;  %v4448_v26 = vpop.permute.xlu1 %4447 }
 0x2c3   :  { %v12889_v37 = vpop.f32.mrb[29].mxu1  ;;  %v4450_v2 = vpop.permute.xlu0 %4449  ;;  %v4571_v39 = vsel %vm4567_vm4, %v12580_v57, %v4448_v26 }
 0x2c4   :  { %v4573_v7 = vsel %vm4567_vm4, %v4450_v2, %v12708_v3  ;;  %v4572_v56 = vsel %vm4567_vm4, %v4448_v26, %v4450_v2  ;;  %v12896_v53 = vmax.f32 %v4378_v45, %v4571_v39  ;;  %v12898_v9 = vpop.f32.mrb[30].mxu1 }
 0x2c5   :  { %v12900_v46 = vmax.f32 %v4380_v43, %v4573_v7  ;;  %v12902_v21 = vmax.f32 %v4379_v49, %v4572_v56  ;;  %v12904_v32 = vpop.f32.mrb[31].mxu1  ;;  %4236 = vrot.lane.b32.xlu0 %v12878_v15, %s10533_s21  ;;  %4238 = vrot.lane.b32.xlu1 %v12885_v27, %s10533_s21 }
 0x2c6   :  { %4759 = vst [vmem:[#allocation4 + $0x18] sm:$0xff] %v12896_v53  ;;  %v4163_v57 = vpop.permute.xlu1 %4162 }
 0x2c7   :  { %4761 = vst [vmem:[#allocation4 + $0x28] sm:$0xff] %v12900_v46  ;;  %4760 = vst [vmem:[#allocation4 + $0x20] sm:$0xff] %v12902_v21  ;;  %v4165_v3 = vpop.permute.xlu0 %4164  ;;  %v4269_v19 = vsel %vm620_vm0, %v12587_v34, %v4163_v57 }
 0x2c8   :  { %v4271_v2 = vsel %vm620_vm0, %v4165_v3, %v12738_v24  ;;  %v4270_v59 = vsel %vm620_vm0, %v4163_v57, %v4165_v3  ;;  %v4394_v45 = vmax.f32 %v12269_v18, %v4269_v19 }
 0x2c9   :  { %4553 = vrot.lane.b32.xlu0 %v12878_v15, %s10537_s0  ;;  %4555 = vrot.lane.b32.xlu1 %v12885_v27, %s10537_s0  ;;  %v4396_v43 = vmax.f32 %v12484_v14, %v4271_v2  ;;  %v4395_v49 = vmax.f32 %v12478_v55, %v4270_v59  ;;  %v12941_v55 = vadd.f32 %v12839_v5, %v12240_v22 }
 0x2ca   :  { %v4480_v26 = vpop.permute.xlu1 %4479 }
 0x2cb   :  { %v4482_v39 = vpop.permute.xlu0 %4481  ;;  %v4586_v34 = vsel %vm4567_vm4, %v12601_v36, %v4480_v26 }
 0x2cc   :  { %v4588_v24 = vsel %vm4567_vm4, %v4482_v39, %v12760_v48  ;;  %v4587_v7 = vsel %vm4567_vm4, %v4480_v26, %v4482_v39  ;;  %v12930_v56 = vmax.f32 %v4394_v45, %v4586_v34  ;;  %v14932_v39 = vld [vmem:[#allocation7_spill] sm:$0xff] }
 0x2cd   :  { %v12932_v57 = vmax.f32 %v4396_v43, %v4588_v24  ;;  %v4712_v3 = vmax.f32 %v4395_v49, %v4587_v7  ;;  %9849 = vrot.lane.b32.xlu0 %v12691_v16, %s10538_s14  ;;  %9829 = vrot.lane.b32.xlu1 %v12671_v12, %s10534_s24  ;;  %v12955_v12 = vadd.f32 %v12474_v0, %v12240_v22 }
 0x2ce   :  { %4775 = vst [vmem:[#allocation4 + $0x98] sm:$0xff] %v12930_v56  ;;  %v4195_v18 = vpop.permute.xlu1 %4194 }
 0x2cf   :  { %4777 = vst [vmem:[#allocation4 + $0xa8] sm:$0xff] %v12932_v57  ;;  %4776 = vst [vmem:[#allocation4 + $0xa0] sm:$0xff] %v4712_v3  ;;  %v4197_v14 = vpop.permute.xlu0 %4196  ;;  %v4284_v36 = vsel %vm620_vm0, %v12608_v52, %v4195_v18  ;;  %v12960_v52 = vadd.f32 %v12852_v54, %v12240_v22 }
 0x2d0   :  { %v4286_v16 = vsel %vm620_vm0, %v4197_v14, %v12794_v51  ;;  %v4285_v48 = vsel %vm620_vm0, %v4195_v18, %v4197_v14  ;;  %v4410_v5 = vmax.f32 %v12316_v11, %v4284_v36  ;;  %v14934_v18 = vld [vmem:[#allocation14_spill] sm:$0xff] }
 0x2d1   :  { %4467 = vrot.lane.b32.xlu0 %v12941_v55, %s10537_s0  ;;  %9844 = vrot.lane.b32.xlu1 %v12743_v10, %s10538_s14  ;;  %v4412_v51 = vmax.f32 %v12508_v20, %v4286_v16  ;;  %v4411_v2 = vmax.f32 %v12502_v40, %v4285_v48  ;;  %v12982_v20 = vadd.f32 %v12859_v6, %v12242_v50 }
 0x2d2   :  { %v4512_v19 = vpop.permute.xlu1 %4511  ;;  %v12997_v6 = vadd.f32 %v12480_v4, %v12240_v22  ;;  %v10385_v4 = vld [vmem:[%s14856_s3 + $0xc0] sm:$0xff]  }
 0x2d3   :  { %v4514_v59 = vpop.permute.xlu0 %4513  ;;  %v4601_v45 = vsel %vm4567_vm4, %v12616_v30, %v4512_v19  ;;  %9142 = vmatprep.subr.bf16.mxu1 %v10385_v4  ;;  %v10400_v4 = vld [vmem:[%s14856_s3 + $0xb8] sm:$0xff]  }
 0x2d4   :  { %v4603_v10 = vsel %vm4567_vm4, %v4514_v59, %v12812_v63  ;;  %v4602_v0 = vsel %vm4567_vm4, %v4512_v19, %v4514_v59  ;;  %v12969_v26 = vmax.f32 %v4410_v5, %v4601_v45  ;;  %v10388_v59 = vld [vmem:[%s14856_s3 + $0x88] sm:$0xff]   ;;  %v14935_v45 = vld [vmem:[#allocation12_spill] sm:$0xff] }
 0x2d5   :  { %v12971_v11 = vmax.f32 %v4412_v51, %v4603_v10  ;;  %v12973_v43 = vmax.f32 %v4411_v2, %v4602_v0  ;;  %4152 = vrot.lane.b32.xlu0 %v12960_v52, %s10533_s21  ;;  %4138 = vrot.lane.b32.xlu1 %v12955_v12, %s10533_s21  ;;  %v13036_v10 = vadd.f32 %v14935_v45, %v12278_v58 }
 0x2d6   :  { %4791 = vst [vmem:[#allocation4 + $0x118] sm:$0xff] %v12969_v26  ;;  %v4227_v40 = vpop.permute.xlu1 %4226 }
 0x2d7   :  { %4793 = vst [vmem:[#allocation4 + $0x128] sm:$0xff] %v12971_v11  ;;  %4792 = vst [vmem:[#allocation4 + $0x120] sm:$0xff] %v12973_v43  ;;  %v4229_v30 = vpop.permute.xlu0 %4228  ;;  %v4299_v63 = vsel %vm620_vm0, %v12631_v29, %v4227_v40  ;;  %v13002_v29 = vadd.f32 %v12861_v60, %v12242_v50  ;;  %v10386_v60 = vld [vmem:[%s14856_s3 + $0x80] sm:$0xff]  }
 0x2d8   :  { %v4301_v54 = vsel %vm620_vm0, %v4229_v30, %v12830_v42  ;;  %v4300_v49 = vsel %vm620_vm0, %v4227_v40, %v4229_v30  ;;  %v4426_v34 = vmax.f32 %v14932_v39, %v4299_v63  ;;  %v14933_v42 = vld [vmem:[#allocation15_spill] sm:$0xff]  ;;  %9143 = vmatpush3.bf16.msra.mxu1 %v10386_v60  ;;  %v13051_v40 = vpack.i.bf16 %v12786_v28, %v12932_v57  ;;  %v10391_v30 = vld [vmem:[%s14856_s3 + $0xd8] sm:$0xff]   ;;  %v10394_v39 = vld [vmem:[%s14856_s3 + $0xa0] sm:$0xff]  }
 0x2d9   :  { %4499 = vrot.lane.b32.xlu0 %v12982_v20, %s10537_s0  ;;  %4455 = vrot.lane.b32.xlu1 %v12955_v12, %s10537_s0  ;;  %v4428_v7 = vmax.f32 %v14933_v42, %v4301_v54  ;;  %v4427_v14 = vmax.f32 %v14934_v18, %v4300_v49  ;;  %v10392_v63 = vld [vmem:[%s14856_s3 + $0x98] sm:$0xff]   ;;  %v14936_v54 = vld [vmem:[#allocation13_spill] sm:$0xff]  ;;  %v13069_v57 = vadd.f32 %v12889_v37, %v12278_v58  ;;  %v10395_v37 = vld [vmem:[%s14856_s3 + $0xe8] sm:$0xff]  }
 0x2da   :  { %v4544_v24 = vpop.permute.xlu1 %4543  ;;  %v13065_v28 = vadd.f32 %v14936_v54, %v12278_v58  ;;  %v10393_v49 = vld [vmem:[%s14856_s3 + $0xe0] sm:$0xff]   ;;  %v13095_v42 = vadd.f32 %v12904_v32, %v12273_v8  ;;  %v10397_v18 = vld [vmem:[%s14856_s3 + $0xf0] sm:$0xff]   ;;  %v13136_v60 = vadd.f32 %v12715_v1, %v12240_v22 }
 0x2db   :  { %v4546_v36 = vpop.permute.xlu0 %4545  ;;  %v4616_v16 = vsel %vm4567_vm4, %v12650_v62, %v4544_v24  ;;  %v9868_v62 = vpack.i.bf16 %v4712_v3, %v12930_v56  ;;  %v10389_v56 = vld [vmem:[%s14856_s3 + $0xd0] sm:$0xff]  }
 0x2dc   :  { %v4618_v48 = vsel %vm4567_vm4, %v4546_v36, %v12854_v33  ;;  %v4617_v5 = vsel %vm4567_vm4, %v4544_v24, %v4546_v36  ;;  %v4743_v19 = vmax.f32 %v4426_v34, %v4616_v16  ;;  %v10387_v33 = vld [vmem:[%s14856_s3 + $0xc8] sm:$0xff]   ;;  %v10390_v3 = vld [vmem:[%s14856_s3 + $0x90] sm:$0xff]   ;;  %v10399_v16 = vld [vmem:[%s14856_s3 + $0xf8] sm:$0xff]   ;;  %14939 = vst [vmem:[#allocation14_spill] sm:$0xff] %v13136_v60 }
 0x2dd   :  { %v13017_v51 = vmax.f32 %v4428_v7, %v4618_v48  ;;  %v4744_v2 = vmax.f32 %v4427_v14, %v4617_v5  ;;  %4184 = vrot.lane.b32.xlu0 %v13002_v29, %s10533_s21  ;;  %4140 = vrot.lane.b32.xlu1 %v12997_v6, %s10533_s21  ;;  %v10396_v24 = vld [vmem:[%s14856_s3 + $0xa8] sm:$0xff]   ;;  %v10398_v14 = vld [vmem:[%s14856_s3 + $0xb0] sm:$0xff]   ;;  %v13125_v48 = vadd.f32 %v12706_v31, %v12240_v22 }
 0x2de   :  { %4807 = vst [vmem:[#allocation4 + $0x198] sm:$0xff] %v4743_v19  ;;  %9144 = vmatprep.subr.bf16.mxu1 %v10387_v33  ;;  %v13145_v31 = vadd.f32 %v12725_v23, %v12242_v50  ;;  %v13155_v22 = vadd.f32 %v12732_v13, %v12242_v50  ;;  %v13169_v23 = vadd.f32 %v12758_v38, %v12278_v58 }
 0x2df   :  { %4809 = vst [vmem:[#allocation4 + $0x1a8] sm:$0xff] %v13017_v51  ;;  %4808 = vst [vmem:[#allocation4 + $0x1a0] sm:$0xff] %v4744_v2  ;;  %9145 = vmatpush3.bf16.msra.mxu1 %v10388_v59  ;;  %v13111_v36 = vpack.i.bf16 %v4744_v2, %v4743_v19  ;;  %v9853_v19 = vpack.i.bf16 %v12902_v21, %v12896_v53  ;;  %v13161_v21 = vpack.i.bf16 %v12730_v44, %v12900_v46 }
 0x2e0   :  { %9146 = vmatprep.subr.bf16.mxu1 %v10389_v56  ;;  %14937 = vst [vmem:[#allocation7_spill] sm:$0xff] %v13125_v48  ;;  %v13179_v50 = vadd.f32 %v12771_v17, %v12278_v58  ;;  %v13183_v44 = vadd.f32 %v12881_v41, %v12278_v58  ;;  %v13195_v46 = vadd.f32 %v12781_v35, %v12273_v8 }
 0x2e1   :  { %4457 = vrot.lane.b32.xlu1 %v12997_v6, %s10537_s0  ;;  %9869 = vrot.lane.b32.xlu0 %v9868_v62, %s10534_s24  ;;  %v13207_v58 = vadd.f32 %v12788_v47, %v12273_v8  ;;  %v13211_v41 = vadd.f32 %v12898_v9, %v12273_v8  ;;  %v14947_v47 = vld [vmem:[#allocation16_spill] sm:$0xff]  ;;  %v13231_v9 = vpack.i.bf16 %v12973_v43, %v12969_v26  ;;  %v10401_v26 = vld [vmem:[%s14856_s3 + $0x140] sm:$0xff]  }
 0x2e2   :  { %14942 = vst [vmem:[#allocation32_spill] sm:$0xff] %v13195_v46  ;;  %9170 = vmatprep.subr.bf16.mxu0 %v10401_v26 }
 0x2e3   :  { %v13047_v0 = vpop.permute.xlu0 %9799  ;;  %9147 = vmatpush3.bf16.msra.mxu1 %v10390_v3  ;;  %v13185_v13 = vpop.permute.xlu1 %9794  ;;  %14943 = vst [vmem:[#allocation33_spill] sm:$0xff] %v13207_v58  ;;  %14944 = vst [vmem:[#allocation34_spill] sm:$0xff] %v13211_v41 }
 0x2e4   :  { %9148 = vmatprep.subr.bf16.mxu1 %v10391_v30 }
 0x2e5   :  { %4202 = vrot.lane.b32.xlu1 %v13036_v10, %s10533_s21  ;;  %9874 = vrot.lane.b32.xlu0 %v9868_v62, %s10538_s14 }
 0x2e7   :  { %9149 = vmatpush3.bf16.msra.mxu1 %v10392_v63  ;;  %v13077_v34 = vpop.permute.xlu0 %4142 }
 0x2e8   :  { %9150 = vmatprep.subr.bf16.mxu1 %v10393_v49 }
 0x2e9   :  { %4519 = vrot.lane.b32.xlu1 %v13036_v10, %s10537_s0  ;;  %9879 = vrot.lane.b32.xlu0 %v13051_v40, %s10534_s24 }
 0x2eb   :  { %9151 = vmatpush3.bf16.msra.mxu1 %v10394_v39  ;;  %v13097_v7 = vpop.permute.xlu0 %4459 }
 0x2ec   :  { %9152 = vmatprep.subr.bf16.mxu1 %v10395_v37  ;;  %v14950_v37 = vld [vmem:[#allocation9_spill] sm:$0xff] }
 0x2ed   :  { %4204 = vrot.lane.b32.xlu1 %v13065_v28, %s10533_s21  ;;  %4216 = vrot.lane.b32.xlu0 %v13069_v57, %s10533_s21 }
 0x2ef   :  { %9153 = vmatpush3.bf16.msra.mxu1 %v10396_v24 }
 0x2f0   :  { %9154 = vmatprep.subr.bf16.mxu1 %v10397_v18 }
 0x2f1   :  { %4521 = vrot.lane.b32.xlu1 %v13065_v28, %s10537_s0  ;;  %4533 = vrot.lane.b32.xlu0 %v13069_v57, %s10537_s0 }
 0x2f3   :  { %9155 = vmatpush3.bf16.msra.mxu1 %v10398_v14 }
 0x2f4   :  { %9156 = vmatprep.subr.bf16.mxu1 %v10399_v16 }
 0x2f5   :  { %4150 = vrot.lane.b32.xlu1 %v12941_v55, %s10533_s21  ;;  %4248 = vrot.lane.b32.xlu0 %v13095_v42, %s10533_s21 }
 0x2f7   :  { %v13109_v32 = vpop.permute.xlu0 %9814  ;;  %9157 = vmatpush3.bf16.msra.mxu1 %v10400_v4  ;;  %v14951_v4 = vld [vmem:[#allocation24_spill] sm:$0xff] }
 0x2f9   :  { %4469 = vrot.lane.b32.xlu1 %v12960_v52, %s10537_s0  ;;  %9889 = vrot.lane.b32.xlu0 %v13111_v36, %s10534_s24 }
 0x2fb   :  { %v13127_v5 = vpop.permute.xlu0 %4176 }
 0x2fc   :  { %14938 = vst [vmem:[#allocation15_spill] sm:$0xff] %v13127_v5 }
 0x2fd   :  { %9854 = vrot.lane.b32.xlu1 %v9853_v19, %s10534_s24  ;;  %4463 = vrot.lane.b32.xlu0 %v13125_v48, %s10537_s0 }
 0x2ff   :  { %v13138_v2 = vpop.permute.xlu0 %4493 }
 0x300   :  { %14940 = vst [vmem:[#allocation12_spill] sm:$0xff] %v13138_v2 }
 0x301   :  { %9859 = vrot.lane.b32.xlu1 %v9853_v19, %s10538_s14  ;;  %4148 = vrot.lane.b32.xlu0 %v13136_v60, %s10533_s21 }
 0x303   :  { %v13147_v53 = vpop.permute.xlu0 %9819 }
 0x305   :  { %4182 = vrot.lane.b32.xlu1 %v12982_v20, %s10533_s21  ;;  %4495 = vrot.lane.b32.xlu0 %v13145_v31, %s10537_s0 }
 0x307   :  { %v13157_v1 = vpop.permute.xlu0 %4206 }
 0x309   :  { %9864 = vrot.lane.b32.xlu1 %v13161_v21, %s10534_s24  ;;  %4180 = vrot.lane.b32.xlu0 %v13155_v22, %s10533_s21 }
 0x30b   :  { %v13171_v62 = vpop.permute.xlu0 %4523 }
 0x30d   :  { %4501 = vrot.lane.b32.xlu1 %v13002_v29, %s10537_s0  ;;  %4527 = vrot.lane.b32.xlu0 %v13169_v23, %s10537_s0 }
 0x30f   :  { %v13187_v38 = vpop.permute.xlu0 %9834 }
 0x310   :  { %14941 = vst [vmem:[#allocation13_spill] sm:$0xff] %v13187_v38 }
 0x311   :  { %4214 = vrot.lane.b32.xlu1 %v13183_v44, %s10533_s21  ;;  %4212 = vrot.lane.b32.xlu0 %v13179_v50, %s10533_s21 }
 0x313   :  { %v13197_v17 = vpop.permute.xlu0 %4240  ;;  %v13199_v33 = vpop.permute.xlu1 %9804 }
 0x315   :  { %4531 = vrot.lane.b32.xlu1 %v13183_v44, %s10537_s0  ;;  %4559 = vrot.lane.b32.xlu0 %v13195_v46, %s10537_s0 }
 0x317   :  { %v13213_v35 = vpop.permute.xlu0 %4557  ;;  %v13215_v59 = vpop.permute.xlu1 %4144 }
 0x318   :  { %14945 = vst [vmem:[#allocation35_spill] sm:$0xff] %v13213_v35  ;;  %14946 = vst [vmem:[#allocation36_spill] sm:$0xff] %v13215_v59  ;;  %v4261_v45 = vsel %vm620_vm0, %v13077_v34, %v13215_v59 }
 0x319   :  { %4246 = vrot.lane.b32.xlu1 %v13211_v41, %s10533_s21  ;;  %4244 = vrot.lane.b32.xlu0 %v13207_v58, %s10533_s21  ;;  %v4385_v56 = vmax.f32 %v14947_v47, %v4261_v45 }
 0x31b   :  { %v13225_v3 = vpop.permute.xlu0 %9839  ;;  %v13227_v8 = vpop.permute.xlu1 %4461 }
 0x31c   :  { %14948 = vst [vmem:[#allocation16_spill] sm:$0xff] %v13225_v3  ;;  %14949 = vst [vmem:[#allocation37_spill] sm:$0xff] %v13227_v8  ;;  %v4578_v30 = vsel %vm4567_vm4, %v13097_v7, %v13227_v8 }
 0x31d   :  { %v13236_v63 = vmax.f32 %v4385_v56, %v4578_v30  ;;  %9884 = vrot.lane.b32.xlu1 %v13231_v9, %s10534_s24  ;;  %4565 = vrot.lane.b32.xlu0 %v13095_v42, %s10537_s0  ;;  %v9797_v56 = vunpack.i.h.bf16 %v13185_v13  ;;  %v9796_v30 = vunpack.i.l.bf16 %v13185_v13  ;;  %v9802_v13 = vunpack.i.h.bf16 %v13047_v0 }
 0x31f   :  { %4766 = vst [vmem:[#allocation4 + $0x50] sm:$0xff] %v13236_v63  ;;  %v4171_v54 = vpop.permute.xlu0 %4170  ;;  %v4175_v49 = vpop.permute.xlu1 %4174 }
 0x320   :  { %v4273_v43 = vsel %vm620_vm0, %v12741_v25, %v4171_v54  ;;  %v4276_v39 = vsel %vm620_vm0, %v4175_v49, %v13127_v5  ;;  %v10507_v5 = vld [vmem:[#allocation4] sm:$0xff] }
 0x321   :  { %4563 = vrot.lane.b32.xlu1 %v13211_v41, %s10537_s0  ;;  %9899 = vrot.lane.b32.xlu0 %v13051_v40, %s10538_s14  ;;  %v4398_v24 = vmax.f32 %v14950_v37, %v4273_v43  ;;  %v4401_v18 = vmax.f32 %v12768_v61, %v4276_v39  ;;  %v14895_v61 = vunpack.i.h.bf16 %v13147_v53  ;;  %v9821_v40 = vunpack.i.l.bf16 %v13147_v53 }
 0x322   :  { %v13277_v39 = vpack.i.bf16 %v13017_v51, %v12971_v11 }
 0x323   :  { %v4488_v14 = vpop.permute.xlu0 %4487  ;;  %v4492_v16 = vpop.permute.xlu1 %4491  ;;  %v4956_v11 = vsel %vm1785_vm1, %v9797_v56, %v9821_v40  ;;  %v4957_v51 = vsel %vm1785_vm1, %v9821_v40, %v14895_v61  ;;  %v10508_v56 = vld [vmem:[#allocation4 + $0x8] sm:$0xff] }
 0x324   :  { %v4590_v19 = vsel %vm4567_vm4, %v14951_v4, %v4488_v14  ;;  %v4593_v25 = vsel %vm4567_vm4, %v4492_v16, %v13138_v2  ;;  %v9801_v4 = vunpack.i.l.bf16 %v13047_v0 }
 0x325   :  { %v13260_v45 = vmax.f32 %v4398_v24, %v4590_v19  ;;  %v13262_v47 = vmax.f32 %v4401_v18, %v4593_v25  ;;  %4146 = vrot.lane.b32.xlu1 %v13125_v48, %s10533_s21  ;;  %9909 = vrot.lane.b32.xlu0 %v13111_v36, %s10538_s14  ;;  %v9816_v25 = vunpack.i.l.bf16 %v13109_v32  ;;  %v14953_v19 = vld [vmem:[#allocation26_spill] sm:$0xff] }
 0x327   :  { %4782 = vst [vmem:[#allocation4 + $0xd0] sm:$0xff] %v13262_v47  ;;  %v4173_v26 = vpop.permute.xlu0 %4172  ;;  %v13273_v43 = vpop.permute.xlu1 %9809 }
 0x328   :  { %v4274_v36 = vsel %vm620_vm0, %v4171_v54, %v4173_v26  ;;  %v4275_v37 = vsel %vm620_vm0, %v4173_v26, %v4175_v49  ;;  %v14896_v24 = vunpack.i.h.bf16 %v13273_v43  ;;  %v9811_v18 = vunpack.i.l.bf16 %v13273_v43  ;;  %v14952_v49 = vld [vmem:[#allocation23_spill] sm:$0xff] }
 0x329   :  { %4465 = vrot.lane.b32.xlu1 %v13136_v60, %s10537_s0  ;;  %9919 = vrot.lane.b32.xlu0 %v13277_v39, %s10538_s14  ;;  %v4399_v26 = vmax.f32 %v14952_v49, %v4274_v36  ;;  %v4400_v2 = vmax.f32 %v14953_v19, %v4275_v37 }
 0x32a   :  { %v4949_v54 = vsel %vm1785_vm1, %v9796_v30, %v9811_v18  ;;  %v4950_v0 = vsel %vm1785_vm1, %v9811_v18, %v14896_v24  ;;  %v10509_v18 = vld [vmem:[#allocation4 + $0x80] sm:$0xff] }
 0x32b   :  { %v5005_v48 = vmax.f32 %v10507_v5, %v4949_v54  ;;  %v4490_v60 = vpop.permute.xlu0 %4489  ;;  %v13301_v8 = vpop.permute.xlu1 %9824  ;;  %v5006_v59 = vmax.f32 %v10508_v56, %v4950_v0  ;;  %v5012_v24 = vmax.f32 %v10509_v18, %v4956_v11  ;;  %v10510_v5 = vld [vmem:[#allocation4 + $0x88] sm:$0xff]  ;;  %v5098_v54 = vsel %vm5097_vm5, %v9801_v4, %v9816_v25 }
 0x32c   :  { %v4591_v41 = vsel %vm4567_vm4, %v4488_v14, %v4490_v60  ;;  %v4592_v40 = vsel %vm4567_vm4, %v4490_v60, %v4492_v16  ;;  %v14897_v30 = vunpack.i.h.bf16 %v13301_v8  ;;  %v9826_v61 = vunpack.i.l.bf16 %v13301_v8  ;;  %v14957_v18 = vld [vmem:[#allocation18_spill] sm:$0xff] }
 0x32d   :  { %v13307_v36 = vmax.f32 %v4399_v26, %v4591_v41  ;;  %v13309_v37 = vmax.f32 %v4400_v2, %v4592_v40  ;;  %4178 = vrot.lane.b32.xlu1 %v13145_v31, %s10533_s21  ;;  %v5013_v19 = vmax.f32 %v10510_v5, %v4957_v51  ;;  %v14954_v60 = vunpack.i.h.bf16 %v13109_v32 }
 0x32e   :  { %v5105_v14 = vsel %vm5097_vm5, %v9802_v13, %v9826_v61  ;;  %v5106_v41 = vsel %vm5097_vm5, %v9826_v61, %v14897_v30  ;;  %v5154_v11 = vmax.f32 %v5005_v48, %v5098_v54  ;;  %v14955_v13 = vld [vmem:[#allocation28_spill] sm:$0xff]  ;;  %v10402_v61 = vld [vmem:[%s14856_s3 + $0x100] sm:$0xff]  }
 0x32f   :  { %v5099_v16 = vsel %vm5097_vm5, %v9816_v25, %v14954_v60  ;;  %4780 = vst [vmem:[#allocation4 + $0xc0] sm:$0xff] %v13307_v36  ;;  %4781 = vst [vmem:[#allocation4 + $0xc8] sm:$0xff] %v13309_v37  ;;  %v5161_v2 = vmax.f32 %v5012_v24, %v5105_v14  ;;  %v4235_v0 = vpop.permute.xlu0 %4234  ;;  %v13323_v51 = vpop.permute.xlu1 %4208  ;;  %v5162_v49 = vmax.f32 %v5013_v19, %v5106_v41  ;;  %v14956_v24 = vld [vmem:[#allocation11_spill] sm:$0xff]  ;;  %v14958_v14 = vld [vmem:[#allocation29_spill] sm:$0xff] }
 0x330   :  { %v5155_v4 = vmax.f32 %v5006_v59, %v5099_v16  ;;  %v4303_v26 = vsel %vm620_vm0, %v14955_v13, %v4235_v0  ;;  %v4291_v25 = vsel %vm620_vm0, %v13157_v1, %v13323_v51  ;;  %v10403_v59 = vld [vmem:[%s14856_s3 + $0x148] sm:$0xff]  }
 0x331   :  { %v5182_v56 = vpack.c.bf16 %v5161_v2, %v5154_v11  ;;  %4497 = vrot.lane.b32.xlu1 %v13155_v22, %s10537_s0  ;;  %v4430_v40 = vmax.f32 %v14956_v24, %v4303_v26  ;;  %v4417_v5 = vmax.f32 %v14957_v18, %v4291_v25  ;;  %v10404_v2 = vld [vmem:[%s14856_s3 + $0x108] sm:$0xff]  }
 0x332   :  { %v5183_v48 = vpack.c.bf16 %v5162_v49, %v5155_v4  ;;  %v10405_v4 = vld [vmem:[%s14856_s3 + $0x150] sm:$0xff]  }
 0x333   :  { %v4552_v19 = vpop.permute.xlu0 %4551  ;;  %v13340_v54 = vpop.permute.xlu1 %4525 }
 0x334   :  { %5676 = vmatprep.mubr.bf16.mxu0 %v5183_v48  ;;  %v4620_v60 = vsel %vm4567_vm4, %v14958_v14, %v4552_v19  ;;  %v4608_v16 = vsel %vm4567_vm4, %v13171_v62, %v13340_v54  ;;  %v10406_v48 = vld [vmem:[%s14856_s3 + $0x110] sm:$0xff]  }
 0x335   :  { %5677 = vmatmul.mubr.bf16.vlgmr.msra.gmra.mrb[40].mxu0 %v5182_v56  ;;  %v13347_v41 = vmax.f32 %v4430_v40, %v4620_v60  ;;  %v13349_v11 = vmax.f32 %v4417_v5, %v4608_v16  ;;  %4210 = vrot.lane.b32.xlu1 %v13169_v23, %s10533_s21 }
 0x336   :  { %9171 = vmatpush3.bf16.msra.mxu0 %v10402_v61  ;;  %v10407_v61 = vld [vmem:[%s14856_s3 + $0x158] sm:$0xff]  }
 0x337   :  { %9172 = vmatprep.subr.bf16.mxu0 %v10403_v59  ;;  %4798 = vst [vmem:[#allocation4 + $0x150] sm:$0xff] %v13349_v11  ;;  %v4237_v49 = vpop.permute.xlu0 %4236  ;;  %v4239_v13 = vpop.permute.xlu1 %4238  ;;  %v14959_v59 = vld [vmem:[#allocation30_spill] sm:$0xff] }
 0x338   :  { %v4304_v26 = vsel %vm620_vm0, %v4235_v0, %v4237_v49  ;;  %v4305_v25 = vsel %vm620_vm0, %v4237_v49, %v4239_v13  ;;  %v4306_v56 = vsel %vm620_vm0, %v4239_v13, %v13197_v17 }
 0x339   :  { %4529 = vrot.lane.b32.xlu1 %v13179_v50, %s10537_s0  ;;  %v4431_v0 = vmax.f32 %v14959_v59, %v4304_v26  ;;  %v4432_v24 = vmax.f32 %v12878_v15, %v4305_v25  ;;  %v4433_v40 = vmax.f32 %v12885_v27, %v4306_v56  ;;  %v10408_v15 = vld [vmem:[%s14856_s3 + $0x118] sm:$0xff]   ;;  %v14898_v27 = vunpack.i.h.bf16 %v13225_v3 }
 0x33a   :  { %9173 = vmatpush3.bf16.msra.mxu0 %v10404_v2  ;;  %v9841_v2 = vunpack.i.l.bf16 %v13225_v3  ;;  %v9807_v26 = vunpack.i.h.bf16 %v13199_v33 }
 0x33b   :  { %9174 = vmatprep.subr.bf16.mxu0 %v10405_v4  ;;  %v4554_v18 = vpop.permute.xlu0 %4553  ;;  %v4556_v5 = vpop.permute.xlu1 %4555 }
 0x33c   :  { %v4621_v14 = vsel %vm4567_vm4, %v4552_v19, %v4554_v18  ;;  %v4622_v60 = vsel %vm4567_vm4, %v4554_v18, %v4556_v5  ;;  %v4623_v16 = vsel %vm4567_vm4, %v4556_v5, %v13213_v35  ;;  %v10409_v19 = vld [vmem:[%s14856_s3 + $0x160] sm:$0xff]   ;;  %v4970_v18 = vsel %vm1785_vm1, %v9807_v26, %v9841_v2  ;;  %v10412_v35 = vld [vmem:[%s14856_s3 + $0x128] sm:$0xff]  }
 0x33d   :  { %v13380_v4 = vmax.f32 %v4431_v0, %v4621_v14  ;;  %v13382_v49 = vmax.f32 %v4432_v24, %v4622_v60  ;;  %v13384_v13 = vmax.f32 %v4433_v40, %v4623_v16  ;;  %4242 = vrot.lane.b32.xlu1 %v13195_v46, %s10533_s21  ;;  %v13407_v0 = vld [vmem:[%s14856_s3 + $0x180] sm:$0xff]   ;;  %v9836_v40 = vunpack.i.l.bf16 %v13187_v38  ;;  %v10511_v24 = vld [vmem:[#allocation4 + $0x108] sm:$0xff] }
 0x33e   :  { %9175 = vmatpush3.bf16.msra.mxu0 %v10406_v48  ;;  %v9806_v48 = vunpack.i.l.bf16 %v13199_v33  ;;  %v10410_v33 = vld [vmem:[%s14856_s3 + $0x120] sm:$0xff]   ;;  %v4971_v5 = vsel %vm1785_vm1, %v9841_v2, %v14898_v27  ;;  %9438 = vmatprep.subr.bf16.mxu1 %v13407_v0 }
 0x33f   :  { %9176 = vmatprep.subr.bf16.mxu0 %v10407_v61  ;;  %4812 = vst [vmem:[#allocation4 + $0x1c0] sm:$0xff] %v13380_v4  ;;  %4813 = vst [vmem:[#allocation4 + $0x1c8] sm:$0xff] %v13382_v49  ;;  %v9850_v25 = vpop.permute.xlu0 %9849  ;;  %v13399_v56 = vpop.permute.xlu1 %9829  ;;  %v10512_v27 = vld [vmem:[#allocation4 + $0x100] sm:$0xff] }
 0x340   :  { %4814 = vst [vmem:[#allocation4 + $0x1d0] sm:$0xff] %v13384_v13  ;;  %14960 = vst [vmem:[#allocation9_spill] sm:$0xff] %v13399_v56  ;;  %v14901_v59 = vunpack.i.h.bf16 %v13399_v56  ;;  %v9831_v61 = vunpack.i.l.bf16 %v13399_v56  ;;  %v9851_v14 = vunpack.i.l.bf16 %v9850_v25  ;;  %v10514_v46 = vld [vmem:[#allocation4 + $0x180] sm:$0xff] }
 0x341   :  { %4561 = vrot.lane.b32.xlu1 %v13207_v58, %s10537_s0  ;;  %v5026_v58 = vmax.f32 %v10514_v46, %v4970_v18  ;;  %v10413_v46 = vld [vmem:[%s14856_s3 + $0x170] sm:$0xff]  }
 0x342   :  { %9177 = vmatpush3.bf16.msra.mxu0 %v10408_v15  ;;  %v4963_v60 = vsel %vm1785_vm1, %v9806_v48, %v9831_v61  ;;  %v4964_v16 = vsel %vm1785_vm1, %v9831_v61, %v14901_v59  ;;  %v10411_v15 = vld [vmem:[%s14856_s3 + $0x168] sm:$0xff]   ;;  %v9852_v48 = vunpack.i.h.bf16 %v9850_v25 }
 0x343   :  { %9178 = vmatprep.subr.bf16.mxu0 %v10409_v19  ;;  %v13428_v26 = vpop.permute.xlu0 %4467  ;;  %v13430_v30 = vpop.permute.xlu1 %9844  ;;  %v5020_v2 = vmax.f32 %v10511_v24, %v4964_v16  ;;  %v5019_v3 = vmax.f32 %v10512_v27, %v4963_v60  ;;  %v10513_v19 = vld [vmem:[#allocation4 + $0x188] sm:$0xff]  ;;  %v14962_v24 = vunpack.i.h.bf16 %v13187_v38  ;;  %v5112_v60 = vsel %vm5097_vm5, %v9851_v14, %v9836_v40  ;;  %v14963_v38 = vld [vmem:[#allocation20_spill] sm:$0xff] }
 0x344   :  { %14961 = vst [vmem:[#allocation24_spill] sm:$0xff] %v13430_v30  ;;  %v9847_v56 = vunpack.i.h.bf16 %v13430_v30  ;;  %v9846_v61 = vunpack.i.l.bf16 %v13430_v30  ;;  %v5027_v59 = vmax.f32 %v10513_v19, %v4971_v5 }
 0x345   :  { %9894 = vrot.lane.b32.xlu1 %v13161_v21, %s10538_s14  ;;  %v5113_v27 = vsel %vm5097_vm5, %v9836_v40, %v14962_v24  ;;  %v5168_v19 = vmax.f32 %v5019_v3, %v5112_v60  ;;  %v14964_v3 = vld [vmem:[#allocation8_spill] sm:$0xff]  ;;  %v10420_v60 = vld [vmem:[%s14856_s3 + $0x40] sm:$0xff]  }
 0x346   :  { %9179 = vmatpush3.bf16.msra.mxu0 %v10410_v33  ;;  %v5120_v25 = vsel %vm5097_vm5, %v9846_v61, %v9847_v56  ;;  %v5119_v21 = vsel %vm5097_vm5, %v9852_v48, %v9846_v61  ;;  %v5169_v5 = vmax.f32 %v5020_v2, %v5113_v27  ;;  %v14965_v48 = vld [vmem:[#allocation22_spill] sm:$0xff]  ;;  %v10416_v61 = vld [vmem:[%s14856_s3 + $0x138] sm:$0xff]  }
 0x347   :  { %9180 = vmatprep.subr.bf16.mxu0 %v10411_v15  ;;  %v13450_v18 = vpop.permute.xlu0 %4152  ;;  %v4139_v33 = vpop.permute.xlu1 %4138  ;;  %v5176_v16 = vmax.f32 %v5027_v59, %v5120_v25  ;;  %v5175_v24 = vmax.f32 %v5026_v58, %v5119_v21  ;;  %v10414_v15 = vld [vmem:[%s14856_s3 + $0x130] sm:$0xff]   ;;  %v10415_v59 = vld [vmem:[%s14856_s3 + $0x178] sm:$0xff]  }
 0x348   :  { %v4258_v30 = vsel %vm620_vm0, %v14963_v38, %v4139_v33 }
 0x349   :  { %9904 = vrot.lane.b32.xlu1 %v13231_v9, %s10538_s14  ;;  %v5190_v40 = vpack.c.bf16 %v5176_v16, %v5169_v5  ;;  %v5189_v14 = vpack.c.bf16 %v5175_v24, %v5168_v19  ;;  %v4382_v58 = vmax.f32 %v14964_v3, %v4258_v30 }
 0x34a   :  { %9181 = vmatpush3.bf16.msra.mxu0 %v10412_v35 }
 0x34b   :  { %9182 = vmatprep.subr.bf16.mxu0 %v10413_v46  ;;  %v13463_v2 = vpop.permute.xlu0 %4499  ;;  %v4456_v38 = vpop.permute.xlu1 %4455  ;;  %5684 = vmatprep.mubr.bf16.mxu0 %v5190_v40 }
 0x34c   :  { %v4575_v9 = vsel %vm4567_vm4, %v14965_v48, %v4456_v38  ;;  %5685 = vmatmul.mubr.bf16.gmra.mrb[44].mxu0 %v5189_v14  ;;  %v14968_v48 = vld [vmem:[#allocation27_spill] sm:$0xff] }
 0x34d   :  { %v4699_v35 = vmax.f32 %v4382_v58, %v4575_v9  ;;  %9914 = vrot.lane.b32.xlu1 %v13277_v39, %s10534_s24 }
 0x34e   :  { %9183 = vmatpush3.bf16.msra.mxu0 %v10414_v15  ;;  %v14966_v15 = vld [vmem:[#allocation25_spill] sm:$0xff] }
 0x34f   :  { %9184 = vmatprep.subr.bf16.mxu0 %v10415_v59  ;;  %v13472_v27 = vpop.permute.xlu0 %4184  ;;  %v4141_v30 = vpop.permute.xlu1 %4140  ;;  %v9928_v25 = vpack.i.bf16 %v13260_v45, %v4699_v35 }
 0x350   :  { %v4259_v21 = vsel %vm620_vm0, %v4139_v33, %v4141_v30  ;;  %v4260_v39 = vsel %vm620_vm0, %v4141_v30, %v13077_v34 }
 0x351   :  { %9929 = vrot.lane.b32.xlu0 %v9928_v25, %s10538_s14  ;;  %9924 = vrot.lane.b32.xlu1 %v9928_v25, %s10534_s24  ;;  %v4383_v46 = vmax.f32 %v12955_v12, %v4259_v21  ;;  %v4384_v5 = vmax.f32 %v12997_v6, %v4260_v39  ;;  %v14967_v6 = vld [vmem:[#allocation10_spill] sm:$0xff]  ;;  %v13511_v39 = vld [vmem:[#allocation4 + $0x1b0] sm:$0xff] }
 0x352   :  { %9185 = vmatpush3.bf16.msra.mxu0 %v10416_v61 }
 0x353   :  { %v13485_v16 = vpop.permute.xlu0 %9869  ;;  %v4458_v45 = vpop.permute.xlu1 %4457  ;;  %9208 = vmatprep.subr.bf16.mxu0 %v10420_v60 }
 0x354   :  { %v4576_v19 = vsel %vm4567_vm4, %v4456_v38, %v4458_v45  ;;  %v4577_v33 = vsel %vm4567_vm4, %v4458_v45, %v13097_v7  ;;  %v13499_v7 = vld [vmem:[#allocation4 + $0x130] sm:$0xff] }
 0x355   :  { %v4700_v24 = vmax.f32 %v4383_v46, %v4576_v19  ;;  %v4701_v34 = vmax.f32 %v4384_v5, %v4577_v33  ;;  %v9943_v33 = vpack.i.bf16 %v13347_v41, %v13511_v39 }
 0x357   :  { %4764 = vst [vmem:[#allocation4 + $0x40] sm:$0xff] %v4700_v24  ;;  %4765 = vst [vmem:[#allocation4 + $0x48] sm:$0xff] %v4701_v34  ;;  %v13490_v40 = vpop.permute.xlu0 %9874  ;;  %v4203_v14 = vpop.permute.xlu1 %4202  ;;  %v9948_v41 = vpack.i.bf16 %v13236_v63, %v4701_v34  ;;  %v9963_v63 = vpack.i.bf16 %v13307_v36, %v4700_v24  ;;  %v9871_v34 = vunpack.i.l.bf16 %v13485_v16 }
 0x358   :  { %v4288_v12 = vsel %vm620_vm0, %v14966_v15, %v4203_v14  ;;  %v9877_v24 = vunpack.i.h.bf16 %v13490_v40 }
 0x359   :  { %v4414_v59 = vmax.f32 %v14967_v6, %v4288_v12 }
 0x35b   :  { %v13495_v3 = vpop.permute.xlu0 %9879  ;;  %v4520_v58 = vpop.permute.xlu1 %4519 }
 0x35c   :  { %v4605_v38 = vsel %vm4567_vm4, %v14968_v48, %v4520_v58 }
 0x35d   :  { %v4731_v9 = vmax.f32 %v4414_v59, %v4605_v38  ;;  %v4390_v59 = vmax.f32 %v12960_v52, %v13450_v18  ;;  %v9872_v52 = vunpack.i.h.bf16 %v13485_v16 }
 0x35f   :  { %v13501_v35 = vpop.permute.xlu0 %4216  ;;  %v4205_v61 = vpop.permute.xlu1 %4204  ;;  %v9938_v30 = vpack.i.bf16 %v4731_v9, %v13499_v7 }
 0x360   :  { %v4289_v25 = vsel %vm620_vm0, %v4203_v14, %v4205_v61  ;;  %v4290_v60 = vsel %vm620_vm0, %v4205_v61, %v13157_v1  ;;  %v4422_v21 = vmax.f32 %v13069_v57, %v13501_v35 }
 0x361   :  { %9939 = vrot.lane.b32.xlu1 %v9938_v30, %s10538_s14  ;;  %9934 = vrot.lane.b32.xlu0 %v9938_v30, %s10534_s24  ;;  %v4415_v46 = vmax.f32 %v13036_v10, %v4289_v25  ;;  %v4416_v5 = vmax.f32 %v13065_v28, %v4290_v60  ;;  %v14969_v25 = vunpack.i.h.bf16 %v13147_v53  ;;  %v14971_v53 = vunpack.i.h.bf16 %v13301_v8 }
 0x363   :  { %v13515_v45 = vpop.permute.xlu0 %4533  ;;  %v4522_v19 = vpop.permute.xlu1 %4521  ;;  %v4958_v60 = vsel %vm1785_vm1, %v14969_v25, %v9871_v34 }
 0x364   :  { %v4739_v1 = vmax.f32 %v4422_v21, %v13515_v45  ;;  %v4606_v14 = vsel %vm4567_vm4, %v4520_v58, %v4522_v19  ;;  %v4607_v15 = vsel %vm4567_vm4, %v4522_v19, %v13171_v62  ;;  %v9958_v62 = vpack.i.bf16 %v13262_v47, %v13309_v37 }
 0x365   :  { %v13523_v57 = vmax.f32 %v4415_v46, %v4606_v14  ;;  %v4733_v12 = vmax.f32 %v4416_v5, %v4607_v15  ;;  %9944 = vrot.lane.b32.xlu1 %v9943_v33, %s10534_s24  ;;  %9954 = vrot.lane.b32.xlu0 %v9943_v33, %s10538_s14  ;;  %v4959_v21 = vsel %vm1785_vm1, %v9871_v34, %v9872_v52  ;;  %v14970_v46 = vunpack.i.h.bf16 %v13273_v43 }
 0x366   :  { %4803 = vst.msk [vmem:[#allocation4 + $0x178] sm:$0xff] %vm4567_vm4, %v4739_v1 }
 0x367   :  { %4796 = vst [vmem:[#allocation4 + $0x140] sm:$0xff] %v13523_v57  ;;  %4797 = vst [vmem:[#allocation4 + $0x148] sm:$0xff] %v4733_v12  ;;  %v13529_v10 = vpop.permute.xlu0 %4248  ;;  %v13531_v28 = vpop.permute.xlu1 %4150  ;;  %v9988_v15 = vpack.i.bf16 %v13349_v11, %v4733_v12  ;;  %v14972_v12 = vunpack.i.h.bf16 %v13109_v32 }
 0x368   :  { %v4265_v6 = vsel %vm620_vm0, %v13531_v28, %v13450_v18 }
 0x369   :  { %9949 = vrot.lane.b32.xlu1 %v9948_v41, %s10534_s24  ;;  %9959 = vrot.lane.b32.xlu0 %v9958_v62, %s10534_s24  ;;  %v4389_v58 = vmax.f32 %v12941_v55, %v4265_v6  ;;  %v9876_v55 = vunpack.i.l.bf16 %v13490_v40 }
 0x36b   :  { %v13544_v48 = vpop.permute.xlu0 %9889  ;;  %v4470_v38 = vpop.permute.xlu1 %4469  ;;  %v5107_v33 = vsel %vm5097_vm5, %v14971_v53, %v9876_v55 }
 0x36c   :  { %v4582_v47 = vsel %vm4567_vm4, %v13428_v26, %v4470_v38  ;;  %v4707_v37 = vmax.f32 %v4390_v59, %v4470_v38  ;;  %v5108_v59 = vsel %vm5097_vm5, %v9876_v55, %v9877_v24  ;;  %v10517_v38 = vld [vmem:[#allocation4 + $0x18] sm:$0xff]  ;;  %v9993_v55 = vpack.i.bf16 %v13384_v13, %v13382_v49  ;;  %v10418_v49 = vld [vmem:[%s14856_s3 + $0x188] sm:$0xff]  }
 0x36d   :  { %v13550_v9 = vmax.f32 %v4389_v58, %v4582_v47  ;;  %9964 = vrot.lane.b32.xlu1 %v9963_v63, %s10534_s24  ;;  %9969 = vrot.lane.b32.xlu0 %v9948_v41, %s10538_s14  ;;  %v10515_v41 = vld [vmem:[#allocation4 + $0x90] sm:$0xff]  ;;  %v10518_v47 = vld [vmem:[#allocation4 + $0x98] sm:$0xff] }
 0x36e   :  { %4771 = vst.msk [vmem:[#allocation4 + $0x78] sm:$0xff] %vm4567_vm4, %v4707_v37  ;;  %v10516_v58 = vld [vmem:[#allocation4 + $0x10] sm:$0xff]  ;;  %v5015_v37 = vmax.f32 %v10518_v47, %v4959_v21 }
 0x36f   :  { %4770 = vst [vmem:[#allocation4 + $0x70] sm:$0xff] %v13550_v9  ;;  %v13558_v36 = vpop.permute.xlu0 %4463  ;;  %v13560_v18 = vpop.permute.xlu1 %9854 }
 0x370   :  { %v9857_v61 = vunpack.i.h.bf16 %v13560_v18  ;;  %v9856_v30 = vunpack.i.l.bf16 %v13560_v18 }
 0x371   :  { %9974 = vrot.lane.b32.xlu1 %v9958_v62, %s10538_s14  ;;  %9979 = vrot.lane.b32.xlu0 %v9963_v63, %s10538_s14  ;;  %v5014_v62 = vmax.f32 %v10515_v41, %v4958_v60 }
 0x372   :  { %v4951_v5 = vsel %vm1785_vm1, %v14970_v46, %v9856_v30  ;;  %v4952_v19 = vsel %vm1785_vm1, %v9856_v30, %v9857_v61 }
 0x373   :  { %v13582_v1 = vpop.permute.xlu0 %4148  ;;  %v13584_v14 = vpop.permute.xlu1 %9859  ;;  %v5007_v8 = vmax.f32 %v10516_v58, %v4951_v5  ;;  %v5008_v63 = vmax.f32 %v10517_v38, %v4952_v19  ;;  %v5163_v11 = vmax.f32 %v5014_v62, %v5107_v33  ;;  %v5164_v5 = vmax.f32 %v5015_v37, %v5108_v59  ;;  %v10424_v37 = vld [vmem:[%s14856_s3 + $0x1a0] sm:$0xff]  }
 0x374   :  { %v9862_v43 = vunpack.i.h.bf16 %v13584_v14  ;;  %v9861_v6 = vunpack.i.l.bf16 %v13584_v14  ;;  %v9998_v19 = vpack.i.bf16 %v13380_v4, %v13523_v57  ;;  %v4406_v4 = vmax.f32 %v13002_v29, %v13472_v27 }
 0x375   :  { %9989 = vrot.lane.b32.xlu0 %v9988_v15, %s10538_s14  ;;  %9984 = vrot.lane.b32.xlu1 %v9988_v15, %s10534_s24 }
 0x376   :  { %v5100_v34 = vsel %vm5097_vm5, %v14972_v12, %v9861_v6  ;;  %v5101_v30 = vsel %vm5097_vm5, %v9861_v6, %v9862_v43  ;;  %v10419_v6 = vld [vmem:[%s14856_s3 + $0x190] sm:$0xff]  }
 0x377   :  { %v5156_v25 = vmax.f32 %v5007_v8, %v5100_v34  ;;  %v13602_v60 = vpop.permute.xlu0 %4495  ;;  %v13604_v21 = vpop.permute.xlu1 %4182  ;;  %v5157_v46 = vmax.f32 %v5008_v63, %v5101_v30  ;;  %v10427_v34 = vld [vmem:[%s14856_s3 + $0x1a8] sm:$0xff]   ;;  %v9881_v30 = vunpack.i.l.bf16 %v13495_v3 }
 0x378   :  { %v4280_v13 = vsel %vm620_vm0, %v13604_v21, %v13472_v27 }
 0x379   :  { %v5184_v32 = vpack.c.bf16 %v5163_v11, %v5156_v25  ;;  %v5185_v53 = vpack.c.bf16 %v5164_v5, %v5157_v46  ;;  %9994 = vrot.lane.b32.xlu0 %v9993_v55, %s10534_s24  ;;  %9999 = vrot.lane.b32.xlu1 %v9998_v19, %s10534_s24  ;;  %v4405_v57 = vmax.f32 %v12982_v20, %v4280_v13  ;;  %v10430_v46 = vld [vmem:[%s14856_s3 + $0x1b0] sm:$0xff]  }
 0x37b   :  { %v13610_v33 = vpop.permute.xlu0 %4180  ;;  %v13612_v15 = vpop.permute.xlu1 %9864  ;;  %5725 = vmatprep.mubr.bf16.mxu1 %v5185_v53 }
 0x37c   :  { %5726 = vmatmul.mubr.bf16.vlgmr.msra.gmra.mrb[32].mxu1 %v5184_v32  ;;  %v14973_v32 = vld [vmem:[#allocation34_spill] sm:$0xff] }
 0x37d   :  { %10009 = vrot.lane.b32.xlu0 %v9998_v19, %s10538_s14  ;;  %10004 = vrot.lane.b32.xlu1 %v9993_v55, %s10538_s14  ;;  %v4438_v55 = vmax.f32 %v13095_v42, %v13529_v10  ;;  %v4960_v42 = vsel %vm1785_vm1, %v9872_v52, %v9881_v30  ;;  %v10519_v52 = vld [vmem:[#allocation4 + $0xa0] sm:$0xff] }
 0x37e   :  { %9439 = vmatpush3.bf16.msra.mxu1 %v13407_v0  ;;  %v10421_v0 = vld [vmem:[%s14856_s3 + $0x198] sm:$0xff]  }
 0x37f   :  { %v13626_v41 = vpop.permute.xlu0 %4527  ;;  %v4502_v62 = vpop.permute.xlu1 %4501  ;;  %9440 = vmatprep.subr.bf16.mxu1 %v10418_v49 }
 0x380   :  { %v4597_v59 = vsel %vm4567_vm4, %v13463_v2, %v4502_v62  ;;  %v4723_v58 = vmax.f32 %v4406_v4, %v4502_v62 }
 0x381   :  { %v13633_v8 = vmax.f32 %v4405_v57, %v4597_v59  ;;  %v5016_v57 = vmax.f32 %v10519_v52, %v4960_v42 }
 0x382   :  { %4787 = vst.msk [vmem:[#allocation4 + $0xf8] sm:$0xff] %vm4567_vm4, %v4723_v58  ;;  %9441 = vmatpush3.bf16.msra.mxu1 %v10418_v49 }
 0x383   :  { %4786 = vst [vmem:[#allocation4 + $0xf0] sm:$0xff] %v13633_v8  ;;  %v13637_v20 = vpop.permute.xlu0 %4212  ;;  %v13639_v29 = vpop.permute.xlu1 %4214  ;;  %9442 = vmatprep.subr.bf16.mxu1 %v10419_v6 }
 0x384   :  { %v4295_v27 = vsel %vm620_vm0, %v13639_v29, %v13501_v35 }
 0x385   :  { %v4421_v38 = vmax.f32 %v13183_v44, %v4295_v27  ;;  %v4264_v27 = vsel %vm620_vm0, %v13582_v1, %v13531_v28 }
 0x386   :  { %9443 = vmatpush3.bf16.msra.mxu1 %v10419_v6 }
 0x387   :  { %v13648_v63 = vpop.permute.xlu0 %4559  ;;  %v13650_v47 = vpop.permute.xlu1 %4531  ;;  %9444 = vmatprep.subr.bf16.mxu1 %v10421_v0 }
 0x388   :  { %v4612_v11 = vsel %vm4567_vm4, %v13650_v47, %v13515_v45 }
 0x389   :  { %v13658_v12 = vmax.f32 %v4421_v38, %v4612_v11  ;;  %v14974_v38 = vld [vmem:[#allocation36_spill] sm:$0xff] }
 0x38a   :  { %9445 = vmatpush3.bf16.msra.mxu1 %v10421_v0  ;;  %v10441_v0 = vld [vmem:[%s14856_s3 + $0xc0] sm:$0xff]  }
 0x38b   :  { %4802 = vst [vmem:[#allocation4 + $0x170] sm:$0xff] %v13658_v12  ;;  %v13661_v35 = vpop.permute.xlu0 %4244  ;;  %v13663_v44 = vpop.permute.xlu1 %4246  ;;  %9446 = vmatprep.subr.bf16.mxu1 %v10424_v37 }
 0x38c   :  { %v4310_v5 = vsel %vm620_vm0, %v13663_v44, %v13529_v10  ;;  %v10433_v10 = vld [vmem:[%s14856_s3 + $0x1b8] sm:$0xff]  }
 0x38d   :  { %v4437_v53 = vmax.f32 %v14973_v32, %v4310_v5  ;;  %v14978_v5 = vld [vmem:[#allocation7_spill] sm:$0xff] }
 0x38e   :  { %9447 = vmatpush3.bf16.msra.mxu1 %v10424_v37  ;;  %v14975_v37 = vld [vmem:[#allocation21_spill] sm:$0xff] }
 0x38f   :  { %v4566_v45 = vpop.permute.xlu0 %4565  ;;  %v13671_v25 = vpop.permute.xlu1 %9884  ;;  %9448 = vmatprep.subr.bf16.mxu1 %v10427_v34 }
 0x390   :  { %v4755_v19 = vmax.f32 %v4438_v55, %v4566_v45 }
 0x392   :  { %4819 = vst.msk [vmem:[#allocation4 + $0x1f8] sm:$0xff] %vm4567_vm4, %v4755_v19  ;;  %9449 = vmatpush3.bf16.msra.mxu1 %v10427_v34  ;;  %v14976_v34 = vld [vmem:[#allocation37_spill] sm:$0xff] }
 0x393   :  { %v13686_v49 = vpop.permute.xlu0 %9899  ;;  %v13688_v13 = vpop.permute.xlu1 %4563  ;;  %9450 = vmatprep.subr.bf16.mxu1 %v10430_v46  ;;  %v4579_v55 = vsel %vm4567_vm4, %v14976_v34, %v13558_v36  ;;  %v5887_v34 = vld [vmem:[#allocation4 + $0xf8] sm:$0xff] }
 0x394   :  { %v9901_v4 = vunpack.i.l.bf16 %v13686_v49  ;;  %v4627_v16 = vsel %vm4567_vm4, %v13688_v13, %v4566_v45  ;;  %v14977_v45 = vld [vmem:[#allocation14_spill] sm:$0xff] }
 0x395   :  { %v13696_v62 = vmax.f32 %v4437_v53, %v4627_v16 }
 0x396   :  { %v5109_v6 = vsel %vm5097_vm5, %v9877_v24, %v9901_v4  ;;  %9451 = vmatpush3.bf16.msra.mxu1 %v10430_v46  ;;  %v4388_v46 = vmax.f32 %v14977_v45, %v4264_v27 }
 0x397   :  { %v13703_v59 = vmax.f32 %v5016_v57, %v5109_v6  ;;  %4818 = vst [vmem:[#allocation4 + $0x1f0] sm:$0xff] %v13696_v62  ;;  %v4147_v58 = vpop.permute.xlu1 %4146  ;;  %9452 = vmatprep.subr.bf16.mxu1 %v10433_v10  ;;  %v4279_v57 = vsel %vm620_vm0, %v13610_v33, %v13604_v21  ;;  %v14979_v6 = vld [vmem:[#allocation15_spill] sm:$0xff] }
 0x398   :  { %v4262_v40 = vsel %vm620_vm0, %v14974_v38, %v4147_v58  ;;  %v4263_v24 = vsel %vm620_vm0, %v4147_v58, %v13582_v1 }
 0x399   :  { %v4386_v11 = vmax.f32 %v14975_v37, %v4262_v40  ;;  %v4387_v19 = vmax.f32 %v14978_v5, %v4263_v24  ;;  %v4404_v40 = vmax.f32 %v13155_v22, %v4279_v57  ;;  %v9882_v57 = vunpack.i.h.bf16 %v13495_v3  ;;  %v10429_v3 = vld [vmem:[%s14856_s3 + $0x58] sm:$0xff]  }
 0x39a   :  { %9453 = vmatpush3.bf16.msra.mxu1 %v10433_v10 }
 0x39b   :  { %v4703_v42 = vmax.f32 %v4386_v11, %v4579_v55  ;;  %v4466_v32 = vpop.permute.xlu1 %4465  ;;  %9236 = vmatprep.subr.bf16.mxu1 %v10441_v0  ;;  %v14980_v0 = vld [vmem:[#allocation17_spill] sm:$0xff] }
 0x39c   :  { %v4580_v28 = vsel %vm4567_vm4, %v13558_v36, %v4466_v32  ;;  %v4581_v1 = vsel %vm4567_vm4, %v4466_v32, %v13428_v26  ;;  %v14981_v26 = vld [vmem:[#allocation12_spill] sm:$0xff] }
 0x39d   :  { %4767 = vst [vmem:[#allocation4 + $0x58] sm:$0xff] %v4703_v42  ;;  %v4704_v53 = vmax.f32 %v4387_v19, %v4580_v28  ;;  %v4705_v16 = vmax.f32 %v4388_v46, %v4581_v1  ;;  %v4594_v38 = vsel %vm4567_vm4, %v14981_v26, %v13602_v60  ;;  %v5879_v46 = vld [vmem:[#allocation4 + $0x78] sm:$0xff]  ;;  %v4609_v28 = vsel %vm4567_vm4, %v13340_v54, %v13626_v41 }
 0x39e   :  { %v13745_v5 = vpack.i.bf16 %v5887_v34, %v5879_v46  ;;  %v4309_v54 = vsel %vm620_vm0, %v13661_v35, %v13663_v44  ;;  %v14983_v44 = vld [vmem:[#allocation19_spill] sm:$0xff]  ;;  %v14987_v34 = vld [vmem:[#allocation16_spill] sm:$0xff] }
 0x39f   :  { %4768 = vst [vmem:[#allocation4 + $0x60] sm:$0xff] %v4704_v53  ;;  %4769 = vst [vmem:[#allocation4 + $0x68] sm:$0xff] %v4705_v16  ;;  %v4179_v52 = vpop.permute.xlu1 %4178  ;;  %v10013_v10 = vpack.i.bf16 %v4704_v53, %v4703_v42  ;;  %v14982_v42 = vld [vmem:[#allocation31_spill] sm:$0xff] }
 0x3a0   :  { %v4277_v58 = vsel %vm620_vm0, %v14979_v6, %v4179_v52  ;;  %v4278_v36 = vsel %vm620_vm0, %v4179_v52, %v13610_v33  ;;  %v10028_v52 = vpack.i.bf16 %v13550_v9, %v4705_v16 }
 0x3a1   :  { %v4402_v27 = vmax.f32 %v14980_v0, %v4277_v58  ;;  %10014 = vrot.lane.b32.xlu1 %v10013_v10, %s10534_s24  ;;  %v4403_v24 = vmax.f32 %v13145_v31, %v4278_v36  ;;  %v4961_v0 = vsel %vm1785_vm1, %v9881_v30, %v9882_v57  ;;  %v9902_v30 = vunpack.i.h.bf16 %v13686_v49  ;;  %v10434_v49 = vld [vmem:[%s14856_s3 + $0x20] sm:$0xff]  }
 0x3a3   :  { %v4719_v37 = vmax.f32 %v4402_v27, %v4594_v38  ;;  %v4498_v21 = vpop.permute.xlu1 %4497  ;;  %v14985_v38 = vld [vmem:[#allocation33_spill] sm:$0xff] }
 0x3a4   :  { %v4595_v11 = vsel %vm4567_vm4, %v13602_v60, %v4498_v21  ;;  %v4596_v33 = vsel %vm4567_vm4, %v4498_v21, %v13463_v2  ;;  %v4294_v60 = vsel %vm620_vm0, %v13637_v20, %v13639_v29 }
 0x3a5   :  { %4783 = vst [vmem:[#allocation4 + $0xd8] sm:$0xff] %v4719_v37  ;;  %v4720_v55 = vmax.f32 %v4403_v24, %v4595_v11  ;;  %v4721_v45 = vmax.f32 %v4404_v40, %v4596_v33  ;;  %10019 = vrot.lane.b32.xlu1 %v10013_v10, %s10538_s14  ;;  %v4420_v1 = vmax.f32 %v13179_v50, %v4294_v60  ;;  %v9891_v50 = vunpack.i.l.bf16 %v13544_v48  ;;  %v14986_v24 = vld [vmem:[#allocation32_spill] sm:$0xff] }
 0x3a6   :  { %v4436_v40 = vmax.f32 %v14985_v38, %v4309_v54  ;;  %v10523_v54 = vld [vmem:[#allocation4 + $0x190] sm:$0xff] }
 0x3a7   :  { %4784 = vst [vmem:[#allocation4 + $0xe0] sm:$0xff] %v4720_v55  ;;  %4785 = vst [vmem:[#allocation4 + $0xe8] sm:$0xff] %v4721_v45  ;;  %v4211_v22 = vpop.permute.xlu1 %4210  ;;  %v10038_v31 = vpack.i.bf16 %v4720_v55, %v4719_v37  ;;  %v14988_v55 = vunpack.i.h.bf16 %v14987_v34 }
 0x3a8   :  { %v4292_v2 = vsel %vm620_vm0, %v13323_v51, %v4211_v22  ;;  %v4293_v19 = vsel %vm620_vm0, %v4211_v22, %v13637_v20  ;;  %v13810_v22 = vpop.permute.xlu0 %9909 }
 0x3a9   :  { %v4418_v32 = vmax.f32 %v14982_v42, %v4292_v2  ;;  %10024 = vrot.lane.b32.xlu1 %v13745_v5, %s10534_s24  ;;  %10039 = vrot.lane.b32.xlu0 %v10038_v31, %s10534_s24  ;;  %v4419_v29 = vmax.f32 %v13169_v23, %v4293_v19  ;;  %v9892_v23 = vunpack.i.h.bf16 %v13544_v48  ;;  %v9887_v2 = vunpack.i.h.bf16 %v13671_v25 }
 0x3aa   :  { %v9886_v19 = vunpack.i.l.bf16 %v13671_v25  ;;  %v10529_v25 = vld [vmem:[#allocation4 + $0x120] sm:$0xff] }
 0x3ab   :  { %v4735_v53 = vmax.f32 %v4418_v32, %v4609_v28  ;;  %v4530_v51 = vpop.permute.xlu1 %4529  ;;  %v10521_v28 = vld [vmem:[#allocation4 + $0x198] sm:$0xff] }
 0x3ac   :  { %v4610_v20 = vsel %vm4567_vm4, %v13626_v41, %v4530_v51  ;;  %v4611_v10 = vsel %vm4567_vm4, %v4530_v51, %v13650_v47  ;;  %v10048_v41 = vpack.i.bf16 %v13633_v8, %v4721_v45  ;;  %v9866_v47 = vunpack.i.l.bf16 %v13612_v15 }
 0x3ad   :  { %4799 = vst [vmem:[#allocation4 + $0x158] sm:$0xff] %v4735_v53  ;;  %v4736_v6 = vmax.f32 %v4419_v29, %v4610_v20  ;;  %v4737_v58 = vmax.f32 %v4420_v1, %v4611_v10  ;;  %10029 = vrot.lane.b32.xlu1 %v10028_v52, %s10534_s24  ;;  %10044 = vrot.lane.b32.xlu0 %v10038_v31, %s10538_s14  ;;  %v9912_v1 = vunpack.i.h.bf16 %v13810_v22  ;;  %v9911_v29 = vunpack.i.l.bf16 %v13810_v22  ;;  %v10522_v20 = vld [vmem:[#allocation4 + $0x20] sm:$0xff] }
 0x3ae   :  { %v13793_v8 = vsel %vm1785_vm1, %v9891_v50, %v9892_v23  ;;  %v13805_v45 = vsel %vm1785_vm1, %v14988_v55, %v9891_v50  ;;  %v4953_v46 = vsel %vm1785_vm1, %v9857_v61, %v9866_v47  ;;  %v10520_v61 = vld [vmem:[#allocation4 + $0xa8] sm:$0xff]  ;;  %v5110_v51 = vsel %vm5097_vm5, %v9901_v4, %v9902_v30  ;;  %v10526_v55 = vld [vmem:[#allocation4 + $0x110] sm:$0xff] }
 0x3af   :  { %4800 = vst [vmem:[#allocation4 + $0x160] sm:$0xff] %v4736_v6  ;;  %4801 = vst [vmem:[#allocation4 + $0x168] sm:$0xff] %v4737_v58  ;;  %v4243_v9 = vpop.permute.xlu1 %4242  ;;  %v10058_v33 = vpack.i.bf16 %v4736_v6, %v4735_v53  ;;  %v5009_v10 = vmax.f32 %v10522_v20, %v4953_v46  ;;  %v5895_v20 = vld [vmem:[#allocation4 + $0x178] sm:$0xff] }
 0x3b0   :  { %v4307_v16 = vsel %vm620_vm0, %v13197_v17, %v4243_v9  ;;  %v4308_v36 = vsel %vm620_vm0, %v4243_v9, %v13661_v35  ;;  %v9867_v17 = vunpack.i.h.bf16 %v13612_v15  ;;  %v14984_v35 = vld [vmem:[#allocation35_spill] sm:$0xff]  ;;  %v5028_v9 = vmax.f32 %v10523_v54, %v13805_v45 }
 0x3b1   :  { %v4434_v27 = vmax.f32 %v14983_v44, %v4307_v16  ;;  %10034 = vrot.lane.b32.xlu1 %v10028_v52, %s10538_s14  ;;  %10049 = vrot.lane.b32.xlu0 %v10048_v41, %s10534_s24  ;;  %v4624_v26 = vsel %vm4567_vm4, %v14984_v35, %v13648_v63  ;;  %v4435_v37 = vmax.f32 %v14986_v24, %v4308_v36  ;;  %v10525_v24 = vld [vmem:[#allocation4 + $0x118] sm:$0xff]  ;;  %v10426_v54 = vld [vmem:[%s14856_s3 + $0x50] sm:$0xff]  }
 0x3b2   :  { %v4954_v18 = vsel %vm1785_vm1, %v9866_v47, %v9867_v17  ;;  %v13834_v52 = vpack.i.bf16 %v13658_v12, %v4737_v58  ;;  %v10524_v47 = vld [vmem:[#allocation4 + $0x28] sm:$0xff]  ;;  %v14989_v12 = vld [vmem:[#allocation9_spill] sm:$0xff] }
 0x3b3   :  { %v4751_v21 = vmax.f32 %v4434_v27, %v4624_v26  ;;  %v4562_v11 = vpop.permute.xlu1 %4561  ;;  %v5010_v16 = vmax.f32 %v10524_v47, %v4954_v18  ;;  %v14990_v4 = vunpack.i.h.bf16 %v14989_v12  ;;  %v5122_v26 = vsel %vm5097_vm5, %v9911_v29, %v9912_v1 }
 0x3b4   :  { %v4625_v31 = vsel %vm4567_vm4, %v13648_v63, %v4562_v11  ;;  %v4626_v60 = vsel %vm4567_vm4, %v4562_v11, %v13688_v13  ;;  %v5017_v63 = vmax.f32 %v10520_v61, %v4961_v0  ;;  %v5029_v13 = vmax.f32 %v10521_v28, %v13793_v8  ;;  %v10423_v28 = vld [vmem:[%s14856_s3 + $0x48] sm:$0xff]  }
 0x3b5   :  { %4815 = vst [vmem:[#allocation4 + $0x1d8] sm:$0xff] %v4751_v21  ;;  %v4752_v42 = vmax.f32 %v4435_v37, %v4625_v31  ;;  %v4753_v32 = vmax.f32 %v4436_v40, %v4626_v60  ;;  %10054 = vrot.lane.b32.xlu0 %v10048_v41, %s10538_s14  ;;  %10059 = vrot.lane.b32.xlu1 %v10058_v33, %s10534_s24  ;;  %v14992_v31 = vld [vmem:[#allocation13_spill] sm:$0xff] }
 0x3b6   :  { %v4966_v41 = vsel %vm1785_vm1, %v9886_v19, %v9887_v2  ;;  %v4965_v58 = vsel %vm1785_vm1, %v14990_v4, %v9886_v19  ;;  %v5166_v44 = vmax.f32 %v5017_v63, %v5110_v51  ;;  %v5121_v11 = vsel %vm5097_vm5, %v9847_v56, %v9911_v29  ;;  %v10422_v56 = vld [vmem:[%s14856_s3] sm:$0xff]  }
 0x3b7   :  { %4816 = vst [vmem:[#allocation4 + $0x1e0] sm:$0xff] %v4752_v42  ;;  %4817 = vst [vmem:[#allocation4 + $0x1e8] sm:$0xff] %v4753_v32  ;;  %v13826_v53 = vpop.permute.xlu1 %9894  ;;  %v10073_v38 = vpack.i.bf16 %v4752_v42, %v4751_v21  ;;  %v5021_v45 = vmax.f32 %v10526_v55, %v4965_v58  ;;  %v5178_v46 = vmax.f32 %v5029_v13, %v5122_v26  ;;  %v14993_v60 = vunpack.i.h.bf16 %v14992_v31  ;;  %v5903_v13 = vld [vmem:[#allocation4 + $0x1f8] sm:$0xff]  ;;  %v10428_v58 = vld [vmem:[%s14856_s3 + $0x10] sm:$0xff]  }
 0x3b8   :  { %v9897_v6 = vunpack.i.h.bf16 %v13826_v53  ;;  %v9896_v50 = vunpack.i.l.bf16 %v13826_v53  ;;  %v5177_v61 = vmax.f32 %v5028_v9, %v5121_v11  ;;  %v10098_v63 = vpack.i.bf16 %v13696_v62, %v4753_v32  ;;  %v10431_v26 = vld [vmem:[%s14856_s3 + $0x18] sm:$0xff]   ;;  %v10432_v53 = vld [vmem:[%s14856_s3 + $0x60] sm:$0xff]  }
 0x3b9   :  { %10069 = vrot.lane.b32.xlu0 %v13834_v52, %s10534_s24  ;;  %10064 = vrot.lane.b32.xlu1 %v10058_v33, %s10538_s14 }
 0x3ba   :  { %v5102_v36 = vsel %vm5097_vm5, %v9862_v43, %v9896_v50  ;;  %v5103_v0 = vsel %vm5097_vm5, %v9896_v50, %v9897_v6  ;;  %v5022_v43 = vmax.f32 %v10525_v24, %v4966_v41  ;;  %v10083_v50 = vpack.i.bf16 %v5903_v13, %v5895_v20 }
 0x3bb   :  { %v5158_v27 = vmax.f32 %v5009_v10, %v5102_v36  ;;  %v13854_v8 = vpop.permute.xlu1 %9904  ;;  %v5159_v35 = vmax.f32 %v5010_v16, %v5103_v0  ;;  %v10425_v10 = vld [vmem:[%s14856_s3 + $0x8] sm:$0xff]   ;;  %v10527_v36 = vld [vmem:[#allocation4 + $0x30] sm:$0xff] }
 0x3bc   :  { %v9907_v40 = vunpack.i.h.bf16 %v13854_v8  ;;  %v9906_v14 = vunpack.i.l.bf16 %v13854_v8 }
 0x3bd   :  { %v5186_v33 = vpack.c.bf16 %v13703_v59, %v5158_v27  ;;  %v5187_v34 = vpack.c.bf16 %v5166_v44, %v5159_v35  ;;  %10089 = vrot.lane.b32.xlu1 %v13745_v5, %s10538_s14  ;;  %10074 = vrot.lane.b32.xlu0 %v10073_v38, %s10534_s24  ;;  %v13877_v59 = vpop.permute.xlu0 %9919  ;;  %v10528_v44 = vld [vmem:[#allocation4 + $0xb0] sm:$0xff] }
 0x3be   :  { %v5115_v21 = vsel %vm5097_vm5, %v9906_v14, %v9907_v40  ;;  %v5114_v19 = vsel %vm5097_vm5, %v14993_v60, %v9906_v14  ;;  %v10436_v14 = vld [vmem:[%s14856_s3 + $0x28] sm:$0xff]   ;;  %v10438_v60 = vld [vmem:[%s14856_s3 + $0x30] sm:$0xff]  }
 0x3bf   :  { %v13879_v42 = vpop.permute.xlu1 %9914  ;;  %5774 = vmatprep.mubr.bf16.mxu0 %v5187_v34  ;;  %v5171_v5 = vmax.f32 %v5022_v43, %v5115_v21  ;;  %v5170_v18 = vmax.f32 %v5021_v45, %v5114_v19  ;;  %v9922_v45 = vunpack.i.h.bf16 %v13877_v59  ;;  %v9921_v21 = vunpack.i.l.bf16 %v13877_v59  ;;  %v10531_v59 = vld [vmem:[#allocation4 + $0x128] sm:$0xff] }
 0x3c0   :  { %5775 = vmatmul.mubr.bf16.vlgmr.msra.gmra.mrb[48].mxu0 %v5186_v33  ;;  %v10437_v33 = vld [vmem:[%s14856_s3 + $0x70] sm:$0xff]  }
 0x3c1   :  { %v5192_v29 = vpack.c.bf16 %v5178_v46, %v5171_v5  ;;  %v5191_v51 = vpack.c.bf16 %v5177_v61, %v5170_v18  ;;  %10099 = vrot.lane.b32.xlu1 %v10098_v63, %s10534_s24  ;;  %10079 = vrot.lane.b32.xlu0 %v10073_v38, %s10538_s14  ;;  %v10530_v46 = vld [vmem:[#allocation4 + $0x1a0] sm:$0xff]  ;;  %v5116_v20 = vsel %vm5097_vm5, %v9907_v40, %v9921_v21 }
 0x3c2   :  { %9209 = vmatpush3.bf16.msra.mxu0 %v10422_v56 }
 0x3c3   :  { %5733 = vmatprep.mubr.bf16.mxu1 %v5192_v29  ;;  %v9930_v62 = vpop.permute.xlu0 %9929  ;;  %v9925_v32 = vpop.permute.xlu1 %9924  ;;  %9210 = vmatprep.subr.bf16.mxu0 %v10423_v28 }
 0x3c4   :  { %5734 = vmatmul.mubr.bf16.gmra.mrb[36].mxu1 %v5191_v51  ;;  %v9932_v9 = vunpack.i.h.bf16 %v9930_v62  ;;  %v9931_v41 = vunpack.i.l.bf16 %v9930_v62  ;;  %v9927_v47 = vunpack.i.h.bf16 %v9925_v32  ;;  %v9926_v16 = vunpack.i.l.bf16 %v9925_v32 }
 0x3c5   :  { %10104 = vrot.lane.b32.xlu1 %v10098_v63, %s10538_s14  ;;  %10084 = vrot.lane.b32.xlu0 %v10083_v50, %s10534_s24  ;;  %v10439_v63 = vld [vmem:[%s14856_s3 + $0x78] sm:$0xff]   ;;  %s10543_s24 = smov 32  }
 0x3c6   :  { %v4962_v12 = vsel %vm1785_vm1, %v9882_v57, %v9927_v47  ;;  %v4955_v4 = vsel %vm1785_vm1, %v9867_v17, %v9926_v16  ;;  %9211 = vmatpush3.bf16.msra.mxu0 %v10425_v10  ;;  %v5104_v15 = vsel %vm5097_vm5, %v9897_v6, %v9931_v41  ;;  %v5111_v57 = vsel %vm5097_vm5, %v9902_v30, %v9932_v9  ;;  %v10435_v6 = vld [vmem:[%s14856_s3 + $0x68] sm:$0xff]   ;;  %v10447_v16 = vld [vmem:[%s14856_s3 + $0x140] sm:$0xff]  }
 0x3c7   :  { %v5011_v0 = vmax.f32 %v10527_v36, %v4955_v4  ;;  %v5018_v27 = vmax.f32 %v10528_v44, %v4962_v12  ;;  %9212 = vmatprep.subr.bf16.mxu0 %v10426_v54  ;;  %v9917_v30 = vunpack.i.h.bf16 %v13879_v42  ;;  %v10440_v54 = vld [vmem:[%s14856_s3 + $0x38] sm:$0xff]  }
 0x3c9   :  { %10094 = vrot.lane.b32.xlu0 %v13834_v52, %s10538_s14  ;;  %v5160_v17 = vmax.f32 %v5011_v0, %v5104_v15  ;;  %v5167_v35 = vmax.f32 %v5018_v27, %v5111_v57  ;;  %v9916_v52 = vunpack.i.l.bf16 %v13879_v42  ;;  %v4974_v24 = vsel %vm1785_vm1, %v9892_v23, %v9917_v30  ;;  %v10442_v57 = vld [vmem:[%s14856_s3 + $0x80] sm:$0xff]  }
 0x3ca   :  { %9213 = vmatpush3.bf16.msra.mxu0 %v10428_v58  ;;  %v5030_v31 = vmax.f32 %v10530_v46, %v4974_v24 }
 0x3cb   :  { %v5188_v38 = vpack.c.bf16 %v5167_v35, %v5160_v17  ;;  %9214 = vmatprep.subr.bf16.mxu0 %v10429_v3  ;;  %v4967_v43 = vsel %vm1785_vm1, %v9887_v2, %v9916_v52 }
 0x3cc   :  { %v5023_v2 = vmax.f32 %v10529_v25, %v4967_v43 }
 0x3cd   :  { %10109 = vrot.lane.b32.xlu0 %v10083_v50, %s10538_s14  ;;  %9454 = vmatprep.mubr.bf16.mxu1 %v5188_v38 }
 0x3ce   :  { %9215 = vmatpush3.bf16.msra.mxu0 %v10431_v26  ;;  %v5172_v32 = vmax.f32 %v5023_v2, %v5116_v20 }
 0x3cf   :  { %9216 = vmatprep.subr.bf16.mxu0 %v10432_v53 }
 0x3d2   :  { %9217 = vmatpush3.bf16.msra.mxu0 %v10434_v49  ;;  %v10443_v49 = vld [vmem:[%s14856_s3 + $0xc8] sm:$0xff]  }
 0x3d3   :  { %v9935_v37 = vpop.permute.xlu0 %9934  ;;  %v9940_v11 = vpop.permute.xlu1 %9939  ;;  %9218 = vmatprep.subr.bf16.mxu0 %v10435_v6 }
 0x3d4   :  { %v9937_v34 = vunpack.i.h.bf16 %v9935_v37  ;;  %v9936_v55 = vunpack.i.l.bf16 %v9935_v37  ;;  %v9942_v56 = vunpack.i.h.bf16 %v9940_v11  ;;  %v9941_v42 = vunpack.i.l.bf16 %v9940_v11 }
 0x3d6   :  { %v4968_v48 = vsel %vm1785_vm1, %v9916_v52, %v9936_v55  ;;  %v4969_v23 = vsel %vm1785_vm1, %v9936_v55, %v9937_v34  ;;  %9219 = vmatpush3.bf16.msra.mxu0 %v10436_v14  ;;  %v5118_v9 = vsel %vm5097_vm5, %v9941_v42, %v9942_v56  ;;  %v5117_v47 = vsel %vm5097_vm5, %v9921_v21, %v9941_v42  ;;  %v5851_v34 = vld [vmem:[#allocation4 + $0xc0] sm:$0xff] }
 0x3d7   :  { %v5025_v19 = vmax.f32 %v13499_v7, %v4969_v23  ;;  %v9955_v5 = vpop.permute.xlu0 %9954  ;;  %v9945_v18 = vpop.permute.xlu1 %9944  ;;  %v5024_v61 = vmax.f32 %v10531_v59, %v4968_v48  ;;  %9220 = vmatprep.subr.bf16.mxu0 %v10437_v33  ;;  %v5123_v7 = vsel %vm5097_vm5, %v9912_v1, %v9922_v45  ;;  %v10532_v1 = vld [vmem:[#allocation4 + $0x1a8] sm:$0xff]  ;;  %v10445_v48 = vld [vmem:[%s14856_s3 + $0xd0] sm:$0xff]   ;;  %v5844_v23 = vld [vmem:[#allocation4 + $0x40] sm:$0xff] }
 0x3d8   :  { %v9957_v28 = vunpack.i.h.bf16 %v9955_v5  ;;  %v9956_v13 = vunpack.i.l.bf16 %v9955_v5  ;;  %v9947_v29 = vunpack.i.h.bf16 %v9945_v18  ;;  %v9946_v51 = vunpack.i.l.bf16 %v9945_v18  ;;  %v10444_v33 = vld [vmem:[%s14856_s3 + $0x88] sm:$0xff]  }
 0x3d9   :  { %v5179_v50 = vmax.f32 %v5030_v31, %v5123_v7  ;;  %v5174_v12 = vmax.f32 %v5025_v19, %v5118_v9  ;;  %v5173_v36 = vmax.f32 %v5024_v61, %v5117_v47  ;;  %v5852_v19 = vld [vmem:[#allocation4 + $0xc8] sm:$0xff] }
 0x3da   :  { %v4975_v10 = vsel %vm1785_vm1, %v9917_v30, %v9946_v51  ;;  %v4976_v62 = vsel %vm1785_vm1, %v9946_v51, %v9947_v29  ;;  %9221 = vmatpush3.bf16.msra.mxu0 %v10438_v60  ;;  %v5125_v4 = vsel %vm5097_vm5, %v9956_v13, %v9957_v28  ;;  %v5124_v58 = vsel %vm5097_vm5, %v9922_v45, %v9956_v13  ;;  %v5845_v60 = vld [vmem:[#allocation4 + $0x48] sm:$0xff]  ;;  %v10446_v28 = vld [vmem:[%s14856_s3 + $0x90] sm:$0xff]  }
 0x3db   :  { %v5032_v8 = vmax.f32 %v13511_v39, %v4976_v62  ;;  %v13966_v40 = vpop.permute.xlu0 %9959  ;;  %v13968_v22 = vpop.permute.xlu1 %9949  ;;  %v5031_v41 = vmax.f32 %v10532_v1, %v4975_v10  ;;  %9222 = vmatprep.subr.bf16.mxu0 %v10439_v63  ;;  %v5193_v53 = vpack.c.bf16 %v5179_v50, %v5172_v32  ;;  %v10449_v62 = vld [vmem:[%s14856_s3 + $0xd8] sm:$0xff]  }
 0x3dc   :  { %v9962_v0 = vunpack.i.h.bf16 %v13966_v40  ;;  %v9961_v44 = vunpack.i.l.bf16 %v13966_v40  ;;  %v9952_v3 = vunpack.i.h.bf16 %v13968_v22  ;;  %v9951_v15 = vunpack.i.l.bf16 %v13968_v22  ;;  %v10450_v1 = vld [vmem:[%s14856_s3 + $0x98] sm:$0xff]  }
 0x3dd   :  { %v5181_v39 = vmax.f32 %v5032_v8, %v5125_v4  ;;  %v5180_v27 = vmax.f32 %v5031_v41, %v5124_v58  ;;  %v10448_v8 = vld [vmem:[%s14856_s3 + $0x100] sm:$0xff]   ;;  %v10451_v41 = vld [vmem:[%s14856_s3 + $0x148] sm:$0xff]  }
 0x3de   :  { %9223 = vmatpush3.bf16.msra.mxu0 %v10440_v54  ;;  %v6008_v24 = vsel %vm1785_vm1, %v9961_v44, %v9962_v0  ;;  %v6001_v43 = vsel %vm1785_vm1, %v9951_v15, %v9952_v3  ;;  %v10453_v4 = vld [vmem:[%s14856_s3 + $0xe0] sm:$0xff]  }
 0x3df   :  { %v13983_v17 = vpop.permute.xlu0 %9969  ;;  %v9965_v35 = vpop.permute.xlu1 %9964  ;;  %v5194_v26 = vpack.c.bf16 %v5180_v27, %v5173_v36  ;;  %v5195_v38 = vpack.c.bf16 %v5181_v39, %v5174_v12  ;;  %9264 = vmatprep.subr.bf16.mxu0 %v10447_v16  ;;  %v6057_v5 = vmax.f32 %v5845_v60, %v6001_v43  ;;  %v6064_v18 = vmax.f32 %v5852_v19, %v6008_v24  ;;  %v10457_v43 = vld [vmem:[%s14856_s3 + $0xe8] sm:$0xff]   ;;  %v10456_v60 = vld [vmem:[%s14856_s3 + $0x110] sm:$0xff]  }
 0x3e0   :  { %v9972_v30 = vunpack.i.h.bf16 %v13983_v17  ;;  %v9971_v52 = vunpack.i.l.bf16 %v13983_v17  ;;  %v9967_v6 = vunpack.i.h.bf16 %v9965_v35  ;;  %v9966_v14 = vunpack.i.l.bf16 %v9965_v35  ;;  %v5853_v17 = vld [vmem:[#allocation4 + $0xd0] sm:$0xff] }
 0x3e1   :  { %5782 = vmatprep.mubr.bf16.mxu0 %v5194_v26  ;;  %9455 = vmatmul.mubr.bf16.vlgmr.msra.gmra.mrb[40].mxu1 %v5195_v38 }
 0x3e2   :  { %v6007_v37 = vsel %vm1785_vm1, %v9967_v6, %v9961_v44  ;;  %v6000_v11 = vsel %vm1785_vm1, %v9966_v14, %v9951_v15  ;;  %5783 = vmatmul.mubr.bf16.gmra.mrb[52].mxu0 %v5193_v53  ;;  %9237 = vmatpush3.bf16.msra.mxu1 %v10442_v57  ;;  %v6149_v21 = vsel %vm5097_vm5, %v9971_v52, %v9972_v30  ;;  %v10452_v57 = vld [vmem:[%s14856_s3 + $0x108] sm:$0xff]  }
 0x3e3   :  { %v9980_v55 = vpop.permute.xlu0 %9979  ;;  %v14001_v45 = vpop.permute.xlu1 %9974  ;;  %9238 = vmatprep.subr.bf16.mxu1 %v10443_v49  ;;  %v6063_v56 = vmax.f32 %v5851_v34, %v6007_v37  ;;  %v6056_v42 = vmax.f32 %v5844_v23, %v6000_v11  ;;  %v6205_v7 = vmax.f32 %v6057_v5, %v6149_v21  ;;  %v5859_v53 = vld [vmem:[#allocation4 + $0x148] sm:$0xff]  ;;  %v10454_v49 = vld [vmem:[%s14856_s3 + $0xa0] sm:$0xff]  }
 0x3e4   :  { %v9982_v25 = vunpack.i.h.bf16 %v9980_v55  ;;  %v9981_v2 = vunpack.i.l.bf16 %v9980_v55  ;;  %v9977_v46 = vunpack.i.h.bf16 %v14001_v45  ;;  %v9976_v31 = vunpack.i.l.bf16 %v14001_v45  ;;  %v5866_v55 = vld [vmem:[#allocation4 + $0x1c8] sm:$0xff]  ;;  %v5858_v21 = vld [vmem:[#allocation4 + $0x140] sm:$0xff] }
 0x3e5   :  { %v10458_v5 = vld [vmem:[%s14856_s3 + $0xa8] sm:$0xff]  }
 0x3e6   :  { %v6148_v59 = vsel %vm5097_vm5, %v9981_v2, %v9971_v52  ;;  %v6155_v61 = vsel %vm5097_vm5, %v9982_v25, %v9976_v31  ;;  %v6156_v63 = vsel %vm5097_vm5, %v9976_v31, %v9977_v46  ;;  %9239 = vmatpush3.bf16.msra.mxu1 %v10444_v33  ;;  %v10455_v52 = vld [vmem:[%s14856_s3 + $0x150] sm:$0xff]  }
 0x3e7   :  { %v6204_v13 = vmax.f32 %v6056_v42, %v6148_v59  ;;  %v6211_v29 = vmax.f32 %v6063_v56, %v6155_v61  ;;  %v14019_v51 = vpop.permute.xlu0 %9989  ;;  %v14021_v20 = vpop.permute.xlu1 %9984  ;;  %v6212_v10 = vmax.f32 %v6064_v18, %v6156_v63  ;;  %9240 = vmatprep.subr.bf16.mxu1 %v10445_v48  ;;  %v5865_v48 = vld [vmem:[#allocation4 + $0x1c0] sm:$0xff]  ;;  %v10459_v18 = vld [vmem:[%s14856_s3 + $0x158] sm:$0xff]  }
 0x3e8   :  { %v9987_v32 = vunpack.i.h.bf16 %v14021_v20  ;;  %v9986_v50 = vunpack.i.l.bf16 %v14021_v20  ;;  %v9992_v27 = vunpack.i.h.bf16 %v14019_v51  ;;  %v9991_v15 = vunpack.i.l.bf16 %v14019_v51  ;;  %v5867_v51 = vld [vmem:[#allocation4 + $0x1d0] sm:$0xff] }
 0x3e9   :  { %v6232_v54 = vpack.c.bf16 %v6211_v29, %v6204_v13  ;;  %v6233_v9 = vpack.c.bf16 %v6212_v10, %v6205_v7  ;;  %v10461_v13 = vld [vmem:[%s14856_s3 + $0xf0] sm:$0xff]   ;;  %v10460_v10 = vld [vmem:[%s14856_s3 + $0x118] sm:$0xff]  }
 0x3ea   :  { %9241 = vmatpush3.bf16.msra.mxu1 %v10446_v28  ;;  %v6015_v47 = vsel %vm1785_vm1, %v9986_v50, %v9987_v32  ;;  %v6163_v25 = vsel %vm5097_vm5, %v9991_v15, %v9992_v27 }
 0x3eb   :  { %v14040_v16 = vpop.permute.xlu0 %9994  ;;  %v10000_v12 = vpop.permute.xlu1 %9999  ;;  %6726 = vmatprep.mubr.bf16.mxu0 %v6233_v9  ;;  %9242 = vmatprep.subr.bf16.mxu1 %v10449_v62  ;;  %v6071_v24 = vmax.f32 %v5859_v53, %v6015_v47  ;;  %v10462_v62 = vld [vmem:[%s14856_s3 + $0xb0] sm:$0xff]   ;;  %v10464_v9 = vld [vmem:[%s14856_s3 + $0x120] sm:$0xff]   ;;  %v10468_v47 = vld [vmem:[%s14856_s3 + $0x128] sm:$0xff]  }
 0x3ec   :  { %v9997_v58 = vunpack.i.h.bf16 %v14040_v16  ;;  %v9996_v36 = vunpack.i.l.bf16 %v14040_v16  ;;  %v10002_v39 = vunpack.i.h.bf16 %v10000_v12  ;;  %v10001_v44 = vunpack.i.l.bf16 %v10000_v12  ;;  %6727 = vmatmul.mubr.bf16.vlgmr.msra.gmra.mrb[56].mxu0 %v6232_v54  ;;  %v10465_v54 = vld [vmem:[%s14856_s3 + $0xf8] sm:$0xff]   ;;  %v10470_v12 = vld [vmem:[%s14856_s3 + $0x170] sm:$0xff]  }
 0x3ed   :  { %9265 = vmatpush3.bf16.msra.mxu0 %v10448_v8  ;;  %v6219_v59 = vmax.f32 %v6071_v24, %v6163_v25  ;;  %v10466_v8 = vld [vmem:[%s14856_s3 + $0xb8] sm:$0xff]   ;;  %v5846_v24 = vld [vmem:[#allocation4 + $0x50] sm:$0xff] }
 0x3ee   :  { %v6022_v35 = vsel %vm1785_vm1, %v9996_v36, %v9997_v58  ;;  %v6021_v26 = vsel %vm1785_vm1, %v10002_v39, %v9996_v36  ;;  %v6014_v38 = vsel %vm1785_vm1, %v10001_v44, %v9986_v50  ;;  %9243 = vmatpush3.bf16.msra.mxu1 %v10450_v1  ;;  %9266 = vmatprep.subr.bf16.mxu0 %v10451_v41  ;;  %v10463_v50 = vld [vmem:[%s14856_s3 + $0x160] sm:$0xff]   ;;  %v10467_v1 = vld [vmem:[%s14856_s3 + $0x168] sm:$0xff]   ;;  %v10473_v36 = vld [vmem:[%s14856_s3 + $0x178] sm:$0xff]  }
 0x3ef   :  { %v10010_v6 = vpop.permute.xlu0 %10009  ;;  %v14063_v14 = vpop.permute.xlu1 %10004  ;;  %9244 = vmatprep.subr.bf16.mxu1 %v10453_v4  ;;  %v6078_v23 = vmax.f32 %v5866_v55, %v6022_v35  ;;  %v6070_v2 = vmax.f32 %v5858_v21, %v6014_v38  ;;  %v6077_v31 = vmax.f32 %v5865_v48, %v6021_v26  ;;  %v14114_v41 = vld [vmem:[%s14856_s3 + $0x180] sm:$0xff]   ;;  %v10471_v4 = vld [vmem:[%s14856_s3 + $0x130] sm:$0xff]   ;;  %v10474_v39 = vld [vmem:[%s14856_s3 + $0x138] sm:$0xff]  }
 0x3f0   :  { %v10012_v37 = vunpack.i.h.bf16 %v10010_v6  ;;  %v10011_v11 = vunpack.i.l.bf16 %v10010_v6  ;;  %v10007_v33 = vunpack.i.h.bf16 %v14063_v14  ;;  %v10006_v34 = vunpack.i.l.bf16 %v14063_v14  ;;  %v10478_v14 = vld [vmem:[%s14856_s3 + $0x1a8] sm:$0xff]  }
 0x3f1   :  { %9267 = vmatpush3.bf16.msra.mxu0 %v10452_v57 }
 0x3f2   :  { %v6170_v19 = vsel %vm5097_vm5, %v10006_v34, %v10007_v33  ;;  %v6162_v56 = vsel %vm5097_vm5, %v10011_v11, %v9991_v15  ;;  %v6169_v42 = vsel %vm5097_vm5, %v10012_v37, %v10006_v34  ;;  %9245 = vmatpush3.bf16.msra.mxu1 %v10454_v49  ;;  %9268 = vmatprep.subr.bf16.mxu0 %v10455_v52 }
 0x3f3   :  { %v6226_v61 = vmax.f32 %v6078_v23, %v6170_v19  ;;  %v6218_v63 = vmax.f32 %v6070_v2, %v6162_v56  ;;  %v6225_v28 = vmax.f32 %v6077_v31, %v6169_v42  ;;  %9246 = vmatprep.subr.bf16.mxu1 %v10457_v43 }
 0x3f5   :  { %v6240_v29 = vpack.c.bf16 %v6226_v61, %v6219_v59  ;;  %v6239_v7 = vpack.c.bf16 %v6225_v28, %v6218_v63  ;;  %9269 = vmatpush3.bf16.msra.mxu0 %v10456_v60 }
 0x3f6   :  { %9247 = vmatpush3.bf16.msra.mxu1 %v10458_v5  ;;  %9270 = vmatprep.subr.bf16.mxu0 %v10459_v18  ;;  %v5847_v18 = vld [vmem:[#allocation4 + $0x58] sm:$0xff] }
 0x3f7   :  { %6734 = vmatprep.mubr.bf16.mxu0 %v6240_v29  ;;  %9248 = vmatprep.subr.bf16.mxu1 %v10461_v13 }
 0x3f8   :  { %6735 = vmatmul.mubr.bf16.gmra.mrb[60].mxu0 %v6239_v7 }
 0x3f9   :  { %9271 = vmatpush3.bf16.msra.mxu0 %v10460_v10  ;;  %v5854_v10 = vld [vmem:[#allocation4 + $0xd8] sm:$0xff] }
 0x3fa   :  { %9249 = vmatpush3.bf16.msra.mxu1 %v10462_v62  ;;  %9272 = vmatprep.subr.bf16.mxu0 %v10463_v50 }
 0x3fb   :  { %9250 = vmatprep.subr.bf16.mxu1 %v10465_v54 }
 0x3fd   :  { %9273 = vmatpush3.bf16.msra.mxu0 %v10464_v9 }
 0x3fe   :  { %9251 = vmatpush3.bf16.msra.mxu1 %v10466_v8  ;;  %9274 = vmatprep.subr.bf16.mxu0 %v10467_v1 }
 0x3ff   :  { %9458 = vmatprep.subr.bf16.mxu1 %v14114_v41 }
 0x401   :  { %9275 = vmatpush3.bf16.msra.mxu0 %v10468_v47 }
 0x402   :  { %9276 = vmatprep.subr.bf16.mxu0 %v10470_v12 }
 0x405   :  { %9277 = vmatpush3.bf16.msra.mxu0 %v10471_v4 }
 0x406   :  { %9278 = vmatprep.subr.bf16.mxu0 %v10473_v36 }
 0x408   :  { %v9130_v44 = vpop.f32.mrb[40].mxu0 }
 0x409   :  { %v9131_v15 = vpop.f32.mrb[41].mxu0  ;;  %9279 = vmatpush3.bf16.msra.mxu0 %v10474_v39 }
 0x40a   :  { %v14132_v57 = vadd.f32 %v9131_v15, %v9130_v44  ;;  %v9133_v35 = vpop.f32.mrb[42].mxu0 }
 0x40b   :  { %v9134_v26 = vpop.f32.mrb[43].mxu0 }
 0x40c   :  { %v14134_v38 = vadd.f32 %v9134_v26, %v9133_v35 }
 0x413   :  { %v10015_v53 = vpop.permute.xlu1 %10014 }
 0x414   :  { %v10016_v49 = vunpack.i.l.bf16 %v10015_v53  ;;  %v10017_v11 = vunpack.i.h.bf16 %v10015_v53  ;;  %v5848_v53 = vld [vmem:[#allocation4 + $0x60] sm:$0xff] }
 0x416   :  { %v6002_v52 = vsel %vm1785_vm1, %v9952_v3, %v10016_v49  ;;  %v6003_v22 = vsel %vm1785_vm1, %v10016_v49, %v10017_v11 }
 0x417   :  { %v10020_v6 = vpop.permute.xlu1 %10019  ;;  %v6058_v37 = vmax.f32 %v5846_v24, %v6002_v52  ;;  %v6059_v28 = vmax.f32 %v5847_v18, %v6003_v22  ;;  %v5855_v24 = vld [vmem:[#allocation4 + $0xe0] sm:$0xff] }
 0x418   :  { %v10021_v43 = vunpack.i.l.bf16 %v10020_v6  ;;  %v10022_v2 = vunpack.i.h.bf16 %v10020_v6  ;;  %v5849_v6 = vld [vmem:[#allocation4 + $0x68] sm:$0xff] }
 0x41a   :  { %v6150_v34 = vsel %vm5097_vm5, %v9972_v30, %v10021_v43  ;;  %v6151_v40 = vsel %vm5097_vm5, %v10021_v43, %v10022_v2 }
 0x41b   :  { %v14142_v55 = vmax.f32 %v6058_v37, %v6150_v34  ;;  %v10040_v21 = vpop.permute.xlu0 %10039  ;;  %v14144_v48 = vpop.permute.xlu1 %10024  ;;  %v6207_v4 = vmax.f32 %v6059_v28, %v6151_v40  ;;  %v10475_v40 = vld [vmem:[%s14856_s3 + $0x190] sm:$0xff]  }
 0x41c   :  { %v10042_v23 = vunpack.i.h.bf16 %v10040_v21  ;;  %v10041_v25 = vunpack.i.l.bf16 %v10040_v21  ;;  %v5856_v21 = vld [vmem:[#allocation4 + $0xe8] sm:$0xff]  ;;  %v10027_v18 = vunpack.i.h.bf16 %v14144_v48 }
 0x41e   :  { %v6009_v3 = vsel %vm1785_vm1, %v9962_v0, %v10041_v25  ;;  %v6010_v30 = vsel %vm1785_vm1, %v10041_v25, %v10042_v23 }
 0x41f   :  { %v9136_v31 = vpop.f32.mrb[44].mxu0  ;;  %v10045_v60 = vpop.permute.xlu0 %10044  ;;  %v6065_v63 = vmax.f32 %v5853_v17, %v6009_v3  ;;  %v6066_v8 = vmax.f32 %v5854_v10, %v6010_v30 }
 0x420   :  { %v9137_v19 = vpop.f32.mrb[45].mxu0  ;;  %v10047_v56 = vunpack.i.h.bf16 %v10045_v60  ;;  %v10046_v42 = vunpack.i.l.bf16 %v10045_v60  ;;  %v14151_v5 = vpop.permute.xlu1 %10029 }
 0x421   :  { %v14153_v59 = vadd.f32 %v9137_v19, %v9136_v31  ;;  %v9139_v61 = vpop.f32.mrb[46].mxu0  ;;  %v10032_v29 = vunpack.i.h.bf16 %v14151_v5  ;;  %v10031_v7 = vunpack.i.l.bf16 %v14151_v5 }
 0x422   :  { %v9140_v13 = vpop.f32.mrb[47].mxu0  ;;  %v6157_v0 = vsel %vm5097_vm5, %v9977_v46, %v10046_v42  ;;  %v6158_v62 = vsel %vm5097_vm5, %v10046_v42, %v10047_v56 }
 0x423   :  { %v14162_v50 = vadd.f32 %v9140_v13, %v9139_v61  ;;  %v6213_v54 = vmax.f32 %v6065_v63, %v6157_v0  ;;  %v10050_v9 = vpop.permute.xlu0 %10049  ;;  %v6214_v36 = vmax.f32 %v6066_v8, %v6158_v62  ;;  %v6004_v44 = vsel %vm1785_vm1, %v10017_v11, %v10031_v7  ;;  %v10472_v11 = vld [vmem:[%s14856_s3 + $0x188] sm:$0xff]  }
 0x424   :  { %v10052_v1 = vunpack.i.h.bf16 %v10050_v9  ;;  %v10051_v47 = vunpack.i.l.bf16 %v10050_v9  ;;  %v14164_v12 = vpop.permute.xlu1 %10034  ;;  %v6005_v15 = vsel %vm1785_vm1, %v10031_v7, %v10032_v29  ;;  %v6060_v25 = vmax.f32 %v5848_v53, %v6004_v44  ;;  %v5860_v53 = vld [vmem:[#allocation4 + $0x150] sm:$0xff] }
 0x425   :  { %v10037_v45 = vunpack.i.h.bf16 %v14164_v12  ;;  %v10036_v46 = vunpack.i.l.bf16 %v14164_v12  ;;  %v6234_v39 = vpack.c.bf16 %v6213_v54, %v14142_v55  ;;  %v6235_v52 = vpack.c.bf16 %v6214_v36, %v6207_v4  ;;  %v5850_v4 = vld [vmem:[#allocation4 + $0x70] sm:$0xff] }
 0x426   :  { %v6011_v35 = vsel %vm1785_vm1, %v10042_v23, %v10051_v47  ;;  %v6012_v26 = vsel %vm1785_vm1, %v10051_v47, %v10052_v1  ;;  %v6061_v3 = vmax.f32 %v5849_v6, %v6005_v15  ;;  %v10026_v61 = vunpack.i.l.bf16 %v14144_v48 }
 0x427   :  { %v14173_v49 = vpop.permute.xlu0 %10054  ;;  %v6152_v43 = vsel %vm5097_vm5, %v10022_v2, %v10036_v46  ;;  %v6153_v23 = vsel %vm5097_vm5, %v10036_v46, %v10037_v45  ;;  %v6067_v22 = vmax.f32 %v5855_v24, %v6011_v35  ;;  %6775 = vmatprep.mubr.bf16.mxu1 %v6235_v52  ;;  %v6068_v2 = vmax.f32 %v5856_v21, %v6012_v26  ;;  %v5857_v46 = vld [vmem:[#allocation4 + $0xf0] sm:$0xff]  ;;  %v5861_v35 = vld [vmem:[#allocation4 + $0x158] sm:$0xff] }
 0x428   :  { %v10057_v37 = vunpack.i.h.bf16 %v14173_v49  ;;  %v10056_v34 = vunpack.i.l.bf16 %v14173_v49  ;;  %v14178_v55 = vpop.permute.xlu1 %10059  ;;  %6776 = vmatmul.mubr.bf16.vlgmr.msra.gmra.mrb[44].mxu1 %v6234_v39  ;;  %v6208_v19 = vmax.f32 %v6060_v25, %v6152_v43  ;;  %v6209_v42 = vmax.f32 %v6061_v3, %v6153_v23  ;;  %v10477_v23 = vld [vmem:[%s14856_s3 + $0x1a0] sm:$0xff]   ;;  %v5868_v25 = vld [vmem:[#allocation4 + $0x1d8] sm:$0xff] }
 0x429   :  { %9459 = vmatpush3.bf16.msra.mxu1 %v14114_v41  ;;  %v10062_v63 = vunpack.i.h.bf16 %v14178_v55  ;;  %v6006_v0 = vsel %vm1785_vm1, %v10032_v29, %v10026_v61  ;;  %v6013_v7 = vsel %vm1785_vm1, %v10052_v1, %v10027_v18  ;;  %v10476_v1 = vld [vmem:[%s14856_s3 + $0x198] sm:$0xff]  }
 0x42a   :  { %v6159_v31 = vsel %vm5097_vm5, %v10047_v56, %v10056_v34  ;;  %v6160_v60 = vsel %vm5097_vm5, %v10056_v34, %v10057_v37  ;;  %v10061_v56 = vunpack.i.l.bf16 %v14178_v55  ;;  %9460 = vmatprep.subr.bf16.mxu1 %v10472_v11  ;;  %v6062_v20 = vmax.f32 %v5850_v4, %v6006_v0  ;;  %v10479_v4 = vld [vmem:[%s14856_s3 + $0x1b0] sm:$0xff]  }
 0x42b   :  { %v6215_v17 = vmax.f32 %v6067_v22, %v6159_v31  ;;  %v14191_v30 = vpop.permute.xlu0 %10069  ;;  %v6216_v5 = vmax.f32 %v6068_v2, %v6160_v60  ;;  %v6069_v44 = vmax.f32 %v5857_v46, %v6013_v7  ;;  %v5870_v46 = vld [vmem:[#allocation4 + $0x1e8] sm:$0xff] }
 0x42c   :  { %v14197_v28 = vpop.permute.xlu1 %10064  ;;  %v6016_v54 = vsel %vm1785_vm1, %v9987_v32, %v10061_v56  ;;  %v6017_v9 = vsel %vm1785_vm1, %v10061_v56, %v10062_v63  ;;  %v10072_v6 = vunpack.i.h.bf16 %v14191_v30  ;;  %v10071_v24 = vunpack.i.l.bf16 %v14191_v30 }
 0x42d   :  { %v6236_v41 = vpack.c.bf16 %v6215_v17, %v6208_v19  ;;  %v6237_v13 = vpack.c.bf16 %v6216_v5, %v6209_v42  ;;  %v10067_v10 = vunpack.i.h.bf16 %v14197_v28  ;;  %v10066_v48 = vunpack.i.l.bf16 %v14197_v28  ;;  %9461 = vmatpush3.bf16.msra.mxu1 %v10472_v11 }
 0x42e   :  { %9462 = vmatprep.subr.bf16.mxu1 %v10475_v40  ;;  %v6073_v43 = vmax.f32 %v5861_v35, %v6017_v9  ;;  %v6019_v56 = vsel %vm1785_vm1, %v10071_v24, %v10072_v6  ;;  %v5863_v9 = vld [vmem:[#allocation4 + $0x168] sm:$0xff] }
 0x42f   :  { %v10075_v62 = vpop.permute.xlu0 %10074  ;;  %6824 = vmatprep.mubr.bf16.mxu0 %v6237_v13  ;;  %v6165_v26 = vsel %vm5097_vm5, %v10066_v48, %v10067_v10  ;;  %v6164_v52 = vsel %vm5097_vm5, %v9992_v27, %v10066_v48 }
 0x430   :  { %v10077_v8 = vunpack.i.h.bf16 %v10075_v62  ;;  %v10076_v47 = vunpack.i.l.bf16 %v10075_v62  ;;  %v10090_v29 = vpop.permute.xlu1 %10089  ;;  %6825 = vmatmul.mubr.bf16.vlgmr.msra.gmra.mrb[64].mxu0 %v6236_v41  ;;  %v6221_v2 = vmax.f32 %v6073_v43, %v6165_v26 }
 0x431   :  { %v10092_v36 = vunpack.i.h.bf16 %v10090_v29  ;;  %v10091_v39 = vunpack.i.l.bf16 %v10090_v29  ;;  %9463 = vmatpush3.bf16.msra.mxu1 %v10475_v40 }
 0x432   :  { %v6023_v32 = vsel %vm1785_vm1, %v9997_v58, %v10076_v47  ;;  %v6024_v15 = vsel %vm1785_vm1, %v10076_v47, %v10077_v8  ;;  %v6072_v58 = vmax.f32 %v5860_v53, %v6016_v54  ;;  %9464 = vmatprep.subr.bf16.mxu1 %v10476_v1  ;;  %v5862_v47 = vld [vmem:[#allocation4 + $0x160] sm:$0xff] }
 0x433   :  { %v10080_v16 = vpop.permute.xlu0 %10079  ;;  %v6154_v27 = vsel %vm5097_vm5, %v10037_v45, %v10091_v39  ;;  %v6161_v22 = vsel %vm5097_vm5, %v10057_v37, %v10092_v36  ;;  %v6080_v3 = vmax.f32 %v5868_v25, %v6024_v15  ;;  %v6079_v31 = vmax.f32 %v5867_v51, %v6023_v32  ;;  %v5869_v36 = vld [vmem:[#allocation4 + $0x1e0] sm:$0xff] }
 0x434   :  { %v10082_v34 = vunpack.i.h.bf16 %v10080_v16  ;;  %v10081_v11 = vunpack.i.l.bf16 %v10080_v16  ;;  %v10100_v21 = vpop.permute.xlu1 %10099  ;;  %v6220_v60 = vmax.f32 %v6072_v58, %v6164_v52  ;;  %v6210_v61 = vmax.f32 %v6062_v20, %v6154_v27 }
 0x435   :  { %v10102_v19 = vunpack.i.h.bf16 %v10100_v21  ;;  %v10101_v17 = vunpack.i.l.bf16 %v10100_v21  ;;  %9465 = vmatpush3.bf16.msra.mxu1 %v10476_v1  ;;  %v6217_v49 = vmax.f32 %v6069_v44, %v6161_v22  ;;  %v6018_v37 = vsel %vm1785_vm1, %v10062_v63, %v10071_v24  ;;  %v5871_v21 = vld [vmem:[#allocation4 + $0x1f0] sm:$0xff] }
 0x436   :  { %v6172_v42 = vsel %vm5097_vm5, %v10081_v11, %v10082_v34  ;;  %v6171_v5 = vsel %vm5097_vm5, %v10007_v33, %v10081_v11  ;;  %9466 = vmatprep.subr.bf16.mxu1 %v10477_v23  ;;  %v6075_v20 = vmax.f32 %v5863_v9, %v6019_v56  ;;  %v6074_v32 = vmax.f32 %v5862_v47, %v6018_v37  ;;  %v5864_v11 = vld [vmem:[#allocation4 + $0x170] sm:$0xff] }
 0x437   :  { %v10085_v12 = vpop.permute.xlu0 %10084  ;;  %v6228_v18 = vmax.f32 %v6080_v3, %v6172_v42  ;;  %v6227_v45 = vmax.f32 %v6079_v31, %v6171_v5  ;;  %v6025_v7 = vsel %vm1785_vm1, %v10077_v8, %v10101_v17  ;;  %v6026_v55 = vsel %vm1785_vm1, %v10101_v17, %v10102_v19 }
 0x438   :  { %v10105_v40 = vpop.permute.xlu1 %10104  ;;  %v10087_v48 = vunpack.i.h.bf16 %v10085_v12  ;;  %v10086_v63 = vunpack.i.l.bf16 %v10085_v12  ;;  %v6238_v54 = vpack.c.bf16 %v6217_v49, %v6210_v61  ;;  %v6082_v44 = vmax.f32 %v5870_v46, %v6026_v55 }
 0x439   :  { %v10107_v33 = vunpack.i.h.bf16 %v10105_v40  ;;  %v10106_v41 = vunpack.i.l.bf16 %v10105_v40  ;;  %v6242_v13 = vpack.c.bf16 %v6228_v18, %v6221_v2  ;;  %v6241_v0 = vpack.c.bf16 %v6227_v45, %v6220_v60  ;;  %9467 = vmatpush3.bf16.msra.mxu1 %v10477_v23 }
 0x43a   :  { %9468 = vmatprep.subr.bf16.mxu1 %v10478_v14  ;;  %v6081_v15 = vmax.f32 %v5869_v36, %v6025_v7  ;;  %v6020_v35 = vsel %vm1785_vm1, %v10072_v6, %v10086_v63  ;;  %v6027_v26 = vsel %vm1785_vm1, %v10102_v19, %v10087_v48  ;;  %v10480_v6 = vld [vmem:[%s14856_s3 + $0x1b8] sm:$0xff]   ;;  %s10539_s3 = smov 77  }
 0x43b   :  { %v10095_v62 = vpop.permute.xlu0 %10094  ;;  %6783 = vmatprep.mubr.bf16.mxu1 %v6242_v13  ;;  %v6174_v8 = vsel %vm5097_vm5, %v10106_v41, %v10107_v33  ;;  %v6173_v39 = vsel %vm5097_vm5, %v10082_v34, %v10106_v41  ;;  %v6076_v25 = vmax.f32 %v5864_v11, %v6020_v35  ;;  %v6083_v51 = vmax.f32 %v5871_v21, %v6027_v26 }
 0x43c   :  { %v10097_v29 = vunpack.i.h.bf16 %v10095_v62  ;;  %v10096_v1 = vunpack.i.l.bf16 %v10095_v62  ;;  %6784 = vmatmul.mubr.bf16.gmra.mrb[48].mxu1 %v6241_v0  ;;  %v6230_v43 = vmax.f32 %v6082_v44, %v6174_v8  ;;  %v6229_v34 = vmax.f32 %v6081_v15, %v6173_v39 }
 0x43d   :  { %9474 = vmatprep.mubr.bf16.mxu1 %v6238_v54  ;;  %9469 = vmatpush3.bf16.msra.mxu1 %v10478_v14 }
 0x43e   :  { %v6167_v53 = vsel %vm5097_vm5, %v10096_v1, %v10097_v29  ;;  %v6166_v52 = vsel %vm5097_vm5, %v10067_v10, %v10096_v1  ;;  %9470 = vmatprep.subr.bf16.mxu1 %v10479_v4 }
 0x43f   :  { %v10110_v24 = vpop.permute.xlu0 %10109  ;;  %v6223_v16 = vmax.f32 %v6075_v20, %v6167_v53  ;;  %v6222_v58 = vmax.f32 %v6074_v32, %v6166_v52 }
 0x440   :  { %v10112_v23 = vunpack.i.h.bf16 %v10110_v24  ;;  %v10111_v30 = vunpack.i.l.bf16 %v10110_v24 }
 0x441   :  { %v6244_v28 = vpack.c.bf16 %v6230_v43, %v6223_v16  ;;  %v6243_v27 = vpack.c.bf16 %v6229_v34, %v6222_v58  ;;  %9471 = vmatpush3.bf16.msra.mxu1 %v10479_v4 }
 0x442   :  { %v6168_v10 = vsel %vm5097_vm5, %v10097_v29, %v10111_v30  ;;  %v6175_v22 = vsel %vm5097_vm5, %v10107_v33, %v10112_v23  ;;  %9472 = vmatprep.subr.bf16.mxu1 %v10480_v6 }
 0x443   :  { %v6224_v3 = vmax.f32 %v6076_v25, %v6168_v10  ;;  %v6231_v2 = vmax.f32 %v6083_v51, %v6175_v22  ;;  %6832 = vmatprep.mubr.bf16.mxu0 %v6244_v28 }
 0x444   :  { %6833 = vmatmul.mubr.bf16.gmra.mrb[68].mxu0 %v6243_v27 }
 0x445   :  { %v6245_v31 = vpack.c.bf16 %v6231_v2, %v6224_v3  ;;  %9473 = vmatpush3.bf16.msra.mxu1 %v10480_v6 }
 0x448   :  { %9475 = vmatmul.mubr.bf16.vlgmr.msra.gmra.mrb[52].mxu1 %v6245_v31 }
 0x44f   :  { %v9158_v60 = vpop.f32.mrb[32].mxu1 }
 0x450   :  { %v9159_v19 = vpop.f32.mrb[33].mxu1 }
 0x451   :  { %v9160_v17 = vadd.f32 %v9159_v19, %v9158_v60  ;;  %v9161_v42 = vpop.f32.mrb[34].mxu1 }
 0x452   :  { %v9162_v5 = vpop.f32.mrb[35].mxu1 }
 0x453   :  { %v5728_v12 = vadd.f32 %v9160_v17, %v14132_v57  ;;  %v9163_v18 = vadd.f32 %v9162_v5, %v9161_v42 }
 0x455   :  { %v5731_v45 = vadd.f32 %v9163_v18, %v14134_v38 }
 0x493   :  { %v9186_v61 = vpop.f32.mrb[48].mxu0 }
 0x494   :  { %v9187_v49 = vpop.f32.mrb[49].mxu0 }
 0x495   :  { %v9188_v37 = vadd.f32 %v9187_v49, %v9186_v61  ;;  %v9189_v56 = vpop.f32.mrb[50].mxu0 }
 0x496   :  { %v9190_v40 = vpop.f32.mrb[51].mxu0 }
 0x497   :  { %v9191_v14 = vadd.f32 %v9190_v40, %v9189_v56  ;;  %v9164_v33 = vpop.f32.mrb[36].mxu1  ;;  %v5777_v41 = vadd.f32 %v9188_v37, %v5728_v12 }
 0x498   :  { %v9165_v13 = vpop.f32.mrb[37].mxu1 }
 0x499   :  { %v9166_v0 = vadd.f32 %v9165_v13, %v9164_v33  ;;  %v9167_v7 = vpop.f32.mrb[38].mxu1  ;;  %v5780_v55 = vadd.f32 %v9191_v14, %v5731_v45 }
 0x49a   :  { %v9168_v48 = vpop.f32.mrb[39].mxu1 }
 0x49b   :  { %v5736_v63 = vadd.f32 %v9166_v0, %v14153_v59  ;;  %v9169_v62 = vadd.f32 %v9168_v48, %v9167_v7 }
 0x49d   :  { %v5739_v57 = vadd.f32 %v9169_v62, %v14162_v50 }
 0x4b4   :  { %v9456_v54 = vpop.f32.mrb[40].mxu1 }
 0x4b5   :  { %v9192_v38 = vpop.f32.mrb[52].mxu0  ;;  %v5825_v9 = vpop.f32.mrb[41].mxu1 }
 0x4b6   :  { %v5826_v47 = vadd.f32 %v5825_v9, %v5777_v41  ;;  %v9193_v29 = vpop.f32.mrb[53].mxu0  ;;  %v9457_v1 = vpop.f32.mrb[42].mxu1 }
 0x4b7   :  { %v9194_v4 = vadd.f32 %v9193_v29, %v9192_v38  ;;  %v9195_v46 = vpop.f32.mrb[54].mxu0  ;;  %v5828_v8 = vpop.f32.mrb[43].mxu1 }
 0x4b8   :  { %v5829_v36 = vadd.f32 %v5828_v8, %v5780_v55  ;;  %v9196_v39 = vpop.f32.mrb[55].mxu0 }
 0x4b9   :  { %v5785_v20 = vadd.f32 %v9194_v4, %v5736_v63  ;;  %v9197_v44 = vadd.f32 %v9196_v39, %v9195_v46 }
 0x4ba   :  { %v14273_v32 = vpack.c.bf16 %v5829_v36, %v5826_v47 }
 0x4bb   :  { %v5834_v15 = vadd.f32 %v9456_v54, %v5785_v20  ;;  %v5788_v59 = vadd.f32 %v9197_v44, %v5739_v57 }
 0x4bc   :  { %6896 = vst.msk [vmem:[#allocation6] sm:$0xff] %vm3075_vm3, %v14273_v32 }
 0x4bd   :  { %v5837_v50 = vadd.f32 %v9457_v1, %v5788_v59 }
 0x4bf   :  { %v14277_v35 = vpack.c.bf16 %v5837_v50, %v5834_v15  ;;  %v9224_v26 = vpop.f32.mrb[56].mxu0 }
 0x4c0   :  { %v9225_v53 = vpop.f32.mrb[57].mxu0 }
 0x4c1   :  { %6897 = vst.msk [vmem:[#allocation6 + $0x8] sm:$0xff] %vm3075_vm3, %v14277_v35  ;;  %v9226_v52 = vadd.f32 %v9225_v53, %v9224_v26  ;;  %v9227_v24 = vpop.f32.mrb[58].mxu0  ;;  %7013 = vrot.lane.b32.xlu1 %v14277_v35, %s10539_s3  ;;  %6989 = vrot.lane.b32.xlu0 %v14277_v35, %s10540_s30  ;;  %v10483_v53 = vld [vmem:[%s14857_s4 + $0x4] ss:$12 sps:$4 sm:$0xff]  }
 0x4c2   :  { %v9228_v16 = vpop.f32.mrb[59].mxu0  ;;  %7289 = vmatprep.mubr.bf16.mxu0 %v10483_v53 }
 0x4c3   :  { %v9229_v43 = vadd.f32 %v9228_v16, %v9227_v24  ;;  %v10487_v24 = vld [vmem:[%s14857_s4 + $0x8] ss:$12 sps:$4 sm:$0xff]  }
 0x4c4   :  { %v7138_v16 = vld [vmem:[%s14858_s5 + $0x8] sm:$0xff]  ;;  %9482 = vmatprep.mubr.msk.bf16.mxu1 %vm3075_vm3, %v10487_v24 }
 0x4c5   :  { %7037 = vrot.lane.b32.xlu1 %v14277_v35, %s10541_s13  ;;  %6917 = vrot.lane.b32.xlu0 %v14277_v35, %s10542_s15 }
 0x4c9   :  { %6915 = vrot.lane.b32.xlu0 %v14273_v32, %s10542_s15  ;;  %6987 = vrot.lane.b32.xlu1 %v14273_v32, %s10540_s30 }
 0x4cb   :  { %v9230_v58 = vpop.f32.mrb[60].mxu0 }
 0x4cc   :  { %v9231_v34 = vpop.f32.mrb[61].mxu0 }
 0x4cd   :  { %v9232_v11 = vadd.f32 %v9231_v34, %v9230_v58  ;;  %v9233_v21 = vpop.f32.mrb[62].mxu0  ;;  %6939 = vrot.lane.b32.xlu0 %v14273_v32, %s10533_s21  ;;  %7011 = vrot.lane.b32.xlu1 %v14273_v32, %s10539_s3  ;;  %v7142_v58 = vld [vmem:[%s14858_s5 + $0x28] sm:$0xff]  ;;  %v7143_v34 = vld [vmem:[%s14858_s5 + $0x30] sm:$0xff] }
 0x4ce   :  { %v9234_v23 = vpop.f32.mrb[63].mxu0 }
 0x4cf   :  { %v9235_v30 = vadd.f32 %v9234_v23, %v9233_v21 }
 0x4d1   :  { %7035 = vrot.lane.b32.xlu1 %v14273_v32, %s10541_s13 }
 0x4fb   :  { %v9252_v6 = vpop.f32.mrb[44].mxu1 }
 0x4fc   :  { %v9253_v25 = vpop.f32.mrb[45].mxu1 }
 0x4fd   :  { %v9254_v51 = vadd.f32 %v9253_v25, %v9252_v6  ;;  %v9255_v28 = vpop.f32.mrb[46].mxu1 }
 0x4fe   :  { %v9256_v27 = vpop.f32.mrb[47].mxu1 }
 0x4ff   :  { %v6778_v10 = vadd.f32 %v9254_v51, %v9226_v52  ;;  %v9257_v22 = vadd.f32 %v9256_v27, %v9255_v28  ;;  %v7137_v52 = vld [vmem:[%s14858_s5] sm:$0xff] }
 0x501   :  { %v6781_v3 = vadd.f32 %v9257_v22, %v9229_v43  ;;  %v7141_v43 = vld [vmem:[%s14858_s5 + $0x20] sm:$0xff] }
 0x503   :  { %v9280_v2 = vpop.f32.mrb[64].mxu0 }
 0x504   :  { %v9281_v31 = vpop.f32.mrb[65].mxu0 }
 0x505   :  { %v9282_v60 = vadd.f32 %v9281_v31, %v9280_v2  ;;  %v9283_v19 = vpop.f32.mrb[66].mxu0 }
 0x506   :  { %v9284_v17 = vpop.f32.mrb[67].mxu0 }
 0x507   :  { %v9285_v42 = vadd.f32 %v9284_v17, %v9283_v19  ;;  %v6827_v5 = vadd.f32 %v9282_v60, %v6778_v10 }
 0x509   :  { %v6830_v12 = vadd.f32 %v9285_v42, %v6781_v3 }
 0x50f   :  { %v9258_v18 = vpop.f32.mrb[48].mxu1 }
 0x510   :  { %v9259_v45 = vpop.f32.mrb[49].mxu1 }
 0x511   :  { %v9260_v61 = vadd.f32 %v9259_v45, %v9258_v18  ;;  %v9261_v49 = vpop.f32.mrb[50].mxu1 }
 0x512   :  { %v9262_v37 = vpop.f32.mrb[51].mxu1 }
 0x513   :  { %v6786_v56 = vadd.f32 %v9260_v61, %v9232_v11  ;;  %v9263_v40 = vadd.f32 %v9262_v37, %v9261_v49  ;;  %v7144_v11 = vld [vmem:[%s14858_s5 + $0x38] sm:$0xff] }
 0x515   :  { %v6789_v14 = vadd.f32 %v9263_v40, %v9235_v30 }
 0x517   :  { %v9286_v33 = vpop.f32.mrb[68].mxu0 }
 0x518   :  { %v9287_v41 = vpop.f32.mrb[69].mxu0 }
 0x519   :  { %v9288_v13 = vadd.f32 %v9287_v41, %v9286_v33  ;;  %v9289_v0 = vpop.f32.mrb[70].mxu0 }
 0x51a   :  { %v9290_v7 = vpop.f32.mrb[71].mxu0 }
 0x51b   :  { %v9291_v55 = vadd.f32 %v9290_v7, %v9289_v0  ;;  %v6835_v48 = vadd.f32 %v9288_v13, %v6786_v56  ;;  %v9476_v63 = vpop.f32.mrb[52].mxu1 }
 0x51c   :  { %v6875_v54 = vpop.f32.mrb[53].mxu1 }
 0x51d   :  { %v6838_v62 = vadd.f32 %v9291_v55, %v6789_v14  ;;  %v6884_v57 = vadd.f32 %v9476_v63, %v6835_v48  ;;  %v6876_v38 = vadd.f32 %v6875_v54, %v6827_v5  ;;  %v9477_v9 = vpop.f32.mrb[54].mxu1 }
 0x51e   :  { %v6878_v29 = vpop.f32.mrb[55].mxu1 }
 0x51f   :  { %v6887_v47 = vadd.f32 %v9477_v9, %v6838_v62  ;;  %v6879_v1 = vadd.f32 %v6878_v29, %v6830_v12  ;;  %v10481_v29 = vld [vmem:[%s14857_s4] ss:$12 sps:$4 sm:$0xff]  }
 0x521   :  { %v6891_v4 = vpack.c.bf16 %v6887_v47, %v6884_v57  ;;  %v6890_v46 = vpack.c.bf16 %v6879_v1, %v6876_v38  ;;  %v10484_v1 = vld [vmem:[%s14857_s4 + $0x1c] ss:$12 sps:$4 sm:$0xff]  }
 0x523   :  { %6904 = vrot.lane.b32.xlu0 %v6891_v4, %s10543_s24  ;;  %7001 = vrot.lane.b32.xlu1 %v6891_v4, %s10544_s2 }
 0x527   :  { %6929 = vrot.lane.b32.xlu0 %v6891_v4, %s10545_s16  ;;  %7025 = vrot.lane.b32.xlu1 %v6891_v4, %s10546_s17 }
 0x52b   :  { %6999 = vrot.lane.b32.xlu0 %v6890_v46, %s10544_s2  ;;  %6902 = vrot.lane.b32.xlu1 %v6890_v46, %s10543_s24 }
 0x52f   :  { %6941 = vrot.lane.b32.xlu0 %v14277_v35, %s10533_s21  ;;  %7049 = vrot.lane.b32.xlu1 %v6891_v4, %s10547_s18 }
 0x533   :  { %v7014_v8 = vpop.permute.xlu1 %7013  ;;  %v6990_v36 = vpop.permute.xlu0 %6989  ;;  %6953 = vrot.lane.b32.xlu0 %v6891_v4, %s10548_s19  ;;  %7023 = vrot.lane.b32.xlu1 %v6890_v46, %s10546_s17 }
 0x534   :  { %7018 = vst.msk [vmem:[#allocation6 + $0x58] sm:$0xff] %vm3075_vm3, %v7014_v8  ;;  %6994 = vst.msk [vmem:[#allocation6 + $0x48] sm:$0xff] %vm3075_vm3, %v6990_v36  ;;  %v10486_v8 = vld [vmem:[%s14857_s4 + $0x18] ss:$12 sps:$4 sm:$0xff]   ;;  %v10488_v36 = vld [vmem:[%s14857_s4 + $0x20] ss:$12 sps:$4 sm:$0xff]  }
 0x537   :  { %v7038_v39 = vpop.permute.xlu1 %7037  ;;  %v6918_v20 = vpop.permute.xlu0 %6917  ;;  %6927 = vrot.lane.b32.xlu0 %v6890_v46, %s10545_s16  ;;  %7059 = vrot.lane.b32.xlu1 %v14273_v32, %s10549_s20 }
 0x538   :  { %7042 = vst.msk [vmem:[#allocation6 + $0x68] sm:$0xff] %vm3075_vm3, %v7038_v39  ;;  %6922 = vst.msk [vmem:[#allocation6 + $0x18] sm:$0xff] %vm3075_vm3, %v6918_v20  ;;  %v10489_v39 = vld [vmem:[%s14857_s4 + $0x34] ss:$12 sps:$4 sm:$0xff]   ;;  %v10492_v20 = vld [vmem:[%s14857_s4 + $0x38] ss:$12 sps:$4 sm:$0xff]  }
 0x53b   :  { %v6916_v44 = vpop.permute.xlu0 %6915  ;;  %v6988_v15 = vpop.permute.xlu1 %6987  ;;  %6963 = vrot.lane.b32.xlu0 %v14273_v32, %s10550_s22  ;;  %7047 = vrot.lane.b32.xlu1 %v6890_v46, %s10547_s18 }
 0x53c   :  { %6921 = vst.msk [vmem:[#allocation6 + $0x10] sm:$0xff] %vm3075_vm3, %v6916_v44  ;;  %6993 = vst.msk [vmem:[#allocation6 + $0x40] sm:$0xff] %vm3075_vm3, %v6988_v15  ;;  %v10491_v44 = vld [vmem:[%s14857_s4 + $0x30] ss:$12 sps:$4 sm:$0xff]  }
 0x53d   :  { %v10493_v15 = vld [vmem:[%s14857_s4 + $0x50] ss:$12 sps:$4 sm:$0xff]  }
 0x53f   :  { %v6940_v59 = vpop.permute.xlu0 %6939  ;;  %v7012_v50 = vpop.permute.xlu1 %7011  ;;  %6951 = vrot.lane.b32.xlu0 %v6890_v46, %s10548_s19  ;;  %7061 = vrot.lane.b32.xlu1 %v14277_v35, %s10549_s20 }
 0x540   :  { %6945 = vst.msk [vmem:[#allocation6 + $0x20] sm:$0xff] %vm3075_vm3, %v6940_v59  ;;  %7017 = vst.msk [vmem:[#allocation6 + $0x50] sm:$0xff] %vm3075_vm3, %v7012_v50  ;;  %v10494_v59 = vld [vmem:[%s14857_s4 + $0x4c] ss:$12 sps:$4 sm:$0xff]   ;;  %v10496_v50 = vld [vmem:[%s14857_s4 + $0x48] ss:$12 sps:$4 sm:$0xff]  }
 0x543   :  { %v7036_v26 = vpop.permute.xlu1 %7035  ;;  %6965 = vrot.lane.b32.xlu0 %v14277_v35, %s10550_s22  ;;  %7071 = vrot.lane.b32.xlu1 %v6890_v46, %s10551_s23 }
 0x544   :  { %7041 = vst.msk [vmem:[#allocation6 + $0x60] sm:$0xff] %vm3075_vm3, %v7036_v26 }
 0x547   :  { %6975 = vrot.lane.b32.xlu0 %v6890_v46, %s10552_s25  ;;  %7073 = vrot.lane.b32.xlu1 %v6891_v4, %s10551_s23 }
 0x54b   :  { %6977 = vrot.lane.b32.xlu0 %v6891_v4, %s10552_s25  ;;  %7083 = vrot.lane.b32.xlu1 %v14273_v32, %s10553_s27  ;;  %v7139_v32 = vld [vmem:[%s14858_s5 + $0x10] sm:$0xff] }
 0x54f   :  { %7095 = vrot.lane.b32.xlu0 %v6890_v46, %s10554_s28  ;;  %7085 = vrot.lane.b32.xlu1 %v14277_v35, %s10553_s27  ;;  %v7140_v35 = vld [vmem:[%s14858_s5 + $0x18] sm:$0xff] }
 0x553   :  { %7097 = vrot.lane.b32.xlu0 %v6891_v4, %s10554_s28  ;;  %7147 = vperm.xlu1 %9792, %v7137_v52  }
 0x557   :  { %7152 = vperm.xlu0 %9791, %v7138_v16   ;;  %7157 = vperm.xlu1 %9792, %v7139_v32  }
 0x55b   :  { %7162 = vperm.xlu0 %9791, %v7140_v35   ;;  %7167 = vperm.xlu1 %9792, %v7141_v43  }
 0x55f   :  { %7172 = vperm.xlu0 %9791, %v7142_v58   ;;  %7177 = vperm.xlu1 %9792, %v7143_v34  }
 0x563   :  { %7182 = vperm.xlu0 %9791, %v7144_v11  }
 0x595   :  { %v6905_v21 = vpop.permute.xlu0 %6904  ;;  %v7002_v23 = vpop.permute.xlu1 %7001 }
 0x596   :  { %6910 = vst.msk [vmem:[#allocation6 + $0x8] sm:$0xff] %vm6908_vm6, %v6905_v21  ;;  %7006 = vst.msk [vmem:[#allocation6 + $0x48] sm:$0xff] %vm6908_vm6, %v7002_v23 }
 0x599   :  { %v6930_v30 = vpop.permute.xlu0 %6929  ;;  %v7026_v6 = vpop.permute.xlu1 %7025 }
 0x59a   :  { %6934 = vst.msk [vmem:[#allocation6 + $0x18] sm:$0xff] %vm6908_vm6, %v6930_v30  ;;  %7030 = vst.msk [vmem:[#allocation6 + $0x58] sm:$0xff] %vm6908_vm6, %v7026_v6 }
 0x59d   :  { %v7000_v25 = vpop.permute.xlu0 %6999  ;;  %v6903_v51 = vpop.permute.xlu1 %6902  ;;  %v7128_v31 = vld [vmem:[#allocation6 + $0x48] sm:$0xff] }
 0x59e   :  { %7005 = vst.msk [vmem:[#allocation6 + $0x40] sm:$0xff] %vm6908_vm6, %v7000_v25  ;;  %6909 = vst.msk [vmem:[#allocation6] sm:$0xff] %vm6908_vm6, %v6903_v51  ;;  %v7120_v17 = vld [vmem:[#allocation6 + $0x8] sm:$0xff] }
 0x5a1   :  { %v6942_v28 = vpop.permute.xlu0 %6941  ;;  %v7050_v27 = vpop.permute.xlu1 %7049  ;;  %v7130_v49 = vld [vmem:[#allocation6 + $0x58] sm:$0xff] }
 0x5a2   :  { %6946 = vst.msk [vmem:[#allocation6 + $0x28] sm:$0xff] %vm3075_vm3, %v6942_v28  ;;  %v7122_v40 = vld [vmem:[#allocation6 + $0x18] sm:$0xff] }
 0x5a3   :  { %7054 = vst.msk [vmem:[#allocation6 + $0x68] sm:$0xff] %vm6908_vm6, %v7050_v27 }
 0x5a5   :  { %v6954_v10 = vpop.permute.xlu0 %6953  ;;  %v7024_v22 = vpop.permute.xlu1 %7023  ;;  %v7127_v3 = vld [vmem:[#allocation6 + $0x40] sm:$0xff] }
 0x5a6   :  { %v7119_v2 = vld [vmem:[#allocation6] sm:$0xff]  ;;  %6958 = vst.msk [vmem:[#allocation6 + $0x28] sm:$0xff] %vm6908_vm6, %v6954_v10  ;;  %7029 = vst.msk [vmem:[#allocation6 + $0x50] sm:$0xff] %vm6908_vm6, %v7024_v22  ;;  %9302 = vmatprep.subr.bf16.mxu0 %v7127_v3 }
 0x5a7   :  { %9303 = vmatpush3.bf16.msra.mxu0 %v7119_v2 }
 0x5a8   :  { %9304 = vmatprep.subr.bf16.mxu0 %v7128_v31 }
 0x5a9   :  { %v6928_v60 = vpop.permute.xlu0 %6927  ;;  %v7060_v19 = vpop.permute.xlu1 %7059 }
 0x5aa   :  { %6933 = vst.msk [vmem:[#allocation6 + $0x10] sm:$0xff] %vm6908_vm6, %v6928_v60  ;;  %v7132_v0 = vld [vmem:[#allocation6 + $0x68] sm:$0xff] }
 0x5ab   :  { %7065 = vst.msk [vmem:[#allocation6 + $0x70] sm:$0xff] %vm3075_vm3, %v7060_v19  ;;  %9305 = vmatpush3.bf16.msra.mxu0 %v7120_v17 }
 0x5ad   :  { %v6964_v42 = vpop.permute.xlu0 %6963  ;;  %v7048_v5 = vpop.permute.xlu1 %7047  ;;  %v7129_v12 = vld [vmem:[#allocation6 + $0x50] sm:$0xff]  ;;  %v7124_v48 = vld [vmem:[#allocation6 + $0x28] sm:$0xff] }
 0x5ae   :  { %6969 = vst.msk [vmem:[#allocation6 + $0x30] sm:$0xff] %vm3075_vm3, %v6964_v42  ;;  %9306 = vmatprep.subr.bf16.mxu0 %v7129_v12 }
 0x5af   :  { %7053 = vst.msk [vmem:[#allocation6 + $0x60] sm:$0xff] %vm6908_vm6, %v7048_v5 }
 0x5b1   :  { %v6952_v18 = vpop.permute.xlu0 %6951  ;;  %v7062_v45 = vpop.permute.xlu1 %7061  ;;  %v7121_v61 = vld [vmem:[#allocation6 + $0x10] sm:$0xff] }
 0x5b2   :  { %6957 = vst.msk [vmem:[#allocation6 + $0x20] sm:$0xff] %vm6908_vm6, %v6952_v18  ;;  %9307 = vmatpush3.bf16.msra.mxu0 %v7121_v61 }
 0x5b3   :  { %7066 = vst.msk [vmem:[#allocation6 + $0x78] sm:$0xff] %vm3075_vm3, %v7062_v45  ;;  %9308 = vmatprep.subr.bf16.mxu0 %v7130_v49 }
 0x5b5   :  { %v6966_v37 = vpop.permute.xlu0 %6965  ;;  %v7072_v56 = vpop.permute.xlu1 %7071 }
 0x5b6   :  { %v7131_v14 = vld [vmem:[#allocation6 + $0x60] sm:$0xff]  ;;  %6970 = vst.msk [vmem:[#allocation6 + $0x38] sm:$0xff] %vm3075_vm3, %v6966_v37  ;;  %9309 = vmatpush3.bf16.msra.mxu0 %v7122_v40 }
 0x5b7   :  { %7077 = vst.msk [vmem:[#allocation6 + $0x70] sm:$0xff] %vm6908_vm6, %v7072_v56  ;;  %9310 = vmatprep.subr.bf16.mxu0 %v7131_v14 }
 0x5b9   :  { %v6976_v33 = vpop.permute.xlu0 %6975  ;;  %v7074_v41 = vpop.permute.xlu1 %7073  ;;  %v7123_v13 = vld [vmem:[#allocation6 + $0x20] sm:$0xff] }
 0x5ba   :  { %6981 = vst.msk [vmem:[#allocation6 + $0x30] sm:$0xff] %vm6908_vm6, %v6976_v33  ;;  %7078 = vst.msk [vmem:[#allocation6 + $0x78] sm:$0xff] %vm6908_vm6, %v7074_v41  ;;  %9311 = vmatpush3.bf16.msra.mxu0 %v7123_v13 }
 0x5bb   :  { %9312 = vmatprep.subr.bf16.mxu0 %v7132_v0 }
 0x5bd   :  { %v6978_v7 = vpop.permute.xlu0 %6977  ;;  %v7084_v55 = vpop.permute.xlu1 %7083 }
 0x5be   :  { %v7133_v63 = vld [vmem:[#allocation6 + $0x70] sm:$0xff]  ;;  %6982 = vst.msk [vmem:[#allocation6 + $0x38] sm:$0xff] %vm6908_vm6, %v6978_v7  ;;  %9313 = vmatpush3.bf16.msra.mxu0 %v7124_v48 }
 0x5bf   :  { %7089 = vst.msk [vmem:[#allocation6 + $0x80] sm:$0xff] %vm3075_vm3, %v7084_v55  ;;  %9314 = vmatprep.subr.bf16.mxu0 %v7133_v63 }
 0x5c1   :  { %v7096_v62 = vpop.permute.xlu0 %7095  ;;  %v7086_v57 = vpop.permute.xlu1 %7085  ;;  %v7125_v54 = vld [vmem:[#allocation6 + $0x30] sm:$0xff]  ;;  %v7134_v38 = vld [vmem:[#allocation6 + $0x78] sm:$0xff] }
 0x5c2   :  { %7101 = vst.msk [vmem:[#allocation6 + $0x80] sm:$0xff] %vm6908_vm6, %v7096_v62  ;;  %9315 = vmatpush3.bf16.msra.mxu0 %v7125_v54 }
 0x5c3   :  { %7090 = vst.msk [vmem:[#allocation6 + $0x88] sm:$0xff] %vm3075_vm3, %v7086_v57  ;;  %9316 = vmatprep.subr.bf16.mxu0 %v7134_v38 }
 0x5c5   :  { %v7098_v9 = vpop.permute.xlu0 %7097  ;;  %v7126_v47 = vld [vmem:[#allocation6 + $0x38] sm:$0xff] }
 0x5c6   :  { %7102 = vst.msk [vmem:[#allocation6 + $0x88] sm:$0xff] %vm6908_vm6, %v7098_v9  ;;  %9317 = vmatpush3.bf16.msra.mxu0 %v7126_v47 }
 0x5c9   :  { %7290 = vmatmul.mubr.bf16.vlgmr.msra.gmra.mrb[72].mxu0 %v10481_v29  ;;  %v7135_v4 = vld [vmem:[#allocation6 + $0x80] sm:$0xff] }
 0x5ca   :  { %9478 = vmatprep.subr.bf16.mxu1 %v7135_v4  ;;  %7297 = vmatprep.mubr.bf16.mxu0 %v10484_v1 }
 0x5cb   :  { %9479 = vmatpush3.bf16.msra.mxu1 %v7135_v4 }
 0x5cd   :  { %v7136_v46 = vld [vmem:[#allocation6 + $0x88] sm:$0xff] }
 0x5ce   :  { %9480 = vmatprep.subr.bf16.mxu1 %v7136_v46 }
 0x5cf   :  { %9481 = vmatpush3.bf16.msra.mxu1 %v7136_v46 }
 0x5d1   :  { %7298 = vmatmul.mubr.bf16.gmra.mrb[76].mxu0 %v10486_v8  ;;  %v7531_v8 = vld [vmem:[%s14859_s6] sm:$0xff] }
 0x5d2   :  { %9483 = vmatmul.mubr.msk.bf16.vlgmr.msra.gmra.mrb[56].mxu1 %vm3075_vm3, %v10488_v36  ;;  %7305 = vmatprep.mubr.bf16.mxu0 %v10489_v39  ;;  %v7148_v52 = vpop.permute.xlu1 %7147  ;;  %v7532_v36 = vld [vmem:[%s14859_s6 + $0x8] sm:$0xff]  ;;  %v7533_v39 = vld [vmem:[%s14859_s6 + $0x10] sm:$0xff] }
 0x5d3   :  { %9486 = vmatprep.mubr.msk.bf16.mxu1 %vm3075_vm3, %v10492_v20  ;;  %v9580_v20 = vpack.c.bf16 %v7532_v36, %v7531_v8  ;;  %v7714_v8 = vld [vmem:[%s14860_s8 + $0x50] sm:$0xff]  ;;  %v7715_v36 = vld [vmem:[%s14860_s8 + $0x58] sm:$0xff] }
 0x5d5   :  { %9581 = vmatprep.subr.bf16.mxu1 %v9580_v20 }
 0x5d6   :  { %v7153_v43 = vpop.permute.xlu0 %7152  ;;  %v7158_v58 = vpop.permute.xlu1 %7157  ;;  %9583 = vmatpush3.bf16.msra.mxu1 %v9580_v20  ;;  %v7733_v20 = vld [vmem:[%s14860_s8 + $0xe8] sm:$0xff] }
 0x5d9   :  { %7306 = vmatmul.mubr.bf16.gmra.mrb[80].mxu0 %v10491_v44  ;;  %v7534_v44 = vld [vmem:[%s14859_s6 + $0x18] sm:$0xff] }
 0x5da   :  { %9487 = vmatmul.mubr.msk.bf16.gmra.mrb[60].mxu1 %vm3075_vm3, %v10493_v15  ;;  %7313 = vmatprep.mubr.bf16.mxu0 %v10494_v59  ;;  %v7163_v31 = vpop.permute.xlu0 %7162  ;;  %v7168_v42 = vpop.permute.xlu1 %7167  ;;  %v9584_v15 = vpack.c.bf16 %v7534_v44, %v7533_v39  ;;  %v7535_v59 = vld [vmem:[%s14859_s6 + $0x20] sm:$0xff] }
 0x5db   :  { %v7732_v39 = vld [vmem:[%s14860_s8 + $0xe0] sm:$0xff] }
 0x5dc   :  { %9585 = vmatprep.subr.bf16.mxu1 %v9584_v15  ;;  %v7716_v44 = vld [vmem:[%s14860_s8 + $0x60] sm:$0xff] }
 0x5dd   :  { %9587 = vmatpush3.bf16.msra.mxu1 %v9584_v15  ;;  %v7717_v15 = vld [vmem:[%s14860_s8 + $0x68] sm:$0xff] }
 0x5de   :  { %v7173_v13 = vpop.permute.xlu0 %7172  ;;  %v7178_v54 = vpop.permute.xlu1 %7177 }
 0x5e1   :  { %7314 = vmatmul.mubr.bf16.gmra.mrb[84].mxu0 %v10496_v50  ;;  %v7536_v50 = vld [vmem:[%s14859_s6 + $0x28] sm:$0xff] }
 0x5e2   :  { %v7183_v29 = vpop.permute.xlu0 %7182 }
 0x69c   :  { %v9318_v26 = vpop.f32.mrb[72].mxu0 }
 0x69d   :  { %v9319_v53 = vpop.f32.mrb[73].mxu0 }
 0x69e   :  { %v9320_v24 = vadd.f32 %v9319_v53, %v9318_v26  ;;  %v9321_v16 = vpop.f32.mrb[74].mxu0  ;;  %v9588_v26 = vpack.c.bf16 %v7536_v50, %v7535_v59  ;;  %v7734_v59 = vld [vmem:[%s14860_s8 + $0xf0] sm:$0xff]  ;;  %v7735_v50 = vld [vmem:[%s14860_s8 + $0xf8] sm:$0xff] }
 0x69f   :  { %v9322_v32 = vpop.f32.mrb[75].mxu0 }
 0x6a0   :  { %v9323_v35 = vadd.f32 %v9322_v32, %v9321_v16  ;;  %v7292_v23 = vadd.f32 %v9320_v24, %v7148_v52  ;;  %9589 = vmatprep.subr.bf16.mxu1 %v9588_v26  ;;  %v7537_v52 = vld [vmem:[%s14859_s6 + $0x30] sm:$0xf]  ;;  %s10555_s6 = smov 118  }
 0x6a1   :  { %9591 = vmatpush3.bf16.msra.mxu1 %v9588_v26  ;;  %v7718_v26 = vld [vmem:[%s14860_s8 + $0x70] sm:$0xff] }
 0x6a2   :  { %v7295_v10 = vadd.f32 %v9323_v35, %v7153_v43  ;;  %9502 = vmatprep.subr.msk.mxu1 %vm7563_vm7, %v7537_v52 }
 0x6a4   :  { %v9324_v34 = vpop.f32.mrb[76].mxu0 }
 0x6a5   :  { %v9325_v11 = vpop.f32.mrb[77].mxu0  ;;  %v9484_v21 = vpop.f32.mrb[56].mxu1  ;;  %9503 = vmatpush3.msk.msra.mxu1 %vm7563_vm7, %v7537_v52  ;;  %v8250_v52 = vld [vmem:[%s14861_s10] sm:$0x3] }
 0x6a6   :  { %v9326_v30 = vadd.f32 %v9325_v11, %v9324_v34  ;;  %v9327_v6 = vpop.f32.mrb[78].mxu0  ;;  %v7356_v25 = vpop.f32.mrb[57].mxu1 }
 0x6a7   :  { %v14399_v51 = vadd.f32 %v7356_v25, %v7292_v23  ;;  %v9328_v28 = vpop.f32.mrb[79].mxu0  ;;  %v9485_v27 = vpop.f32.mrb[58].mxu1 }
 0x6a8   :  { %v7300_v22 = vadd.f32 %v9326_v30, %v7158_v58  ;;  %v9329_v3 = vadd.f32 %v9328_v28, %v9327_v6  ;;  %v7359_v2 = vpop.f32.mrb[59].mxu1 }
 0x6a9   :  { %v14401_v60 = vadd.f32 %v7359_v2, %v7295_v10  ;;  %7395 = vrot.lane.b32.xlu1 %v14399_v51, %s10533_s21 }
 0x6aa   :  { %v14405_v19 = vadd.f32 %v9484_v21, %v7300_v22  ;;  %v7303_v17 = vadd.f32 %v9329_v3, %v7163_v31 }
 0x6ab   :  { %7397 = vrot.lane.b32.xlu0 %v14401_v60, %s10533_s21 }
 0x6ac   :  { %v14409_v5 = vadd.f32 %v9485_v27, %v7303_v17  ;;  %v9330_v12 = vpop.f32.mrb[80].mxu0 }
 0x6ad   :  { %v9331_v18 = vpop.f32.mrb[81].mxu0  ;;  %7427 = vrot.lane.b32.xlu1 %v14399_v51, %s10537_s0  ;;  %v9488_v45 = vpop.f32.mrb[60].mxu1 }
 0x6ae   :  { %v9332_v61 = vadd.f32 %v9331_v18, %v9330_v12  ;;  %v9333_v49 = vpop.f32.mrb[82].mxu0  ;;  %v7372_v37 = vpop.f32.mrb[61].mxu1 }
 0x6af   :  { %v9334_v56 = vpop.f32.mrb[83].mxu0  ;;  %7429 = vrot.lane.b32.xlu0 %v14401_v60, %s10537_s0  ;;  %v9489_v40 = vpop.f32.mrb[62].mxu1 }
 0x6b0   :  { %v9335_v14 = vadd.f32 %v9334_v56, %v9333_v49  ;;  %v7308_v33 = vadd.f32 %v9332_v61, %v7168_v42  ;;  %v7375_v41 = vpop.f32.mrb[63].mxu1  ;;  %v7721_v56 = vld [vmem:[%s14860_s8 + $0x88] sm:$0xff] }
 0x6b1   :  { %7399 = vrot.lane.b32.xlu1 %v14405_v19, %s10533_s21 }
 0x6b2   :  { %v14417_v0 = vadd.f32 %v7372_v37, %v7308_v33  ;;  %v7311_v7 = vadd.f32 %v9335_v14, %v7173_v13  ;;  %v7720_v37 = vld [vmem:[%s14860_s8 + $0x80] sm:$0xff]  ;;  %v7705_v14 = vld [vmem:[%s14860_s8 + $0x8] sm:$0xff]  ;;  %v7722_v33 = vld [vmem:[%s14860_s8 + $0x90] sm:$0xff] }
 0x6b3   :  { %7401 = vrot.lane.b32.xlu0 %v14409_v5, %s10533_s21  ;;  %v7706_v13 = vld [vmem:[%s14860_s8 + $0x10] sm:$0xff] }
 0x6b4   :  { %v14421_v55 = vadd.f32 %v7375_v41, %v7311_v7  ;;  %v9336_v48 = vpop.f32.mrb[84].mxu0  ;;  %v7723_v41 = vld [vmem:[%s14860_s8 + $0x98] sm:$0xff]  ;;  %v7724_v7 = vld [vmem:[%s14860_s8 + $0xa0] sm:$0xff] }
 0x6b5   :  { %v9337_v63 = vpop.f32.mrb[85].mxu0  ;;  %7431 = vrot.lane.b32.xlu1 %v14405_v19, %s10537_s0 }
 0x6b6   :  { %v9338_v62 = vadd.f32 %v9337_v63, %v9336_v48  ;;  %v9339_v57 = vpop.f32.mrb[86].mxu0  ;;  %v7708_v48 = vld [vmem:[%s14860_s8 + $0x20] sm:$0xff]  ;;  %v7709_v63 = vld [vmem:[%s14860_s8 + $0x28] sm:$0xff] }
 0x6b7   :  { %v9340_v38 = vpop.f32.mrb[87].mxu0  ;;  %7433 = vrot.lane.b32.xlu0 %v14409_v5, %s10537_s0 }
 0x6b8   :  { %v7316_v9 = vadd.f32 %v9338_v62, %v7178_v54  ;;  %v9341_v47 = vadd.f32 %v9340_v38, %v9339_v57  ;;  %v7726_v62 = vld [vmem:[%s14860_s8 + $0xb0] sm:$0xff]  ;;  %v7727_v57 = vld [vmem:[%s14860_s8 + $0xb8] sm:$0xff] }
 0x6b9   :  { %7403 = vrot.lane.b32.xlu1 %v14417_v0, %s10533_s21  ;;  %v7710_v54 = vld [vmem:[%s14860_s8 + $0x30] sm:$0xff]  ;;  %v7711_v38 = vld [vmem:[%s14860_s8 + $0x38] sm:$0xff] }
 0x6ba   :  { %v14429_v1 = vadd.f32 %v9488_v45, %v7316_v9  ;;  %v7319_v4 = vadd.f32 %v9341_v47, %v7183_v29  ;;  %v7728_v9 = vld [vmem:[%s14860_s8 + $0xc0] sm:$0xff]  ;;  %v7729_v47 = vld [vmem:[%s14860_s8 + $0xc8] sm:$0xff] }
 0x6bb   :  { %7405 = vrot.lane.b32.xlu0 %v14421_v55, %s10533_s21  ;;  %v7712_v29 = vld [vmem:[%s14860_s8 + $0x40] sm:$0xff] }
 0x6bc   :  { %v14433_v46 = vadd.f32 %v9489_v40, %v7319_v4  ;;  %v7704_v40 = vld [vmem:[%s14860_s8] sm:$0xff]  ;;  %v7730_v4 = vld [vmem:[%s14860_s8 + $0xd0] sm:$0xff] }
 0x6bd   :  { %7435 = vrot.lane.b32.xlu1 %v14417_v0, %s10537_s0 }
 0x6bf   :  { %7437 = vrot.lane.b32.xlu0 %v14421_v55, %s10537_s0 }
 0x6c1   :  { %7407 = vrot.lane.b32.xlu1 %v14429_v1, %s10533_s21 }
 0x6c3   :  { %7409 = vrot.lane.b32.xlu0 %v14433_v46, %s10533_s21 }
 0x6c5   :  { %7439 = vrot.lane.b32.xlu1 %v14429_v1, %s10537_s0 }
 0x6c7   :  { %7441 = vrot.lane.b32.xlu0 %v14433_v46, %s10537_s0 }
 0x71b   :  { %v7396_v53 = vpop.permute.xlu1 %7395 }
 0x71c   :  { %v7419_v16 = vmax.f32 %v14399_v51, %v7396_v53  ;;  %v7719_v53 = vld [vmem:[%s14860_s8 + $0x78] sm:$0xff] }
 0x71d   :  { %v7398_v24 = vpop.permute.xlu0 %7397 }
 0x71e   :  { %v7420_v35 = vmax.f32 %v14401_v60, %v7398_v24 }
 0x71f   :  { %v7428_v32 = vpop.permute.xlu1 %7427 }
 0x720   :  { %v14470_v43 = vmax.f32 %v7419_v16, %v7428_v32 }
 0x721   :  { %v7430_v58 = vpop.permute.xlu0 %7429 }
 0x722   :  { %v14472_v34 = vmax.f32 %v7420_v35, %v7430_v58  ;;  %7467 = vrot.lane.b32.xlu1 %v14470_v43, %s10541_s13 }
 0x723   :  { %v7400_v11 = vpop.permute.xlu1 %7399 }
 0x724   :  { %7469 = vrot.lane.b32.xlu0 %v14472_v34, %s10541_s13  ;;  %v7421_v23 = vmax.f32 %v14405_v19, %v7400_v11 }
 0x725   :  { %v7402_v21 = vpop.permute.xlu0 %7401 }
 0x726   :  { %7499 = vrot.lane.b32.xlu1 %v14470_v43, %s10555_s6  ;;  %v7422_v6 = vmax.f32 %v14409_v5, %v7402_v21 }
 0x727   :  { %v7432_v30 = vpop.permute.xlu1 %7431 }
 0x728   :  { %v14482_v25 = vmax.f32 %v7421_v23, %v7432_v30  ;;  %7501 = vrot.lane.b32.xlu0 %v14472_v34, %s10555_s6 }
 0x729   :  { %v7434_v51 = vpop.permute.xlu0 %7433 }
 0x72a   :  { %v14486_v28 = vmax.f32 %v7422_v6, %v7434_v51  ;;  %7471 = vrot.lane.b32.xlu1 %v14482_v25, %s10541_s13 }
 0x72b   :  { %v7404_v27 = vpop.permute.xlu1 %7403 }
 0x72c   :  { %7473 = vrot.lane.b32.xlu0 %v14486_v28, %s10541_s13  ;;  %v7423_v22 = vmax.f32 %v14417_v0, %v7404_v27  ;;  %v7707_v0 = vld [vmem:[%s14860_s8 + $0x18] sm:$0xff] }
 0x72d   :  { %v7406_v10 = vpop.permute.xlu0 %7405 }
 0x72e   :  { %7503 = vrot.lane.b32.xlu1 %v14482_v25, %s10555_s6  ;;  %v7424_v2 = vmax.f32 %v14421_v55, %v7406_v10  ;;  %v7725_v55 = vld [vmem:[%s14860_s8 + $0xa8] sm:$0xff] }
 0x72f   :  { %v7436_v3 = vpop.permute.xlu1 %7435 }
 0x730   :  { %v14496_v31 = vmax.f32 %v7423_v22, %v7436_v3  ;;  %7505 = vrot.lane.b32.xlu0 %v14486_v28, %s10555_s6 }
 0x731   :  { %v7438_v60 = vpop.permute.xlu0 %7437 }
 0x732   :  { %v14500_v19 = vmax.f32 %v7424_v2, %v7438_v60  ;;  %7475 = vrot.lane.b32.xlu1 %v14496_v31, %s10541_s13 }
 0x733   :  { %v7408_v17 = vpop.permute.xlu1 %7407 }
 0x734   :  { %7477 = vrot.lane.b32.xlu0 %v14500_v19, %s10541_s13  ;;  %v7425_v5 = vmax.f32 %v14429_v1, %v7408_v17  ;;  %v7713_v1 = vld [vmem:[%s14860_s8 + $0x48] sm:$0xff] }
 0x735   :  { %v7410_v42 = vpop.permute.xlu0 %7409 }
 0x736   :  { %7507 = vrot.lane.b32.xlu1 %v14496_v31, %s10555_s6  ;;  %v7426_v18 = vmax.f32 %v14433_v46, %v7410_v42  ;;  %v7731_v46 = vld [vmem:[%s14860_s8 + $0xd8] sm:$0xff] }
 0x737   :  { %v7440_v12 = vpop.permute.xlu1 %7439 }
 0x738   :  { %v14510_v45 = vmax.f32 %v7425_v5, %v7440_v12  ;;  %7509 = vrot.lane.b32.xlu0 %v14500_v19, %s10555_s6 }
 0x739   :  { %v7442_v61 = vpop.permute.xlu0 %7441 }
 0x73a   :  { %v14514_v49 = vmax.f32 %v7426_v18, %v7442_v61  ;;  %7479 = vrot.lane.b32.xlu1 %v14510_v45, %s10541_s13 }
 0x73c   :  { %7481 = vrot.lane.b32.xlu0 %v14514_v49, %s10541_s13 }
 0x73e   :  { %7511 = vrot.lane.b32.xlu1 %v14510_v45, %s10555_s6 }
 0x740   :  { %7513 = vrot.lane.b32.xlu0 %v14514_v49, %s10555_s6 }
 0x742   :  { %7818 = vperm.xlu1 %9792, %v7720_v37  }
 0x744   :  { %7823 = vperm.xlu0 %9791, %v7721_v56  }
 0x746   :  { %7738 = vperm.xlu1 %9792, %v7704_v40  }
 0x748   :  { %7743 = vperm.xlu0 %9791, %v7705_v14  }
 0x74a   :  { %7828 = vperm.xlu1 %9792, %v7722_v33  }
 0x74c   :  { %7833 = vperm.xlu0 %9791, %v7723_v41  }
 0x74e   :  { %7748 = vperm.xlu1 %9792, %v7706_v13  }
 0x750   :  { %7753 = vperm.xlu0 %9791, %v7707_v0  }
 0x752   :  { %7838 = vperm.xlu1 %9792, %v7724_v7  }
 0x754   :  { %7843 = vperm.xlu0 %9791, %v7725_v55  }
 0x756   :  { %7758 = vperm.xlu1 %9792, %v7708_v48  }
 0x758   :  { %7763 = vperm.xlu0 %9791, %v7709_v63  }
 0x75a   :  { %7848 = vperm.xlu1 %9792, %v7726_v62  }
 0x75c   :  { %7853 = vperm.xlu0 %9791, %v7727_v57  }
 0x75e   :  { %7768 = vperm.xlu1 %9792, %v7710_v54   ;;  %v7673_v54 = vld [vmem:[%s14862_s7 + $0x8] sm:$0xff] }
 0x760   :  { %7773 = vperm.xlu0 %9791, %v7711_v38   ;;  %v7674_v38 = vld [vmem:[%s14862_s7 + $0x10] sm:$0xff] }
 0x762   :  { %7858 = vperm.xlu1 %9792, %v7728_v9   ;;  %v7675_v9 = vld [vmem:[%s14862_s7 + $0x18] sm:$0xff] }
 0x764   :  { %7863 = vperm.xlu0 %9791, %v7729_v47   ;;  %v7676_v47 = vld [vmem:[%s14862_s7 + $0x20] sm:$0xff] }
 0x766   :  { %7778 = vperm.xlu1 %9792, %v7712_v29   ;;  %v7677_v29 = vld [vmem:[%s14862_s7 + $0x28] sm:$0xff] }
 0x768   :  { %7783 = vperm.xlu0 %9791, %v7713_v1   ;;  %v7678_v1 = vld [vmem:[%s14862_s7 + $0x30] sm:$0xff] }
 0x76a   :  { %7868 = vperm.xlu1 %9792, %v7730_v4   ;;  %v7679_v4 = vld [vmem:[%s14862_s7 + $0x38] sm:$0xff] }
 0x76c   :  { %7873 = vperm.xlu0 %9791, %v7731_v46   ;;  %v7680_v46 = vld [vmem:[%s14862_s7 + $0x40] sm:$0xff] }
 0x76e   :  { %7788 = vperm.xlu1 %9792, %v7714_v8   ;;  %v7681_v8 = vld [vmem:[%s14862_s7 + $0x48] sm:$0xff] }
 0x770   :  { %7793 = vperm.xlu0 %9791, %v7715_v36   ;;  %v7682_v36 = vld [vmem:[%s14862_s7 + $0x50] sm:$0xff] }
 0x772   :  { %7878 = vperm.xlu1 %9792, %v7732_v39   ;;  %v7683_v39 = vld [vmem:[%s14862_s7 + $0x58] sm:$0xff] }
 0x774   :  { %7883 = vperm.xlu0 %9791, %v7733_v20   ;;  %v7684_v20 = vld [vmem:[%s14862_s7 + $0x60] sm:$0xff] }
 0x776   :  { %7798 = vperm.xlu1 %9792, %v7716_v44   ;;  %v7685_v44 = vld [vmem:[%s14862_s7 + $0x68] sm:$0xff] }
 0x778   :  { %7803 = vperm.xlu0 %9791, %v7717_v15   ;;  %v7686_v15 = vld [vmem:[%s14862_s7 + $0x70] sm:$0xff] }
 0x77a   :  { %7888 = vperm.xlu1 %9792, %v7734_v59   ;;  %v7687_v59 = vld [vmem:[%s14862_s7 + $0x78] sm:$0xff] }
 0x77c   :  { %7893 = vperm.xlu0 %9791, %v7735_v50   ;;  %v7688_v50 = vld [vmem:[%s14862_s7 + $0x80] sm:$0xff] }
 0x77e   :  { %7808 = vperm.xlu1 %9792, %v7718_v26   ;;  %v7689_v26 = vld [vmem:[%s14862_s7 + $0x88] sm:$0xff] }
 0x780   :  { %7813 = vperm.xlu0 %9791, %v7719_v53   ;;  %v7690_v53 = vld [vmem:[%s14862_s7 + $0x90] sm:$0xff] }
 0x782   :  { %8253 = vperm.xlu1 %9792, %v8250_v52   ;;  %v7691_v52 = vld [vmem:[%s14862_s7 + $0x98] sm:$0xff] }
 0x794   :  { %v7468_v24 = vpop.permute.xlu1 %7467 }
 0x795   :  { %v7491_v32 = vmax.f32 %v14470_v43, %v7468_v24  ;;  %v7692_v24 = vld [vmem:[%s14862_s7 + $0xa0] sm:$0xff] }
 0x796   :  { %v7470_v16 = vpop.permute.xlu0 %7469 }
 0x797   :  { %v7492_v58 = vmax.f32 %v14472_v34, %v7470_v16  ;;  %v7693_v16 = vld [vmem:[%s14862_s7 + $0xa8] sm:$0xff] }
 0x798   :  { %v7500_v35 = vpop.permute.xlu1 %7499 }
 0x799   :  { %v7523_v11 = vmax.f32 %v7491_v32, %v7500_v35  ;;  %v7694_v32 = vld [vmem:[%s14862_s7 + $0xb0] sm:$0xff]  ;;  %v7695_v35 = vld [vmem:[%s14862_s7 + $0xb8] sm:$0xff] }
 0x79a   :  { %v7502_v21 = vpop.permute.xlu0 %7501 }
 0x79b   :  { %v7524_v23 = vmax.f32 %v7492_v58, %v7502_v21  ;;  %9504 = vmatprep.mubr.msk.f32.mxu1 %vm7538_vm8, %v7523_v11  ;;  %v7696_v58 = vld [vmem:[%s14862_s7 + $0xc0] sm:$0xff]  ;;  %v7697_v11 = vld [vmem:[%s14862_s7 + $0xc8] sm:$0xff]  ;;  %v7698_v21 = vld [vmem:[%s14862_s7 + $0xd0] sm:$0xff] }
 0x79c   :  { %v7472_v30 = vpop.permute.xlu1 %7471 }
 0x79d   :  { %9505 = vmatmul.mubr.msk.f32.vlgmr.msra.gmra.mrb[64].mxu1 %vm7538_vm8, %v7524_v23  ;;  %v7493_v51 = vmax.f32 %v14482_v25, %v7472_v30  ;;  %v7699_v23 = vld [vmem:[%s14862_s7 + $0xd8] sm:$0xff]  ;;  %v7700_v30 = vld [vmem:[%s14862_s7 + $0xe0] sm:$0xff] }
 0x79e   :  { %v7474_v6 = vpop.permute.xlu0 %7473 }
 0x79f   :  { %v7494_v10 = vmax.f32 %v14486_v28, %v7474_v6  ;;  %v7701_v6 = vld [vmem:[%s14862_s7 + $0xe8] sm:$0xff] }
 0x7a0   :  { %v7504_v27 = vpop.permute.xlu1 %7503 }
 0x7a1   :  { %v7525_v22 = vmax.f32 %v7493_v51, %v7504_v27  ;;  %v7702_v51 = vld [vmem:[%s14862_s7 + $0xf0] sm:$0xff]  ;;  %v7703_v27 = vld [vmem:[%s14862_s7 + $0xf8] sm:$0xff] }
 0x7a2   :  { %v7506_v43 = vpop.permute.xlu0 %7505 }
 0x7a3   :  { %v7526_v3 = vmax.f32 %v7494_v10, %v7506_v43  ;;  %9507 = vmatprep.mubr.msk.f32.mxu1 %vm7538_vm8, %v7525_v22  ;;  %v14774_v43 = vld.sshfl [vmem:[%s14863_s9] sm:$0x33 pattern:$0x76325410] }
 0x7a4   :  { %v7476_v34 = vpop.permute.xlu1 %7475 }
 0x7a5   :  { %9508 = vmatmul.mubr.msk.f32.gmra.mrb[66].mxu1 %vm7538_vm8, %v7526_v3  ;;  %v7495_v60 = vmax.f32 %v14496_v31, %v7476_v34  ;;  %v8264_v3 = vcombine.high %v14774_v43, %v14774_v43 }
 0x7a6   :  { %v7478_v2 = vpop.permute.xlu0 %7477 }
 0x7a7   :  { %v7496_v42 = vmax.f32 %v14500_v19, %v7478_v2  ;;  %v7672_v19 = vld [vmem:[%s14862_s7] sm:$0xff]  ;;  %8331 = vmatprep.mubr.f32.mxu0 %v8264_v3 }
 0x7a8   :  { %v7508_v17 = vpop.permute.xlu1 %7507 }
 0x7a9   :  { %v7527_v5 = vmax.f32 %v7495_v60, %v7508_v17 }
 0x7aa   :  { %v7510_v12 = vpop.permute.xlu0 %7509 }
 0x7ab   :  { %v7528_v25 = vmax.f32 %v7496_v42, %v7510_v12  ;;  %9510 = vmatprep.mubr.msk.f32.mxu1 %vm7538_vm8, %v7527_v5 }
 0x7ac   :  { %v7480_v28 = vpop.permute.xlu1 %7479 }
 0x7ad   :  { %9511 = vmatmul.mubr.msk.f32.gmra.mrb[68].mxu1 %vm7538_vm8, %v7528_v25  ;;  %v7497_v61 = vmax.f32 %v14510_v45, %v7480_v28 }
 0x7ae   :  { %v7482_v18 = vpop.permute.xlu0 %7481 }
 0x7af   :  { %v7498_v56 = vmax.f32 %v14514_v49, %v7482_v18 }
 0x7b0   :  { %v7512_v37 = vpop.permute.xlu1 %7511 }
 0x7b1   :  { %v7529_v40 = vmax.f32 %v7497_v61, %v7512_v37 }
 0x7b2   :  { %v7514_v14 = vpop.permute.xlu0 %7513 }
 0x7b3   :  { %v7530_v31 = vmax.f32 %v7498_v56, %v7514_v14  ;;  %9513 = vmatprep.mubr.msk.f32.mxu1 %vm7538_vm8, %v7529_v40 }
 0x7b5   :  { %9514 = vmatmul.mubr.msk.f32.gmra.mrb[70].mxu1 %vm7538_vm8, %v7530_v31 }
 0x7b6   :  { %9532 = vmatprep.mubr.msk.f32.mxu1 %vm5097_vm5, %v7672_v19 }
 0x7c1   :  { %v14769_v22 = vpop.permute.xlu1 %7818 }
 0x7c3   :  { %v14767_v10 = vpop.permute.xlu0 %7823 }
 0x7c5   :  { %v7739_v2 = vpop.permute.xlu1 %7738 }
 0x7c7   :  { %v7744_v34 = vpop.permute.xlu0 %7743 }
 0x7c9   :  { %v14780_v17 = vpop.permute.xlu1 %7828 }
 0x7cb   :  { %v14778_v60 = vpop.permute.xlu0 %7833 }
 0x7cd   :  { %v7749_v5 = vpop.permute.xlu1 %7748 }
 0x7cf   :  { %v7754_v42 = vpop.permute.xlu0 %7753 }
 0x7d1   :  { %v14784_v25 = vpop.permute.xlu1 %7838 }
 0x7d3   :  { %v14782_v12 = vpop.permute.xlu0 %7843 }
 0x7d5   :  { %v7759_v18 = vpop.permute.xlu1 %7758 }
 0x7d7   :  { %v7764_v28 = vpop.permute.xlu0 %7763 }
 0x7d9   :  { %v14788_v37 = vpop.permute.xlu1 %7848 }
 0x7db   :  { %v14786_v61 = vpop.permute.xlu0 %7853 }
 0x7dd   :  { %v7769_v40 = vpop.permute.xlu1 %7768 }
 0x7df   :  { %v7774_v56 = vpop.permute.xlu0 %7773 }
 0x7e1   :  { %v14792_v31 = vpop.permute.xlu1 %7858 }
 0x7e3   :  { %v14790_v14 = vpop.permute.xlu0 %7863 }
 0x7e7   :  { %v7784_v19 = vpop.permute.xlu0 %7783 }
 0x870   :  { %v9506_v33 = vpop.f32.mrb[64].mxu1 }
 0x871   :  { %v7633_v41 = vpop.f32.mrb[65].mxu1 }
 0x872   :  { %v9592_v13 = vpack.c.bf16 %v9506_v33, %v7633_v41  ;;  %v7779_v33 = vpop.permute.xlu1 %7778  ;;  %v14794_v41 = vpop.permute.xlu0 %7873 }
 0x874   :  { %9593 = vmatprep.subr.bf16.mxu1 %v9592_v13 }
 0x875   :  { %9595 = vmatpush3.bf16.msra.mxu1 %v9592_v13 }
 0x876   :  { %v14796_v13 = vpop.permute.xlu1 %7868 }
 0x878   :  { %v9509_v45 = vpop.f32.mrb[66].mxu1 }
 0x879   :  { %v7643_v49 = vpop.f32.mrb[67].mxu1 }
 0x87a   :  { %v9596_v0 = vpack.c.bf16 %v9509_v45, %v7643_v49 }
 0x87c   :  { %9597 = vmatprep.subr.bf16.mxu1 %v9596_v0 }
 0x87d   :  { %9599 = vmatpush3.bf16.msra.mxu1 %v9596_v0 }
 0x880   :  { %v9512_v7 = vpop.f32.mrb[68].mxu1 }
 0x881   :  { %v7653_v55 = vpop.f32.mrb[69].mxu1 }
 0x882   :  { %v9600_v48 = vpack.c.bf16 %v9512_v7, %v7653_v55 }
 0x884   :  { %9601 = vmatprep.subr.bf16.mxu1 %v9600_v48 }
 0x885   :  { %9603 = vmatpush3.bf16.msra.mxu1 %v9600_v48  ;;  %v7794_v48 = vpop.permute.xlu0 %7793 }
 0x888   :  { %v9515_v63 = vpop.f32.mrb[70].mxu1 }
 0x889   :  { %v7663_v62 = vpop.f32.mrb[71].mxu1 }
 0x88a   :  { %v9604_v57 = vpack.c.bf16 %v9515_v63, %v7663_v62 }
 0x88c   :  { %9605 = vmatprep.subr.bf16.mxu1 %v9604_v57 }
 0x88d   :  { %9607 = vmatpush3.bf16.msra.mxu1 %v9604_v57  ;;  %v7789_v57 = vpop.permute.xlu1 %7788 }
 0x890   :  { %9533 = vmatmul.mubr.msk.f32.vlgmr.msra.gmra.mrb[72].mxu1 %vm5097_vm5, %v7673_v54 }
 0x891   :  { %9535 = vmatprep.mubr.msk.f32.mxu1 %vm5097_vm5, %v7674_v38 }
 0x894   :  { %9536 = vmatmul.mubr.msk.f32.gmra.mrb[74].mxu1 %vm5097_vm5, %v7675_v9 }
 0x895   :  { %9538 = vmatprep.mubr.msk.f32.mxu1 %vm5097_vm5, %v7676_v47 }
 0x898   :  { %9539 = vmatmul.mubr.msk.f32.gmra.mrb[76].mxu1 %vm5097_vm5, %v7677_v29 }
 0x899   :  { %9541 = vmatprep.mubr.msk.f32.mxu1 %vm5097_vm5, %v7678_v1 }
 0x89c   :  { %9542 = vmatmul.mubr.msk.f32.gmra.mrb[78].mxu1 %vm5097_vm5, %v7679_v4 }
 0x89d   :  { %9544 = vmatprep.mubr.msk.f32.mxu1 %vm5097_vm5, %v7680_v46 }
 0x8a0   :  { %9545 = vmatmul.mubr.msk.f32.gmra.mrb[80].mxu1 %vm5097_vm5, %v7681_v8 }
 0x8a1   :  { %9547 = vmatprep.mubr.msk.f32.mxu1 %vm5097_vm5, %v7682_v36  ;;  %v14800_v36 = vpop.permute.xlu0 %7883 }
 0x8a4   :  { %9548 = vmatmul.mubr.msk.f32.gmra.mrb[82].mxu1 %vm5097_vm5, %v7683_v39 }
 0x8a5   :  { %9550 = vmatprep.mubr.msk.f32.mxu1 %vm5097_vm5, %v7684_v20 }
 0x8a8   :  { %9551 = vmatmul.mubr.msk.f32.gmra.mrb[84].mxu1 %vm5097_vm5, %v7685_v44  ;;  %v14804_v44 = vpop.permute.xlu1 %7878 }
 0x8a9   :  { %9553 = vmatprep.mubr.msk.f32.mxu1 %vm5097_vm5, %v7686_v15 }
 0x8ac   :  { %9554 = vmatmul.mubr.msk.f32.gmra.mrb[86].mxu1 %vm5097_vm5, %v7687_v59 }
 0x8ad   :  { %9556 = vmatprep.mubr.msk.f32.mxu1 %vm5097_vm5, %v7688_v50 }
 0x8b0   :  { %9557 = vmatmul.mubr.msk.f32.gmra.mrb[88].mxu1 %vm5097_vm5, %v7689_v26 }
 0x8b1   :  { %9559 = vmatprep.mubr.msk.f32.mxu1 %vm5097_vm5, %v7690_v53 }
 0x8b4   :  { %9560 = vmatmul.mubr.msk.f32.gmra.mrb[90].mxu1 %vm5097_vm5, %v7691_v52 }
 0x8b5   :  { %9562 = vmatprep.mubr.msk.f32.mxu1 %vm5097_vm5, %v7692_v24 }
 0x8b8   :  { %9563 = vmatmul.mubr.msk.f32.gmra.mrb[92].mxu1 %vm5097_vm5, %v7693_v16 }
 0x8b9   :  { %9565 = vmatprep.mubr.msk.f32.mxu1 %vm5097_vm5, %v7694_v32  ;;  %v7804_v32 = vpop.permute.xlu0 %7803 }
 0x8bc   :  { %9566 = vmatmul.mubr.msk.f32.gmra.mrb[94].mxu1 %vm5097_vm5, %v7695_v35 }
 0x8bd   :  { %9568 = vmatprep.mubr.msk.f32.mxu1 %vm5097_vm5, %v7696_v58 }
 0x8c0   :  { %9569 = vmatmul.mubr.msk.f32.gmra.mrb[96].mxu1 %vm5097_vm5, %v7697_v11  ;;  %v7799_v11 = vpop.permute.xlu1 %7798 }
 0x8c1   :  { %9571 = vmatprep.mubr.msk.f32.mxu1 %vm5097_vm5, %v7698_v21 }
 0x8c4   :  { %9572 = vmatmul.mubr.msk.f32.gmra.mrb[98].mxu1 %vm5097_vm5, %v7699_v23 }
 0x8c5   :  { %9574 = vmatprep.mubr.msk.f32.mxu1 %vm5097_vm5, %v7700_v30 }
 0x8c8   :  { %9575 = vmatmul.mubr.msk.f32.gmra.mrb[100].mxu1 %vm5097_vm5, %v7701_v6 }
 0x8c9   :  { %9577 = vmatprep.mubr.msk.f32.mxu1 %vm5097_vm5, %v7702_v51 }
 0x8cc   :  { %9578 = vmatmul.mubr.msk.f32.gmra.mrb[102].mxu1 %vm5097_vm5, %v7703_v27 }
 0x963   :  { %v9534_v45 = vpop.f32.mrb[72].mxu1 }
 0x964   :  { %v8064_v49 = vadd.f32 %v9534_v45, %v7744_v34  ;;  %v8058_v0 = vpop.f32.mrb[73].mxu1 }
 0x965   :  { %v8059_v7 = vadd.f32 %v8058_v0, %v7739_v2 }
 0x966   :  { %v8218_v55 = vmax.f32 %v8064_v49, 0.0 }
 0x967   :  { %v8217_v63 = vmax.f32 %v8059_v7, 0.0  ;;  %v9537_v62 = vpop.f32.mrb[74].mxu1 }
 0x968   :  { %v8074_v54 = vadd.f32 %v9537_v62, %v7754_v42  ;;  %v8068_v38 = vpop.f32.mrb[75].mxu1  ;;  %v14810_v42 = vpop.permute.xlu0 %7893 }
 0x969   :  { %v14798_v9 = vpack.c.bf16 %v8218_v55, %v8217_v63  ;;  %v8069_v47 = vadd.f32 %v8068_v38, %v7749_v5 }
 0x96a   :  { %v8220_v29 = vmax.f32 %v8074_v54, 0.0 }
 0x96b   :  { %v8219_v1 = vmax.f32 %v8069_v47, 0.0  ;;  %v9540_v4 = vpop.f32.mrb[76].mxu1 }
 0x96c   :  { %v8084_v46 = vadd.f32 %v9540_v4, %v7764_v28  ;;  %v8078_v8 = vpop.f32.mrb[77].mxu1  ;;  %v7814_v55 = vpop.permute.xlu0 %7813 }
 0x96d   :  { %v14802_v39 = vpack.c.bf16 %v8220_v29, %v8219_v1  ;;  %v8079_v20 = vadd.f32 %v8078_v8, %v7759_v18  ;;  %v14814_v18 = vpop.permute.xlu1 %7888 }
 0x96e   :  { %v8222_v15 = vmax.f32 %v8084_v46, 0.0 }
 0x96f   :  { %v8221_v59 = vmax.f32 %v8079_v20, 0.0  ;;  %v9543_v50 = vpop.f32.mrb[78].mxu1 }
 0x970   :  { %v8094_v26 = vadd.f32 %v9543_v50, %v7774_v56  ;;  %v8088_v53 = vpop.f32.mrb[79].mxu1 }
 0x971   :  { %v14806_v52 = vpack.c.bf16 %v8222_v15, %v8221_v59  ;;  %v8089_v24 = vadd.f32 %v8088_v53, %v7769_v40  ;;  %v7809_v62 = vpop.permute.xlu1 %7808 }
 0x972   :  { %v8224_v16 = vmax.f32 %v8094_v26, 0.0 }
 0x973   :  { %v8223_v35 = vmax.f32 %v8089_v24, 0.0  ;;  %v9546_v58 = vpop.f32.mrb[80].mxu1 }
 0x974   :  { %v8104_v21 = vadd.f32 %v9546_v58, %v7784_v19  ;;  %v8098_v23 = vpop.f32.mrb[81].mxu1 }
 0x975   :  { %v14808_v30 = vpack.c.bf16 %v8224_v16, %v8223_v35  ;;  %v8099_v6 = vadd.f32 %v8098_v23, %v7779_v33 }
 0x976   :  { %v8226_v51 = vmax.f32 %v8104_v21, 0.0 }
 0x977   :  { %v8225_v27 = vmax.f32 %v8099_v6, 0.0  ;;  %v9549_v3 = vpop.f32.mrb[82].mxu1 }
 0x978   :  { %v8114_v34 = vadd.f32 %v9549_v3, %v7794_v48  ;;  %v8108_v2 = vpop.f32.mrb[83].mxu1 }
 0x979   :  { %v14812_v5 = vpack.c.bf16 %v8226_v51, %v8225_v27  ;;  %v8109_v28 = vadd.f32 %v8108_v2, %v7789_v57 }
 0x97a   :  { %v8228_v56 = vmax.f32 %v8114_v34, 0.0 }
 0x97b   :  { %v8227_v40 = vmax.f32 %v8109_v28, 0.0  ;;  %v9552_v45 = vpop.f32.mrb[84].mxu1 }
 0x97c   :  { %v8124_v19 = vadd.f32 %v9552_v45, %v7804_v32  ;;  %v8118_v49 = vpop.f32.mrb[85].mxu1 }
 0x97d   :  { %v14816_v0 = vpack.c.bf16 %v8228_v56, %v8227_v40  ;;  %v8119_v33 = vadd.f32 %v8118_v49, %v7799_v11 }
 0x97e   :  { %v8230_v7 = vmax.f32 %v8124_v19, 0.0 }
 0x97f   :  { %v8229_v63 = vmax.f32 %v8119_v33, 0.0  ;;  %v9555_v48 = vpop.f32.mrb[86].mxu1 }
 0x980   :  { %v8134_v54 = vadd.f32 %v9555_v48, %v7814_v55  ;;  %v8128_v38 = vpop.f32.mrb[87].mxu1 }
 0x981   :  { %v14818_v47 = vpack.c.bf16 %v8230_v7, %v8229_v63  ;;  %v8129_v57 = vadd.f32 %v8128_v38, %v7809_v62 }
 0x982   :  { %v8232_v29 = vmax.f32 %v8134_v54, 0.0 }
 0x983   :  { %v8231_v1 = vmax.f32 %v8129_v57, 0.0  ;;  %v9558_v4 = vpop.f32.mrb[88].mxu1 }
 0x984   :  { %v8144_v46 = vadd.f32 %v9558_v4, %v14767_v10  ;;  %v8138_v8 = vpop.f32.mrb[89].mxu1  ;;  %v8254_v4 = vpop.permute.xlu1 %8253 }
 0x985   :  { %v14821_v20 = vpack.c.bf16 %v8232_v29, %v8231_v1  ;;  %v8139_v15 = vadd.f32 %v8138_v8, %v14769_v22 }
 0x986   :  { %v8234_v59 = vmax.f32 %v8144_v46, 0.0 }
 0x987   :  { %v8233_v50 = vmax.f32 %v8139_v15, 0.0  ;;  %v9561_v26 = vpop.f32.mrb[90].mxu1 }
 0x988   :  { %v8154_v53 = vadd.f32 %v9561_v26, %v14778_v60  ;;  %v8148_v24 = vpop.f32.mrb[91].mxu1 }
 0x989   :  { %v9608_v16 = vpack.c.bf16 %v8234_v59, %v8233_v50  ;;  %v8149_v32 = vadd.f32 %v8148_v24, %v14780_v17 }
 0x98a   :  { %v8236_v35 = vmax.f32 %v8154_v53, 0.0 }
 0x98b   :  { %v8235_v58 = vmax.f32 %v8149_v32, 0.0  ;;  %v9564_v11 = vpop.f32.mrb[92].mxu1  ;;  %9609 = vmatprep.subr.bf16.mxu0 %v9608_v16 }
 0x98c   :  { %v8164_v10 = vadd.f32 %v9564_v11, %v14782_v12  ;;  %v8158_v21 = vpop.f32.mrb[93].mxu1  ;;  %9611 = vmatpush3.bf16.msra.mxu0 %v14798_v9 }
 0x98d   :  { %v9612_v23 = vpack.c.bf16 %v8236_v35, %v8235_v58  ;;  %v8159_v22 = vadd.f32 %v8158_v21, %v14784_v25 }
 0x98e   :  { %v8238_v6 = vmax.f32 %v8164_v10, 0.0 }
 0x98f   :  { %v8237_v51 = vmax.f32 %v8159_v22, 0.0  ;;  %v9567_v27 = vpop.f32.mrb[94].mxu1  ;;  %9613 = vmatprep.subr.bf16.mxu0 %v9612_v23 }
 0x990   :  { %v8174_v60 = vadd.f32 %v9567_v27, %v14786_v61  ;;  %v8168_v3 = vpop.f32.mrb[95].mxu1  ;;  %9615 = vmatpush3.bf16.msra.mxu0 %v14802_v39 }
 0x991   :  { %v9616_v17 = vpack.c.bf16 %v8238_v6, %v8237_v51  ;;  %v8169_v34 = vadd.f32 %v8168_v3, %v14788_v37 }
 0x992   :  { %v8240_v2 = vmax.f32 %v8174_v60, 0.0 }
 0x993   :  { %v8239_v12 = vmax.f32 %v8169_v34, 0.0  ;;  %v9570_v28 = vpop.f32.mrb[96].mxu1  ;;  %9617 = vmatprep.subr.bf16.mxu0 %v9616_v17 }
 0x994   :  { %v8184_v9 = vadd.f32 %v9570_v28, %v14790_v14  ;;  %v8178_v56 = vpop.f32.mrb[97].mxu1  ;;  %9619 = vmatpush3.bf16.msra.mxu0 %v14806_v52 }
 0x995   :  { %v9620_v25 = vpack.c.bf16 %v8240_v2, %v8239_v12  ;;  %v8179_v40 = vadd.f32 %v8178_v56, %v14792_v31 }
 0x996   :  { %v8242_v45 = vmax.f32 %v8184_v9, 0.0 }
 0x997   :  { %v8241_v61 = vmax.f32 %v8179_v40, 0.0  ;;  %v9573_v19 = vpop.f32.mrb[98].mxu1  ;;  %9621 = vmatprep.subr.bf16.mxu0 %v9620_v25 }
 0x998   :  { %v8194_v39 = vadd.f32 %v9573_v19, %v14794_v41  ;;  %v8188_v49 = vpop.f32.mrb[99].mxu1  ;;  %9623 = vmatpush3.bf16.msra.mxu0 %v14808_v30 }
 0x999   :  { %v9624_v37 = vpack.c.bf16 %v8242_v45, %v8241_v61  ;;  %v8189_v33 = vadd.f32 %v8188_v49, %v14796_v13 }
 0x99a   :  { %v8244_v7 = vmax.f32 %v8194_v39, 0.0 }
 0x99b   :  { %v8243_v14 = vmax.f32 %v8189_v33, 0.0  ;;  %v9576_v55 = vpop.f32.mrb[100].mxu1  ;;  %9625 = vmatprep.subr.bf16.mxu0 %v9624_v37 }
 0x99c   :  { %v8204_v52 = vadd.f32 %v9576_v55, %v14800_v36  ;;  %v8198_v63 = vpop.f32.mrb[101].mxu1  ;;  %9627 = vmatpush3.bf16.msra.mxu0 %v14812_v5 }
 0x99d   :  { %v9628_v31 = vpack.c.bf16 %v8244_v7, %v8243_v14  ;;  %v8199_v48 = vadd.f32 %v8198_v63, %v14804_v44 }
 0x99e   :  { %v8246_v62 = vmax.f32 %v8204_v52, 0.0 }
 0x99f   :  { %v8245_v41 = vmax.f32 %v8199_v48, 0.0  ;;  %v9579_v54 = vpop.f32.mrb[102].mxu1  ;;  %9629 = vmatprep.subr.bf16.mxu0 %v9628_v31 }
 0x9a0   :  { %v8214_v30 = vadd.f32 %v9579_v54, %v14810_v42  ;;  %v8208_v38 = vpop.f32.mrb[103].mxu1  ;;  %9631 = vmatpush3.bf16.msra.mxu0 %v14816_v0 }
 0x9a1   :  { %v9632_v13 = vpack.c.bf16 %v8246_v62, %v8245_v41  ;;  %v8209_v57 = vadd.f32 %v8208_v38, %v14814_v18 }
 0x9a2   :  { %v8248_v29 = vmax.f32 %v8214_v30, 0.0 }
 0x9a3   :  { %v8247_v36 = vmax.f32 %v8209_v57, 0.0  ;;  %9633 = vmatprep.subr.bf16.mxu0 %v9632_v13 }
 0x9a4   :  { %9635 = vmatpush3.bf16.msra.mxu0 %v14818_v47 }
 0x9a5   :  { %v9636_v5 = vpack.c.bf16 %v8248_v29, %v8247_v36 }
 0x9a7   :  { %9637 = vmatprep.subr.bf16.mxu0 %v9636_v5 }
 0x9a8   :  { %9639 = vmatpush3.bf16.msra.mxu0 %v14821_v20 }
 0x9ab   :  { %8332 = vmatmul.mubr.f32.vlgmr.msra.gmra.mrb[88].mxu0 %v14774_v43 }
 0xa7e   :  { %v9435_v44 = vpop.f32.mrb[88].mxu0 }
 0xa7f   :  { %v9436_v1 = vpop.f32.mrb[89].mxu0 }
 0xa80   :  { %v9437_v42 = vadd.f32 %v9436_v1, %v9435_v44 }
 0xa82   :  { %v8334_v0 = vadd.f32 %v9437_v42, %v8254_v4 }
 0xa84   :  { %v8338_v46 = vsel %vm8337_vm9, %v8334_v0, -inf }
 0xa85   :  { %v8339_v18 = vrot.slane %v8338_v46, 4 }
 0xa87   :  { %v8340_v8 = vmax.f32 %v8338_v46, %v8339_v18 }
 0xa89   :  { %v8341_v15 = vrot.slane %v8340_v8, 2 }
 0xa8b   :  { %v8342_v59 = vmax.f32 %v8340_v8, %v8341_v15 }
 0xa8d   :  { %v8343_v50 = vrot.slane %v8342_v59, 1 }
 0xa8f   :  { %v8344_v47 = vmax.f32 %v8342_v59, %v8343_v50 }
 0xa91   :  { %v8345_v26 = vsub.f32 %v8334_v0, %v8344_v47 }
 0xa93   :  { %v8346_v53 = vmul.f32 1.442695, %v8345_v26 }
 0xa95   :  { %10497 = vpow2.f32 %v8346_v53 }
 0xa9f   :  { %v10498_v20 = vpop.eup %10497 }
 0xaa0   :  { %v8348_v43 = vsel %vm8337_vm9, %v10498_v20, 0.0 }
 0xaa1   :  { %v8349_v24 = vrot.slane %v8348_v43, 4 }
 0xaa3   :  { %v8350_v16 = vadd.f32 %v8349_v24, %v8348_v43 }
 0xaa5   :  { %v8351_v32 = vrot.slane %v8350_v16, 2 }
 0xaa7   :  { %v8352_v35 = vadd.f32 %v8351_v32, %v8350_v16 }
 0xaa9   :  { %v8353_v58 = vrot.slane %v8352_v35, 1 }
 0xaab   :  { %v8354_v11 = vadd.f32 %v8353_v58, %v8352_v35 }
 0xaad   :  { %10499 = vrcp.f32 %v8354_v11 }
 0xab7   :  { %v10500_v10 = vpop.eup %10499 }
 0xab8   :  { %v8356_v21 = vmul.f32 %v10500_v10, %v10498_v20 }
 0xaba   :  { %8357 = vst.msk [vmem:[%s14864_s11] sm:$0x3] %vm8337_vm9, %v8356_v21 }

</bundles_post_ra>
